<compile_context>
chip_gen: v7x
topology: tpu7x:2x2x1
jax: 0.10.0
libtpu: 0.0.40
codegen_flags: <defaults>
</compile_context>

<pallas_src>
import functools

import jax
import jax.numpy as jnp
from jax.experimental import pallas as pl
from jax.experimental.pallas import tpu as pltpu


def convblock_kernel(x_ref, w1_ref, b1_ref, w2_ref, b2_ref, pool_ref,
                     out_ref, scr_a, scr_b, *, rows, zero_border_once):
    # x_ref   : (bb, H, W, Cp)        bf16 NHWC input tile (channels zero-padded to Cp)
    # w*_ref  : (9, Cp, Cp)           bf16 conv taps (ky*3+kx), BN scale folded, zero-padded
    # b*_ref  : (1, Cp)               f32 folded BN bias (zero-padded)
    # pool_ref: (rows*W//4, rows*W)   bf16 0.25-valued per-chunk 2x2 avg-pool matrix
    # out_ref : (bb, Hp*Wp, Cp)       f32 pooled output (row = h2*Wp + w2)
    # scr_a   : (bb, H+2, W+2, Cp)    bf16 zero-bordered padded input (conv1 source)
    # scr_b   : (bb, H+2, W+2, Cp)    bf16 zero-bordered conv1 output (conv2 source)
    bb, H, W, Cp = x_ref.shape
    Wp = W // 2
    M = bb * rows * W
    Pc = pool_ref.shape[0]          # (rows//2) * Wp pooled rows per chunk

    def zero_borders():
        zrow = jnp.zeros((bb, 1, W + 2, Cp), jnp.bfloat16)
        zcol = jnp.zeros((bb, H + 2, 1, Cp), jnp.bfloat16)
        for scr in (scr_a, scr_b):
            scr[:, 0:1, :, :] = zrow
            scr[:, H + 1:H + 2, :, :] = zrow
            scr[:, :, 0:1, :] = zcol
            scr[:, :, W + 1:W + 2, :] = zcol

    if zero_border_once:
        # Single-TC path ("arbitrary" grid axis): border strips are never overwritten, so
        # zero them only on the first grid step.
        @pl.when(pl.program_id(0) == 0)
        def _():
            zero_borders()
    else:
        # Multi-TC path ("parallel" grid axis is core-sharded): step 0 only runs on one core,
        # so every step must (re)zero its own core's scratch borders.
        zero_borders()

    # "same" padding = 1: write the input into the scratch interior (full-lane stores).
    scr_a[:, 1:H + 1, 1:W + 1, :] = x_ref[...]

    def conv_chunk(src, w_ref, b_ref, r0):
        # 3x3 conv on output rows [r0, r0+rows): 9 accumulating (M, Cp) x (Cp, Cp) bf16
        # matmuls with f32 accumulation, then folded-BN bias + ReLU.
        acc = jnp.zeros((M, Cp), jnp.float32)
        for ky in range(3):
            for kx in range(3):
                patch = src[:, r0 + ky:r0 + ky + rows, kx:kx + W, :].reshape(M, Cp)
                acc = acc + jnp.dot(patch, w_ref[3 * ky + kx],
                                    preferred_element_type=jnp.float32)
        return jnp.maximum(acc + b_ref[...], 0.0)

    # ---- conv1 + BN + ReLU: all row chunks into scr_b interior (conv2 needs halo rows) ----
    for r0 in range(0, H, rows):
        y1 = conv_chunk(scr_a, w1_ref, b1_ref, r0)
        scr_b[:, r0 + 1:r0 + 1 + rows, 1:W + 1, :] = (
            y1.astype(jnp.bfloat16).reshape(bb, rows, W, Cp))

    # ---- conv2 + BN + ReLU + per-chunk 2x2 average pool (one batched MXU contraction) ----
    poolb = jnp.broadcast_to(pool_ref[...][None], (bb,) + pool_ref.shape)   # hoisted
    for r0 in range(0, H, rows):
        y2 = conv_chunk(scr_b, w2_ref, b2_ref, r0)
        y2 = y2.astype(jnp.bfloat16).reshape(bb, rows * W, Cp)
        pooled = jnp.einsum('bpk,bkc->bpc', poolb, y2,
                            preferred_element_type=jnp.float32)
        p0 = (r0 // 2) * Wp
        out_ref[:, p0:p0 + Pc, :] = pooled.astype(out_ref.dtype)


def _is_single_tensorcore(dev):
    """True only when confident this device drives a single TensorCore.

    When unsure, return False: the multi-TC config ("parallel" grid + per-step border
    zeroing) is correct everywhere, whereas the single-TC config would idle a core on a
    megacore chip (v7x / v5p / v4)."""
    for attr in ("num_cores", "core_count", "num_tensor_cores"):
        try:
            n = getattr(dev, attr, None)
        except Exception:
            n = None
        if isinstance(n, int) and n >= 1:
            return n == 1
    try:
        kind = dev.device_kind.lower().replace(" ", "").replace("-", "")
    except Exception:
        return False
    single_markers = ("v2", "v3", "v5lite", "v5e", "v6lite", "v6e")
    return any(m in kind for m in single_markers)


def _pick_bb(B, target_steps=2, bb_cap=8):
    """Largest divisor of B (capped) that still leaves >= target_steps grid steps."""
    best = 1
    for cand in range(1, min(B, bb_cap) + 1):
        if B % cand == 0 and B // cand >= target_steps:
            best = cand
    return best


def _pick_rows(H, W, bb, m_target=128):
    """Even divisor of H giving conv chunks of roughly m_target rows (bb*rows*W <= target)."""
    rows = 2
    for r in range(2, H + 1, 2):
        if H % r == 0 and bb * r * W <= m_target:
            rows = r
    return rows


def conv_block_forward(x_nchw, w1, g1, beta1, m1, v1, w2, g2, beta2, m2, v2,
                       eps=1e-5):
    """ConvBlock forward (inference BN). x_nchw: (B, C, H, W) f32 -> (B, C, H//2, W//2) f32."""
    B, C, H, W = x_nchw.shape
    assert H % 2 == 0 and W % 2 == 0
    Cp = ((C + 127) // 128) * 128          # pad channels to a multiple of 128 lanes

    # fold BatchNorm (eval mode) into per-channel scale/bias; fold scale into weights
    s1 = g1 / jnp.sqrt(v1 + eps); b1 = beta1 - m1 * s1
    s2 = g2 / jnp.sqrt(v2 + eps); b2 = beta2 - m2 * s2

    def prep_w(w, s):
        # OIHW -> HWIO, BN scale folded on out-channels, zero-padded to Cp, (9, Cp, Cp) bf16
        w_hwio = jnp.transpose(w, (2, 3, 1, 0)) * s[None, None, None, :]
        w_hwio = jnp.pad(w_hwio, ((0, 0), (0, 0), (0, Cp - C), (0, Cp - C)))
        return w_hwio.reshape(9, Cp, Cp).astype(jnp.bfloat16)

    def prep_b(b):
        return jnp.pad(b, (0, Cp - C)).reshape(1, Cp).astype(jnp.float32)

    w1m, w2m = prep_w(w1, s1), prep_w(w2, s2)
    b1m, b2m = prep_b(b1), prep_b(b2)

    # NCHW -> NHWC, bf16, zero-pad channels to Cp (spatial padding is done in the kernel)
    x = jnp.transpose(x_nchw, (0, 2, 3, 1)).astype(jnp.bfloat16)
    x = jnp.pad(x, ((0, 0), (0, 0), (0, 0), (0, Cp - C)))

    single_tc = _is_single_tensorcore(jax.devices()[0])
    bb = _pick_bb(B, target_steps=2)                 # >=2 grid steps when B allows
    rows = _pick_rows(H, W, bb)                      # even, divides H

    Hp, Wp = H // 2, W // 2
    rW = rows * W
    Pc = (rows // 2) * Wp
    # per-chunk 0.25-valued 2x2 avg-pool matrix acting on flattened (r*W + w) rows
    k = jnp.arange(rW)
    p = jnp.arange(Pc)
    pool = ((((k // W)[None, :] // 2) == (p // Wp)[:, None]) &
            (((k % W)[None, :] // 2) == (p % Wp)[:, None]))
    pool = (pool.astype(jnp.float32) * 0.25).astype(jnp.bfloat16)

    kernel = functools.partial(convblock_kernel, rows=rows,
                               zero_border_once=single_tc)

    out_flat = pl.pallas_call(
        kernel,
        out_shape=jax.ShapeDtypeStruct((B, Hp * Wp, Cp), jnp.float32),
        grid=(B // bb,),
        in_specs=[
            pl.BlockSpec((bb, H, W, Cp), lambda g: (g, 0, 0, 0)),
            pl.BlockSpec((9, Cp, Cp), lambda g: (0, 0, 0)),
            pl.BlockSpec((1, Cp), lambda g: (0, 0)),
            pl.BlockSpec((9, Cp, Cp), lambda g: (0, 0, 0)),
            pl.BlockSpec((1, Cp), lambda g: (0, 0)),
            pl.BlockSpec((Pc, rW), lambda g: (0, 0)),
        ],
        out_specs=pl.BlockSpec((bb, Hp * Wp, Cp), lambda g: (g, 0, 0)),
        scratch_shapes=[pltpu.VMEM((bb, H + 2, W + 2, Cp), jnp.bfloat16),
                        pltpu.VMEM((bb, H + 2, W + 2, Cp), jnp.bfloat16)],
        compiler_params=pltpu.CompilerParams(
            dimension_semantics=(("arbitrary",) if single_tc else ("parallel",))),
    )(x, w1m, b1m, w2m, b2m, pool)

    out = out_flat[:, :, :C].reshape(B, Hp, Wp, C)
    return jnp.transpose(out, (0, 3, 1, 2))          # back to NCHW


def conv_block_reference(x_nchw, w1, g1, beta1, m1, v1, w2, g2, beta2, m2, v2,
                         eps=1e-5):
    """Numerics-matched pure-JAX reference (bf16 inputs/weights, f32 accumulation)."""
    C = x_nchw.shape[1]
    s1 = g1 / jnp.sqrt(v1 + eps); b1 = beta1 - m1 * s1
    s2 = g2 / jnp.sqrt(v2 + eps); b2 = beta2 - m2 * s2
    w1f = (jnp.transpose(w1, (2, 3, 1, 0)) * s1[None, None, None, :]).astype(jnp.bfloat16)
    w2f = (jnp.transpose(w2, (2, 3, 1, 0)) * s2[None, None, None, :]).astype(jnp.bfloat16)
    x = jnp.transpose(x_nchw, (0, 2, 3, 1)).astype(jnp.bfloat16)

    def conv(y, w):
        return jax.lax.conv_general_dilated(
            y, w, window_strides=(1, 1), padding=((1, 1), (1, 1)),
            dimension_numbers=('NHWC', 'HWIO', 'NHWC'),
            preferred_element_type=jnp.float32)

    y = jnp.maximum(conv(x, w1f) + b1, 0.0).astype(jnp.bfloat16)
    y = jnp.maximum(conv(y, w2f) + b2, 0.0)
    y = y.astype(jnp.bfloat16).astype(jnp.float32)      # match kernel's bf16 pooling input
    B, H, W, _ = y.shape
    y = y.reshape(B, H // 2, 2, W // 2, 2, C).mean(axis=(2, 4))
    return jnp.transpose(y, (0, 3, 1, 2))


if __name__ == "__main__":
    key = jax.random.PRNGKey(0)
    B, C, H, W = 2, 48, 16, 16   # hid_channels=48 default, small spatial/batch
    ks = jax.random.split(key, 11)

    x = jax.random.normal(ks[0], (B, C, H, W), jnp.float32)

    fan_in = C * 3 * 3
    w1 = jax.random.normal(ks[1], (C, C, 3, 3), jnp.float32) / jnp.sqrt(fan_in)
    w2 = jax.random.normal(ks[2], (C, C, 3, 3), jnp.float32) / jnp.sqrt(fan_in)

    g1 = 1.0 + 0.1 * jax.random.normal(ks[3], (C,), jnp.float32)
    beta1 = 0.1 * jax.random.normal(ks[4], (C,), jnp.float32)
    m1 = 0.05 * jax.random.normal(ks[5], (C,), jnp.float32)
    v1 = 1.0 + 0.1 * jnp.abs(jax.random.normal(ks[6], (C,), jnp.float32))

    g2 = 1.0 + 0.1 * jax.random.normal(ks[7], (C,), jnp.float32)
    beta2 = 0.1 * jax.random.normal(ks[8], (C,), jnp.float32)
    m2 = 0.05 * jax.random.normal(ks[9], (C,), jnp.float32)
    v2 = 1.0 + 0.1 * jnp.abs(jax.random.normal(ks[10], (C,), jnp.float32))

    out = conv_block_forward(x, w1, g1, beta1, m1, v1, w2, g2, beta2, m2, v2)
    out = jax.block_until_ready(out)
    assert out.shape == (B, C, H // 2, W // 2), out.shape

    ref = conv_block_reference(x, w1, g1, beta1, m1, v1, w2, g2, beta2, m2, v2)
    err = float(jnp.max(jnp.abs(out - ref)))
    assert err < 2e-2, err
    print("KERNEL_OK")
</pallas_src>

<mosaic_0001>
module attributes {stable_mosaic.version = 11 : i64} {
  func.func @convblock_kernel(%arg0: i32, %arg1: memref<1x16x16x128xbf16, #tpu.memory_space<vmem>>, %arg2: memref<9x128x128xbf16, #tpu.memory_space<vmem>>, %arg3: memref<1x128xf32, #tpu.memory_space<vmem>>, %arg4: memref<9x128x128xbf16, #tpu.memory_space<vmem>>, %arg5: memref<1x128xf32, #tpu.memory_space<vmem>>, %arg6: memref<32x128xbf16, #tpu.memory_space<vmem>>, %arg7: memref<1x64x128xf32, #tpu.memory_space<vmem>>, %arg8: memref<1x18x18x128xbf16, #tpu.memory_space<vmem>>, %arg9: memref<1x18x18x128xbf16, #tpu.memory_space<vmem>>) attributes {dimension_semantics = [#tpu.dimension_semantics<parallel>], iteration_bounds = array<i64: 2>, scalar_prefetch = 0 : i64, scratch_operands = 2 : i64, tpu.core_type = #tpu.core_type<tc>, window_params = [{transform_indices = @transform_0, window_bounds = array<i64: 1, 16, 16, 128>}, {pipeline_mode = #tpu.pipeline_mode<synchronous>, transform_indices = @transform_1, window_bounds = array<i64: 9, 128, 128>}, {pipeline_mode = #tpu.pipeline_mode<synchronous>, transform_indices = @transform_2, window_bounds = array<i64: 1, 128>}, {pipeline_mode = #tpu.pipeline_mode<synchronous>, transform_indices = @transform_3, window_bounds = array<i64: 9, 128, 128>}, {pipeline_mode = #tpu.pipeline_mode<synchronous>, transform_indices = @transform_4, window_bounds = array<i64: 1, 128>}, {pipeline_mode = #tpu.pipeline_mode<synchronous>, transform_indices = @transform_5, window_bounds = array<i64: 32, 128>}, {transform_indices = @transform_6, window_bounds = array<i64: 1, 64, 128>}]} {
    %cst = arith.constant 0.000000e+00 : bf16
    %0 = vector.broadcast %cst : bf16 to vector<1x1x18x128xbf16>
    %cst_0 = arith.constant 0.000000e+00 : bf16
    %1 = vector.broadcast %cst_0 : bf16 to vector<1x18x1x128xbf16>
    %c0 = arith.constant 0 : index
    %c0_1 = arith.constant 0 : index
    %c0_2 = arith.constant 0 : index
    %c0_3 = arith.constant 0 : index
    %2 = vector.load %arg8[%c0, %c0_1, %c0_2, %c0_3] : memref<1x18x18x128xbf16, #tpu.memory_space<vmem>>, vector<1x1x18x128xbf16>
    tpu.vector_store %arg8[%c0, %c0_1, %c0_2, %c0_3], %0 {strides = array<i32>} : memref<1x18x18x128xbf16, #tpu.memory_space<vmem>>, vector<1x1x18x128xbf16>,
    %c0_4 = arith.constant 0 : index
    %c17 = arith.constant 17 : index
    %c0_5 = arith.constant 0 : index
    %c0_6 = arith.constant 0 : index
    %3 = vector.load %arg8[%c0_4, %c17, %c0_5, %c0_6] : memref<1x18x18x128xbf16, #tpu.memory_space<vmem>>, vector<1x1x18x128xbf16>
    tpu.vector_store %arg8[%c0_4, %c17, %c0_5, %c0_6], %0 {strides = array<i32>} : memref<1x18x18x128xbf16, #tpu.memory_space<vmem>>, vector<1x1x18x128xbf16>,
    %c0_7 = arith.constant 0 : index
    %c0_8 = arith.constant 0 : index
    %c0_9 = arith.constant 0 : index
    %c0_10 = arith.constant 0 : index
    %4 = vector.load %arg8[%c0_7, %c0_8, %c0_9, %c0_10] : memref<1x18x18x128xbf16, #tpu.memory_space<vmem>>, vector<1x18x1x128xbf16>
    tpu.vector_store %arg8[%c0_7, %c0_8, %c0_9, %c0_10], %1 {strides = array<i32>} : memref<1x18x18x128xbf16, #tpu.memory_space<vmem>>, vector<1x18x1x128xbf16>,
    %c0_11 = arith.constant 0 : index
    %c0_12 = arith.constant 0 : index
    %c17_13 = arith.constant 17 : index
    %c0_14 = arith.constant 0 : index
    %5 = vector.load %arg8[%c0_11, %c0_12, %c17_13, %c0_14] : memref<1x18x18x128xbf16, #tpu.memory_space<vmem>>, vector<1x18x1x128xbf16>
    tpu.vector_store %arg8[%c0_11, %c0_12, %c17_13, %c0_14], %1 {strides = array<i32>} : memref<1x18x18x128xbf16, #tpu.memory_space<vmem>>, vector<1x18x1x128xbf16>,
    %c0_15 = arith.constant 0 : index
    %c0_16 = arith.constant 0 : index
    %c0_17 = arith.constant 0 : index
    %c0_18 = arith.constant 0 : index
    %6 = vector.load %arg9[%c0_15, %c0_16, %c0_17, %c0_18] : memref<1x18x18x128xbf16, #tpu.memory_space<vmem>>, vector<1x1x18x128xbf16>
    tpu.vector_store %arg9[%c0_15, %c0_16, %c0_17, %c0_18], %0 {strides = array<i32>} : memref<1x18x18x128xbf16, #tpu.memory_space<vmem>>, vector<1x1x18x128xbf16>,
    %c0_19 = arith.constant 0 : index
    %c17_20 = arith.constant 17 : index
    %c0_21 = arith.constant 0 : index
    %c0_22 = arith.constant 0 : index
    %7 = vector.load %arg9[%c0_19, %c17_20, %c0_21, %c0_22] : memref<1x18x18x128xbf16, #tpu.memory_space<vmem>>, vector<1x1x18x128xbf16>
    tpu.vector_store %arg9[%c0_19, %c17_20, %c0_21, %c0_22], %0 {strides = array<i32>} : memref<1x18x18x128xbf16, #tpu.memory_space<vmem>>, vector<1x1x18x128xbf16>,
    %c0_23 = arith.constant 0 : index
    %c0_24 = arith.constant 0 : index
    %c0_25 = arith.constant 0 : index
    %c0_26 = arith.constant 0 : index
    %8 = vector.load %arg9[%c0_23, %c0_24, %c0_25, %c0_26] : memref<1x18x18x128xbf16, #tpu.memory_space<vmem>>, vector<1x18x1x128xbf16>
    tpu.vector_store %arg9[%c0_23, %c0_24, %c0_25, %c0_26], %1 {strides = array<i32>} : memref<1x18x18x128xbf16, #tpu.memory_space<vmem>>, vector<1x18x1x128xbf16>,
    %c0_27 = arith.constant 0 : index
    %c0_28 = arith.constant 0 : index
    %c17_29 = arith.constant 17 : index
    %c0_30 = arith.constant 0 : index
    %9 = vector.load %arg9[%c0_27, %c0_28, %c17_29, %c0_30] : memref<1x18x18x128xbf16, #tpu.memory_space<vmem>>, vector<1x18x1x128xbf16>
    tpu.vector_store %arg9[%c0_27, %c0_28, %c17_29, %c0_30], %1 {strides = array<i32>} : memref<1x18x18x128xbf16, #tpu.memory_space<vmem>>, vector<1x18x1x128xbf16>,
    %c0_31 = arith.constant 0 : index
    %c0_32 = arith.constant 0 : index
    %c0_33 = arith.constant 0 : index
    %c0_34 = arith.constant 0 : index
    %10 = vector.load %arg1[%c0_31, %c0_32, %c0_33, %c0_34] : memref<1x16x16x128xbf16, #tpu.memory_space<vmem>>, vector<1x16x16x128xbf16>
    %c0_35 = arith.constant 0 : index
    %c1 = arith.constant 1 : index
    %c1_36 = arith.constant 1 : index
    %c0_37 = arith.constant 0 : index
    %11 = vector.load %arg8[%c0_35, %c1, %c1_36, %c0_37] : memref<1x18x18x128xbf16, #tpu.memory_space<vmem>>, vector<1x16x16x128xbf16>
    tpu.vector_store %arg8[%c0_35, %c1, %c1_36, %c0_37], %10 {strides = array<i32>} : memref<1x18x18x128xbf16, #tpu.memory_space<vmem>>, vector<1x16x16x128xbf16>,
    %cst_38 = arith.constant 0.000000e+00 : f32
    %12 = vector.broadcast %cst_38 : f32 to vector<128x128xf32>
    %c0_39 = arith.constant 0 : index
    %c0_40 = arith.constant 0 : index
    %c0_41 = arith.constant 0 : index
    %c0_42 = arith.constant 0 : index
    %13 = vector.load %arg8[%c0_39, %c0_40, %c0_41, %c0_42] : memref<1x18x18x128xbf16, #tpu.memory_space<vmem>>, vector<1x8x16x128xbf16>
    %14 = vector.shape_cast %13 : vector<1x8x16x128xbf16> to vector<128x128xbf16>
    %c0_43 = arith.constant 0 : index
    %c0_44 = arith.constant 0 : index
    %c0_45 = arith.constant 0 : index
    %15 = vector.load %arg2[%c0_43, %c0_44, %c0_45] : memref<9x128x128xbf16, #tpu.memory_space<vmem>>, vector<1x128x128xbf16>
    %16 = vector.shape_cast %15 : vector<1x128x128xbf16> to vector<128x128xbf16>
    %cst_46 = arith.constant dense<0.000000e+00> : vector<128x128xf32>
    %17 = tpu.matmul %14, %16, %cst_46 {dimension_numbers = #tpu.dot_dimension_numbers<[1], [0], [0], [1], [0, 0, 1, 1], [], []>} : vector<128x128xbf16>, vector<128x128xbf16>, vector<128x128xf32> -> vector<128x128xf32>
    %18 = arith.addf %12, %17 : vector<128x128xf32>
    %c0_47 = arith.constant 0 : index
    %c0_48 = arith.constant 0 : index
    %c1_49 = arith.constant 1 : index
    %c0_50 = arith.constant 0 : index
    %19 = vector.load %arg8[%c0_47, %c0_48, %c1_49, %c0_50] : memref<1x18x18x128xbf16, #tpu.memory_space<vmem>>, vector<1x8x16x128xbf16>
    %20 = vector.shape_cast %19 : vector<1x8x16x128xbf16> to vector<128x128xbf16>
    %c1_51 = arith.constant 1 : index
    %c0_52 = arith.constant 0 : index
    %c0_53 = arith.constant 0 : index
    %21 = vector.load %arg2[%c1_51, %c0_52, %c0_53] : memref<9x128x128xbf16, #tpu.memory_space<vmem>>, vector<1x128x128xbf16>
    %22 = vector.shape_cast %21 : vector<1x128x128xbf16> to vector<128x128xbf16>
    %cst_54 = arith.constant dense<0.000000e+00> : vector<128x128xf32>
    %23 = tpu.matmul %20, %22, %cst_54 {dimension_numbers = #tpu.dot_dimension_numbers<[1], [0], [0], [1], [0, 0, 1, 1], [], []>} : vector<128x128xbf16>, vector<128x128xbf16>, vector<128x128xf32> -> vector<128x128xf32>
    %24 = arith.addf %18, %23 : vector<128x128xf32>
    %c0_55 = arith.constant 0 : index
    %c0_56 = arith.constant 0 : index
    %c2 = arith.constant 2 : index
    %c0_57 = arith.constant 0 : index
    %25 = vector.load %arg8[%c0_55, %c0_56, %c2, %c0_57] : memref<1x18x18x128xbf16, #tpu.memory_space<vmem>>, vector<1x8x16x128xbf16>
    %26 = vector.shape_cast %25 : vector<1x8x16x128xbf16> to vector<128x128xbf16>
    %c2_58 = arith.constant 2 : index
    %c0_59 = arith.constant 0 : index
    %c0_60 = arith.constant 0 : index
    %27 = vector.load %arg2[%c2_58, %c0_59, %c0_60] : memref<9x128x128xbf16, #tpu.memory_space<vmem>>, vector<1x128x128xbf16>
    %28 = vector.shape_cast %27 : vector<1x128x128xbf16> to vector<128x128xbf16>
    %cst_61 = arith.constant dense<0.000000e+00> : vector<128x128xf32>
    %29 = tpu.matmul %26, %28, %cst_61 {dimension_numbers = #tpu.dot_dimension_numbers<[1], [0], [0], [1], [0, 0, 1, 1], [], []>} : vector<128x128xbf16>, vector<128x128xbf16>, vector<128x128xf32> -> vector<128x128xf32>
    %30 = arith.addf %24, %29 : vector<128x128xf32>
    %c0_62 = arith.constant 0 : index
    %c1_63 = arith.constant 1 : index
    %c0_64 = arith.constant 0 : index
    %c0_65 = arith.constant 0 : index
    %31 = vector.load %arg8[%c0_62, %c1_63, %c0_64, %c0_65] : memref<1x18x18x128xbf16, #tpu.memory_space<vmem>>, vector<1x8x16x128xbf16>
    %32 = vector.shape_cast %31 : vector<1x8x16x128xbf16> to vector<128x128xbf16>
    %c3 = arith.constant 3 : index
    %c0_66 = arith.constant 0 : index
    %c0_67 = arith.constant 0 : index
    %33 = vector.load %arg2[%c3, %c0_66, %c0_67] : memref<9x128x128xbf16, #tpu.memory_space<vmem>>, vector<1x128x128xbf16>
    %34 = vector.shape_cast %33 : vector<1x128x128xbf16> to vector<128x128xbf16>
    %cst_68 = arith.constant dense<0.000000e+00> : vector<128x128xf32>
    %35 = tpu.matmul %32, %34, %cst_68 {dimension_numbers = #tpu.dot_dimension_numbers<[1], [0], [0], [1], [0, 0, 1, 1], [], []>} : vector<128x128xbf16>, vector<128x128xbf16>, vector<128x128xf32> -> vector<128x128xf32>
    %36 = arith.addf %30, %35 : vector<128x128xf32>
    %c0_69 = arith.constant 0 : index
    %c1_70 = arith.constant 1 : index
    %c1_71 = arith.constant 1 : index
    %c0_72 = arith.constant 0 : index
    %37 = vector.load %arg8[%c0_69, %c1_70, %c1_71, %c0_72] : memref<1x18x18x128xbf16, #tpu.memory_space<vmem>>, vector<1x8x16x128xbf16>
    %38 = vector.shape_cast %37 : vector<1x8x16x128xbf16> to vector<128x128xbf16>
    %c4 = arith.constant 4 : index
    %c0_73 = arith.constant 0 : index
    %c0_74 = arith.constant 0 : index
    %39 = vector.load %arg2[%c4, %c0_73, %c0_74] : memref<9x128x128xbf16, #tpu.memory_space<vmem>>, vector<1x128x128xbf16>
    %40 = vector.shape_cast %39 : vector<1x128x128xbf16> to vector<128x128xbf16>
    %cst_75 = arith.constant dense<0.000000e+00> : vector<128x128xf32>
    %41 = tpu.matmul %38, %40, %cst_75 {dimension_numbers = #tpu.dot_dimension_numbers<[1], [0], [0], [1], [0, 0, 1, 1], [], []>} : vector<128x128xbf16>, vector<128x128xbf16>, vector<128x128xf32> -> vector<128x128xf32>
    %42 = arith.addf %36, %41 : vector<128x128xf32>
    %c0_76 = arith.constant 0 : index
    %c1_77 = arith.constant 1 : index
    %c2_78 = arith.constant 2 : index
    %c0_79 = arith.constant 0 : index
    %43 = vector.load %arg8[%c0_76, %c1_77, %c2_78, %c0_79] : memref<1x18x18x128xbf16, #tpu.memory_space<vmem>>, vector<1x8x16x128xbf16>
    %44 = vector.shape_cast %43 : vector<1x8x16x128xbf16> to vector<128x128xbf16>
    %c5 = arith.constant 5 : index
    %c0_80 = arith.constant 0 : index
    %c0_81 = arith.constant 0 : index
    %45 = vector.load %arg2[%c5, %c0_80, %c0_81] : memref<9x128x128xbf16, #tpu.memory_space<vmem>>, vector<1x128x128xbf16>
    %46 = vector.shape_cast %45 : vector<1x128x128xbf16> to vector<128x128xbf16>
    %cst_82 = arith.constant dense<0.000000e+00> : vector<128x128xf32>
    %47 = tpu.matmul %44, %46, %cst_82 {dimension_numbers = #tpu.dot_dimension_numbers<[1], [0], [0], [1], [0, 0, 1, 1], [], []>} : vector<128x128xbf16>, vector<128x128xbf16>, vector<128x128xf32> -> vector<128x128xf32>
    %48 = arith.addf %42, %47 : vector<128x128xf32>
    %c0_83 = arith.constant 0 : index
    %c2_84 = arith.constant 2 : index
    %c0_85 = arith.constant 0 : index
    %c0_86 = arith.constant 0 : index
    %49 = vector.load %arg8[%c0_83, %c2_84, %c0_85, %c0_86] : memref<1x18x18x128xbf16, #tpu.memory_space<vmem>>, vector<1x8x16x128xbf16>
    %50 = vector.shape_cast %49 : vector<1x8x16x128xbf16> to vector<128x128xbf16>
    %c6 = arith.constant 6 : index
    %c0_87 = arith.constant 0 : index
    %c0_88 = arith.constant 0 : index
    %51 = vector.load %arg2[%c6, %c0_87, %c0_88] : memref<9x128x128xbf16, #tpu.memory_space<vmem>>, vector<1x128x128xbf16>
    %52 = vector.shape_cast %51 : vector<1x128x128xbf16> to vector<128x128xbf16>
    %cst_89 = arith.constant dense<0.000000e+00> : vector<128x128xf32>
    %53 = tpu.matmul %50, %52, %cst_89 {dimension_numbers = #tpu.dot_dimension_numbers<[1], [0], [0], [1], [0, 0, 1, 1], [], []>} : vector<128x128xbf16>, vector<128x128xbf16>, vector<128x128xf32> -> vector<128x128xf32>
    %54 = arith.addf %48, %53 : vector<128x128xf32>
    %c0_90 = arith.constant 0 : index
    %c2_91 = arith.constant 2 : index
    %c1_92 = arith.constant 1 : index
    %c0_93 = arith.constant 0 : index
    %55 = vector.load %arg8[%c0_90, %c2_91, %c1_92, %c0_93] : memref<1x18x18x128xbf16, #tpu.memory_space<vmem>>, vector<1x8x16x128xbf16>
    %56 = vector.shape_cast %55 : vector<1x8x16x128xbf16> to vector<128x128xbf16>
    %c7 = arith.constant 7 : index
    %c0_94 = arith.constant 0 : index
    %c0_95 = arith.constant 0 : index
    %57 = vector.load %arg2[%c7, %c0_94, %c0_95] : memref<9x128x128xbf16, #tpu.memory_space<vmem>>, vector<1x128x128xbf16>
    %58 = vector.shape_cast %57 : vector<1x128x128xbf16> to vector<128x128xbf16>
    %cst_96 = arith.constant dense<0.000000e+00> : vector<128x128xf32>
    %59 = tpu.matmul %56, %58, %cst_96 {dimension_numbers = #tpu.dot_dimension_numbers<[1], [0], [0], [1], [0, 0, 1, 1], [], []>} : vector<128x128xbf16>, vector<128x128xbf16>, vector<128x128xf32> -> vector<128x128xf32>
    %60 = arith.addf %54, %59 : vector<128x128xf32>
    %c0_97 = arith.constant 0 : index
    %c2_98 = arith.constant 2 : index
    %c2_99 = arith.constant 2 : index
    %c0_100 = arith.constant 0 : index
    %61 = vector.load %arg8[%c0_97, %c2_98, %c2_99, %c0_100] : memref<1x18x18x128xbf16, #tpu.memory_space<vmem>>, vector<1x8x16x128xbf16>
    %62 = vector.shape_cast %61 : vector<1x8x16x128xbf16> to vector<128x128xbf16>
    %c8 = arith.constant 8 : index
    %c0_101 = arith.constant 0 : index
    %c0_102 = arith.constant 0 : index
    %63 = vector.load %arg2[%c8, %c0_101, %c0_102] : memref<9x128x128xbf16, #tpu.memory_space<vmem>>, vector<1x128x128xbf16>
    %64 = vector.shape_cast %63 : vector<1x128x128xbf16> to vector<128x128xbf16>
    %cst_103 = arith.constant dense<0.000000e+00> : vector<128x128xf32>
    %65 = tpu.matmul %62, %64, %cst_103 {dimension_numbers = #tpu.dot_dimension_numbers<[1], [0], [0], [1], [0, 0, 1, 1], [], []>} : vector<128x128xbf16>, vector<128x128xbf16>, vector<128x128xf32> -> vector<128x128xf32>
    %66 = arith.addf %60, %65 : vector<128x128xf32>
    %c0_104 = arith.constant 0 : index
    %c0_105 = arith.constant 0 : index
    %67 = vector.load %arg3[%c0_104, %c0_105] : memref<1x128xf32, #tpu.memory_space<vmem>>, vector<1x128xf32>
    %68 = vector.broadcast %67 : vector<1x128xf32> to vector<128x128xf32>
    %69 = arith.addf %66, %68 : vector<128x128xf32>
    %cst_106 = arith.constant 0.000000e+00 : f32
    %70 = vector.broadcast %cst_106 : f32 to vector<128x128xf32>
    %71 = arith.maximumf %69, %70 : vector<128x128xf32>
    %72 = arith.truncf %71 : vector<128x128xf32> to vector<128x128xbf16>
    %73 = vector.shape_cast %72 : vector<128x128xbf16> to vector<1x8x16x128xbf16>
    %c0_107 = arith.constant 0 : index
    %c1_108 = arith.constant 1 : index
    %c1_109 = arith.constant 1 : index
    %c0_110 = arith.constant 0 : index
    %74 = vector.load %arg9[%c0_107, %c1_108, %c1_109, %c0_110] : memref<1x18x18x128xbf16, #tpu.memory_space<vmem>>, vector<1x8x16x128xbf16>
    tpu.vector_store %arg9[%c0_107, %c1_108, %c1_109, %c0_110], %73 {strides = array<i32>} : memref<1x18x18x128xbf16, #tpu.memory_space<vmem>>, vector<1x8x16x128xbf16>,
    %cst_111 = arith.constant 0.000000e+00 : f32
    %75 = vector.broadcast %cst_111 : f32 to vector<128x128xf32>
    %c0_112 = arith.constant 0 : index
    %c8_113 = arith.constant 8 : index
    %c0_114 = arith.constant 0 : index
    %c0_115 = arith.constant 0 : index
    %76 = vector.load %arg8[%c0_112, %c8_113, %c0_114, %c0_115] : memref<1x18x18x128xbf16, #tpu.memory_space<vmem>>, vector<1x8x16x128xbf16>
    %77 = vector.shape_cast %76 : vector<1x8x16x128xbf16> to vector<128x128xbf16>
    %c0_116 = arith.constant 0 : index
    %c0_117 = arith.constant 0 : index
    %c0_118 = arith.constant 0 : index
    %78 = vector.load %arg2[%c0_116, %c0_117, %c0_118] : memref<9x128x128xbf16, #tpu.memory_space<vmem>>, vector<1x128x128xbf16>
    %79 = vector.shape_cast %78 : vector<1x128x128xbf16> to vector<128x128xbf16>
    %cst_119 = arith.constant dense<0.000000e+00> : vector<128x128xf32>
    %80 = tpu.matmul %77, %79, %cst_119 {dimension_numbers = #tpu.dot_dimension_numbers<[1], [0], [0], [1], [0, 0, 1, 1], [], []>} : vector<128x128xbf16>, vector<128x128xbf16>, vector<128x128xf32> -> vector<128x128xf32>
    %81 = arith.addf %75, %80 : vector<128x128xf32>
    %c0_120 = arith.constant 0 : index
    %c8_121 = arith.constant 8 : index
    %c1_122 = arith.constant 1 : index
    %c0_123 = arith.constant 0 : index
    %82 = vector.load %arg8[%c0_120, %c8_121, %c1_122, %c0_123] : memref<1x18x18x128xbf16, #tpu.memory_space<vmem>>, vector<1x8x16x128xbf16>
    %83 = vector.shape_cast %82 : vector<1x8x16x128xbf16> to vector<128x128xbf16>
    %c1_124 = arith.constant 1 : index
    %c0_125 = arith.constant 0 : index
    %c0_126 = arith.constant 0 : index
    %84 = vector.load %arg2[%c1_124, %c0_125, %c0_126] : memref<9x128x128xbf16, #tpu.memory_space<vmem>>, vector<1x128x128xbf16>
    %85 = vector.shape_cast %84 : vector<1x128x128xbf16> to vector<128x128xbf16>
    %cst_127 = arith.constant dense<0.000000e+00> : vector<128x128xf32>
    %86 = tpu.matmul %83, %85, %cst_127 {dimension_numbers = #tpu.dot_dimension_numbers<[1], [0], [0], [1], [0, 0, 1, 1], [], []>} : vector<128x128xbf16>, vector<128x128xbf16>, vector<128x128xf32> -> vector<128x128xf32>
    %87 = arith.addf %81, %86 : vector<128x128xf32>
    %c0_128 = arith.constant 0 : index
    %c8_129 = arith.constant 8 : index
    %c2_130 = arith.constant 2 : index
    %c0_131 = arith.constant 0 : index
    %88 = vector.load %arg8[%c0_128, %c8_129, %c2_130, %c0_131] : memref<1x18x18x128xbf16, #tpu.memory_space<vmem>>, vector<1x8x16x128xbf16>
    %89 = vector.shape_cast %88 : vector<1x8x16x128xbf16> to vector<128x128xbf16>
    %c2_132 = arith.constant 2 : index
    %c0_133 = arith.constant 0 : index
    %c0_134 = arith.constant 0 : index
    %90 = vector.load %arg2[%c2_132, %c0_133, %c0_134] : memref<9x128x128xbf16, #tpu.memory_space<vmem>>, vector<1x128x128xbf16>
    %91 = vector.shape_cast %90 : vector<1x128x128xbf16> to vector<128x128xbf16>
    %cst_135 = arith.constant dense<0.000000e+00> : vector<128x128xf32>
    %92 = tpu.matmul %89, %91, %cst_135 {dimension_numbers = #tpu.dot_dimension_numbers<[1], [0], [0], [1], [0, 0, 1, 1], [], []>} : vector<128x128xbf16>, vector<128x128xbf16>, vector<128x128xf32> -> vector<128x128xf32>
    %93 = arith.addf %87, %92 : vector<128x128xf32>
    %c0_136 = arith.constant 0 : index
    %c9 = arith.constant 9 : index
    %c0_137 = arith.constant 0 : index
    %c0_138 = arith.constant 0 : index
    %94 = vector.load %arg8[%c0_136, %c9, %c0_137, %c0_138] : memref<1x18x18x128xbf16, #tpu.memory_space<vmem>>, vector<1x8x16x128xbf16>
    %95 = vector.shape_cast %94 : vector<1x8x16x128xbf16> to vector<128x128xbf16>
    %c3_139 = arith.constant 3 : index
    %c0_140 = arith.constant 0 : index
    %c0_141 = arith.constant 0 : index
    %96 = vector.load %arg2[%c3_139, %c0_140, %c0_141] : memref<9x128x128xbf16, #tpu.memory_space<vmem>>, vector<1x128x128xbf16>
    %97 = vector.shape_cast %96 : vector<1x128x128xbf16> to vector<128x128xbf16>
    %cst_142 = arith.constant dense<0.000000e+00> : vector<128x128xf32>
    %98 = tpu.matmul %95, %97, %cst_142 {dimension_numbers = #tpu.dot_dimension_numbers<[1], [0], [0], [1], [0, 0, 1, 1], [], []>} : vector<128x128xbf16>, vector<128x128xbf16>, vector<128x128xf32> -> vector<128x128xf32>
    %99 = arith.addf %93, %98 : vector<128x128xf32>
    %c0_143 = arith.constant 0 : index
    %c9_144 = arith.constant 9 : index
    %c1_145 = arith.constant 1 : index
    %c0_146 = arith.constant 0 : index
    %100 = vector.load %arg8[%c0_143, %c9_144, %c1_145, %c0_146] : memref<1x18x18x128xbf16, #tpu.memory_space<vmem>>, vector<1x8x16x128xbf16>
    %101 = vector.shape_cast %100 : vector<1x8x16x128xbf16> to vector<128x128xbf16>
    %c4_147 = arith.constant 4 : index
    %c0_148 = arith.constant 0 : index
    %c0_149 = arith.constant 0 : index
    %102 = vector.load %arg2[%c4_147, %c0_148, %c0_149] : memref<9x128x128xbf16, #tpu.memory_space<vmem>>, vector<1x128x128xbf16>
    %103 = vector.shape_cast %102 : vector<1x128x128xbf16> to vector<128x128xbf16>
    %cst_150 = arith.constant dense<0.000000e+00> : vector<128x128xf32>
    %104 = tpu.matmul %101, %103, %cst_150 {dimension_numbers = #tpu.dot_dimension_numbers<[1], [0], [0], [1], [0, 0, 1, 1], [], []>} : vector<128x128xbf16>, vector<128x128xbf16>, vector<128x128xf32> -> vector<128x128xf32>
    %105 = arith.addf %99, %104 : vector<128x128xf32>
    %c0_151 = arith.constant 0 : index
    %c9_152 = arith.constant 9 : index
    %c2_153 = arith.constant 2 : index
    %c0_154 = arith.constant 0 : index
    %106 = vector.load %arg8[%c0_151, %c9_152, %c2_153, %c0_154] : memref<1x18x18x128xbf16, #tpu.memory_space<vmem>>, vector<1x8x16x128xbf16>
    %107 = vector.shape_cast %106 : vector<1x8x16x128xbf16> to vector<128x128xbf16>
    %c5_155 = arith.constant 5 : index
    %c0_156 = arith.constant 0 : index
    %c0_157 = arith.constant 0 : index
    %108 = vector.load %arg2[%c5_155, %c0_156, %c0_157] : memref<9x128x128xbf16, #tpu.memory_space<vmem>>, vector<1x128x128xbf16>
    %109 = vector.shape_cast %108 : vector<1x128x128xbf16> to vector<128x128xbf16>
    %cst_158 = arith.constant dense<0.000000e+00> : vector<128x128xf32>
    %110 = tpu.matmul %107, %109, %cst_158 {dimension_numbers = #tpu.dot_dimension_numbers<[1], [0], [0], [1], [0, 0, 1, 1], [], []>} : vector<128x128xbf16>, vector<128x128xbf16>, vector<128x128xf32> -> vector<128x128xf32>
    %111 = arith.addf %105, %110 : vector<128x128xf32>
    %c0_159 = arith.constant 0 : index
    %c10 = arith.constant 10 : index
    %c0_160 = arith.constant 0 : index
    %c0_161 = arith.constant 0 : index
    %112 = vector.load %arg8[%c0_159, %c10, %c0_160, %c0_161] : memref<1x18x18x128xbf16, #tpu.memory_space<vmem>>, vector<1x8x16x128xbf16>
    %113 = vector.shape_cast %112 : vector<1x8x16x128xbf16> to vector<128x128xbf16>
    %c6_162 = arith.constant 6 : index
    %c0_163 = arith.constant 0 : index
    %c0_164 = arith.constant 0 : index
    %114 = vector.load %arg2[%c6_162, %c0_163, %c0_164] : memref<9x128x128xbf16, #tpu.memory_space<vmem>>, vector<1x128x128xbf16>
    %115 = vector.shape_cast %114 : vector<1x128x128xbf16> to vector<128x128xbf16>
    %cst_165 = arith.constant dense<0.000000e+00> : vector<128x128xf32>
    %116 = tpu.matmul %113, %115, %cst_165 {dimension_numbers = #tpu.dot_dimension_numbers<[1], [0], [0], [1], [0, 0, 1, 1], [], []>} : vector<128x128xbf16>, vector<128x128xbf16>, vector<128x128xf32> -> vector<128x128xf32>
    %117 = arith.addf %111, %116 : vector<128x128xf32>
    %c0_166 = arith.constant 0 : index
    %c10_167 = arith.constant 10 : index
    %c1_168 = arith.constant 1 : index
    %c0_169 = arith.constant 0 : index
    %118 = vector.load %arg8[%c0_166, %c10_167, %c1_168, %c0_169] : memref<1x18x18x128xbf16, #tpu.memory_space<vmem>>, vector<1x8x16x128xbf16>
    %119 = vector.shape_cast %118 : vector<1x8x16x128xbf16> to vector<128x128xbf16>
    %c7_170 = arith.constant 7 : index
    %c0_171 = arith.constant 0 : index
    %c0_172 = arith.constant 0 : index
    %120 = vector.load %arg2[%c7_170, %c0_171, %c0_172] : memref<9x128x128xbf16, #tpu.memory_space<vmem>>, vector<1x128x128xbf16>
    %121 = vector.shape_cast %120 : vector<1x128x128xbf16> to vector<128x128xbf16>
    %cst_173 = arith.constant dense<0.000000e+00> : vector<128x128xf32>
    %122 = tpu.matmul %119, %121, %cst_173 {dimension_numbers = #tpu.dot_dimension_numbers<[1], [0], [0], [1], [0, 0, 1, 1], [], []>} : vector<128x128xbf16>, vector<128x128xbf16>, vector<128x128xf32> -> vector<128x128xf32>
    %123 = arith.addf %117, %122 : vector<128x128xf32>
    %c0_174 = arith.constant 0 : index
    %c10_175 = arith.constant 10 : index
    %c2_176 = arith.constant 2 : index
    %c0_177 = arith.constant 0 : index
    %124 = vector.load %arg8[%c0_174, %c10_175, %c2_176, %c0_177] : memref<1x18x18x128xbf16, #tpu.memory_space<vmem>>, vector<1x8x16x128xbf16>
    %125 = vector.shape_cast %124 : vector<1x8x16x128xbf16> to vector<128x128xbf16>
    %c8_178 = arith.constant 8 : index
    %c0_179 = arith.constant 0 : index
    %c0_180 = arith.constant 0 : index
    %126 = vector.load %arg2[%c8_178, %c0_179, %c0_180] : memref<9x128x128xbf16, #tpu.memory_space<vmem>>, vector<1x128x128xbf16>
    %127 = vector.shape_cast %126 : vector<1x128x128xbf16> to vector<128x128xbf16>
    %cst_181 = arith.constant dense<0.000000e+00> : vector<128x128xf32>
    %128 = tpu.matmul %125, %127, %cst_181 {dimension_numbers = #tpu.dot_dimension_numbers<[1], [0], [0], [1], [0, 0, 1, 1], [], []>} : vector<128x128xbf16>, vector<128x128xbf16>, vector<128x128xf32> -> vector<128x128xf32>
    %129 = arith.addf %123, %128 : vector<128x128xf32>
    %c0_182 = arith.constant 0 : index
    %c0_183 = arith.constant 0 : index
    %130 = vector.load %arg3[%c0_182, %c0_183] : memref<1x128xf32, #tpu.memory_space<vmem>>, vector<1x128xf32>
    %131 = vector.broadcast %130 : vector<1x128xf32> to vector<128x128xf32>
    %132 = arith.addf %129, %131 : vector<128x128xf32>
    %cst_184 = arith.constant 0.000000e+00 : f32
    %133 = vector.broadcast %cst_184 : f32 to vector<128x128xf32>
    %134 = arith.maximumf %132, %133 : vector<128x128xf32>
    %135 = arith.truncf %134 : vector<128x128xf32> to vector<128x128xbf16>
    %136 = vector.shape_cast %135 : vector<128x128xbf16> to vector<1x8x16x128xbf16>
    %c0_185 = arith.constant 0 : index
    %c9_186 = arith.constant 9 : index
    %c1_187 = arith.constant 1 : index
    %c0_188 = arith.constant 0 : index
    %137 = vector.load %arg9[%c0_185, %c9_186, %c1_187, %c0_188] : memref<1x18x18x128xbf16, #tpu.memory_space<vmem>>, vector<1x8x16x128xbf16>
    tpu.vector_store %arg9[%c0_185, %c9_186, %c1_187, %c0_188], %136 {strides = array<i32>} : memref<1x18x18x128xbf16, #tpu.memory_space<vmem>>, vector<1x8x16x128xbf16>,
    %c0_189 = arith.constant 0 : index
    %c0_190 = arith.constant 0 : index
    %138 = vector.load %arg6[%c0_189, %c0_190] : memref<32x128xbf16, #tpu.memory_space<vmem>>, vector<32x128xbf16>
    %139 = vector.shape_cast %138 : vector<32x128xbf16> to vector<1x32x128xbf16>
    %cst_191 = arith.constant 0.000000e+00 : f32
    %140 = vector.broadcast %cst_191 : f32 to vector<128x128xf32>
    %c0_192 = arith.constant 0 : index
    %c0_193 = arith.constant 0 : index
    %c0_194 = arith.constant 0 : index
    %c0_195 = arith.constant 0 : index
    %141 = vector.load %arg9[%c0_192, %c0_193, %c0_194, %c0_195] : memref<1x18x18x128xbf16, #tpu.memory_space<vmem>>, vector<1x8x16x128xbf16>
    %142 = vector.shape_cast %141 : vector<1x8x16x128xbf16> to vector<128x128xbf16>
    %c0_196 = arith.constant 0 : index
    %c0_197 = arith.constant 0 : index
    %c0_198 = arith.constant 0 : index
    %143 = vector.load %arg4[%c0_196, %c0_197, %c0_198] : memref<9x128x128xbf16, #tpu.memory_space<vmem>>, vector<1x128x128xbf16>
    %144 = vector.shape_cast %143 : vector<1x128x128xbf16> to vector<128x128xbf16>
    %cst_199 = arith.constant dense<0.000000e+00> : vector<128x128xf32>
    %145 = tpu.matmul %142, %144, %cst_199 {dimension_numbers = #tpu.dot_dimension_numbers<[1], [0], [0], [1], [0, 0, 1, 1], [], []>} : vector<128x128xbf16>, vector<128x128xbf16>, vector<128x128xf32> -> vector<128x128xf32>
    %146 = arith.addf %140, %145 : vector<128x128xf32>
    %c0_200 = arith.constant 0 : index
    %c0_201 = arith.constant 0 : index
    %c1_202 = arith.constant 1 : index
    %c0_203 = arith.constant 0 : index
    %147 = vector.load %arg9[%c0_200, %c0_201, %c1_202, %c0_203] : memref<1x18x18x128xbf16, #tpu.memory_space<vmem>>, vector<1x8x16x128xbf16>
    %148 = vector.shape_cast %147 : vector<1x8x16x128xbf16> to vector<128x128xbf16>
    %c1_204 = arith.constant 1 : index
    %c0_205 = arith.constant 0 : index
    %c0_206 = arith.constant 0 : index
    %149 = vector.load %arg4[%c1_204, %c0_205, %c0_206] : memref<9x128x128xbf16, #tpu.memory_space<vmem>>, vector<1x128x128xbf16>
    %150 = vector.shape_cast %149 : vector<1x128x128xbf16> to vector<128x128xbf16>
    %cst_207 = arith.constant dense<0.000000e+00> : vector<128x128xf32>
    %151 = tpu.matmul %148, %150, %cst_207 {dimension_numbers = #tpu.dot_dimension_numbers<[1], [0], [0], [1], [0, 0, 1, 1], [], []>} : vector<128x128xbf16>, vector<128x128xbf16>, vector<128x128xf32> -> vector<128x128xf32>
    %152 = arith.addf %146, %151 : vector<128x128xf32>
    %c0_208 = arith.constant 0 : index
    %c0_209 = arith.constant 0 : index
    %c2_210 = arith.constant 2 : index
    %c0_211 = arith.constant 0 : index
    %153 = vector.load %arg9[%c0_208, %c0_209, %c2_210, %c0_211] : memref<1x18x18x128xbf16, #tpu.memory_space<vmem>>, vector<1x8x16x128xbf16>
    %154 = vector.shape_cast %153 : vector<1x8x16x128xbf16> to vector<128x128xbf16>
    %c2_212 = arith.constant 2 : index
    %c0_213 = arith.constant 0 : index
    %c0_214 = arith.constant 0 : index
    %155 = vector.load %arg4[%c2_212, %c0_213, %c0_214] : memref<9x128x128xbf16, #tpu.memory_space<vmem>>, vector<1x128x128xbf16>
    %156 = vector.shape_cast %155 : vector<1x128x128xbf16> to vector<128x128xbf16>
    %cst_215 = arith.constant dense<0.000000e+00> : vector<128x128xf32>
    %157 = tpu.matmul %154, %156, %cst_215 {dimension_numbers = #tpu.dot_dimension_numbers<[1], [0], [0], [1], [0, 0, 1, 1], [], []>} : vector<128x128xbf16>, vector<128x128xbf16>, vector<128x128xf32> -> vector<128x128xf32>
    %158 = arith.addf %152, %157 : vector<128x128xf32>
    %c0_216 = arith.constant 0 : index
    %c1_217 = arith.constant 1 : index
    %c0_218 = arith.constant 0 : index
    %c0_219 = arith.constant 0 : index
    %159 = vector.load %arg9[%c0_216, %c1_217, %c0_218, %c0_219] : memref<1x18x18x128xbf16, #tpu.memory_space<vmem>>, vector<1x8x16x128xbf16>
    %160 = vector.shape_cast %159 : vector<1x8x16x128xbf16> to vector<128x128xbf16>
    %c3_220 = arith.constant 3 : index
    %c0_221 = arith.constant 0 : index
    %c0_222 = arith.constant 0 : index
    %161 = vector.load %arg4[%c3_220, %c0_221, %c0_222] : memref<9x128x128xbf16, #tpu.memory_space<vmem>>, vector<1x128x128xbf16>
    %162 = vector.shape_cast %161 : vector<1x128x128xbf16> to vector<128x128xbf16>
    %cst_223 = arith.constant dense<0.000000e+00> : vector<128x128xf32>
    %163 = tpu.matmul %160, %162, %cst_223 {dimension_numbers = #tpu.dot_dimension_numbers<[1], [0], [0], [1], [0, 0, 1, 1], [], []>} : vector<128x128xbf16>, vector<128x128xbf16>, vector<128x128xf32> -> vector<128x128xf32>
    %164 = arith.addf %158, %163 : vector<128x128xf32>
    %c0_224 = arith.constant 0 : index
    %c1_225 = arith.constant 1 : index
    %c1_226 = arith.constant 1 : index
    %c0_227 = arith.constant 0 : index
    %165 = vector.load %arg9[%c0_224, %c1_225, %c1_226, %c0_227] : memref<1x18x18x128xbf16, #tpu.memory_space<vmem>>, vector<1x8x16x128xbf16>
    %166 = vector.shape_cast %165 : vector<1x8x16x128xbf16> to vector<128x128xbf16>
    %c4_228 = arith.constant 4 : index
    %c0_229 = arith.constant 0 : index
    %c0_230 = arith.constant 0 : index
    %167 = vector.load %arg4[%c4_228, %c0_229, %c0_230] : memref<9x128x128xbf16, #tpu.memory_space<vmem>>, vector<1x128x128xbf16>
    %168 = vector.shape_cast %167 : vector<1x128x128xbf16> to vector<128x128xbf16>
    %cst_231 = arith.constant dense<0.000000e+00> : vector<128x128xf32>
    %169 = tpu.matmul %166, %168, %cst_231 {dimension_numbers = #tpu.dot_dimension_numbers<[1], [0], [0], [1], [0, 0, 1, 1], [], []>} : vector<128x128xbf16>, vector<128x128xbf16>, vector<128x128xf32> -> vector<128x128xf32>
    %170 = arith.addf %164, %169 : vector<128x128xf32>
    %c0_232 = arith.constant 0 : index
    %c1_233 = arith.constant 1 : index
    %c2_234 = arith.constant 2 : index
    %c0_235 = arith.constant 0 : index
    %171 = vector.load %arg9[%c0_232, %c1_233, %c2_234, %c0_235] : memref<1x18x18x128xbf16, #tpu.memory_space<vmem>>, vector<1x8x16x128xbf16>
    %172 = vector.shape_cast %171 : vector<1x8x16x128xbf16> to vector<128x128xbf16>
    %c5_236 = arith.constant 5 : index
    %c0_237 = arith.constant 0 : index
    %c0_238 = arith.constant 0 : index
    %173 = vector.load %arg4[%c5_236, %c0_237, %c0_238] : memref<9x128x128xbf16, #tpu.memory_space<vmem>>, vector<1x128x128xbf16>
    %174 = vector.shape_cast %173 : vector<1x128x128xbf16> to vector<128x128xbf16>
    %cst_239 = arith.constant dense<0.000000e+00> : vector<128x128xf32>
    %175 = tpu.matmul %172, %174, %cst_239 {dimension_numbers = #tpu.dot_dimension_numbers<[1], [0], [0], [1], [0, 0, 1, 1], [], []>} : vector<128x128xbf16>, vector<128x128xbf16>, vector<128x128xf32> -> vector<128x128xf32>
    %176 = arith.addf %170, %175 : vector<128x128xf32>
    %c0_240 = arith.constant 0 : index
    %c2_241 = arith.constant 2 : index
    %c0_242 = arith.constant 0 : index
    %c0_243 = arith.constant 0 : index
    %177 = vector.load %arg9[%c0_240, %c2_241, %c0_242, %c0_243] : memref<1x18x18x128xbf16, #tpu.memory_space<vmem>>, vector<1x8x16x128xbf16>
    %178 = vector.shape_cast %177 : vector<1x8x16x128xbf16> to vector<128x128xbf16>
    %c6_244 = arith.constant 6 : index
    %c0_245 = arith.constant 0 : index
    %c0_246 = arith.constant 0 : index
    %179 = vector.load %arg4[%c6_244, %c0_245, %c0_246] : memref<9x128x128xbf16, #tpu.memory_space<vmem>>, vector<1x128x128xbf16>
    %180 = vector.shape_cast %179 : vector<1x128x128xbf16> to vector<128x128xbf16>
    %cst_247 = arith.constant dense<0.000000e+00> : vector<128x128xf32>
    %181 = tpu.matmul %178, %180, %cst_247 {dimension_numbers = #tpu.dot_dimension_numbers<[1], [0], [0], [1], [0, 0, 1, 1], [], []>} : vector<128x128xbf16>, vector<128x128xbf16>, vector<128x128xf32> -> vector<128x128xf32>
    %182 = arith.addf %176, %181 : vector<128x128xf32>
    %c0_248 = arith.constant 0 : index
    %c2_249 = arith.constant 2 : index
    %c1_250 = arith.constant 1 : index
    %c0_251 = arith.constant 0 : index
    %183 = vector.load %arg9[%c0_248, %c2_249, %c1_250, %c0_251] : memref<1x18x18x128xbf16, #tpu.memory_space<vmem>>, vector<1x8x16x128xbf16>
    %184 = vector.shape_cast %183 : vector<1x8x16x128xbf16> to vector<128x128xbf16>
    %c7_252 = arith.constant 7 : index
    %c0_253 = arith.constant 0 : index
    %c0_254 = arith.constant 0 : index
    %185 = vector.load %arg4[%c7_252, %c0_253, %c0_254] : memref<9x128x128xbf16, #tpu.memory_space<vmem>>, vector<1x128x128xbf16>
    %186 = vector.shape_cast %185 : vector<1x128x128xbf16> to vector<128x128xbf16>
    %cst_255 = arith.constant dense<0.000000e+00> : vector<128x128xf32>
    %187 = tpu.matmul %184, %186, %cst_255 {dimension_numbers = #tpu.dot_dimension_numbers<[1], [0], [0], [1], [0, 0, 1, 1], [], []>} : vector<128x128xbf16>, vector<128x128xbf16>, vector<128x128xf32> -> vector<128x128xf32>
    %188 = arith.addf %182, %187 : vector<128x128xf32>
    %c0_256 = arith.constant 0 : index
    %c2_257 = arith.constant 2 : index
    %c2_258 = arith.constant 2 : index
    %c0_259 = arith.constant 0 : index
    %189 = vector.load %arg9[%c0_256, %c2_257, %c2_258, %c0_259] : memref<1x18x18x128xbf16, #tpu.memory_space<vmem>>, vector<1x8x16x128xbf16>
    %190 = vector.shape_cast %189 : vector<1x8x16x128xbf16> to vector<128x128xbf16>
    %c8_260 = arith.constant 8 : index
    %c0_261 = arith.constant 0 : index
    %c0_262 = arith.constant 0 : index
    %191 = vector.load %arg4[%c8_260, %c0_261, %c0_262] : memref<9x128x128xbf16, #tpu.memory_space<vmem>>, vector<1x128x128xbf16>
    %192 = vector.shape_cast %191 : vector<1x128x128xbf16> to vector<128x128xbf16>
    %cst_263 = arith.constant dense<0.000000e+00> : vector<128x128xf32>
    %193 = tpu.matmul %190, %192, %cst_263 {dimension_numbers = #tpu.dot_dimension_numbers<[1], [0], [0], [1], [0, 0, 1, 1], [], []>} : vector<128x128xbf16>, vector<128x128xbf16>, vector<128x128xf32> -> vector<128x128xf32>
    %194 = arith.addf %188, %193 : vector<128x128xf32>
    %c0_264 = arith.constant 0 : index
    %c0_265 = arith.constant 0 : index
    %195 = vector.load %arg5[%c0_264, %c0_265] : memref<1x128xf32, #tpu.memory_space<vmem>>, vector<1x128xf32>
    %196 = vector.broadcast %195 : vector<1x128xf32> to vector<128x128xf32>
    %197 = arith.addf %194, %196 : vector<128x128xf32>
    %cst_266 = arith.constant 0.000000e+00 : f32
    %198 = vector.broadcast %cst_266 : f32 to vector<128x128xf32>
    %199 = arith.maximumf %197, %198 : vector<128x128xf32>
    %200 = arith.truncf %199 : vector<128x128xf32> to vector<128x128xbf16>
    %201 = vector.shape_cast %200 : vector<128x128xbf16> to vector<1x128x128xbf16>
    "tpu.trace_start"() <{level = 10 : i32, message = "bpk,bkc->bpc"}> : () -> ()
    %cst_267 = arith.constant dense<0.000000e+00> : vector<1x32x128xf32>
    %202 = tpu.matmul %139, %201, %cst_267 {dimension_numbers = #tpu.dot_dimension_numbers<[2], [1], [1], [2], [0, 0, 0, 1, 1, 2], [0], [0]>} : vector<1x32x128xbf16>, vector<1x128x128xbf16>, vector<1x32x128xf32> -> vector<1x32x128xf32>
    "tpu.trace_stop"() : () -> ()
    %c0_268 = arith.constant 0 : index
    %c0_269 = arith.constant 0 : index
    %c0_270 = arith.constant 0 : index
    %203 = vector.load %arg7[%c0_268, %c0_269, %c0_270] : memref<1x64x128xf32, #tpu.memory_space<vmem>>, vector<1x32x128xf32>
    tpu.vector_store %arg7[%c0_268, %c0_269, %c0_270], %202 {strides = array<i32>} : memref<1x64x128xf32, #tpu.memory_space<vmem>>, vector<1x32x128xf32>,
    %cst_271 = arith.constant 0.000000e+00 : f32
    %204 = vector.broadcast %cst_271 : f32 to vector<128x128xf32>
    %c0_272 = arith.constant 0 : index
    %c8_273 = arith.constant 8 : index
    %c0_274 = arith.constant 0 : index
    %c0_275 = arith.constant 0 : index
    %205 = vector.load %arg9[%c0_272, %c8_273, %c0_274, %c0_275] : memref<1x18x18x128xbf16, #tpu.memory_space<vmem>>, vector<1x8x16x128xbf16>
    %206 = vector.shape_cast %205 : vector<1x8x16x128xbf16> to vector<128x128xbf16>
    %c0_276 = arith.constant 0 : index
    %c0_277 = arith.constant 0 : index
    %c0_278 = arith.constant 0 : index
    %207 = vector.load %arg4[%c0_276, %c0_277, %c0_278] : memref<9x128x128xbf16, #tpu.memory_space<vmem>>, vector<1x128x128xbf16>
    %208 = vector.shape_cast %207 : vector<1x128x128xbf16> to vector<128x128xbf16>
    %cst_279 = arith.constant dense<0.000000e+00> : vector<128x128xf32>
    %209 = tpu.matmul %206, %208, %cst_279 {dimension_numbers = #tpu.dot_dimension_numbers<[1], [0], [0], [1], [0, 0, 1, 1], [], []>} : vector<128x128xbf16>, vector<128x128xbf16>, vector<128x128xf32> -> vector<128x128xf32>
    %210 = arith.addf %204, %209 : vector<128x128xf32>
    %c0_280 = arith.constant 0 : index
    %c8_281 = arith.constant 8 : index
    %c1_282 = arith.constant 1 : index
    %c0_283 = arith.constant 0 : index
    %211 = vector.load %arg9[%c0_280, %c8_281, %c1_282, %c0_283] : memref<1x18x18x128xbf16, #tpu.memory_space<vmem>>, vector<1x8x16x128xbf16>
    %212 = vector.shape_cast %211 : vector<1x8x16x128xbf16> to vector<128x128xbf16>
    %c1_284 = arith.constant 1 : index
    %c0_285 = arith.constant 0 : index
    %c0_286 = arith.constant 0 : index
    %213 = vector.load %arg4[%c1_284, %c0_285, %c0_286] : memref<9x128x128xbf16, #tpu.memory_space<vmem>>, vector<1x128x128xbf16>
    %214 = vector.shape_cast %213 : vector<1x128x128xbf16> to vector<128x128xbf16>
    %cst_287 = arith.constant dense<0.000000e+00> : vector<128x128xf32>
    %215 = tpu.matmul %212, %214, %cst_287 {dimension_numbers = #tpu.dot_dimension_numbers<[1], [0], [0], [1], [0, 0, 1, 1], [], []>} : vector<128x128xbf16>, vector<128x128xbf16>, vector<128x128xf32> -> vector<128x128xf32>
    %216 = arith.addf %210, %215 : vector<128x128xf32>
    %c0_288 = arith.constant 0 : index
    %c8_289 = arith.constant 8 : index
    %c2_290 = arith.constant 2 : index
    %c0_291 = arith.constant 0 : index
    %217 = vector.load %arg9[%c0_288, %c8_289, %c2_290, %c0_291] : memref<1x18x18x128xbf16, #tpu.memory_space<vmem>>, vector<1x8x16x128xbf16>
    %218 = vector.shape_cast %217 : vector<1x8x16x128xbf16> to vector<128x128xbf16>
    %c2_292 = arith.constant 2 : index
    %c0_293 = arith.constant 0 : index
    %c0_294 = arith.constant 0 : index
    %219 = vector.load %arg4[%c2_292, %c0_293, %c0_294] : memref<9x128x128xbf16, #tpu.memory_space<vmem>>, vector<1x128x128xbf16>
    %220 = vector.shape_cast %219 : vector<1x128x128xbf16> to vector<128x128xbf16>
    %cst_295 = arith.constant dense<0.000000e+00> : vector<128x128xf32>
    %221 = tpu.matmul %218, %220, %cst_295 {dimension_numbers = #tpu.dot_dimension_numbers<[1], [0], [0], [1], [0, 0, 1, 1], [], []>} : vector<128x128xbf16>, vector<128x128xbf16>, vector<128x128xf32> -> vector<128x128xf32>
    %222 = arith.addf %216, %221 : vector<128x128xf32>
    %c0_296 = arith.constant 0 : index
    %c9_297 = arith.constant 9 : index
    %c0_298 = arith.constant 0 : index
    %c0_299 = arith.constant 0 : index
    %223 = vector.load %arg9[%c0_296, %c9_297, %c0_298, %c0_299] : memref<1x18x18x128xbf16, #tpu.memory_space<vmem>>, vector<1x8x16x128xbf16>
    %224 = vector.shape_cast %223 : vector<1x8x16x128xbf16> to vector<128x128xbf16>
    %c3_300 = arith.constant 3 : index
    %c0_301 = arith.constant 0 : index
    %c0_302 = arith.constant 0 : index
    %225 = vector.load %arg4[%c3_300, %c0_301, %c0_302] : memref<9x128x128xbf16, #tpu.memory_space<vmem>>, vector<1x128x128xbf16>
    %226 = vector.shape_cast %225 : vector<1x128x128xbf16> to vector<128x128xbf16>
    %cst_303 = arith.constant dense<0.000000e+00> : vector<128x128xf32>
    %227 = tpu.matmul %224, %226, %cst_303 {dimension_numbers = #tpu.dot_dimension_numbers<[1], [0], [0], [1], [0, 0, 1, 1], [], []>} : vector<128x128xbf16>, vector<128x128xbf16>, vector<128x128xf32> -> vector<128x128xf32>
    %228 = arith.addf %222, %227 : vector<128x128xf32>
    %c0_304 = arith.constant 0 : index
    %c9_305 = arith.constant 9 : index
    %c1_306 = arith.constant 1 : index
    %c0_307 = arith.constant 0 : index
    %229 = vector.load %arg9[%c0_304, %c9_305, %c1_306, %c0_307] : memref<1x18x18x128xbf16, #tpu.memory_space<vmem>>, vector<1x8x16x128xbf16>
    %230 = vector.shape_cast %229 : vector<1x8x16x128xbf16> to vector<128x128xbf16>
    %c4_308 = arith.constant 4 : index
    %c0_309 = arith.constant 0 : index
    %c0_310 = arith.constant 0 : index
    %231 = vector.load %arg4[%c4_308, %c0_309, %c0_310] : memref<9x128x128xbf16, #tpu.memory_space<vmem>>, vector<1x128x128xbf16>
    %232 = vector.shape_cast %231 : vector<1x128x128xbf16> to vector<128x128xbf16>
    %cst_311 = arith.constant dense<0.000000e+00> : vector<128x128xf32>
    %233 = tpu.matmul %230, %232, %cst_311 {dimension_numbers = #tpu.dot_dimension_numbers<[1], [0], [0], [1], [0, 0, 1, 1], [], []>} : vector<128x128xbf16>, vector<128x128xbf16>, vector<128x128xf32> -> vector<128x128xf32>
    %234 = arith.addf %228, %233 : vector<128x128xf32>
    %c0_312 = arith.constant 0 : index
    %c9_313 = arith.constant 9 : index
    %c2_314 = arith.constant 2 : index
    %c0_315 = arith.constant 0 : index
    %235 = vector.load %arg9[%c0_312, %c9_313, %c2_314, %c0_315] : memref<1x18x18x128xbf16, #tpu.memory_space<vmem>>, vector<1x8x16x128xbf16>
    %236 = vector.shape_cast %235 : vector<1x8x16x128xbf16> to vector<128x128xbf16>
    %c5_316 = arith.constant 5 : index
    %c0_317 = arith.constant 0 : index
    %c0_318 = arith.constant 0 : index
    %237 = vector.load %arg4[%c5_316, %c0_317, %c0_318] : memref<9x128x128xbf16, #tpu.memory_space<vmem>>, vector<1x128x128xbf16>
    %238 = vector.shape_cast %237 : vector<1x128x128xbf16> to vector<128x128xbf16>
    %cst_319 = arith.constant dense<0.000000e+00> : vector<128x128xf32>
    %239 = tpu.matmul %236, %238, %cst_319 {dimension_numbers = #tpu.dot_dimension_numbers<[1], [0], [0], [1], [0, 0, 1, 1], [], []>} : vector<128x128xbf16>, vector<128x128xbf16>, vector<128x128xf32> -> vector<128x128xf32>
    %240 = arith.addf %234, %239 : vector<128x128xf32>
    %c0_320 = arith.constant 0 : index
    %c10_321 = arith.constant 10 : index
    %c0_322 = arith.constant 0 : index
    %c0_323 = arith.constant 0 : index
    %241 = vector.load %arg9[%c0_320, %c10_321, %c0_322, %c0_323] : memref<1x18x18x128xbf16, #tpu.memory_space<vmem>>, vector<1x8x16x128xbf16>
    %242 = vector.shape_cast %241 : vector<1x8x16x128xbf16> to vector<128x128xbf16>
    %c6_324 = arith.constant 6 : index
    %c0_325 = arith.constant 0 : index
    %c0_326 = arith.constant 0 : index
    %243 = vector.load %arg4[%c6_324, %c0_325, %c0_326] : memref<9x128x128xbf16, #tpu.memory_space<vmem>>, vector<1x128x128xbf16>
    %244 = vector.shape_cast %243 : vector<1x128x128xbf16> to vector<128x128xbf16>
    %cst_327 = arith.constant dense<0.000000e+00> : vector<128x128xf32>
    %245 = tpu.matmul %242, %244, %cst_327 {dimension_numbers = #tpu.dot_dimension_numbers<[1], [0], [0], [1], [0, 0, 1, 1], [], []>} : vector<128x128xbf16>, vector<128x128xbf16>, vector<128x128xf32> -> vector<128x128xf32>
    %246 = arith.addf %240, %245 : vector<128x128xf32>
    %c0_328 = arith.constant 0 : index
    %c10_329 = arith.constant 10 : index
    %c1_330 = arith.constant 1 : index
    %c0_331 = arith.constant 0 : index
    %247 = vector.load %arg9[%c0_328, %c10_329, %c1_330, %c0_331] : memref<1x18x18x128xbf16, #tpu.memory_space<vmem>>, vector<1x8x16x128xbf16>
    %248 = vector.shape_cast %247 : vector<1x8x16x128xbf16> to vector<128x128xbf16>
    %c7_332 = arith.constant 7 : index
    %c0_333 = arith.constant 0 : index
    %c0_334 = arith.constant 0 : index
    %249 = vector.load %arg4[%c7_332, %c0_333, %c0_334] : memref<9x128x128xbf16, #tpu.memory_space<vmem>>, vector<1x128x128xbf16>
    %250 = vector.shape_cast %249 : vector<1x128x128xbf16> to vector<128x128xbf16>
    %cst_335 = arith.constant dense<0.000000e+00> : vector<128x128xf32>
    %251 = tpu.matmul %248, %250, %cst_335 {dimension_numbers = #tpu.dot_dimension_numbers<[1], [0], [0], [1], [0, 0, 1, 1], [], []>} : vector<128x128xbf16>, vector<128x128xbf16>, vector<128x128xf32> -> vector<128x128xf32>
    %252 = arith.addf %246, %251 : vector<128x128xf32>
    %c0_336 = arith.constant 0 : index
    %c10_337 = arith.constant 10 : index
    %c2_338 = arith.constant 2 : index
    %c0_339 = arith.constant 0 : index
    %253 = vector.load %arg9[%c0_336, %c10_337, %c2_338, %c0_339] : memref<1x18x18x128xbf16, #tpu.memory_space<vmem>>, vector<1x8x16x128xbf16>
    %254 = vector.shape_cast %253 : vector<1x8x16x128xbf16> to vector<128x128xbf16>
    %c8_340 = arith.constant 8 : index
    %c0_341 = arith.constant 0 : index
    %c0_342 = arith.constant 0 : index
    %255 = vector.load %arg4[%c8_340, %c0_341, %c0_342] : memref<9x128x128xbf16, #tpu.memory_space<vmem>>, vector<1x128x128xbf16>
    %256 = vector.shape_cast %255 : vector<1x128x128xbf16> to vector<128x128xbf16>
    %cst_343 = arith.constant dense<0.000000e+00> : vector<128x128xf32>
    %257 = tpu.matmul %254, %256, %cst_343 {dimension_numbers = #tpu.dot_dimension_numbers<[1], [0], [0], [1], [0, 0, 1, 1], [], []>} : vector<128x128xbf16>, vector<128x128xbf16>, vector<128x128xf32> -> vector<128x128xf32>
    %258 = arith.addf %252, %257 : vector<128x128xf32>
    %c0_344 = arith.constant 0 : index
    %c0_345 = arith.constant 0 : index
    %259 = vector.load %arg5[%c0_344, %c0_345] : memref<1x128xf32, #tpu.memory_space<vmem>>, vector<1x128xf32>
    %260 = vector.broadcast %259 : vector<1x128xf32> to vector<128x128xf32>
    %261 = arith.addf %258, %260 : vector<128x128xf32>
    %cst_346 = arith.constant 0.000000e+00 : f32
    %262 = vector.broadcast %cst_346 : f32 to vector<128x128xf32>
    %263 = arith.maximumf %261, %262 : vector<128x128xf32>
    %264 = arith.truncf %263 : vector<128x128xf32> to vector<128x128xbf16>
    %265 = vector.shape_cast %264 : vector<128x128xbf16> to vector<1x128x128xbf16>
    "tpu.trace_start"() <{level = 10 : i32, message = "bpk,bkc->bpc"}> : () -> ()
    %cst_347 = arith.constant dense<0.000000e+00> : vector<1x32x128xf32>
    %266 = tpu.matmul %139, %265, %cst_347 {dimension_numbers = #tpu.dot_dimension_numbers<[2], [1], [1], [2], [0, 0, 0, 1, 1, 2], [0], [0]>} : vector<1x32x128xbf16>, vector<1x128x128xbf16>, vector<1x32x128xf32> -> vector<1x32x128xf32>
    "tpu.trace_stop"() : () -> ()
    %c0_348 = arith.constant 0 : index
    %c32 = arith.constant 32 : index
    %c0_349 = arith.constant 0 : index
    %267 = vector.load %arg7[%c0_348, %c32, %c0_349] : memref<1x64x128xf32, #tpu.memory_space<vmem>>, vector<1x32x128xf32>
    tpu.vector_store %arg7[%c0_348, %c32, %c0_349], %266 {strides = array<i32>} : memref<1x64x128xf32, #tpu.memory_space<vmem>>, vector<1x32x128xf32>,
    return
  }
  func.func @transform_0(%arg0: i32) -> (i32, i32, i32, i32) {
    %c0_i32 = arith.constant 0 : i32
    %c0_i32_0 = arith.constant 0 : i32
    %c0_i32_1 = arith.constant 0 : i32
    %c0_i32_2 = arith.constant 0 : i32
    return %arg0, %c0_i32, %c0_i32_0, %c0_i32_1 : i32, i32, i32, i32
  }
  func.func @transform_1(%arg0: i32) -> (i32, i32, i32) {
    %c0_i32 = arith.constant 0 : i32
    %c0_i32_0 = arith.constant 0 : i32
    %c0_i32_1 = arith.constant 0 : i32
    %c0_i32_2 = arith.constant 0 : i32
    return %c0_i32, %c0_i32_0, %c0_i32_1 : i32, i32, i32
  }
  func.func @transform_2(%arg0: i32) -> (i32, i32) {
    %c0_i32 = arith.constant 0 : i32
    %c0_i32_0 = arith.constant 0 : i32
    %c0_i32_1 = arith.constant 0 : i32
    return %c0_i32, %c0_i32_0 : i32, i32
  }
  func.func @transform_3(%arg0: i32) -> (i32, i32, i32) {
    %c0_i32 = arith.constant 0 : i32
    %c0_i32_0 = arith.constant 0 : i32
    %c0_i32_1 = arith.constant 0 : i32
    %c0_i32_2 = arith.constant 0 : i32
    return %c0_i32, %c0_i32_0, %c0_i32_1 : i32, i32, i32
  }
  func.func @transform_4(%arg0: i32) -> (i32, i32) {
    %c0_i32 = arith.constant 0 : i32
    %c0_i32_0 = arith.constant 0 : i32
    %c0_i32_1 = arith.constant 0 : i32
    return %c0_i32, %c0_i32_0 : i32, i32
  }
  func.func @transform_5(%arg0: i32) -> (i32, i32) {
    %c0_i32 = arith.constant 0 : i32
    %c0_i32_0 = arith.constant 0 : i32
    %c0_i32_1 = arith.constant 0 : i32
    return %c0_i32, %c0_i32_0 : i32, i32
  }
  func.func @transform_6(%arg0: i32) -> (i32, i32, i32) {
    %c0_i32 = arith.constant 0 : i32
    %c0_i32_0 = arith.constant 0 : i32
    %c0_i32_1 = arith.constant 0 : i32
    return %arg0, %c0_i32, %c0_i32_0 : i32, i32, i32
  }
}

</mosaic_0001>

<bundles_post_ra>
// kernel: tpu_custom_call.1
= control target key start
LH: loop header
LB: loop body
LE: loop exit
PB: predicated region body
PF: predicated region fallthrough
CT: control target
= control target key end

     0   :  { %11 = vsyncpa [#allocation5], 0  ;;  %s20355_s0 = inlined_call_operand.hbm [shape: bf16[2,16,16,128], index: 0, kind: input, shape index: {}]   ;;  %s20356_s1 = inlined_call_operand.hbm [shape: bf16[9,128,128], index: 1, kind: input, shape index: {}]   ;;  %s20357_s2 = inlined_call_operand.vmem [shape: f32[1,128], index: 2, kind: input, shape index: {}]   ;;  %s20358_s3 = inlined_call_operand.hbm [shape: bf16[9,128,128], index: 3, kind: input, shape index: {}]   ;;  %s20359_s4 = inlined_call_operand.vmem [shape: f32[1,128], index: 4, kind: input, shape index: {}]   ;;  %s20360_s5 = inlined_call_operand.vmem [shape: bf16[32,128], index: 5, kind: input, shape index: {}]   ;;  %s20361_s6 = inlined_call_operand.hbm [shape: f32[2,64,128], index: 6, kind: output, shape index: {}]  }
   0x1   :  { %13 = vsyncpa [#allocation5 + $0x1], 0 }
   0x2   :  { %14 = vsyncpa [#allocation8], 0 }
   0x3   :  { %15 = vsyncpa [#allocation6], 0 }
   0x4   :  { %17 = vsyncpa [#allocation6 + $0x1], 0  ;;  %s17063_s21 = smov 0   ;;  %s17065_s22 = smov 0  }
   0x5   :  { %s17067_s23 = smov 0   ;;  %s17069_s24 = smov 0  }
   0x6 LB: > { %s17084_s25 = sadd.s32 4294967295, %s17017_s24   ;;  %s13295_s26 = sadd.s32 4294967294, %s17017_s24   ;;  %s17017_s24 = sphi %s17069_s24, %s20532_s24   ;;  %s17013_s23 = sphi %s17067_s23, %s20531_s23   ;;  %s17009_s22 = sphi %s17065_s22, %s20530_s22   ;;  %s17005_s21 = sphi %s17063_s21, %s20529_s21  }
   0x7   : > { %p43_p0 = scmp.ne.s32.totalorder %s17009_s22, %s17005_s21  ;;  %p20362_p1 = scmp.eq.s32.totalorder %s17084_s25, 0 }
   0x8   : > { %p178_p3 = scmp.eq.s32.totalorder %s13295_s26, 1  ;;  %p13296_p5 = scmp.ge.s32.totalorder %s17017_s24, 1 }
   0x9   : > { %p17093_p4 = por %p20362_p1, %p43_p0  ;;  %p185_p7 = scmp.lt.s32.totalorder %s17017_s24, 3 }
   0xa   : > { %p17098_p6 = por %p178_p3, %p43_p0  ;;  %s17019_s30 = smov [#allocation7]  }
   0xb   : > { %s20404_s27 = scalar_select %p17093_p4, 1, 0 }
   0xc   : > { %s20405_s28 = scalar_select %p17098_p6, 1, 0 }
   0xd   : > { %p17103_p8 = pnand %p13296_p5, %p185_p7  ;;  %s197_s7 = sshll.u32 %s17019_s30, 4  ;;  %s17107_s7 = int_to_ptr.vmem [resolvable:$true] %s197_s7 }
   0xe   : > { %s17020_s9 = smov [#allocation9]   ;;  %s16861_s13 = scalar_lea.hbm %s20356_s1, 9216 }
   0xf   : > { %p16369_p9 = pneg %p17103_p8  ;;  %s213_s10 = sshll.u32 %s17020_s9, 4  ;;  %s17118_s10 = int_to_ptr.vmem [resolvable:$true] %s213_s10 }
  0x10   : > { %p16862_p12 = scmp.ne.s32.totalorder %s20356_s1, %s16861_s13  ;;  %p16868_p5 = scmp.lt.u32.totalorder %s16861_s13, %s20356_s1 }
  0x11   : > { %p17114_p11 = pnand %p16369_p9, %p20362_p1 }
  0x13   : > { %p16863_p13 = pneg %p17114_p11 }
  0x15   : > { %p16864_p0 = pnand %p16863_p13, %p16862_p12 }
  0x17   : > { %p16865_p3 = pneg %p16864_p0 }
  0x19   : > { %p16870_p7 = pnand %p16868_p5, %p16865_p3 }
  0x1b   : > { %16873 = shalt.err (!%p16870_p7)
}
  0x1c   : > { %s16874_s18 = scalar_lea.vmem %s17107_s7, 9216  ;;  %p16882_p2 = scmp.lt.s32.totalorder %s17107_s7, %s17107_s7 }
  0x1d   : > { %p16875_p9 = scmp.ne.s32.totalorder %s17107_s7, %s16874_s18  ;;  %p16883_p12 = scmp.lt.s32.totalorder %s16874_s18, %s16874_s18 }
  0x1f   : > { %p16877_p10 = pnand %p16875_p9, %p16863_p13  ;;  %p16884_p0 = por %p16883_p12, %p16882_p2 }
  0x21   : > { %p16878_p1 = pneg %p16877_p10 }
  0x23   : > { %p16885_p6 = pnand %p16884_p0, %p16878_p1 }
  0x25   : > { %16888 = shalt.err (!%p16885_p6)
}
  0x26   : > { %s17021_s19 = smov 64   ;;  %s17022_s20 = smov 4  }
  0x27   : > { %16372 = dma.hbm_to_vmem [thread:$0]  (!%p17114_p11), %s20356_s1, 9216, %s17107_s7, [#allocation8], %s17021_s19, %s17021_s19, %s17022_s20  }
  0x28   : > { %s16889_s12 = scalar_lea.hbm %s20358_s3, 9216 }
  0x29   : > { %p16890_p1 = scmp.ne.s32.totalorder %s20358_s3, %s16889_s12  ;;  %p16896_p10 = scmp.lt.u32.totalorder %s16889_s12, %s20358_s3 }
  0x2b   : > { %p16892_p2 = pnand %p16890_p1, %p16863_p13 }
  0x2d   : > { %p16893_p6 = pneg %p16892_p2 }
  0x2f   : > { %p16898_p3 = pnand %p16896_p10, %p16893_p6 }
  0x31   : > { %16901 = shalt.err (!%p16898_p3)
}
  0x32   : > { %s16902_s7 = scalar_lea.vmem %s17118_s10, 9216  ;;  %p16910_p12 = scmp.lt.s32.totalorder %s17118_s10, %s17118_s10 }
  0x33   : > { %p16903_p5 = scmp.ne.s32.totalorder %s17118_s10, %s16902_s7  ;;  %p16911_p0 = scmp.lt.s32.totalorder %s16902_s7, %s16902_s7 }
  0x35   : > { %p16905_p7 = pnand %p16903_p5, %p16863_p13  ;;  %p16912_p1 = por %p16911_p0, %p16910_p12 }
  0x37   : > { %p16906_p9 = pneg %p16905_p7 }
  0x39   : > { %p16913_p2 = pnand %p16912_p1, %p16906_p9 }
  0x3b   : > { %16916 = shalt.err (!%p16913_p2)
}
  0x3c   : > { %16375 = dma.hbm_to_vmem [thread:$0]  (!%p17114_p11), %s20358_s3, 9216, %s17118_s10, [#allocation8], %s17021_s19, %s17021_s19, %s17022_s20  }
  0x3d   : > { %s17179_s8 = sadd.s32 1, %s17017_s24   ;;  %s30_s26 = sadd.s32 1, %s17013_s23 }
  0x3e   : > { %s27_s30 = ssub.s32 %s17017_s24, %s17179_s8  ;;  %p37_p13 = scmp.ne.s32.totalorder %s17013_s23, %s17009_s22 }
  0x3f   : > { %p28_p6 = scmp.eq.s32.totalorder %s27_s30, 0  ;;  %p38_p10 = scmp.eq.s32.totalorder %s17017_s24, 0 }
  0x40   : > { %p20408_p3 = scmp.eq.s32.totalorder %s17084_s25, 1  ;;  %p16386_p7 = scmp.lt.s32.totalorder %s17017_s24, 2 }
  0x41   : > { %s17195_s11 = scalar_select %p28_p6, %s17013_s23, %s30_s26  }
  0x42   : > { %p17189_p5 = por %p20408_p3, %p37_p13  ;;  %p39_p9 = por %p38_p10, %p37_p13 }
  0x43   : > { %s233_s12 = sand.u32 1, %s17013_s23   ;;  %s14023_s10 = sshll.u32 %s17017_s24, 11 }
  0x44   : > { %s20409_s9 = scalar_select %p17189_p5, 1, 0 }
  0x45   : > { %s13300_s13 = sshll.u32 %s233_s12, 7  ;;  %s17202_s16 = scalar_lea.hbm %s20355_s0, %s14023_s10 }
  0x46   : > { %s237_s7 = scalar_lea.vmem [#allocation4], %s13300_s13  ;;  %p17206_p11 = pnand %p16386_p7, %p39_p9 }
  0x47   : > { %s244_s17 = sshll.u32 %s237_s7, 4  ;;  %s17210_s26 = scalar_lea.sflag [#allocation5], %s233_s12  ;;  %s17204_s17 = int_to_ptr.vmem [resolvable:$true] %s244_s17 }
  0x48   : > { %s16917_s30 = scalar_lea.hbm %s17202_s16, 2048  ;;  %p16919_p0 = pneg %p17206_p11 }
  0x49   : > { %p16918_p12 = scmp.ne.s32.totalorder %s17202_s16, %s16917_s30  ;;  %s16922_s14 = scalar_lea.hbm %s20355_s0, 4096 }
  0x4a   : > { %p16923_p13 = scmp.lt.u32.totalorder %s17202_s16, %s20355_s0  ;;  %p16924_p6 = scmp.lt.u32.totalorder %s16922_s14, %s16917_s30 }
  0x4b   : > { %p16920_p1 = pnand %p16919_p0, %p16918_p12  ;;  %p16926_p3 = scmp.lt.u32.totalorder %s16917_s30, %s17202_s16 }
  0x4c   : > { %p16925_p10 = por %p16924_p6, %p16923_p13 }
  0x4d   : > { %p16921_p2 = pneg %p16920_p1 }
  0x4e   : > { %p16927_p7 = por %p16926_p3, %p16925_p10 }
  0x50   : > { %p16928_p9 = pnand %p16927_p7, %p16921_p2 }
  0x52   : > { %16931 = shalt.err (!%p16928_p9)
}
  0x53   : > { %s16932_s12 = scalar_lea.vmem %s17204_s17, 2048  ;;  %s17023_s13 = smov [#allocation4]  }
  0x54   : > { %p16933_p12 = scmp.ne.s32.totalorder %s17204_s17, %s16932_s12  ;;  %s16937_s10 = sshll.u32 %s17023_s13, 4  ;;  %s16938_s10 = int_to_ptr.vmem [resolvable:$false] %s16937_s10 }
  0x55   : > { %s16939_s15 = scalar_lea.vmem %s16938_s10, 4096  ;;  %p16940_p4 = scmp.lt.s32.totalorder %s17204_s17, %s16938_s10 }
  0x56   : > { %p16935_p1 = pnand %p16933_p12, %p16919_p0  ;;  %p16941_p13 = scmp.lt.s32.totalorder %s16939_s15, %s16932_s12 }
  0x58   : > { %p16936_p5 = pneg %p16935_p1  ;;  %p16942_p6 = por %p16941_p13, %p16940_p4 }
  0x5a   : > { %p16943_p10 = pnand %p16942_p6, %p16936_p5 }
  0x5c   : > { %16946 = shalt.err (!%p16943_p10)
}
  0x5d   : > { %16379 = dma.hbm_to_vmem [thread:$0]  (!%p17206_p11), %s17202_s16, 2048, %s17204_s17, %s17210_s26, %s17021_s19, %s17021_s19, %s17022_s20  }
  0x5e   : > { %256 = sbr.rel (%p17103_p8) target bundleno = 2098 (0x832), region = 44 }
  0x65   : > { %s17244_s30 = sand.u32 1, %s17009_s22   ;;  %p20411_p4 = scmp.ne.s32.totalorder %s20404_s27, 0 }
  0x66   : > { %s13304_s14 = sshll.u32 %s17244_s30, 7  ;;  %s259_s7 = scalar_lea.sflag [#allocation5], %s17244_s30 }
  0x67   : > { %s17248_s12 = scalar_lea.vmem [#allocation4], %s13304_s14 }
  0x68   : > { %16992 = dma.done.wait (%p20411_p4), %s259_s7, 2048  }
  0x69   : > { %16994 = vsyncadd (%p20411_p4), %s259_s7, 4294965248  ;;  %p20412_p5 = scmp.eq.s32.totalorder %s17084_s25, 0 }
  0x6b   : > { %16996 = dma.done.wait (%p20412_p5), [#allocation8], 18432   ;;  %p20413_p8 = pmov %p20412_p5 }
  0x6c   : > { %v17024_v0 = vmov 0   ;;  %v16429_v1 = vld [vmem:[#allocation7 + $0x40] sm:$0xff]   ;;  %v16431_v3 = vld [vmem:[#allocation7 + $0x48] sm:$0xff]   ;;  %v16433_v5 = vld [vmem:[#allocation7 + $0x50] sm:$0xff]   ;;  %vm307_vm0 = vcmask 1040384   ;;  %v20414_v9 = vmov 0 }
  0x6d   : > { %16998 = vsyncadd (%p20413_p8), [#allocation8], 4294948864  ;;  %300 = vst [vmem:[#allocation2] sm:$0xf] %v17024_v0  ;;  %v16430_v2 = vld [vmem:[#allocation7 + $0x40] sm:$0xff]   ;;  %14653 = vmatprep.subr.bf16.mxu0 %v16429_v1  ;;  %v16432_v4 = vld [vmem:[#allocation7 + $0x48] sm:$0xff]  }
  0x6e   : > { %301 = vst [vmem:[#allocation2 + $0x4] sm:$0xf] %v17024_v0  ;;  %302 = vst [vmem:[#allocation2 + $0x8] sm:$0x1] %v17024_v0  ;;  %14941 = vmatprep.subr.bf16.mxu1 %v16430_v2  ;;  %14654 = vmatpush3.bf16.msra.mxu0 %v16429_v1  ;;  %v16434_v6 = vld [vmem:[#allocation7 + $0x50] sm:$0xff]   ;;  %v16435_v7 = vld [vmem:[#allocation7 + $0x58] sm:$0xff]  }
  0x6f   : > { %304 = vst [vmem:[#allocation2 + $0xcc] sm:$0xf] %v17024_v0  ;;  %305 = vst [vmem:[#allocation2 + $0xd0] sm:$0xf] %v17024_v0  ;;  %14942 = vmatpush3.bf16.msra.mxu1 %v16430_v2  ;;  %14655 = vmatprep.subr.bf16.mxu0 %v16431_v3  ;;  %vm308_vm1 = vsmask.f32 256 }
  0x70   : > { %306 = vst [vmem:[#allocation2 + $0xd4] sm:$0x1] %v17024_v0  ;;  %420 = vst [vmem:[#allocation3] sm:$0xf] %v17024_v0  ;;  %14943 = vmatprep.subr.bf16.mxu1 %v16432_v4  ;;  %vm364_vm2 = vsmask.f32 7938 }
  0x71   : > { %421 = vst [vmem:[#allocation3 + $0x4] sm:$0xf] %v17024_v0  ;;  %422 = vst [vmem:[#allocation3 + $0x8] sm:$0x1] %v17024_v0  ;;  %v16436_v8 = vld [vmem:[#allocation7 + $0x58] sm:$0xff]   ;;  %v20417_v10 = vmov 0 }
  0x72   : > { %424 = vst [vmem:[#allocation3 + $0xcc] sm:$0xf] %v17024_v0  ;;  %425 = vst [vmem:[#allocation3 + $0xd0] sm:$0xf] %v17024_v0  ;;  %14656 = vmatpush3.bf16.msra.mxu0 %v16431_v3  ;;  %vm567_vm5 = vsmask.f32 4368 }
  0x73   : > { %426 = vst [vmem:[#allocation3 + $0xd4] sm:$0x1] %v17024_v0  ;;  %14944 = vmatpush3.bf16.msra.mxu1 %v16432_v4  ;;  %14657 = vmatprep.subr.bf16.mxu0 %v16433_v5  ;;  %vm17259_vm3 = vmand %vm307_vm0, %vm308_vm1  ;;  %v16437_v11 = vld [vmem:[#allocation7 + $0x60] sm:$0xff]   ;;  %v16439_v13 = vld [vmem:[#allocation7 + $0x68] sm:$0xff]   ;;  %vm890_vm6 = vcmask 1043456   ;;  %v20420_v42 = vmov 0 }
  0x74   : > { %14945 = vmatprep.subr.bf16.mxu1 %v16434_v6  ;;  %v20415_v9 = vsel %vm17259_vm3, 4294967295, %v20414_v9  ;;  %vm17264_vm4 = vmand %vm307_vm0, %vm364_vm2  ;;  %v16438_v12 = vld [vmem:[#allocation7 + $0x60] sm:$0xff]   ;;  %v16440_v14 = vld [vmem:[#allocation7 + $0x68] sm:$0xff]   ;;  %vm1044_vm7 = vsmask.f32 3328  ;;  %v20423_v49 = vmov 0 }
  0x75   : > { %20416 = vst [vmem:[#allocation14_spill] sm:$0xff] %v20415_v9  ;;  %v20418_v10 = vsel %vm17264_vm4, 4294967295, %v20417_v10  ;;  %v310_v15 = vld [vmem:[#allocation2] sm:$0x1]  ;;  %v366_v16 = vld [vmem:[#allocation2 + $0x8] sm:$0x1]  ;;  %vm17286_vm9 = vmor %vm308_vm1, %vm567_vm5 }
  0x76   : > { %14658 = vmatpush3.bf16.msra.mxu0 %v16433_v5  ;;  %20419 = vst [vmem:[#allocation15_spill] sm:$0xff] %v20418_v10  ;;  %v1005_v17 = vld [vmem:[#allocation2 + $0x4] sm:$0xf]  ;;  %v311_v18 = vsel %vm17259_vm3, 0, %v310_v15  ;;  %v367_v19 = vsel %vm17264_vm4, 0, %v366_v16  ;;  %v20421_v42 = vsel %vm17286_vm9, 4294967295, %v20420_v42  ;;  %vm17295_vm10 = vmand %vm890_vm6, %vm364_vm2 }
  0x77   : > { %14946 = vmatpush3.bf16.msra.mxu1 %v16434_v6  ;;  %14659 = vmatprep.subr.bf16.mxu0 %v16435_v7  ;;  %v1057_v20 = vshll.u32 %v1005_v17, 16  ;;  %v1061_v21 = vshrl.u32 %v1005_v17, 16  ;;  %v334_v22 = vld [vmem:[#allocation2 + $0x60] sm:$0x1]  ;;  %312 = vst [vmem:[#allocation2] sm:$0x1] %v311_v18 }
  0x78   : > { %14947 = vmatprep.subr.bf16.mxu1 %v16436_v8  ;;  %v16441_v23 = vld [vmem:[#allocation7 + $0x70] sm:$0xff]   ;;  %368 = vst [vmem:[#allocation2 + $0x8] sm:$0x1] %v367_v19  ;;  %vm1045_vm8 = vsmask.f32 7440  ;;  %v335_v24 = vsel %vm17259_vm3, 0, %v334_v22 }
  0x79   : > { %v390_v25 = vld [vmem:[#allocation2 + $0x68] sm:$0x1]  ;;  %v17275_v27 = vrot.slane %v1057_v20, 5  ;;  %v1063_v28 = vrot.slane %v1061_v21, 4  ;;  %336 = vst [vmem:[#allocation2 + $0x60] sm:$0x1] %v335_v24  ;;  %vm17309_vm11 = vmor %vm1044_vm7, %vm1045_vm8 }
  0x7a   : > { %14660 = vmatpush3.bf16.msra.mxu0 %v16435_v7  ;;  %v549_v26 = vld [vmem:[%s17248_s12 + $0x38] sm:$0xf]  ;;  %v391_v29 = vsel %vm17264_vm4, 0, %v390_v25  ;;  %v550_v30 = vld [vmem:[%s17248_s12 + $0x3c] sm:$0xf]  ;;  %v16442_v32 = vld [vmem:[#allocation7 + $0x70] sm:$0xff]  }
  0x7b   : > { %14948 = vmatpush3.bf16.msra.mxu1 %v16436_v8  ;;  %14661 = vmatprep.subr.bf16.mxu0 %v16437_v11  ;;  %v689_v31 = vshrl.u32 %v549_v26, 16  ;;  %392 = vst [vmem:[#allocation2 + $0x68] sm:$0x1] %v391_v29  ;;  %v692_v33 = vshll.u32 %v549_v26, 16  ;;  %v697_v34 = vshrl.u32 %v550_v30, 16  ;;  %v700_v35 = vshll.u32 %v550_v30, 16 }
  0x7c   : > { %14949 = vmatprep.subr.bf16.mxu1 %v16438_v12  ;;  %v313_v36 = vld [vmem:[#allocation2 + $0xc] sm:$0x1]  ;;  %v369_v39 = vld [vmem:[#allocation2 + $0x14] sm:$0x1]  ;;  %v535_v40 = vld [vmem:[%s17248_s12] sm:$0xf]  ;;  %v1064_v41 = vor.u32 %v1063_v28, %v17275_v27 }
  0x7d   : > { %v691_v37 = vrot.slane %v689_v31, 7  ;;  %v314_v38 = vsel %vm17259_vm3, 0, %v313_v36  ;;  %20422 = vst [vmem:[#allocation16_spill] sm:$0xff] %v20421_v42  ;;  %v699_v43 = vrot.slane %v697_v34, 7  ;;  %v370_v44 = vsel %vm17264_vm4, 0, %v369_v39  ;;  %v16443_v52 = vld [vmem:[#allocation7 + $0x78] sm:$0xff]  }
  0x7e   : > { %14662 = vmatpush3.bf16.msra.mxu0 %v16437_v11  ;;  %315 = vst [vmem:[#allocation2 + $0xc] sm:$0x1] %v314_v38  ;;  %v536_v45 = vld [vmem:[%s17248_s12 + $0x4] sm:$0xf]  ;;  %v570_v46 = vshrl.u32 %v535_v40, 16  ;;  %v20424_v49 = vsel %vm17295_vm10, 4294967295, %v20423_v49 }
  0x7f   : > { %14950 = vmatpush3.bf16.msra.mxu1 %v16438_v12  ;;  %14663 = vmatprep.subr.bf16.mxu0 %v16439_v13  ;;  %v694_v47 = vor.u32 %v692_v33, %v691_v37  ;;  %v695_v48 = vrot.slane %v691_v37, 4  ;;  %20425 = vst [vmem:[#allocation17_spill] sm:$0xff] %v20424_v49  ;;  %371 = vst [vmem:[#allocation2 + $0x14] sm:$0x1] %v370_v44  ;;  %v573_v50 = vshll.u32 %v535_v40, 16  ;;  %v578_v51 = vshrl.u32 %v536_v45, 16 }
  0x80   : > { %14951 = vmatprep.subr.bf16.mxu1 %v16440_v14  ;;  %v16444_v53 = vld [vmem:[#allocation7 + $0x78] sm:$0xff]   ;;  %v702_v54 = vor.u32 %v700_v35, %v699_v43  ;;  %v704_v55 = vrot.slane %v699_v43, 4  ;;  %v572_v56 = vrot.slane %v570_v46, 7  ;;  %v1004_v57 = vld [vmem:[#allocation2] sm:$0xf]  ;;  %v581_v60 = vshll.u32 %v536_v45, 16 }
  0x81   : > { %v1036_v58 = vld [vmem:[#allocation2 + $0x8] sm:$0x1]  ;;  %v580_v59 = vrot.slane %v578_v51, 7  ;;  %v1048_v61 = vshrl.u32 %v1004_v57, 16  ;;  %v1051_v62 = vshll.u32 %v1004_v57, 16  ;;  %v1065_v63 = vrot.slane %v1064_v41, 4 }
  0x82   : > { %14664 = vmatpush3.bf16.msra.mxu0 %v16439_v13  ;;  %v1067_v0 = vshll.u32 %v1036_v58, 16  ;;  %v941_v1 = vld [vmem:[#allocation2 + $0x60] sm:$0xf]  ;;  %v703_v2 = vsel %vm17286_vm9, %v695_v48, %v702_v54  ;;  %v945_v4 = vld [vmem:[#allocation2 + $0x68] sm:$0x1]  ;;  %v575_v5 = vor.u32 %v573_v50, %v572_v56  ;;  %v576_v6 = vrot.slane %v572_v56, 4 }
  0x83   : > { %14952 = vmatpush3.bf16.msra.mxu1 %v16440_v14  ;;  %14665 = vmatprep.subr.bf16.mxu0 %v16441_v23  ;;  %v942_v3 = vsel %vm17295_vm10, %v694_v47, %v941_v1  ;;  %v337_v7 = vld [vmem:[#allocation2 + $0x6c] sm:$0x1]  ;;  %v1050_v8 = vrot.slane %v1048_v61, 4  ;;  %v1053_v11 = vrot.slane %v1051_v62, 5  ;;  %944 = vst [vmem:[#allocation2 + $0x64] sm:$0xf] %v703_v2  ;;  %v946_v13 = vsel %vm17259_vm3, %v704_v55, %v945_v4 }
  0x84   : > { %14953 = vmatprep.subr.bf16.mxu1 %v16442_v32  ;;  %v1069_v12 = vrot.slane %v1067_v0, 5  ;;  %943 = vst [vmem:[#allocation2 + $0x60] sm:$0xf] %v942_v3  ;;  %v17305_v14 = vld [vmem:[#allocation7] sm:$0xff]   ;;  %v20426_v16 = vmov 0  ;;  %v583_v17 = vor.u32 %v581_v60, %v580_v59  ;;  %v585_v18 = vrot.slane %v580_v59, 4 }
  0x85   : > { %v393_v15 = vld [vmem:[#allocation2 + $0x74] sm:$0x1]  ;;  %v20427_v16 = vsel %vm17309_vm11, 4294967295, %v20426_v16  ;;  %947 = vst [vmem:[#allocation2 + $0x68] sm:$0x1] %v946_v13  ;;  %v338_v20 = vsel %vm17259_vm3, 0, %v337_v7 }
  0x86   : > { %14666 = vmatpush3.bf16.msra.mxu0 %v16441_v23  ;;  %20428 = vst [vmem:[#allocation18_spill] sm:$0xff] %v20427_v16  ;;  %v892_v19 = vld [vmem:[#allocation2 + $0xc] sm:$0xf]  ;;  %v394_v21 = vsel %vm17264_vm4, 0, %v393_v15  ;;  %v17317_v22 = vld [vmem:[#allocation7] sm:$0xff]   ;;  %v1054_v23 = vor.u32 %v1053_v11, %v1050_v8  ;;  %v584_v29 = vsel %vm17286_vm9, %v576_v6, %v583_v17  ;;  %v1070_v34 = vsel %vm17309_vm11, %v1065_v63, %v1069_v12  ;;  %s13307_s13 = sshll.u32 %s17244_s30, 6 }
  0x87   : > { %14954 = vmatpush3.bf16.msra.mxu1 %v16442_v32  ;;  %14667 = vmatprep.subr.bf16.mxu0 %v16443_v52  ;;  %v893_v24 = vsel %vm17295_vm10, %v575_v5, %v892_v19  ;;  %v896_v25 = vld [vmem:[#allocation2 + $0x14] sm:$0x1]  ;;  %339 = vst [vmem:[#allocation2 + $0x6c] sm:$0x1] %v338_v20  ;;  %395 = vst [vmem:[#allocation2 + $0x74] sm:$0x1] %v394_v21 }
  0x88   : > { %14955 = vmatprep.subr.bf16.mxu1 %v16444_v53  ;;  %v551_v26 = vld [vmem:[%s17248_s12 + $0x40] sm:$0xf]  ;;  %v552_v28 = vld [vmem:[%s17248_s12 + $0x44] sm:$0xf]  ;;  %894 = vst [vmem:[#allocation2 + $0xc] sm:$0xf] %v893_v24  ;;  %v897_v30 = vsel %vm17259_vm3, %v585_v18, %v896_v25 }
  0x89   : > { %v706_v31 = vshrl.u32 %v551_v26, 16  ;;  %v709_v32 = vshll.u32 %v551_v26, 16  ;;  %v1055_v33 = vrot.slane %v1054_v23, 4  ;;  %895 = vst [vmem:[#allocation2 + $0x10] sm:$0xf] %v584_v29  ;;  %v714_v35 = vshrl.u32 %v552_v28, 16 }
  0x8a   : > { %14668 = vmatpush3.bf16.msra.mxu0 %v16443_v52  ;;  %898 = vst [vmem:[#allocation2 + $0x14] sm:$0x1] %v897_v30  ;;  %v717_v37 = vshll.u32 %v552_v28, 16  ;;  %v316_v40 = vld [vmem:[#allocation2 + $0x18] sm:$0x1]  ;;  %vm1650_vm12 = vcmask 1042432  }
  0x8b   : > { %14956 = vmatpush3.bf16.msra.mxu1 %v16444_v53  ;;  %14685 = vmatprep.subr.bf16.mxu0 %v17305_v14  ;;  %v708_v36 = vrot.slane %v706_v31, 7  ;;  %v1060_v38 = vsel %vm17309_vm11, %v1055_v33, %v17275_v27  ;;  %v716_v39 = vrot.slane %v714_v35, 7  ;;  %v4157_v43 = vld [vmem:[#allocation2 + $0x60] sm:$0xf]  ;;  %v4158_v44 = vld [vmem:[#allocation2 + $0x64] sm:$0xf] }
  0x8c   : > { %14973 = vmatprep.subr.bf16.mxu1 %v17317_v22  ;;  %v13308_v41 = vcombine.low %v1060_v38, %v1070_v34  ;;  %v317_v47 = vsel %vm17259_vm3, 0, %v316_v40  ;;  %v4189_v48 = vld [vmem:[#allocation2 + $0x68] sm:$0x1]  ;;  %v4198_v50 = vshrl.u32 %v4157_v43, 16  ;;  %v4201_v51 = vshll.u32 %v4157_v43, 16  ;;  %s20122_s10 = scalar_lea.vmem [#allocation10], %s13307_s13 }
  0x8d   : > { %v711_v45 = vor.u32 %v709_v32, %v708_v36  ;;  %v712_v46 = vrot.slane %v708_v36, 4  ;;  %v4207_v52 = vshll.u32 %v4158_v44, 16  ;;  %v4211_v53 = vshrl.u32 %v4158_v44, 16  ;;  %318 = vst [vmem:[#allocation2 + $0x18] sm:$0x1] %v317_v47  ;;  %v16475_v42 = vld [vmem:[#allocation7 + $0x98] sm:$0xff]  }
  0x8e   : > { %14669 = vmatprep.mubr.bf16.mxu0 %v13308_v41  ;;  %v4217_v54 = vshll.u32 %v4189_v48, 16  ;;  %v719_v55 = vor.u32 %v717_v37, %v716_v39  ;;  %v721_v27 = vrot.slane %v716_v39, 4  ;;  %v948_v56 = vld [vmem:[#allocation2 + $0x6c] sm:$0xf]  ;;  %v4200_v57 = vrot.slane %v4198_v50, 4  ;;  %s13203_s27 = sshll.u32 %s20122_s10, 4  ;;  %s20302_s27 = int_to_ptr.vmem [resolvable:$true] %s13203_s27 }
  0x8f   : > { %v4203_v58 = vrot.slane %v4201_v51, 5  ;;  %v4209_v59 = vrot.slane %v4207_v52, 5  ;;  %v4213_v60 = vrot.slane %v4211_v53, 4  ;;  %v1006_v61 = vld [vmem:[#allocation2 + $0xc] sm:$0xf]  ;;  %v949_v3 = vsel %vm17295_vm10, %v711_v45, %v948_v56  ;;  %s14056_s29 = sshll.u32 %s17084_s25, 10 }
  0x90   : > { %v4219_v62 = vrot.slane %v4217_v54, 5  ;;  %v1007_v63 = vld [vmem:[#allocation2 + $0x10] sm:$0xf]  ;;  %v1072_v1 = vshrl.u32 %v1006_v61, 16  ;;  %v720_v2 = vsel %vm17286_vm9, %v712_v46, %v719_v55  ;;  %v1075_v6 = vshll.u32 %v1006_v61, 16  ;;  %s20308_s16 = scalar_lea.hbm %s20361_s6, %s14056_s29  ;;  %s13190_s17 = scalar_lea.sflag [#allocation6], %s17244_s30 }
  0x91   : > { %v1037_v0 = vld [vmem:[#allocation2 + $0x14] sm:$0x1]  ;;  %v4204_v4 = vor.u32 %v4203_v58, %v4200_v57  ;;  %v4214_v5 = vor.u32 %v4213_v60, %v4209_v59  ;;  %v1081_v7 = vshll.u32 %v1007_v63, 16  ;;  %950 = vst [vmem:[#allocation2 + $0x6c] sm:$0xf] %v949_v3  ;;  %v1085_v13 = vshrl.u32 %v1007_v63, 16 }
  0x92   : > { %951 = vst [vmem:[#allocation2 + $0x70] sm:$0xf] %v720_v2  ;;  %v952_v8 = vld [vmem:[#allocation2 + $0x74] sm:$0x1]  ;;  %v372_v11 = vld [vmem:[#allocation2 + $0x20] sm:$0x1] }
  0x93   : > { %v1074_v12 = vrot.slane %v1072_v1, 4  ;;  %v1091_v15 = vshll.u32 %v1037_v0, 16  ;;  %v537_v17 = vld [vmem:[%s17248_s12 + $0x8] sm:$0xf]  ;;  %v4205_v18 = vrot.slane %v4204_v4, 4  ;;  %v4215_v19 = vrot.slane %v4214_v5, 4 }
  0x94   : > { %v1077_v20 = vrot.slane %v1075_v6, 5  ;;  %v1083_v21 = vrot.slane %v1081_v7, 5  ;;  %v538_v23 = vld [vmem:[%s17248_s12 + $0xc] sm:$0xf]  ;;  %v1087_v24 = vrot.slane %v1085_v13, 4  ;;  %v953_v26 = vsel %vm17259_vm3, %v721_v27, %v952_v8  ;;  %s16947_s25 = scalar_lea.vmem %s20302_s27, 1024 }
  0x95   : > { %v1093_v25 = vrot.slane %v1091_v15, 5  ;;  %v373_v28 = vsel %vm17264_vm4, 0, %v372_v11  ;;  %v4210_v29 = vsel %vm17309_vm11, %v4205_v18, %v4209_v59  ;;  %v4220_v30 = vsel %vm17309_vm11, %v4215_v19, %v4219_v62  ;;  %954 = vst [vmem:[#allocation2 + $0x74] sm:$0x1] %v953_v26  ;;  %v340_v33 = vld [vmem:[#allocation2 + $0x78] sm:$0x1]  ;;  %p16948_p11 = scmp.ne.s32.totalorder %s20302_s27, %s16947_s25 }
  0x96   : > { %v1078_v31 = vor.u32 %v1077_v20, %v1074_v12  ;;  %374 = vst [vmem:[#allocation2 + $0x20] sm:$0x1] %v373_v28  ;;  %v587_v32 = vshrl.u32 %v537_v17, 16  ;;  %v13493_v34 = vcombine.low %v4210_v29, %v4220_v30  ;;  %v1088_v35 = vor.u32 %v1087_v24, %v1083_v21  ;;  %v899_v41 = vld [vmem:[#allocation2 + $0x18] sm:$0xf]  ;;  %v16449_v20 = vld [vmem:[#allocation7 + $0x10] sm:$0xff]  }
  0x97   : > { %v590_v36 = vshll.u32 %v537_v17, 16  ;;  %v595_v37 = vshrl.u32 %v538_v23, 16  ;;  %v598_v40 = vshll.u32 %v538_v23, 16  ;;  %v341_v43 = vsel %vm17259_vm3, 0, %v340_v33  ;;  %v396_v53 = vld [vmem:[#allocation2 + $0x80] sm:$0x1] }
  0x98   : > { %v1079_v38 = vrot.slane %v1078_v31, 4  ;;  %v589_v39 = vrot.slane %v587_v32, 7  ;;  %14957 = vmatprep.mubr.bf16.mxu1 %v13493_v34  ;;  %v1089_v44 = vrot.slane %v1088_v35, 4  ;;  %v4159_v45 = vld [vmem:[#allocation2 + $0x6c] sm:$0xf]  ;;  %v16447_v63 = vld [vmem:[#allocation7 + $0x8] sm:$0xff]  }
  0x99   : > { %v4160_v46 = vld [vmem:[#allocation2 + $0x70] sm:$0xf]  ;;  %v597_v47 = vrot.slane %v595_v37, 7  ;;  %342 = vst [vmem:[#allocation2 + $0x78] sm:$0x1] %v341_v43  ;;  %v4222_v50 = vshrl.u32 %v4159_v45, 16 }
  0x9a   : > { %v1084_v48 = vsel %vm17309_vm11, %v1079_v38, %v1083_v21  ;;  %v4225_v51 = vshll.u32 %v4159_v45, 16  ;;  %v4231_v52 = vshll.u32 %v4160_v46, 16  ;;  %v1094_v54 = vsel %vm17309_vm11, %v1089_v44, %v1093_v25  ;;  %v553_v57 = vld [vmem:[%s17248_s12 + $0x48] sm:$0xf]  ;;  %v554_v58 = vld [vmem:[%s17248_s12 + $0x4c] sm:$0xf] }
  0x9b   : > { %v4235_v55 = vshrl.u32 %v4160_v46, 16  ;;  %v592_v27 = vor.u32 %v590_v36, %v589_v39  ;;  %v593_v56 = vrot.slane %v589_v39, 4  ;;  %v13309_v59 = vcombine.low %v1084_v48, %v1094_v54  ;;  %v319_v11 = vld [vmem:[#allocation2 + $0x24] sm:$0x1]  ;;  %v375_v18 = vld [vmem:[#allocation2 + $0x2c] sm:$0x1] }
  0x9c   : > { %v4224_v60 = vrot.slane %v4222_v50, 4  ;;  %v4227_v61 = vrot.slane %v4225_v51, 5  ;;  %v4233_v62 = vrot.slane %v4231_v52, 5  ;;  %v4190_v0 = vld [vmem:[#allocation2 + $0x74] sm:$0x1]  ;;  %v600_v2 = vor.u32 %v598_v40, %v597_v47  ;;  %v16448_v33 = vld [vmem:[#allocation7 + $0x8] sm:$0xff]  }
  0x9d   : > { %v4237_v1 = vrot.slane %v4235_v55, 4  ;;  %v602_v3 = vrot.slane %v597_v47, 4  ;;  %v900_v4 = vsel %vm17295_vm10, %v592_v27, %v899_v41  ;;  %v903_v5 = vld [vmem:[#allocation2 + $0x20] sm:$0x1]  ;;  %14670 = vmatmul.mubr.bf16.vlgmr.msra.gmra.mrb[0].mxu0 %v13309_v59  ;;  %v4241_v7 = vshll.u32 %v4190_v0, 16  ;;  %v16451_v38 = vld [vmem:[#allocation7 + $0x18] sm:$0xff]  }
  0x9e   : > { %v4228_v6 = vor.u32 %v4227_v61, %v4224_v60  ;;  %901 = vst [vmem:[#allocation2 + $0x18] sm:$0xf] %v900_v4  ;;  %v397_v8 = vsel %vm17264_vm4, 0, %v396_v53  ;;  %14686 = vmatpush3.bf16.msra.mxu0 %v17305_v14  ;;  %v601_v13 = vsel %vm17286_vm9, %v593_v56, %v600_v2  ;;  %v723_v17 = vshrl.u32 %v553_v57, 16  ;;  %v539_v19 = vld [vmem:[%s17248_s12 + $0x10] sm:$0xf] }
  0x9f   : > { %v4238_v12 = vor.u32 %v4237_v1, %v4233_v62  ;;  %v904_v15 = vsel %vm17259_vm3, %v602_v3, %v903_v5  ;;  %398 = vst [vmem:[#allocation2 + $0x80] sm:$0x1] %v397_v8  ;;  %v4243_v23 = vrot.slane %v4241_v7, 5  ;;  %14687 = vmatprep.subr.bf16.mxu0 %v16447_v63  ;;  %902 = vst [vmem:[#allocation2 + $0x1c] sm:$0xf] %v601_v13  ;;  %v726_v24 = vshll.u32 %v553_v57, 16 }
  0xa0   : > { %v4229_v21 = vrot.slane %v4228_v6, 4  ;;  %905 = vst [vmem:[#allocation2 + $0x20] sm:$0x1] %v904_v15  ;;  %v731_v25 = vshrl.u32 %v554_v58, 16  ;;  %v540_v26 = vld [vmem:[%s17248_s12 + $0x14] sm:$0xf] }
  0xa1   : > { %v4239_v14 = vrot.slane %v4238_v12, 4  ;;  %v725_v28 = vrot.slane %v723_v17, 7  ;;  %v734_v29 = vshll.u32 %v554_v58, 16  ;;  %v320_v30 = vsel %vm17259_vm3, 0, %v319_v11  ;;  %v343_v31 = vld [vmem:[#allocation2 + $0x84] sm:$0x1] }
  0xa2   : > { %v4234_v32 = vsel %vm17309_vm11, %v4229_v21, %v4233_v62  ;;  %v733_v34 = vrot.slane %v731_v25, 7  ;;  %v955_v35 = vld [vmem:[#allocation2 + $0x78] sm:$0xf]  ;;  %321 = vst [vmem:[#allocation2 + $0x24] sm:$0x1] %v320_v30  ;;  %v376_v36 = vsel %vm17264_vm4, 0, %v375_v18  ;;  %14688 = vmatpush3.bf16.msra.mxu0 %v16447_v63 }
  0xa3   : > { %v604_v37 = vshrl.u32 %v539_v19, 16  ;;  %v4244_v39 = vsel %vm17309_vm11, %v4239_v14, %v4243_v23  ;;  %v728_v40 = vor.u32 %v726_v24, %v725_v28  ;;  %v729_v41 = vrot.slane %v725_v28, 4  ;;  %377 = vst [vmem:[#allocation2 + $0x2c] sm:$0x1] %v376_v36  ;;  %14689 = vmatprep.subr.bf16.mxu0 %v16449_v20  ;;  %v399_v48 = vld [vmem:[#allocation2 + $0x8c] sm:$0x1] }
  0xa4   : > { %v607_v43 = vshll.u32 %v539_v19, 16  ;;  %v13494_v44 = vcombine.low %v4234_v32, %v4244_v39  ;;  %v736_v45 = vor.u32 %v734_v29, %v733_v34  ;;  %v738_v46 = vrot.slane %v733_v34, 4  ;;  %v555_v59 = vld [vmem:[%s17248_s12 + $0x50] sm:$0xf]  ;;  %v16453_v61 = vld [vmem:[#allocation7 + $0x20] sm:$0xff]   ;;  %v16452_v30 = vld [vmem:[#allocation7 + $0x18] sm:$0xff]  }
  0xa5   : > { %v606_v47 = vrot.slane %v604_v37, 7  ;;  %v1008_v50 = vld [vmem:[#allocation2 + $0x18] sm:$0xf]  ;;  %v956_v51 = vsel %vm17295_vm10, %v728_v40, %v955_v35  ;;  %v612_v52 = vshrl.u32 %v540_v26, 16  ;;  %v615_v53 = vshll.u32 %v540_v26, 16  ;;  %v16450_v60 = vld [vmem:[#allocation7 + $0x10] sm:$0xff]  }
  0xa6   : > { %v344_v54 = vsel %vm17259_vm3, 0, %v343_v31  ;;  %14958 = vmatmul.mubr.bf16.vlgmr.msra.gmra.mrb[0].mxu1 %v13494_v44  ;;  %v1096_v55 = vshrl.u32 %v1008_v50, 16  ;;  %v1099_v27 = vshll.u32 %v1008_v50, 16  ;;  %v737_v56 = vsel %vm17286_vm9, %v729_v41, %v736_v45  ;;  %957 = vst [vmem:[#allocation2 + $0x78] sm:$0xf] %v956_v51  ;;  %14690 = vmatpush3.bf16.msra.mxu0 %v16449_v20  ;;  %v16455_v31 = vld [vmem:[#allocation7 + $0x28] sm:$0xff]  }
  0xa7   : > { %v959_v57 = vld [vmem:[#allocation2 + $0x80] sm:$0x1]  ;;  %v609_v58 = vor.u32 %v607_v43, %v606_v47  ;;  %345 = vst [vmem:[#allocation2 + $0x84] sm:$0x1] %v344_v54  ;;  %14974 = vmatpush3.bf16.msra.mxu1 %v17317_v22  ;;  %v1009_v62 = vld [vmem:[#allocation2 + $0x1c] sm:$0xf]  ;;  %14691 = vmatprep.subr.bf16.mxu0 %v16451_v38 }
  0xa8   : > { %v1038_v63 = vld [vmem:[#allocation2 + $0x20] sm:$0x1]  ;;  %958 = vst [vmem:[#allocation2 + $0x7c] sm:$0xf] %v737_v56  ;;  %v960_v0 = vsel %vm17259_vm3, %v738_v46, %v959_v57  ;;  %v610_v1 = vrot.slane %v606_v47, 4  ;;  %v614_v2 = vrot.slane %v612_v52, 7  ;;  %14975 = vmatprep.subr.bf16.mxu1 %v16448_v33 }
  0xa9   : > { %v17388_v3 = vld [vmem:[%s17248_s12 + $0x54] sm:$0xf]  ;;  %v1098_v4 = vrot.slane %v1096_v55, 4  ;;  %v1101_v5 = vrot.slane %v1099_v27, 5  ;;  %v1105_v6 = vshll.u32 %v1009_v62, 16  ;;  %v1109_v7 = vshrl.u32 %v1009_v62, 16 }
  0xaa   : > { %961 = vst [vmem:[#allocation2 + $0x80] sm:$0x1] %v960_v0  ;;  %v1115_v8 = vshll.u32 %v1038_v63, 16  ;;  %v617_v22 = vor.u32 %v615_v53, %v614_v2  ;;  %v619_v11 = vrot.slane %v614_v2, 4  ;;  %v906_v12 = vld [vmem:[#allocation2 + $0x24] sm:$0xf]  ;;  %14692 = vmatpush3.bf16.msra.mxu0 %v16451_v38 }
  0xab   : > { %v400_v13 = vsel %vm17264_vm4, 0, %v399_v48  ;;  %v1102_v15 = vor.u32 %v1101_v5, %v1098_v4  ;;  %v1107_v17 = vrot.slane %v1105_v6, 5  ;;  %v1111_v18 = vrot.slane %v1109_v7, 4  ;;  %v910_v20 = vld [vmem:[#allocation2 + $0x2c] sm:$0x1]  ;;  %14976 = vmatpush3.bf16.msra.mxu1 %v16448_v33  ;;  %14693 = vmatprep.subr.bf16.mxu0 %v16453_v61  ;;  %v16454_v53 = vld [vmem:[#allocation7 + $0x20] sm:$0xff]  }
  0xac   : > { %v907_v19 = vsel %vm17295_vm10, %v609_v58, %v906_v12  ;;  %401 = vst [vmem:[#allocation2 + $0x8c] sm:$0x1] %v400_v13  ;;  %v1117_v21 = vrot.slane %v1115_v8, 5  ;;  %v618_v23 = vsel %vm17286_vm9, %v610_v1, %v617_v22  ;;  %v911_v24 = vsel %vm17259_vm3, %v619_v11, %v910_v20  ;;  %14977 = vmatprep.subr.bf16.mxu1 %v16450_v60  ;;  %v322_v36 = vld [vmem:[#allocation2 + $0x30] sm:$0x1]  ;;  %v16457_v57 = vld [vmem:[#allocation7 + $0x30] sm:$0xff]  }
  0xad   : > { %908 = vst [vmem:[#allocation2 + $0x24] sm:$0xf] %v907_v19  ;;  %v740_v25 = vshrl.u32 %v555_v59, 16  ;;  %v1103_v26 = vrot.slane %v1102_v15, 4  ;;  %v1112_v14 = vor.u32 %v1111_v18, %v1107_v17  ;;  %909 = vst [vmem:[#allocation2 + $0x28] sm:$0xf] %v618_v23 }
  0xae   : > { %912 = vst [vmem:[#allocation2 + $0x2c] sm:$0x1] %v911_v24  ;;  %v743_v28 = vshll.u32 %v555_v59, 16  ;;  %v748_v29 = vshrl.u32 %v17388_v3, 16  ;;  %v4161_v32 = vld [vmem:[#allocation2 + $0x78] sm:$0xf]  ;;  %14694 = vmatpush3.bf16.msra.mxu0 %v16453_v61 }
  0xaf   : > { %v742_v33 = vrot.slane %v740_v25, 7  ;;  %v751_v34 = vshll.u32 %v17388_v3, 16  ;;  %v962_v35 = vld [vmem:[#allocation2 + $0x84] sm:$0xf]  ;;  %v1108_v37 = vsel %vm17309_vm11, %v1103_v26, %v1107_v17  ;;  %v1113_v38 = vrot.slane %v1112_v14, 4  ;;  %14978 = vmatpush3.bf16.msra.mxu1 %v16450_v60  ;;  %14695 = vmatprep.subr.bf16.mxu0 %v16455_v31  ;;  %v16456_v0 = vld [vmem:[#allocation7 + $0x28] sm:$0xff]  }
  0xb0   : > { %v4162_v39 = vld [vmem:[#allocation2 + $0x7c] sm:$0xf]  ;;  %v4246_v40 = vshrl.u32 %v4161_v32, 16  ;;  %v4249_v41 = vshll.u32 %v4161_v32, 16  ;;  %14979 = vmatprep.subr.bf16.mxu1 %v16452_v30  ;;  %v750_v56 = vrot.slane %v748_v29, 7  ;;  %v323_v61 = vsel %vm17259_vm3, 0, %v322_v36 }
  0xb1   : > { %v4191_v43 = vld [vmem:[#allocation2 + $0x80] sm:$0x1]  ;;  %v4255_v44 = vshll.u32 %v4162_v39, 16  ;;  %v4259_v45 = vshrl.u32 %v4162_v39, 16  ;;  %v745_v46 = vor.u32 %v743_v28, %v742_v33  ;;  %v746_v47 = vrot.slane %v742_v33, 4  ;;  %v16459_v20 = vld [vmem:[#allocation7 + $0x38] sm:$0xff]  }
  0xb2   : > { %v1118_v48 = vsel %vm17309_vm11, %v1113_v38, %v1117_v21  ;;  %v4248_v50 = vrot.slane %v4246_v40, 4  ;;  %v4251_v51 = vrot.slane %v4249_v41, 5  ;;  %v4265_v52 = vshll.u32 %v4191_v43, 16  ;;  %v378_v63 = vld [vmem:[#allocation2 + $0x38] sm:$0x1]  ;;  %14696 = vmatpush3.bf16.msra.mxu0 %v16455_v31  ;;  %v16458_v31 = vld [vmem:[#allocation7 + $0x30] sm:$0xff]  }
  0xb3   : > { %v13310_v54 = vcombine.low %v1108_v37, %v1118_v48  ;;  %v4257_v55 = vrot.slane %v4255_v44, 5  ;;  %v4261_v27 = vrot.slane %v4259_v45, 4  ;;  %v963_v60 = vsel %vm17295_vm10, %v745_v46, %v962_v35  ;;  %14980 = vmatpush3.bf16.msra.mxu1 %v16452_v30  ;;  %324 = vst [vmem:[#allocation2 + $0x30] sm:$0x1] %v323_v61  ;;  %v541_v12 = vld [vmem:[%s17248_s12 + $0x18] sm:$0xf]  ;;  %14697 = vmatprep.subr.bf16.mxu0 %v16457_v57 }
  0xb4   : > { %v4252_v58 = vor.u32 %v4251_v51, %v4248_v50  ;;  %v4267_v59 = vrot.slane %v4265_v52, 5  ;;  %v1010_v62 = vld [vmem:[#allocation2 + $0x24] sm:$0xf]  ;;  %v1011_v2 = vld [vmem:[#allocation2 + $0x28] sm:$0xf]  ;;  %v753_v6 = vor.u32 %v751_v34, %v750_v56  ;;  %14981 = vmatprep.subr.bf16.mxu1 %v16454_v53  ;;  %v755_v29 = vrot.slane %v750_v56, 4 }
  0xb5   : > { %14673 = vmatprep.mubr.bf16.mxu0 %v13310_v54  ;;  %v4262_v1 = vor.u32 %v4261_v27, %v4257_v55  ;;  %v1039_v3 = vld [vmem:[#allocation2 + $0x2c] sm:$0x1]  ;;  %v1120_v4 = vshrl.u32 %v1010_v62, 16  ;;  %v1123_v5 = vshll.u32 %v1010_v62, 16  ;;  %964 = vst [vmem:[#allocation2 + $0x84] sm:$0xf] %v963_v60 }
  0xb6   : > { %v4253_v7 = vrot.slane %v4252_v58, 4  ;;  %v1129_v8 = vshll.u32 %v1011_v2, 16  ;;  %v1133_v22 = vshrl.u32 %v1011_v2, 16  ;;  %v1139_v11 = vshll.u32 %v1039_v3, 16  ;;  %v542_v19 = vld [vmem:[%s17248_s12 + $0x1c] sm:$0xf]  ;;  %14698 = vmatpush3.bf16.msra.mxu0 %v16457_v57 }
  0xb7   : > { %v4263_v13 = vrot.slane %v4262_v1, 4  ;;  %v1122_v15 = vrot.slane %v1120_v4, 4  ;;  %v1125_v17 = vrot.slane %v1123_v5, 5  ;;  %v754_v18 = vsel %vm17286_vm9, %v746_v47, %v753_v6  ;;  %v966_v26 = vld [vmem:[#allocation2 + $0x8c] sm:$0x1]  ;;  %14982 = vmatpush3.bf16.msra.mxu1 %v16454_v53  ;;  %14699 = vmatprep.subr.bf16.mxu0 %v16459_v20  ;;  %v17420_v41 = vld [vmem:[#allocation7 + $0x80] sm:$0xff]  }
  0xb8   : > { %v4258_v21 = vsel %vm17309_vm11, %v4253_v7, %v4257_v55  ;;  %v1131_v23 = vrot.slane %v1129_v8, 5  ;;  %v1135_v24 = vrot.slane %v1133_v22, 4  ;;  %v1141_v25 = vrot.slane %v1139_v11, 5  ;;  %965 = vst [vmem:[#allocation2 + $0x88] sm:$0xf] %v754_v18  ;;  %14983 = vmatprep.subr.bf16.mxu1 %v16456_v0  ;;  %v16460_v53 = vld [vmem:[#allocation7 + $0x38] sm:$0xff]  }
  0xb9   : > { %v4268_v14 = vsel %vm17309_vm11, %v4263_v13, %v4267_v59  ;;  %v1126_v28 = vor.u32 %v1125_v17, %v1122_v15  ;;  %v379_v30 = vsel %vm17264_vm4, 0, %v378_v63  ;;  %v621_v34 = vshrl.u32 %v541_v12, 16  ;;  %v346_v36 = vld [vmem:[#allocation2 + $0x90] sm:$0x1]  ;;  %v402_v46 = vld [vmem:[#allocation2 + $0x98] sm:$0x1] }
  0xba   : > { %v13495_v32 = vcombine.low %v4258_v21, %v4268_v14  ;;  %v1136_v33 = vor.u32 %v1135_v24, %v1131_v23  ;;  %380 = vst [vmem:[#allocation2 + $0x38] sm:$0x1] %v379_v30  ;;  %v624_v35 = vshll.u32 %v541_v12, 16  ;;  %v967_v38 = vsel %vm17259_vm3, %v755_v29, %v966_v26  ;;  %v913_v52 = vld [vmem:[#allocation2 + $0x30] sm:$0xf]  ;;  %14700 = vmatpush3.bf16.msra.mxu0 %v16459_v20  ;;  %p20526_p0 = scmp.ne.s32.totalorder %s20409_s9, 0 }
  0xbb   : > { %v1127_v37 = vrot.slane %v1126_v28, 4  ;;  %v629_v39 = vshrl.u32 %v542_v19, 16  ;;  %v632_v40 = vshll.u32 %v542_v19, 16  ;;  %968 = vst [vmem:[#allocation2 + $0x8c] sm:$0x1] %v967_v38  ;;  %v623_v45 = vrot.slane %v621_v34, 7  ;;  %14984 = vmatpush3.bf16.msra.mxu1 %v16456_v0  ;;  %14717 = vmatprep.subr.bf16.mxu0 %v17420_v41 }
  0xbc   : > { %14961 = vmatprep.mubr.bf16.mxu1 %v13495_v32  ;;  %v1137_v43 = vrot.slane %v1136_v33, 4  ;;  %v4163_v44 = vld [vmem:[#allocation2 + $0x84] sm:$0xf]  ;;  %v347_v56 = vsel %vm17259_vm3, 0, %v346_v36  ;;  %v557_v57 = vld [vmem:[%s17248_s12 + $0x58] sm:$0xf]  ;;  %14985 = vmatprep.subr.bf16.mxu1 %v16458_v31  ;;  %p16949_p2 = pnand %p16948_p11, %p20526_p0 }
  0xbd   : > { %v1132_v47 = vsel %vm17309_vm11, %v1127_v37, %v1131_v23  ;;  %v4270_v48 = vshrl.u32 %v4163_v44, 16  ;;  %v4273_v50 = vshll.u32 %v4163_v44, 16  ;;  %v631_v51 = vrot.slane %v629_v39, 7  ;;  %v558_v58 = vld [vmem:[%s17248_s12 + $0x5c] sm:$0xf]  ;;  %v17447_v20 = vld [vmem:[#allocation7 + $0x80] sm:$0xff]  }
  0xbe   : > { %v1142_v54 = vsel %vm17309_vm11, %v1137_v43, %v1141_v25  ;;  %v626_v55 = vor.u32 %v624_v35, %v623_v45  ;;  %v627_v27 = vrot.slane %v623_v45, 4  ;;  %348 = vst [vmem:[#allocation2 + $0x90] sm:$0x1] %v347_v56  ;;  %v325_v0 = vld [vmem:[#allocation2 + $0x3c] sm:$0x1]  ;;  %v403_v22 = vsel %vm17264_vm4, 0, %v402_v46  ;;  %p16950_p3 = pneg %p16949_p2 }
  0xbf   : > { %v13311_v59 = vcombine.low %v1132_v47, %v1142_v54  ;;  %v17430_v62 = vld [vmem:[#allocation2 + $0x88] sm:$0xf]  ;;  %v4272_v60 = vrot.slane %v4270_v48, 4  ;;  %v4275_v61 = vrot.slane %v4273_v50, 5  ;;  %v634_v63 = vor.u32 %v632_v40, %v631_v51  ;;  %v381_v1 = vld [vmem:[#allocation2 + $0x44] sm:$0x1]  ;;  %14986 = vmatpush3.bf16.msra.mxu1 %v16458_v31 }
  0xc0   : > { %v4279_v2 = vshll.u32 %v17430_v62, 16  ;;  %v4283_v3 = vshrl.u32 %v17430_v62, 16  ;;  %v636_v4 = vrot.slane %v631_v51, 4  ;;  %v914_v5 = vsel %vm17295_vm10, %v626_v55, %v913_v52  ;;  %v543_v12 = vld [vmem:[%s17248_s12 + $0x20] sm:$0xf]  ;;  %14987 = vmatprep.subr.bf16.mxu1 %v16460_v53  ;;  %s17025_s18 = smov [#allocation10]  }
  0xc1   : > { %14674 = vmatmul.mubr.bf16.gmra.mrb[4].mxu0 %v13311_v59  ;;  %v4276_v6 = vor.u32 %v4275_v61, %v4272_v60  ;;  %v635_v7 = vsel %vm17286_vm9, %v627_v27, %v634_v63  ;;  %915 = vst [vmem:[#allocation2 + $0x30] sm:$0xf] %v914_v5  ;;  %v917_v8 = vld [vmem:[#allocation2 + $0x38] sm:$0x1]  ;;  %v757_v11 = vshrl.u32 %v557_v57, 16  ;;  %v760_v18 = vshll.u32 %v557_v57, 16 }
  0xc2   : > { %v4281_v13 = vrot.slane %v4279_v2, 5  ;;  %v4285_v15 = vrot.slane %v4283_v3, 4  ;;  %916 = vst [vmem:[#allocation2 + $0x34] sm:$0xf] %v635_v7  ;;  %v918_v17 = vsel %vm17259_vm3, %v636_v4, %v917_v8  ;;  %404 = vst [vmem:[#allocation2 + $0x98] sm:$0x1] %v403_v22 }
  0xc3   : > { %v17445_v19 = vld [vmem:[%s17248_s12 + $0x24] sm:$0xf]  ;;  %v4192_v21 = vld [vmem:[#allocation2 + $0x8c] sm:$0x1]  ;;  %v4277_v23 = vrot.slane %v4276_v6, 4  ;;  %v759_v24 = vrot.slane %v757_v11, 7  ;;  %14988 = vmatpush3.bf16.msra.mxu1 %v16460_v53 }
  0xc4   : > { %919 = vst [vmem:[#allocation2 + $0x38] sm:$0x1] %v918_v17  ;;  %v765_v25 = vshrl.u32 %v558_v58, 16  ;;  %v768_v26 = vshll.u32 %v558_v58, 16  ;;  %v349_v14 = vld [vmem:[#allocation2 + $0x9c] sm:$0x1]  ;;  %v4286_v28 = vor.u32 %v4285_v15, %v4281_v13  ;;  %15005 = vmatprep.subr.bf16.mxu1 %v17447_v20 }
  0xc5   : > { %v4289_v29 = vshll.u32 %v4192_v21, 16  ;;  %v326_v30 = vsel %vm17259_vm3, 0, %v325_v0  ;;  %v382_v31 = vsel %vm17264_vm4, 0, %v381_v1  ;;  %v4282_v32 = vsel %vm17309_vm11, %v4277_v23, %v4281_v13  ;;  %v969_v38 = vld [vmem:[#allocation2 + $0x90] sm:$0xf]  ;;  %s16951_s26 = sshll.u32 %s17025_s18, 4  ;;  %s16952_s26 = int_to_ptr.vmem [resolvable:$false] %s16951_s26 }
  0xc6   : > { %v762_v33 = vor.u32 %v760_v18, %v759_v24  ;;  %v763_v34 = vrot.slane %v759_v24, 4  ;;  %v767_v35 = vrot.slane %v765_v25, 7  ;;  %327 = vst [vmem:[#allocation2 + $0x3c] sm:$0x1] %v326_v30  ;;  %383 = vst [vmem:[#allocation2 + $0x44] sm:$0x1] %v382_v31  ;;  %p16954_p7 = scmp.lt.s32.totalorder %s20302_s27, %s16952_s26 }
  0xc7   : > { %v4287_v36 = vrot.slane %v4286_v28, 4  ;;  %v4291_v37 = vrot.slane %v4289_v29, 5  ;;  %v638_v39 = vshrl.u32 %v543_v12, 16  ;;  %v641_v40 = vshll.u32 %v543_v12, 16  ;;  %v405_v47 = vld [vmem:[#allocation2 + $0xa4] sm:$0x1] }
  0xc8   : > { %v770_v43 = vor.u32 %v768_v26, %v767_v35  ;;  %v772_v44 = vrot.slane %v767_v35, 4  ;;  %v970_v45 = vsel %vm17295_vm10, %v762_v33, %v969_v38  ;;  %v646_v46 = vshrl.u32 %v17445_v19, 16  ;;  %v17461_v50 = vld [vmem:[#allocation2 + $0x30] sm:$0xf]  ;;  %v560_v6 = vld [vmem:[%s17248_s12 + $0x64] sm:$0xf] }
  0xc9   : > { %v4292_v48 = vsel %vm17309_vm11, %v4287_v36, %v4291_v37  ;;  %971 = vst [vmem:[#allocation2 + $0x90] sm:$0xf] %v970_v45  ;;  %v640_v51 = vrot.slane %v638_v39, 7  ;;  %v649_v52 = vshll.u32 %v17445_v19, 16  ;;  %v350_v53 = vsel %vm17259_vm3, 0, %v349_v14  ;;  %s16953_s13 = scalar_lea.vmem %s16952_s26, 2048 }
  0xca   : > { %v13496_v54 = vcombine.low %v4282_v32, %v4292_v48  ;;  %v17466_v55 = vld [vmem:[#allocation2 + $0x34] sm:$0xf]  ;;  %v1144_v27 = vshrl.u32 %v17461_v50, 16  ;;  %v1147_v56 = vshll.u32 %v17461_v50, 16  ;;  %v771_v57 = vsel %vm17286_vm9, %v763_v34, %v770_v43  ;;  %v973_v58 = vld [vmem:[#allocation2 + $0x98] sm:$0x1]  ;;  %p16955_p9 = scmp.lt.s32.totalorder %s16953_s13, %s16947_s25 }
  0xcb   : > { %351 = vst [vmem:[#allocation2 + $0x9c] sm:$0x1] %v350_v53  ;;  %v17472_v59 = vld [vmem:[#allocation2 + $0x38] sm:$0x1]  ;;  %v1153_v60 = vshll.u32 %v17466_v55, 16  ;;  %v1157_v61 = vshrl.u32 %v17466_v55, 16  ;;  %v974_v63 = vsel %vm17259_vm3, %v772_v44, %v973_v58  ;;  %v643_v0 = vor.u32 %v641_v40, %v640_v51 }
  0xcc   : > { %972 = vst [vmem:[#allocation2 + $0x94] sm:$0xf] %v771_v57  ;;  %v559_v1 = vld [vmem:[%s17248_s12 + $0x60] sm:$0xf]  ;;  %14962 = vmatmul.mubr.bf16.gmra.mrb[4].mxu1 %v13496_v54  ;;  %v1146_v2 = vrot.slane %v1144_v27, 4  ;;  %v1149_v3 = vrot.slane %v1147_v56, 5  ;;  %p16956_p12 = por %p16955_p9, %p16954_p7 }
  0xcd   : > { %v1163_v4 = vshll.u32 %v17472_v59, 16  ;;  %975 = vst [vmem:[#allocation2 + $0x98] sm:$0x1] %v974_v63  ;;  %v644_v5 = vrot.slane %v640_v51, 4  ;;  %v1155_v7 = vrot.slane %v1153_v60, 5  ;;  %v1159_v8 = vrot.slane %v1157_v61, 4 }
  0xce   : > { %v648_v22 = vrot.slane %v646_v46, 7  ;;  %v920_v11 = vld [vmem:[#allocation2 + $0x3c] sm:$0xf]  ;;  %v406_v12 = vsel %vm17264_vm4, 0, %v405_v47  ;;  %v1150_v13 = vor.u32 %v1149_v3, %v1146_v2  ;;  %v774_v18 = vshrl.u32 %v559_v1, 16  ;;  %p16957_p1 = pnand %p16956_p12, %p16950_p3 }
  0xcf   : > { %v1165_v15 = vrot.slane %v1163_v4, 5  ;;  %v921_v17 = vsel %vm17295_vm10, %v643_v0, %v920_v11  ;;  %407 = vst [vmem:[#allocation2 + $0xa4] sm:$0x1] %v406_v12  ;;  %v1160_v19 = vor.u32 %v1159_v8, %v1155_v7  ;;  %v924_v24 = vld [vmem:[#allocation2 + $0x44] sm:$0x1]  ;;  %v777_v25 = vshll.u32 %v559_v1, 16 }
  0xd0   : > { %v651_v21 = vor.u32 %v649_v52, %v648_v22  ;;  %v653_v23 = vrot.slane %v648_v22, 4  ;;  %922 = vst [vmem:[#allocation2 + $0x3c] sm:$0xf] %v921_v17  ;;  %v1151_v26 = vrot.slane %v1150_v13, 4  ;;  %v17485_v14 = vld [vmem:[#allocation2 + $0x90] sm:$0xf] }
  0xd1   : > { %v776_v28 = vrot.slane %v774_v18, 7  ;;  %v782_v29 = vshrl.u32 %v560_v6, 16  ;;  %v785_v30 = vshll.u32 %v560_v6, 16  ;;  %v1161_v31 = vrot.slane %v1160_v19, 4  ;;  %v328_v35 = vld [vmem:[#allocation2 + $0x48] sm:$0x1] }
  0xd2   : > { %v4294_v32 = vshrl.u32 %v17485_v14, 16  ;;  %v4297_v33 = vshll.u32 %v17485_v14, 16  ;;  %v652_v34 = vsel %vm17286_vm9, %v644_v5, %v651_v21  ;;  %v1156_v36 = vsel %vm17309_vm11, %v1151_v26, %v1155_v7  ;;  %v976_v43 = vld [vmem:[#allocation2 + $0x9c] sm:$0xf]  ;;  %v384_v27 = vld [vmem:[#allocation2 + $0x50] sm:$0x1] }
  0xd3   : > { %v17493_v37 = vld [vmem:[#allocation2 + $0x94] sm:$0xf]  ;;  %923 = vst [vmem:[#allocation2 + $0x40] sm:$0xf] %v652_v34  ;;  %v925_v38 = vsel %vm17259_vm3, %v653_v23, %v924_v24  ;;  %v779_v39 = vor.u32 %v777_v25, %v776_v28  ;;  %v780_v40 = vrot.slane %v776_v28, 4  ;;  %v1166_v44 = vsel %vm17309_vm11, %v1161_v31, %v1165_v15 }
  0xd4   : > { %v4193_v45 = vld [vmem:[#allocation2 + $0x98] sm:$0x1]  ;;  %v4296_v46 = vrot.slane %v4294_v32, 4  ;;  %v4299_v47 = vrot.slane %v4297_v33, 5  ;;  %v4303_v48 = vshll.u32 %v17493_v37, 16  ;;  %v13312_v51 = vcombine.low %v1156_v36, %v1166_v44 }
  0xd5   : > { %926 = vst [vmem:[#allocation2 + $0x44] sm:$0x1] %v925_v38  ;;  %v4307_v52 = vshrl.u32 %v17493_v37, 16  ;;  %v4313_v53 = vshll.u32 %v4193_v45, 16  ;;  %v784_v54 = vrot.slane %v782_v29, 7  ;;  %v977_v58 = vsel %vm17295_vm10, %v779_v39, %v976_v43 }
  0xd6   : > { %v4300_v56 = vor.u32 %v4299_v47, %v4296_v46  ;;  %v4305_v57 = vrot.slane %v4303_v48, 5  ;;  %v980_v60 = vld [vmem:[#allocation2 + $0xa4] sm:$0x1]  ;;  %v329_v61 = vsel %vm17259_vm3, 0, %v328_v35  ;;  %v545_v63 = vld [vmem:[%s17248_s12 + $0x28] sm:$0xf]  ;;  %14677 = vmatprep.mubr.bf16.mxu0 %v13312_v51 }
  0xd7   : > { %v4309_v0 = vrot.slane %v4307_v52, 4  ;;  %v4315_v1 = vrot.slane %v4313_v53, 5  ;;  %v17506_v2 = vld [vmem:[#allocation2 + $0x3c] sm:$0xf]  ;;  %v787_v3 = vor.u32 %v785_v30, %v784_v54  ;;  %v789_v4 = vrot.slane %v784_v54, 4 }
  0xd8   : > { %978 = vst [vmem:[#allocation2 + $0x9c] sm:$0xf] %v977_v58  ;;  %330 = vst [vmem:[#allocation2 + $0x48] sm:$0x1] %v329_v61  ;;  %v4301_v5 = vrot.slane %v4300_v56, 4  ;;  %v1168_v6 = vshrl.u32 %v17506_v2, 16 }
  0xd9   : > { %v1171_v7 = vshll.u32 %v17506_v2, 16  ;;  %v385_v8 = vsel %vm17264_vm4, 0, %v384_v27  ;;  %v4310_v22 = vor.u32 %v4309_v0, %v4305_v57  ;;  %v788_v11 = vsel %vm17286_vm9, %v780_v40, %v787_v3  ;;  %v546_v13 = vld [vmem:[%s17248_s12 + $0x2c] sm:$0xf]  ;;  %v352_v39 = vld [vmem:[#allocation2 + $0xa8] sm:$0x1] }
  0xda   : > { %v981_v12 = vsel %vm17259_vm3, %v789_v4, %v980_v60  ;;  %386 = vst [vmem:[#allocation2 + $0x50] sm:$0x1] %v385_v8  ;;  %v655_v15 = vshrl.u32 %v545_v63, 16  ;;  %v4306_v17 = vsel %vm17309_vm11, %v4301_v5, %v4305_v57  ;;  %v17519_v18 = vld [vmem:[#allocation2 + $0x40] sm:$0xf]  ;;  %v1170_v19 = vrot.slane %v1168_v6, 4 }
  0xdb   : > { %v1173_v21 = vrot.slane %v1171_v7, 5  ;;  %979 = vst [vmem:[#allocation2 + $0xa0] sm:$0xf] %v788_v11  ;;  %982 = vst [vmem:[#allocation2 + $0xa4] sm:$0x1] %v981_v12  ;;  %v658_v23 = vshll.u32 %v545_v63, 16 }
  0xdc   : > { %v4311_v24 = vrot.slane %v4310_v22, 4  ;;  %v17521_v25 = vld [vmem:[#allocation2 + $0x44] sm:$0x1]  ;;  %v1177_v26 = vshll.u32 %v17519_v18, 16  ;;  %v1181_v28 = vshrl.u32 %v17519_v18, 16  ;;  %v657_v29 = vrot.slane %v655_v15, 7 }
  0xdd   : > { %v1174_v30 = vor.u32 %v1173_v21, %v1170_v19  ;;  %v1187_v31 = vshll.u32 %v17521_v25, 16  ;;  %v663_v32 = vshrl.u32 %v546_v13, 16  ;;  %v666_v33 = vshll.u32 %v546_v13, 16  ;;  %v408_v40 = vld [vmem:[#allocation2 + $0xb0] sm:$0x1] }
  0xde   : > { %v4316_v34 = vsel %vm17309_vm11, %v4311_v24, %v4315_v1  ;;  %v1179_v35 = vrot.slane %v1177_v26, 5  ;;  %v1183_v36 = vrot.slane %v1181_v28, 4  ;;  %v660_v38 = vor.u32 %v658_v23, %v657_v29  ;;  %v561_v58 = vld [vmem:[%s17248_s12 + $0x68] sm:$0xf]  ;;  %v562_v4 = vld [vmem:[%s17248_s12 + $0x6c] sm:$0xf] }
  0xdf   : > { %v13497_v43 = vcombine.low %v4306_v17, %v4316_v34  ;;  %v1175_v44 = vrot.slane %v1174_v30, 4  ;;  %v1189_v45 = vrot.slane %v1187_v31, 5  ;;  %v17528_v46 = vld [vmem:[#allocation2 + $0x9c] sm:$0xf]  ;;  %v661_v47 = vrot.slane %v657_v29, 4 }
  0xe0   : > { %v1184_v48 = vor.u32 %v1183_v36, %v1179_v35  ;;  %v4318_v51 = vshrl.u32 %v17528_v46, 16  ;;  %v4321_v52 = vshll.u32 %v17528_v46, 16  ;;  %v665_v53 = vrot.slane %v663_v32, 7  ;;  %v927_v54 = vld [vmem:[#allocation2 + $0x48] sm:$0xf] }
  0xe1   : > { %14965 = vmatprep.mubr.bf16.mxu1 %v13497_v43  ;;  %v928_v27 = vsel %vm17295_vm10, %v660_v38, %v927_v54  ;;  %v353_v56 = vsel %vm17259_vm3, 0, %v352_v39  ;;  %v409_v57 = vsel %vm17264_vm4, 0, %v408_v40  ;;  %v1180_v60 = vsel %vm17309_vm11, %v1175_v44, %v1179_v35  ;;  %v931_v22 = vld [vmem:[#allocation2 + $0x50] sm:$0x1]  ;;  %v331_v11 = vld [vmem:[#allocation2 + $0x54] sm:$0x1] }
  0xe2   : > { %v1185_v61 = vrot.slane %v1184_v48, 4  ;;  %v17541_v63 = vld [vmem:[#allocation2 + $0xa0] sm:$0xf]  ;;  %v17543_v0 = vld [vmem:[#allocation2 + $0xa4] sm:$0x1]  ;;  %v4320_v1 = vrot.slane %v4318_v51, 4  ;;  %v668_v3 = vor.u32 %v666_v33, %v665_v53 }
  0xe3   : > { %929 = vst [vmem:[#allocation2 + $0x48] sm:$0xf] %v928_v27  ;;  %354 = vst [vmem:[#allocation2 + $0xa8] sm:$0x1] %v353_v56  ;;  %v4323_v5 = vrot.slane %v4321_v52, 5  ;;  %v4327_v6 = vshll.u32 %v17541_v63, 16 }
  0xe4   : > { %410 = vst [vmem:[#allocation2 + $0xb0] sm:$0x1] %v409_v57  ;;  %v4331_v7 = vshrl.u32 %v17541_v63, 16  ;;  %v4337_v8 = vshll.u32 %v17543_v0, 16  ;;  %v387_v12 = vld [vmem:[#allocation2 + $0x5c] sm:$0x1]  ;;  %v1190_v13 = vsel %vm17309_vm11, %v1185_v61, %v1189_v45  ;;  %v669_v15 = vsel %vm17286_vm9, %v661_v47, %v668_v3 }
  0xe5   : > { %v670_v17 = vrot.slane %v665_v53, 4  ;;  %v791_v19 = vshrl.u32 %v561_v58, 16  ;;  %v13313_v21 = vcombine.low %v1180_v60, %v1190_v13  ;;  %v4324_v23 = vor.u32 %v4323_v5, %v4320_v1  ;;  %930 = vst [vmem:[#allocation2 + $0x4c] sm:$0xf] %v669_v15  ;;  %v547_v28 = vld [vmem:[%s17248_s12 + $0x30] sm:$0xf] }
  0xe6   : > { %v4329_v24 = vrot.slane %v4327_v6, 5  ;;  %v4333_v26 = vrot.slane %v4331_v7, 4  ;;  %v4339_v29 = vrot.slane %v4337_v8, 5  ;;  %v794_v32 = vshll.u32 %v561_v58, 16  ;;  %v548_v52 = vld [vmem:[%s17248_s12 + $0x34] sm:$0xf] }
  0xe7   : > { %v932_v30 = vsel %vm17259_vm3, %v670_v17, %v931_v22  ;;  %v793_v31 = vrot.slane %v791_v19, 7  ;;  %14678 = vmatmul.mubr.bf16.gmra.mrb[8].mxu0 %v13313_v21  ;;  %v4325_v33 = vrot.slane %v4324_v23, 4  ;;  %v799_v35 = vshrl.u32 %v562_v4, 16  ;;  %v355_v8 = vld [vmem:[#allocation2 + $0xb4] sm:$0x1] }
  0xe8   : > { %v4334_v34 = vor.u32 %v4333_v26, %v4329_v24  ;;  %933 = vst [vmem:[#allocation2 + $0x50] sm:$0x1] %v932_v30  ;;  %v802_v36 = vshll.u32 %v562_v4, 16  ;;  %v332_v40 = vsel %vm17259_vm3, 0, %v331_v11  ;;  %v388_v43 = vsel %vm17264_vm4, 0, %v387_v12 }
  0xe9   : > { %v796_v38 = vor.u32 %v794_v32, %v793_v31  ;;  %v797_v39 = vrot.slane %v793_v31, 4  ;;  %v4330_v44 = vsel %vm17309_vm11, %v4325_v33, %v4329_v24  ;;  %v801_v48 = vrot.slane %v799_v35, 7  ;;  %333 = vst [vmem:[#allocation2 + $0x54] sm:$0x1] %v332_v40  ;;  %389 = vst [vmem:[#allocation2 + $0x5c] sm:$0x1] %v388_v43 }
  0xea   : > { %v4335_v45 = vrot.slane %v4334_v34, 4  ;;  %v17562_v47 = vld [vmem:[#allocation2 + $0x48] sm:$0xf]  ;;  %v672_v57 = vshrl.u32 %v547_v28, 16  ;;  %v675_v1 = vshll.u32 %v547_v28, 16  ;;  %v680_v24 = vshrl.u32 %v548_v52, 16 }
  0xeb   : > { %v983_v51 = vld [vmem:[#allocation2 + $0xa8] sm:$0xf]  ;;  %v1192_v53 = vshrl.u32 %v17562_v47, 16  ;;  %v1195_v54 = vshll.u32 %v17562_v47, 16  ;;  %v987_v56 = vld [vmem:[#allocation2 + $0xb0] sm:$0x1]  ;;  %v804_v60 = vor.u32 %v802_v36, %v801_v48 }
  0xec   : > { %v984_v27 = vsel %vm17295_vm10, %v796_v38, %v983_v51  ;;  %v4340_v58 = vsel %vm17309_vm11, %v4335_v45, %v4339_v29  ;;  %v806_v61 = vrot.slane %v801_v48, 4  ;;  %v17571_v4 = vld [vmem:[#allocation2 + $0x4c] sm:$0xf]  ;;  %v674_v7 = vrot.slane %v672_v57, 7  ;;  %v411_v15 = vld [vmem:[#allocation2 + $0xbc] sm:$0x1] }
  0xed   : > { %985 = vst [vmem:[#allocation2 + $0xa8] sm:$0xf] %v984_v27  ;;  %v13498_v3 = vcombine.low %v4330_v44, %v4340_v58  ;;  %v1194_v5 = vrot.slane %v1192_v53, 4  ;;  %v1197_v6 = vrot.slane %v1195_v54, 5  ;;  %v1201_v22 = vshll.u32 %v17571_v4, 16 }
  0xee   : > { %v1205_v11 = vshrl.u32 %v17571_v4, 16  ;;  %v805_v12 = vsel %vm17286_vm9, %v797_v39, %v804_v60  ;;  %v988_v13 = vsel %vm17259_vm3, %v806_v61, %v987_v56  ;;  %v677_v21 = vor.u32 %v675_v1, %v674_v7  ;;  %v563_v26 = vld [vmem:[%s17248_s12 + $0x70] sm:$0xf]  ;;  %v564_v32 = vld [vmem:[%s17248_s12 + $0x74] sm:$0xf] }
  0xef   : > { %14966 = vmatmul.mubr.bf16.gmra.mrb[8].mxu1 %v13498_v3  ;;  %v17579_v17 = vld [vmem:[#allocation2 + $0x50] sm:$0x1]  ;;  %v1198_v19 = vor.u32 %v1197_v6, %v1194_v5  ;;  %986 = vst [vmem:[#allocation2 + $0xac] sm:$0xf] %v805_v12  ;;  %989 = vst [vmem:[#allocation2 + $0xb0] sm:$0x1] %v988_v13 }
  0xf0   : > { %v678_v23 = vrot.slane %v674_v7, 4  ;;  %v1203_v28 = vrot.slane %v1201_v22, 5  ;;  %v1207_v29 = vrot.slane %v1205_v11, 4  ;;  %v1211_v30 = vshll.u32 %v17579_v17, 16  ;;  %v934_v35 = vld [vmem:[#allocation2 + $0x54] sm:$0xf] }
  0xf1   : > { %v683_v31 = vshll.u32 %v548_v52, 16  ;;  %v1199_v33 = vrot.slane %v1198_v19, 4  ;;  %v682_v34 = vrot.slane %v680_v24, 7  ;;  %v938_v36 = vld [vmem:[#allocation2 + $0x5c] sm:$0x1]  ;;  %v935_v43 = vsel %vm17295_vm10, %v677_v21, %v934_v35 }
  0xf2   : > { %v1208_v39 = vor.u32 %v1207_v29, %v1203_v28  ;;  %v1213_v40 = vrot.slane %v1211_v30, 5  ;;  %v356_v44 = vsel %vm17259_vm3, 0, %v355_v8  ;;  %936 = vst [vmem:[#allocation2 + $0x54] sm:$0xf] %v935_v43  ;;  %v412_v53 = vsel %vm17264_vm4, 0, %v411_v15 }
  0xf3   : > { %v1204_v45 = vsel %vm17309_vm11, %v1199_v33, %v1203_v28  ;;  %v685_v51 = vor.u32 %v683_v31, %v682_v34  ;;  %v687_v52 = vrot.slane %v682_v34, 4  ;;  %357 = vst [vmem:[#allocation2 + $0xb4] sm:$0x1] %v356_v44  ;;  %413 = vst [vmem:[#allocation2 + $0xbc] sm:$0x1] %v412_v53  ;;  %v808_v57 = vshrl.u32 %v563_v26, 16 }
  0xf4   : > { %v17592_v48 = vld [vmem:[#allocation2 + $0xa8] sm:$0xf]  ;;  %v1209_v54 = vrot.slane %v1208_v39, 4  ;;  %v811_v61 = vshll.u32 %v563_v26, 16  ;;  %v816_v1 = vshrl.u32 %v564_v32, 16  ;;  %v819_v24 = vshll.u32 %v564_v32, 16 }
  0xf5   : > { %v4342_v27 = vshrl.u32 %v17592_v48, 16  ;;  %v4345_v56 = vshll.u32 %v17592_v48, 16  ;;  %v686_v58 = vsel %vm17286_vm9, %v678_v23, %v685_v51  ;;  %v939_v60 = vsel %vm17259_vm3, %v687_v52, %v938_v36  ;;  %v17732_v10 = vld [vmem:[#allocation2 + $0x20] sm:$0x1] }
  0xf6   : > { %v1214_v3 = vsel %vm17309_vm11, %v1209_v54, %v1213_v40  ;;  %v17604_v5 = vld [vmem:[#allocation2 + $0xac] sm:$0xf]  ;;  %v17606_v6 = vld [vmem:[#allocation2 + $0xb0] sm:$0x1]  ;;  %937 = vst [vmem:[#allocation2 + $0x58] sm:$0xf] %v686_v58 }
  0xf7   : > { %v4344_v7 = vrot.slane %v4342_v27, 4  ;;  %v4347_v8 = vrot.slane %v4345_v56, 5  ;;  %940 = vst [vmem:[#allocation2 + $0x5c] sm:$0x1] %v939_v60  ;;  %v13314_v11 = vcombine.low %v1204_v45, %v1214_v3  ;;  %v4351_v12 = vshll.u32 %v17604_v5, 16 }
  0xf8   : > { %v4355_v13 = vshrl.u32 %v17604_v5, 16  ;;  %v4361_v15 = vshll.u32 %v17606_v6, 16  ;;  %v810_v21 = vrot.slane %v808_v57, 7  ;;  %v818_v23 = vrot.slane %v816_v1, 7  ;;  %v17736_v16 = vld [vmem:[#allocation2 + $0x80] sm:$0x1] }
  0xf9   : > { %v4348_v19 = vor.u32 %v4347_v8, %v4344_v7  ;;  %14681 = vmatprep.mubr.bf16.mxu0 %v13314_v11  ;;  %v4353_v26 = vrot.slane %v4351_v12, 5  ;;  %v17613_v31 = vld [vmem:[#allocation2 + $0x54] sm:$0xf]  ;;  %vm1651_vm13 = vcmask 1046532   ;;  %20434 = vst [vmem:[#allocation24_spill] sm:$0xff] %v17736_v16  ;;  %v1693_v16 = vrot.slane %v17521_v25, 5 }
  0xfa   : > { %v4357_v28 = vrot.slane %v4355_v13, 4  ;;  %v4363_v29 = vrot.slane %v4361_v15, 5  ;;  %v813_v33 = vor.u32 %v811_v61, %v810_v21  ;;  %v814_v34 = vrot.slane %v810_v21, 4  ;;  %v990_v36 = vld [vmem:[#allocation2 + $0xb4] sm:$0xf]  ;;  %vm17763_vm14 = vmor %vm1650_vm12, %vm1651_vm13 }
  0xfb   : > { %v4349_v30 = vrot.slane %v4348_v19, 4  ;;  %v821_v35 = vor.u32 %v819_v24, %v818_v23  ;;  %v1216_v40 = vshrl.u32 %v17613_v31, 16  ;;  %v1219_v43 = vshll.u32 %v17613_v31, 16  ;;  %v994_v45 = vld [vmem:[#allocation2 + $0xbc] sm:$0x1] }
  0xfc   : > { %v4358_v39 = vor.u32 %v4357_v28, %v4353_v26  ;;  %v823_v44 = vrot.slane %v818_v23, 4  ;;  %v991_v51 = vsel %vm17295_vm10, %v813_v33, %v990_v36 }
  0xfd   : > { %v822_v32 = vsel %vm17286_vm9, %v814_v34, %v821_v35  ;;  %v4354_v52 = vsel %vm17309_vm11, %v4349_v30, %v4353_v26  ;;  %v17623_v54 = vld [vmem:[#allocation2 + $0x58] sm:$0xf]  ;;  %v1218_v56 = vrot.slane %v1216_v40, 4  ;;  %992 = vst [vmem:[#allocation2 + $0xb4] sm:$0xf] %v991_v51  ;;  %v1221_v58 = vrot.slane %v1219_v43, 5 }
  0xfe   : > { %v4359_v53 = vrot.slane %v4358_v39, 4  ;;  %v17625_v27 = vld [vmem:[#allocation2 + $0x5c] sm:$0x1]  ;;  %993 = vst [vmem:[#allocation2 + $0xb8] sm:$0xf] %v822_v32  ;;  %v995_v57 = vsel %vm17259_vm3, %v823_v44, %v994_v45  ;;  %v1225_v60 = vshll.u32 %v17623_v54, 16 }
  0xff   : > { %v1229_v61 = vshrl.u32 %v17623_v54, 16  ;;  %v1235_v1 = vshll.u32 %v17625_v27, 16  ;;  %996 = vst [vmem:[#allocation2 + $0xbc] sm:$0x1] %v995_v57  ;;  %v1222_v8 = vor.u32 %v1221_v58, %v1218_v56  ;;  %v17649_v39 = vld [vmem:[#allocation2 + $0x4] sm:$0xf] }
 0x100   : > { %v4364_v3 = vsel %vm17309_vm11, %v4359_v53, %v4363_v29  ;;  %v1227_v11 = vrot.slane %v1225_v60, 5  ;;  %v16816_v40 = vld [vmem:[#allocation2] sm:$0xf]  ;;  %v17652_v56 = vld [vmem:[#allocation2 + $0x8] sm:$0x1] }
 0x101   : > { %v13499_v7 = vcombine.low %v4354_v52, %v4364_v3  ;;  %v1231_v12 = vrot.slane %v1229_v61, 4  ;;  %v1223_v13 = vrot.slane %v1222_v8, 4  ;;  %v1237_v19 = vrot.slane %v1235_v1, 5  ;;  %v17655_v1 = vld [vmem:[#allocation2] sm:$0xe] }
 0x102   : > { %v13324_v43 = vcombine.low %v16816_v40, %v17649_v39  ;;  %v20367_v3 = vrot.slane %v17649_v39, 5  ;;  %v17660_v8 = vld [vmem:[#allocation2 + $0x68] sm:$0x1]  ;;  %v17692_v40 = vld [vmem:[#allocation2 + $0x70] sm:$0xf] }
 0x103   : > { %14969 = vmatprep.mubr.bf16.mxu1 %v13499_v7  ;;  %v1232_v15 = vor.u32 %v1231_v12, %v1227_v11  ;;  %v1228_v21 = vsel %vm17309_vm11, %v1223_v13, %v1227_v11  ;;  %v17658_v7 = vld [vmem:[#allocation2 + $0x60] sm:$0xe]  ;;  %v17663_v13 = vld [vmem:[#allocation2 + $0xc] sm:$0xe]  ;;  %v17709_v57 = vld [vmem:[#allocation2 + $0x78] sm:$0xe] }
 0x104   : > { %v17636_v24 = vld [vmem:[#allocation2 + $0xb4] sm:$0xf]  ;;  %20429 = vst [vmem:[#allocation19_spill] sm:$0xff] %v17709_v57  ;;  %v17748_v57 = vld [vmem:[#allocation2 + $0x30] sm:$0xe] }
 0x105   : > { %v1233_v23 = vrot.slane %v1232_v15, 4  ;;  %v17638_v26 = vld [vmem:[#allocation2 + $0xb8] sm:$0xf]  ;;  %v4366_v29 = vshrl.u32 %v17636_v24, 16  ;;  %v4369_v30 = vshll.u32 %v17636_v24, 16  ;;  %20438 = vst [vmem:[#allocation27_spill] sm:$0xff] %v17748_v57 }
 0x106   : > { %v17640_v28 = vld [vmem:[#allocation2 + $0xbc] sm:$0x1]  ;;  %v4375_v33 = vshll.u32 %v17638_v26, 16  ;;  %v4379_v34 = vshrl.u32 %v17638_v26, 16  ;;  %v16476_v57 = vld [vmem:[#allocation7 + $0x98] sm:$0xff]  }
 0x107   : > { %v1238_v35 = vsel %vm17309_vm11, %v1233_v23, %v1237_v19  ;;  %v4385_v36 = vshll.u32 %v17640_v28, 16  ;;  %v4368_v45 = vrot.slane %v4366_v29, 4  ;;  %v4371_v32 = vrot.slane %v4369_v30, 5  ;;  %v16819_v19 = vld [vmem:[#allocation2 + $0xc] sm:$0xf] }
 0x108   : > { %v13315_v44 = vcombine.low %v1228_v21, %v1238_v35  ;;  %v4377_v51 = vrot.slane %v4375_v33, 5  ;;  %v4381_v52 = vrot.slane %v4379_v34, 4  ;;  %v17667_v21 = vld [vmem:[#allocation2 + $0x10] sm:$0xf]  ;;  %v17670_v29 = vld [vmem:[#allocation2 + $0x64] sm:$0xf] }
 0x109   : > { %v4372_v53 = vor.u32 %v4371_v32, %v4368_v45  ;;  %v4387_v60 = vrot.slane %v4385_v36, 5  ;;  %v13325_v23 = vcombine.low %v16819_v19, %v17667_v21  ;;  %v20365_v30 = vrot.slane %v17670_v29, 5  ;;  %v17674_v34 = vld [vmem:[#allocation2 + $0x14] sm:$0x1]  ;;  %v16467_v32 = vld [vmem:[#allocation7 + $0x88] sm:$0xff]   ;;  %v16472_v35 = vld [vmem:[#allocation7 + $0x90] sm:$0xff]  }
 0x10a   : > { %14682 = vmatmul.mubr.bf16.gmra.mrb[12].mxu0 %v13315_v44  ;;  %v4382_v58 = vor.u32 %v4381_v52, %v4377_v51  ;;  %v20366_v33 = vrot.slane %v17667_v21, 5  ;;  %v17677_v36 = vld [vmem:[#allocation2 + $0x74] sm:$0x1]  ;;  %v16824_v44 = vld [vmem:[#allocation2 + $0x60] sm:$0xf]  ;;  %v17690_v19 = vrot.slane %v20367_v3, 4 }
 0x10b   : > { %14701 = vmatprep.mubr.bf16.mxu0 %v13324_v43  ;;  %v4373_v61 = vrot.slane %v4372_v53, 4  ;;  %v13509_v45 = vcombine.low %v16824_v44, %v17670_v29  ;;  %v16825_v53 = vld [vmem:[#allocation2 + $0x18] sm:$0xf]  ;;  %v17703_v11 = vrot.slane %v20365_v30, 4  ;;  %v17713_v44 = vld [vmem:[#allocation2 + $0x7c] sm:$0xf] }
 0x10c   : > { %v4383_v12 = vrot.slane %v4382_v58, 4  ;;  %v17685_v58 = vld [vmem:[#allocation2 + $0x1c] sm:$0xf]  ;;  %v17707_v22 = vrot.slane %v20366_v33, 4  ;;  %20430 = vst [vmem:[#allocation20_spill] sm:$0xff] %v17713_v44 }
 0x10d   : > { %v4378_v15 = vsel %vm17309_vm11, %v4373_v61, %v4377_v51  ;;  %v17683_v51 = vld [vmem:[#allocation2 + $0x6c] sm:$0xe]  ;;  %v13326_v61 = vcombine.low %v16825_v53, %v17685_v58  ;;  %v20375_v53 = vrot.slane %v17685_v58, 5  ;;  %v17724_v3 = vld [vmem:[#allocation2 + $0x28] sm:$0xf] }
 0x10e   : > { %v4388_v43 = vsel %vm17309_vm11, %v4383_v12, %v4387_v60  ;;  %v20370_v60 = vrot.slane %v17692_v40, 5  ;;  %v16829_v12 = vld [vmem:[#allocation2 + $0x6c] sm:$0xf]  ;;  %20433 = vst [vmem:[#allocation23_spill] sm:$0xff] %v17724_v3  ;;  %v1631_v33 = vld [vmem:[#allocation2 + $0x3c] sm:$0xe] }
 0x10f   : > { %v13500_v52 = vcombine.low %v4378_v15, %v4388_v43  ;;  %v17698_v43 = vld [vmem:[#allocation2 + $0x18] sm:$0xe]  ;;  %v17729_v38 = vrot.slane %v20375_v53, 4  ;;  %v20439_v49 = vrot.slane %v17724_v3, 5 }
 0x110   : > { %v17720_v30 = vrot.slane %v20370_v60, 4  ;;  %v13345_v60 = vrot.slane %v1631_v33, 9  ;;  %v16480_v33 = vld [vmem:[#allocation7 + $0xa0] sm:$0xff]  }
 0x111   : > { %14970 = vmatmul.mubr.bf16.gmra.mrb[12].mxu1 %v13500_v52  ;;  %v17716_v52 = vld [vmem:[#allocation2 + $0x24] sm:$0xe] }
 0x112   : > { %14702 = vmatmul.mubr.bf16.vlgmr.msra.gmra.mrb[0].mxu0 %v13325_v23  ;;  %14989 = vmatprep.mubr.bf16.mxu1 %v13509_v45  ;;  %20431 = vst [vmem:[#allocation21_spill] sm:$0xff] %v17716_v52  ;;  %20432 = vst [vmem:[#allocation22_spill] sm:$0xff] %v17720_v30  ;;  %v13510_v45 = vcombine.low %v16829_v12, %v17692_v40  ;;  %v16468_v23 = vld [vmem:[#allocation7 + $0x88] sm:$0xff]   ;;  %v17745_v30 = vld [vmem:[#allocation2 + $0x2c] sm:$0x1]  ;;  %v1700_v52 = vrot.slane %v17579_v17, 5 }
 0x113   : > { %14718 = vmatpush3.bf16.msra.mxu0 %v17420_v41  ;;  %14705 = vmatprep.mubr.bf16.mxu0 %v13326_v61  ;;  %v16830_v41 = vld [vmem:[#allocation2 + $0x24] sm:$0xf]  ;;  %v20435_v61 = vrot.slane %v17713_v44, 5  ;;  %20437 = vst [vmem:[#allocation26_spill] sm:$0xff] %v17745_v30  ;;  %v4780_v12 = vld [vmem:[#allocation2 + $0x9c] sm:$0xe] }
 0x114   : > { %14719 = vmatprep.subr.bf16.mxu0 %v16467_v32  ;;  %v13327_v15 = vcombine.low %v16830_v41, %v17724_v3  ;;  %v16834_v41 = vld [vmem:[#allocation2 + $0x78] sm:$0xf]  ;;  %v1690_v30 = vrot.slane %v17519_v18, 5 }
 0x115   : > { %v13511_v53 = vcombine.low %v16834_v41, %v17713_v44  ;;  %v17743_v9 = vrot.slane %v20435_v61, 4  ;;  %v17754_v41 = vrot.slane %v20439_v49, 4  ;;  %v16474_v61 = vld [vmem:[#allocation7 + $0x90] sm:$0xff]   ;;  %v16837_v44 = vld [vmem:[#allocation2 + $0x88] sm:$0xf] }
 0x116   : > { %v17770_v25 = vsel %vm17763_vm14, %v13345_v60, %v1690_v30  ;;  %v4781_v60 = vld [vmem:[#allocation2 + $0xa8] sm:$0xe] }
 0x117   : > { %14720 = vmatpush3.bf16.msra.mxu0 %v16467_v32  ;;  %20436 = vst [vmem:[#allocation25_spill] sm:$0xff] %v17743_v9  ;;  %v13328_v32 = vcombine.low %v17461_v50, %v17466_v55  ;;  %v16836_v50 = vld [vmem:[#allocation2 + $0x84] sm:$0xf]  ;;  %v13531_v17 = vrot.slane %v4781_v60, 9 }
 0x118   : > { %14721 = vmatprep.subr.bf16.mxu0 %v16472_v35  ;;  %v13512_v3 = vcombine.low %v16836_v50, %v16837_v44  ;;  %v4839_v44 = vrot.slane %v17543_v0, 5  ;;  %v13513_v50 = vcombine.low %v17485_v14, %v17493_v37  ;;  %v1633_v37 = vld [vmem:[#allocation2 + $0x54] sm:$0xe] }
 0x119   : > { %14990 = vmatmul.mubr.bf16.vlgmr.msra.gmra.mrb[0].mxu1 %v13510_v45  ;;  %v13530_v45 = vrot.slane %v4780_v12, 9  ;;  %v13330_v12 = vcombine.low %v17562_v47, %v17571_v4 }
 0x11a   : > { %14706 = vmatmul.mubr.bf16.gmra.mrb[4].mxu0 %v13327_v15  ;;  %15006 = vmatpush3.bf16.msra.mxu1 %v17447_v20  ;;  %v1692_v20 = vrot.slane %v1690_v30, 4  ;;  %v1632_v15 = vld [vmem:[#allocation2 + $0x48] sm:$0xe]  ;;  %v4782_v30 = vld [vmem:[#allocation2 + $0xb4] sm:$0xe] }
 0x11b   : > { %14993 = vmatprep.mubr.bf16.mxu1 %v13511_v53  ;;  %15007 = vmatprep.subr.bf16.mxu1 %v16468_v23  ;;  %v4836_v53 = vrot.slane %v17541_v63, 5 }
 0x11c   : > { %14722 = vmatpush3.bf16.msra.mxu0 %v16472_v35  ;;  %14709 = vmatprep.mubr.bf16.mxu0 %v13328_v32  ;;  %v1697_v35 = vrot.slane %v17571_v4, 5  ;;  %v17783_v9 = vsel %vm17763_vm14, %v1692_v20, %v1693_v16  ;;  %v13346_v4 = vrot.slane %v1632_v15, 9  ;;  %v4843_v20 = vrot.slane %v17604_v5, 5 }
 0x11d   : > { %14723 = vmatprep.subr.bf16.mxu0 %v16475_v42  ;;  %v17787_v0 = vsel %vm17763_vm14, %v13530_v45, %v4836_v53  ;;  %v4838_v14 = vrot.slane %v4836_v53, 4  ;;  %v13353_v47 = vcombine.low %v17770_v25, %v17783_v9  ;;  %v4846_v45 = vrot.slane %v17606_v6, 5 }
 0x11e   : > { %15008 = vmatpush3.bf16.msra.mxu1 %v16468_v23  ;;  %v1699_v32 = vrot.slane %v1697_v35, 4  ;;  %v13347_v53 = vrot.slane %v1633_v37, 9  ;;  %v16483_v23 = vld [vmem:[#allocation7 + $0xa8] sm:$0xff]   ;;  %v17801_v60 = vsel %vm17763_vm14, %v13346_v4, %v1697_v35  ;;  %v20442_v6 = vcombine.low %v17506_v2, %v17519_v18 }
 0x11f   : > { %15009 = vmatprep.subr.bf16.mxu1 %v16474_v61  ;;  %v17793_v16 = vsel %vm17763_vm14, %v4838_v14, %v4839_v44  ;;  %v1704_v44 = vrot.slane %v17623_v54, 5  ;;  %v17815_v37 = vsel %vm17763_vm14, %v13531_v17, %v4843_v20  ;;  %v4845_v35 = vrot.slane %v4843_v20, 4 }
 0x120   : > { %14724 = vmatpush3.bf16.msra.mxu0 %v16475_v42  ;;  %v13538_v15 = vcombine.low %v17787_v0, %v17793_v16  ;;  %v17805_v42 = vsel %vm17763_vm14, %v1699_v32, %v1700_v52  ;;  %v1707_v4 = vrot.slane %v17625_v27, 5  ;;  %v16482_v52 = vld [vmem:[#allocation7 + $0xa0] sm:$0xff]   ;;  %v13532_v2 = vrot.slane %v4782_v30, 9 }
 0x121   : > { %14725 = vmatprep.subr.bf16.mxu0 %v16480_v33  ;;  %14994 = vmatmul.mubr.bf16.gmra.mrb[4].mxu1 %v13512_v3  ;;  %v13354_v14 = vcombine.low %v17801_v60, %v17805_v42  ;;  %v17820_v3 = vsel %vm17763_vm14, %v13347_v53, %v1704_v44  ;;  %v1706_v32 = vrot.slane %v1704_v44, 4  ;;  %v4850_v18 = vrot.slane %v17638_v26, 5  ;;  %v16484_v44 = vld [vmem:[#allocation7 + $0xa8] sm:$0xff]   ;;  %v16507_v60 = vld [vmem:[#allocation7 + $0xf8] sm:$0xff]  }
 0x122   : > { %14710 = vmatmul.mubr.bf16.gmra.mrb[8].mxu0 %v20442_v6  ;;  %15010 = vmatpush3.bf16.msra.mxu1 %v16474_v61  ;;  %v20443_v6 = vrot.slane %v17466_v55, 5  ;;  %v17829_v27 = vsel %vm17763_vm14, %v4845_v35, %v4846_v45  ;;  %v4853_v61 = vrot.slane %v17640_v28, 5  ;;  %v13331_v45 = vcombine.low %v17613_v31, %v17623_v54  ;;  %v16491_v54 = vld [vmem:[#allocation7 + $0xb8] sm:$0xff]  }
 0x123   : > { %14997 = vmatprep.mubr.bf16.mxu1 %v13513_v50  ;;  %15011 = vmatprep.subr.bf16.mxu1 %v16476_v57  ;;  %v16488_v50 = vld [vmem:[#allocation7 + $0xb0] sm:$0xff]   ;;  %v13539_v30 = vcombine.low %v17815_v37, %v17829_v27  ;;  %v17836_v20 = vsel %vm17763_vm14, %v1706_v32, %v1707_v4  ;;  %v4852_v53 = vrot.slane %v4850_v18, 4  ;;  %v20444_v28 = vrot.slane %v17649_v39, 5  ;;  %v16509_v42 = vld [vmem:[#allocation2 + $0xc] sm:$0xff]  }
 0x124   : > { %14726 = vmatpush3.bf16.msra.mxu0 %v16480_v33  ;;  %v17825_v17 = vrot.slane %v20443_v6, 4  ;;  %14713 = vmatprep.mubr.bf16.mxu0 %v13330_v12  ;;  %v17840_v33 = vsel %vm17763_vm14, %v13532_v2, %v4850_v18  ;;  %v20445_v12 = vrot.slane %v17655_v1, 9  ;;  %v20446_v6 = vrot.slane %v17652_v56, 5 }
 0x125   : > { %14727 = vmatprep.subr.bf16.mxu0 %v16483_v23  ;;  %v13355_v32 = vcombine.low %v17820_v3, %v17836_v20  ;;  %v13515_v31 = vcombine.low %v17592_v48, %v17604_v5  ;;  %v17861_v39 = vsel %vm17763_vm14, %v4852_v53, %v4853_v61  ;;  %v16493_v48 = vld [vmem:[#allocation7 + $0xc0] sm:$0xff]   ;;  %v20448_v5 = vrot.slane %v17670_v29, 5  ;;  %v16508_v3 = vld [vmem:[#allocation7 + $0xf8] sm:$0xff]   ;;  %v18150_v20 = vld [vmem:[#allocation2 + $0xa0] sm:$0xf] }
 0x126   : > { %v1656_v35 = vsel %vm17763_vm14, %v20445_v12, %v20444_v28  ;;  %v1659_v4 = vsel %vm17763_vm14, %v17690_v19, %v20446_v6  ;;  %15012 = vmatpush3.bf16.msra.mxu1 %v16476_v57  ;;  %v13540_v56 = vcombine.low %v17840_v33, %v17861_v39  ;;  %v20447_v19 = vcombine.low %v17528_v46, %v17541_v63  ;;  %v16490_v57 = vld [vmem:[#allocation7 + $0xb0] sm:$0xff]   ;;  %v16494_v6 = vld [vmem:[#allocation7 + $0xc0] sm:$0xff]   ;;  %v16513_v39 = vld [vmem:[#allocation2 + $0x78] sm:$0xff]  }
 0x127   : > { %15013 = vmatprep.subr.bf16.mxu1 %v16482_v52  ;;  %v13348_v1 = vcombine.low %v1656_v35, %v1659_v4  ;;  %v20450_v18 = vrot.slane %v17660_v8, 5  ;;  %v20451_v63 = vrot.slane %v17667_v21, 5  ;;  %v13516_v8 = vcombine.low %v17636_v24, %v17638_v26  ;;  %v16495_v24 = vld [vmem:[#allocation7 + $0xc8] sm:$0xff]   ;;  %v4778_v26 = vld [vmem:[#allocation2 + $0x84] sm:$0xe] }
 0x128   : > { %14728 = vmatpush3.bf16.msra.mxu0 %v16483_v23  ;;  %v20449_v23 = vrot.slane %v17658_v7, 9  ;;  %v20453_v7 = vrot.slane %v17674_v34, 5  ;;  %v20455_v53 = vrot.slane %v17698_v43, 9  ;;  %v20456_v21 = vrot.slane %v17732_v10, 5  ;;  %v4779_v35 = vld [vmem:[#allocation2 + $0x90] sm:$0xe] }
 0x129   : > { %14729 = vmatprep.subr.bf16.mxu0 %v16488_v50  ;;  %14998 = vmatmul.mubr.bf16.gmra.mrb[8].mxu1 %v20447_v19  ;;  %v4805_v46 = vsel %vm17763_vm14, %v17703_v11, %v20450_v18  ;;  %v20454_v11 = vrot.slane %v17685_v58, 5  ;;  %v20457_v43 = vrot.slane %v17692_v40, 5  ;;  %v20458_v28 = vrot.slane %v17683_v51, 9  ;;  %v20461_v4 = vld [vmem:[#allocation20_spill] sm:$0xff]  ;;  %v20463_v40 = vld [vmem:[#allocation19_spill] sm:$0xff] }
 0x12a   : > { %14714 = vmatmul.mubr.bf16.gmra.mrb[12].mxu0 %v13331_v45  ;;  %15014 = vmatpush3.bf16.msra.mxu1 %v16482_v52  ;;  %v4802_v2 = vsel %vm17763_vm14, %v20449_v23, %v20448_v5  ;;  %v20452_v52 = vrot.slane %v17663_v13, 9  ;;  %v1666_v61 = vsel %vm17763_vm14, %v17707_v22, %v20453_v7  ;;  %v1673_v34 = vsel %vm17763_vm14, %v17729_v38, %v20456_v21  ;;  %v20460_v38 = vld [vmem:[#allocation22_spill] sm:$0xff]  ;;  %v20468_v18 = vld [vmem:[#allocation23_spill] sm:$0xff]  ;;  %v16839_v21 = vld [vmem:[#allocation2 + $0x8c] sm:$0x1] }
 0x12b   : > { %15001 = vmatprep.mubr.bf16.mxu1 %v13515_v31  ;;  %15015 = vmatprep.subr.bf16.mxu1 %v16484_v44  ;;  %v1670_v13 = vsel %vm17763_vm14, %v20455_v53, %v20454_v11  ;;  %v13533_v45 = vcombine.low %v4802_v2, %v4805_v46  ;;  %v4809_v10 = vsel %vm17763_vm14, %v20458_v28, %v20457_v43  ;;  %v20459_v12 = vrot.slane %v17677_v36, 5  ;;  %v20467_v36 = vld [vmem:[#allocation25_spill] sm:$0xff]  ;;  %v16838_v23 = vld [vmem:[#allocation2 + $0x94] sm:$0xf]  ;;  %v16497_v11 = vld [vmem:[#allocation7 + $0xd0] sm:$0xff]  }
 0x12c   : > { %14730 = vmatpush3.bf16.msra.mxu0 %v16488_v50  ;;  %14733 = vmatprep.mubr.bf16.mxu0 %v13348_v1  ;;  %v1663_v29 = vsel %vm17763_vm14, %v20452_v52, %v20451_v63  ;;  %v16492_v50 = vld [vmem:[#allocation7 + $0xb8] sm:$0xff]   ;;  %v13350_v58 = vcombine.low %v1670_v13, %v1673_v34  ;;  %v20462_v31 = vrot.slane %v20461_v4, 5  ;;  %v20465_v1 = vld [vmem:[#allocation24_spill] sm:$0xff]  ;;  %v4829_v2 = vrot.slane %v16838_v23, 5  ;;  %v20472_v7 = vld [vmem:[#allocation26_spill] sm:$0xff]  ;;  %20485 = vst [vmem:[#allocation20_spill] sm:$0xff] %v18150_v20 }
 0x12d   : > { %14731 = vmatprep.subr.bf16.mxu0 %v16491_v54  ;;  %v13349_v22 = vcombine.low %v1663_v29, %v1666_v61  ;;  %v20466_v19 = vrot.slane %v20465_v1, 5  ;;  %v20469_v46 = vrot.slane %v20468_v18, 5  ;;  %v20470_v63 = vld [vmem:[#allocation21_spill] sm:$0xff]  ;;  %v20473_v61 = vrot.slane %v20472_v7, 5  ;;  %v17965_v7 = vld [vmem:[#allocation2 + $0x10] sm:$0xf] }
 0x12e   : > { %15016 = vmatpush3.bf16.msra.mxu1 %v16484_v44  ;;  %v4812_v44 = vsel %vm17763_vm14, %v20460_v38, %v20459_v12  ;;  %v20471_v52 = vrot.slane %v20470_v63, 9  ;;  %v13528_v53 = vrot.slane %v4778_v26, 9  ;;  %v20474_v13 = vrot.slane %v17430_v62, 5  ;;  %v16496_v26 = vld [vmem:[#allocation7 + $0xc8] sm:$0xff]  }
 0x12f   : > { %15017 = vmatprep.subr.bf16.mxu1 %v16490_v57  ;;  %v4819_v5 = vsel %vm17763_vm14, %v20467_v36, %v20466_v19  ;;  %v4825_v34 = vrot.slane %v16839_v21, 5  ;;  %v20478_v28 = vrot.slane %v17472_v59, 5  ;;  %v13529_v12 = vrot.slane %v4779_v35, 9  ;;  %v16498_v35 = vld [vmem:[#allocation7 + $0xd0] sm:$0xff]   ;;  %v565_v19 = vld [vmem:[%s17248_s12 + $0x78] sm:$0xf] }
 0x130   : > { %14732 = vmatpush3.bf16.msra.mxu0 %v16491_v54  ;;  %v20464_v54 = vrot.slane %v20463_v40, 9  ;;  %v1677_v29 = vsel %vm17763_vm14, %v20471_v52, %v20469_v46  ;;  %v358_v40 = vld [vmem:[#allocation2 + $0xc0] sm:$0x1]  ;;  %v20479_v59 = vmov %v20474_v13  ;;  %v566_v36 = vld [vmem:[%s17248_s12 + $0x7c] sm:$0xf]  ;;  %v16501_v46 = vld [vmem:[#allocation7 + $0xe0] sm:$0xff]  }
 0x131   : > { %14749 = vmatprep.subr.bf16.mxu0 %v16493_v48  ;;  %15002 = vmatmul.mubr.bf16.gmra.mrb[12].mxu1 %v13516_v8  ;;  %v1680_v8 = vsel %vm17763_vm14, %v17754_v41, %v20473_v61  ;;  %v1687_v41 = vsel %vm17763_vm14, %v17825_v17, %v20478_v28  ;;  %v4823_v17 = vsel %vm17763_vm14, %v13528_v53, %v20479_v59  ;;  %v359_v1 = vsel %vm17259_vm3, 0, %v358_v40  ;;  %v16500_v61 = vld [vmem:[#allocation7 + $0xd8] sm:$0xff]   ;;  %v17968_v21 = vld [vmem:[#allocation2 + $0x14] sm:$0x1] }
 0x132   : > { %15018 = vmatpush3.bf16.msra.mxu1 %v16490_v57  ;;  %15021 = vmatprep.mubr.bf16.mxu1 %v13533_v45  ;;  %v4816_v51 = vsel %vm17763_vm14, %v20464_v54, %v20462_v31  ;;  %v13534_v57 = vcombine.low %v4809_v10, %v4812_v44  ;;  %v20475_v45 = vrot.slane %v17466_v55, 5  ;;  %v13351_v38 = vcombine.low %v1677_v29, %v1680_v8  ;;  %v16840_v44 = vld [vmem:[#allocation2 + $0x98] sm:$0x1]  ;;  %v16499_v54 = vld [vmem:[#allocation7 + $0xd8] sm:$0xff]  }
 0x133   : > { %15019 = vmatprep.subr.bf16.mxu1 %v16492_v50  ;;  %14734 = vmatmul.mubr.bf16.vlgmr.msra.gmra.mrb[0].mxu0 %v13349_v22  ;;  %v20476_v22 = vld [vmem:[#allocation27_spill] sm:$0xff]  ;;  %v13535_v10 = vcombine.low %v4816_v51, %v4819_v5  ;;  %v4831_v55 = vrot.slane %v4829_v2, 4  ;;  %v4832_v4 = vrot.slane %v16840_v44, 5  ;;  %360 = vst [vmem:[#allocation2 + $0xc0] sm:$0x1] %v359_v1  ;;  %v828_v5 = vshll.u32 %v565_v19, 16 }
 0x134   : > { %14750 = vmatpush3.bf16.msra.mxu0 %v16493_v48  ;;  %14737 = vmatprep.mubr.bf16.mxu0 %v13350_v58  ;;  %v4824_v48 = vrot.slane %v20474_v13, 4  ;;  %v20477_v58 = vrot.slane %v20476_v22, 9  ;;  %v833_v23 = vshrl.u32 %v566_v36, 16  ;;  %v836_v62 = vshll.u32 %v566_v36, 16  ;;  %v2161_v29 = vld [vmem:[#allocation2 + $0xc] sm:$0xf] }
 0x135   : > { %14751 = vmatprep.subr.bf16.mxu0 %v16495_v24  ;;  %v4833_v18 = vsel %vm17763_vm14, %v4831_v55, %v4832_v4  ;;  %v2195_v22 = vshll.u32 %v17965_v7, 16  ;;  %v2164_v1 = vld [vmem:[#allocation2 + $0x18] sm:$0xf] }
 0x136   : > { %v1684_v43 = vsel %vm17763_vm14, %v20477_v58, %v20475_v45  ;;  %15020 = vmatpush3.bf16.msra.mxu1 %v16492_v50  ;;  %v4826_v50 = vsel %vm17763_vm14, %v4824_v48, %v4825_v34  ;;  %v17963_v52 = vrot.slane %v833_v23, 7  ;;  %v5306_v48 = vld [vmem:[#allocation2 + $0x6c] sm:$0xf]  ;;  %v2186_v34 = vshrl.u32 %v2161_v29, 16  ;;  %v17987_v23 = vld [vmem:[#allocation2 + $0x1c] sm:$0xf] }
 0x137   : > { %15037 = vmatprep.subr.bf16.mxu1 %v16494_v6  ;;  %v13352_v31 = vcombine.low %v1684_v43, %v1687_v41  ;;  %v2189_v45 = vshll.u32 %v2161_v29, 16  ;;  %v2199_v58 = vshrl.u32 %v17965_v7, 16  ;;  %v17974_v41 = vld [vmem:[#allocation2 + $0x70] sm:$0xf]  ;;  %v17976_v4 = vrot.slane %v2195_v22, 5  ;;  %v16536_v43 = vld [vmem:[#allocation7 + $0x130] sm:$0xff]  }
 0x138   : > { %14752 = vmatpush3.bf16.msra.mxu0 %v16495_v24  ;;  %v825_v24 = vshrl.u32 %v565_v19, 16  ;;  %v2188_v55 = vrot.slane %v2186_v34, 4  ;;  %v16502_v19 = vld [vmem:[#allocation7 + $0xe0] sm:$0xff]   ;;  %v2210_v25 = vshrl.u32 %v2164_v1, 16  ;;  %v17994_v29 = vld [vmem:[#allocation2 + $0x20] sm:$0x1] }
 0x139   : > { %15022 = vmatmul.mubr.bf16.vlgmr.msra.gmra.mrb[0].mxu1 %v13534_v57  ;;  %14753 = vmatprep.subr.bf16.mxu0 %v16497_v11  ;;  %v4830_v57 = vsel %vm17763_vm14, %v13529_v12, %v4829_v2  ;;  %v838_v2 = vor.u32 %v836_v62, %v17963_v52  ;;  %v5334_v12 = vshll.u32 %v5306_v48, 16  ;;  %v2191_v44 = vrot.slane %v2189_v45, 5  ;;  %v16505_v62 = vld [vmem:[#allocation7 + $0xf0] sm:$0xff]   ;;  %v18000_v22 = vld [vmem:[#allocation2 + $0x7c] sm:$0xf] }
 0x13a   : > { %15038 = vmatpush3.bf16.msra.mxu1 %v16494_v6  ;;  %15025 = vmatprep.mubr.bf16.mxu1 %v13535_v10  ;;  %v827_v63 = vrot.slane %v825_v24, 7  ;;  %v13536_v6 = vcombine.low %v4823_v17, %v4826_v50  ;;  %v13537_v8 = vcombine.low %v4830_v57, %v4833_v18  ;;  %v5331_v10 = vshrl.u32 %v5306_v48, 16  ;;  %v16504_v18 = vld [vmem:[#allocation7 + $0xe8] sm:$0xff]  }
 0x13b   : > { %15039 = vmatprep.subr.bf16.mxu1 %v16496_v26  ;;  %14738 = vmatmul.mubr.bf16.gmra.mrb[4].mxu0 %v13351_v38  ;;  %v997_v38 = vld [vmem:[#allocation2 + $0xc0] sm:$0xf]  ;;  %v2205_v17 = vshll.u32 %v17968_v21, 16  ;;  %v2192_v36 = vor.u32 %v2191_v44, %v2188_v55  ;;  %v2219_v45 = vshll.u32 %v17987_v23, 16  ;;  %v2229_v0 = vshll.u32 %v17994_v29, 16 }
 0x13c   : > { %14754 = vmatpush3.bf16.msra.mxu0 %v16497_v11  ;;  %14741 = vmatprep.mubr.bf16.mxu0 %v13352_v31  ;;  %v830_v53 = vor.u32 %v828_v5, %v827_v63  ;;  %v831_v13 = vrot.slane %v827_v63, 4  ;;  %v16503_v11 = vld [vmem:[#allocation7 + $0xe8] sm:$0xff]   ;;  %v2201_v31 = vrot.slane %v2199_v58, 4  ;;  %v5333_v50 = vrot.slane %v5331_v10, 4  ;;  %v18010_v10 = vld [vmem:[#allocation2 + $0x80] sm:$0x1] }
 0x13d   : > { %14755 = vmatprep.subr.bf16.mxu0 %v16499_v54  ;;  %v5344_v5 = vshrl.u32 %v17974_v41, 16 }
 0x13e   : > { %15040 = vmatpush3.bf16.msra.mxu1 %v16496_v26  ;;  %v839_v28 = vsel %vm17286_vm9, %v831_v13, %v838_v2  ;;  %v5308_v26 = vld [vmem:[#allocation2 + $0x74] sm:$0x1]  ;;  %v998_v59 = vsel %vm17295_vm10, %v830_v53, %v997_v38  ;;  %v2202_v24 = vor.u32 %v2201_v31, %v17976_v4  ;;  %v2207_v53 = vrot.slane %v2205_v17, 5  ;;  %v5309_v2 = vld [vmem:[#allocation2 + $0x78] sm:$0xf] }
 0x13f   : > { %15041 = vmatprep.subr.bf16.mxu1 %v16498_v35  ;;  %1000 = vst [vmem:[#allocation2 + $0xc4] sm:$0xf] %v839_v28  ;;  %999 = vst [vmem:[#allocation2 + $0xc0] sm:$0xf] %v998_v59  ;;  %v5350_v9 = vshll.u32 %v5308_v26, 16  ;;  %v2223_v28 = vshrl.u32 %v17987_v23, 16 }
 0x140   : > { %14756 = vmatpush3.bf16.msra.mxu0 %v16499_v54  ;;  %v5336_v54 = vrot.slane %v5334_v12, 5  ;;  %v18008_v26 = vrot.slane %v2219_v45, 5  ;;  %v5355_v12 = vshrl.u32 %v5309_v2, 16  ;;  %v5358_v16 = vshll.u32 %v5309_v2, 16  ;;  %v5312_v2 = vld [vmem:[#allocation2 + $0x84] sm:$0xf] }
 0x141   : > { %15026 = vmatmul.mubr.bf16.gmra.mrb[4].mxu1 %v13536_v6  ;;  %14757 = vmatprep.subr.bf16.mxu0 %v16501_v46  ;;  %v5346_v6 = vrot.slane %v5344_v5, 4  ;;  %v18002_v58 = vrot.slane %v5350_v9, 5  ;;  %v2225_v44 = vrot.slane %v2223_v28, 4  ;;  %v18063_v45 = vld [vmem:[#allocation2 + $0x88] sm:$0xf] }
 0x142   : > { %15042 = vmatpush3.bf16.msra.mxu1 %v16498_v35  ;;  %15029 = vmatprep.mubr.bf16.mxu1 %v13537_v8  ;;  %v5340_v35 = vshll.u32 %v17974_v41, 16  ;;  %v5337_v57 = vor.u32 %v5336_v54, %v5333_v50  ;;  %v2193_v8 = vrot.slane %v2192_v36, 4  ;;  %v5357_v27 = vrot.slane %v5355_v12, 4 }
 0x143   : > { %15043 = vmatprep.subr.bf16.mxu1 %v16500_v61  ;;  %14742 = vmatmul.mubr.bf16.gmra.mrb[8].mxu0 %v13353_v47  ;;  %v2213_v47 = vshll.u32 %v2164_v1, 16  ;;  %v2226_v17 = vor.u32 %v2225_v44, %v18008_v26  ;;  %v5360_v50 = vrot.slane %v5358_v16, 5  ;;  %v5368_v54 = vshrl.u32 %v18000_v22, 16  ;;  %v16520_v16 = vld [vmem:[#allocation7 + $0x110] sm:$0xff]  }
 0x144   : > { %14758 = vmatpush3.bf16.msra.mxu0 %v16501_v46  ;;  %14745 = vmatprep.mubr.bf16.mxu0 %v13354_v14  ;;  %v17992_v63 = vrot.slane %v5340_v35, 5  ;;  %v2212_v46 = vrot.slane %v2210_v25, 4  ;;  %v2203_v14 = vrot.slane %v2202_v24, 4  ;;  %v17996_v48 = vrot.slane %v5337_v57, 4  ;;  %v18043_v57 = vld [vmem:[#allocation2 + $0x28] sm:$0xf] }
 0x145   : > { %14759 = vmatprep.subr.bf16.mxu0 %v16503_v11  ;;  %v2215_v13 = vrot.slane %v2213_v47, 5  ;;  %v2198_v55 = vsel %vm17309_vm11, %v2193_v8, %v17976_v4  ;;  %v16510_v4 = vld [vmem:[#allocation2 + $0x6c] sm:$0xff]   ;;  %v5374_v1 = vshll.u32 %v18010_v10, 16  ;;  %v18041_v35 = vrot.slane %v2229_v0, 5  ;;  %v16517_v8 = vld [vmem:[#allocation2 + $0x24] sm:$0xff]  }
 0x146   : > { %15044 = vmatpush3.bf16.msra.mxu1 %v16500_v61  ;;  %v5347_v34 = vor.u32 %v5346_v6, %v17992_v63  ;;  %v2208_v31 = vsel %vm17309_vm11, %v2203_v14, %v2207_v53  ;;  %v5343_v24 = vsel %vm17309_vm11, %v17996_v48, %v17992_v63  ;;  %v5361_v5 = vor.u32 %v5360_v50, %v5357_v27  ;;  %v18045_v47 = vld [vmem:[#allocation2 + $0x2c] sm:$0x1]  ;;  %v2170_v0 = vld [vmem:[#allocation2 + $0x30] sm:$0xf] }
 0x147   : > { %15045 = vmatprep.subr.bf16.mxu1 %v16502_v19  ;;  %v2216_v61 = vor.u32 %v2215_v13, %v2212_v46  ;;  %v18035_v36 = vcombine.low %v2198_v55, %v2208_v31  ;;  %v2227_v9 = vrot.slane %v2226_v17, 4  ;;  %v5370_v25 = vrot.slane %v5368_v54, 4  ;;  %v18073_v55 = vld [vmem:[#allocation2 + $0x8c] sm:$0x1] }
 0x148   : > { %14760 = vmatpush3.bf16.msra.mxu0 %v16503_v11  ;;  %v16506_v11 = vld [vmem:[#allocation7 + $0xf0] sm:$0xff]   ;;  %v18024_v37 = vrot.slane %v5347_v34, 4  ;;  %v2243_v46 = vshll.u32 %v18043_v57, 16  ;;  %v2247_v13 = vshrl.u32 %v18043_v57, 16  ;;  %v18061_v14 = vrot.slane %v5374_v1, 5 }
 0x149   : > { %15030 = vmatmul.mubr.bf16.gmra.mrb[8].mxu1 %v13538_v15  ;;  %14761 = vmatprep.subr.bf16.mxu0 %v16505_v62  ;;  %v16512_v15 = vld [vmem:[#allocation7 + $0x100] sm:$0xff]   ;;  %v18027_v59 = vrot.slane %v2216_v61, 4  ;;  %v18065_v61 = vrot.slane %v5361_v5, 4  ;;  %v2253_v33 = vshll.u32 %v18045_v47, 16  ;;  %v5382_v44 = vshll.u32 %v5312_v2, 16  ;;  %v16518_v1 = vld [vmem:[#allocation2 + $0x84] sm:$0xff]  }
 0x14a   : > { %15046 = vmatpush3.bf16.msra.mxu1 %v16502_v19  ;;  %15033 = vmatprep.mubr.bf16.mxu1 %v13539_v30  ;;  %v5364_v30 = vshll.u32 %v18000_v22, 16  ;;  %v16511_v19 = vld [vmem:[#allocation2 + $0x18] sm:$0xff]   ;;  %v5353_v63 = vsel %vm17309_vm11, %v18024_v37, %v18002_v58  ;;  %v16514_v58 = vld [vmem:[#allocation7 + $0x100] sm:$0xff]   ;;  %v18067_v28 = vrot.slane %v2243_v46, 5  ;;  %v5388_v27 = vshll.u32 %v18063_v45, 16 }
 0x14b   : > { %15047 = vmatprep.subr.bf16.mxu1 %v16504_v18  ;;  %14746 = vmatmul.mubr.bf16.gmra.mrb[12].mxu0 %v13355_v32  ;;  %v2222_v53 = vsel %vm17309_vm11, %v18027_v59, %v18008_v26  ;;  %v2249_v26 = vrot.slane %v2247_v13, 4  ;;  %v2255_v17 = vrot.slane %v2253_v33, 5  ;;  %v5384_v54 = vrot.slane %v5382_v44, 5 }
 0x14c   : > { %14762 = vmatpush3.bf16.msra.mxu0 %v16505_v62  ;;  %14765 = vmatprep.mubr.bf16.mxu0 %v16509_v42  ;;  %v18031_v32 = vrot.slane %v5364_v30, 5  ;;  %v2167_v62 = vld [vmem:[#allocation2 + $0x24] sm:$0xf]  ;;  %v5392_v30 = vshrl.u32 %v18063_v45, 16  ;;  %v2258_v46 = vshrl.u32 %v2170_v0, 16  ;;  %v2261_v13 = vshll.u32 %v2170_v0, 16 }
 0x14d   : > { %14763 = vmatprep.subr.bf16.mxu0 %v16507_v60  ;;  %v2237_v6 = vshll.u32 %v2167_v62, 16  ;;  %v2250_v37 = vor.u32 %v2249_v26, %v18067_v28  ;;  %v18103_v26 = vld [vmem:[#allocation2 + $0x94] sm:$0xf] }
 0x14e   : > { %15048 = vmatpush3.bf16.msra.mxu1 %v16504_v18  ;;  %v2234_v18 = vshrl.u32 %v2167_v62, 16  ;;  %v5371_v42 = vor.u32 %v5370_v25, %v18031_v32  ;;  %v5394_v5 = vrot.slane %v5392_v30, 4  ;;  %v16516_v62 = vld [vmem:[#allocation7 + $0x108] sm:$0xff]   ;;  %v5412_v30 = vshll.u32 %v18103_v26, 16 }
 0x14f   : > { %15049 = vmatprep.subr.bf16.mxu1 %v16506_v11  ;;  %v2239_v34 = vrot.slane %v2237_v6, 5  ;;  %v16525_v25 = vld [vmem:[#allocation2 + $0x3c] sm:$0xff]  }
 0x150   : > { %14764 = vmatpush3.bf16.msra.mxu0 %v16507_v60  ;;  %v16515_v60 = vld [vmem:[#allocation7 + $0x108] sm:$0xff]   ;;  %v2236_v48 = vrot.slane %v2234_v18, 4  ;;  %v5372_v31 = vrot.slane %v5371_v42, 4  ;;  %v5315_v42 = vld [vmem:[#allocation2 + $0x90] sm:$0xf] }
 0x151   : > { %15034 = vmatmul.mubr.bf16.gmra.mrb[12].mxu1 %v13540_v56  ;;  %14781 = vmatprep.subr.bf16.mxu0 %v16512_v15  ;;  %v2232_v56 = vsel %vm17309_vm11, %v2227_v9, %v18041_v35  ;;  %v18082_v35 = vrot.slane %v5388_v27, 5  ;;  %v16519_v9 = vld [vmem:[#allocation2 + $0x30] sm:$0xff]   ;;  %v5403_v0 = vshrl.u32 %v5315_v42, 16 }
 0x152   : > { %15050 = vmatpush3.bf16.msra.mxu1 %v16506_v11  ;;  %15053 = vmatprep.mubr.bf16.mxu1 %v16510_v4  ;;  %v2240_v12 = vor.u32 %v2239_v34, %v2236_v48  ;;  %v5379_v11 = vshrl.u32 %v5312_v2, 16  ;;  %v18078_v4 = vld [vmem:[#allocation2 + $0x34] sm:$0xf]  ;;  %v18084_v18 = vcombine.low %v2222_v53, %v2232_v56  ;;  %v16522_v53 = vld [vmem:[#allocation7 + $0x110] sm:$0xff]   ;;  %v16523_v48 = vld [vmem:[#allocation7 + $0x118] sm:$0xff]  }
 0x153   : > { %15051 = vmatprep.subr.bf16.mxu1 %v16508_v3  ;;  %14766 = vmatmul.mubr.bf16.vlgmr.msra.gmra.mrb[0].mxu0 %v16511_v19  ;;  %v18080_v19 = vcombine.low %v5343_v24, %v5353_v63  ;;  %v5395_v24 = vor.u32 %v5394_v5, %v18082_v35  ;;  %v18092_v63 = vld [vmem:[#allocation2 + $0x38] sm:$0x1]  ;;  %v2267_v2 = vshll.u32 %v18078_v4, 16  ;;  %v16526_v5 = vld [vmem:[#allocation2 + $0x9c] sm:$0xff]  }
 0x154   : > { %14782 = vmatpush3.bf16.msra.mxu0 %v16512_v15  ;;  %14769 = vmatprep.mubr.bf16.mxu0 %v16517_v8  ;;  %v2241_v59 = vrot.slane %v2240_v12, 4  ;;  %v5381_v50 = vrot.slane %v5379_v11, 4  ;;  %v2251_v15 = vrot.slane %v2250_v37, 4  ;;  %v5398_v8 = vshll.u32 %v18073_v55, 16 }
 0x155   : > { %14783 = vmatprep.subr.bf16.mxu0 %v16515_v60  ;;  %v18107_v56 = vrot.slane %v2267_v2, 5  ;;  %v2271_v12 = vshrl.u32 %v18078_v4, 16  ;;  %v18112_v11 = vrot.slane %v5395_v24, 4 }
 0x156   : > { %15052 = vmatpush3.bf16.msra.mxu1 %v16508_v3  ;;  %v5385_v6 = vor.u32 %v5384_v54, %v5381_v50  ;;  %v5367_v3 = vsel %vm17309_vm11, %v18065_v61, %v18031_v32  ;;  %v2246_v32 = vsel %vm17309_vm11, %v2241_v59, %v18067_v28  ;;  %v2256_v34 = vsel %vm17309_vm11, %v2251_v15, %v2255_v17  ;;  %v16521_v28 = vld [vmem:[#allocation2 + $0x90] sm:$0xff]   ;;  %v2173_v15 = vld [vmem:[#allocation2 + $0x3c] sm:$0xf] }
 0x157   : > { %15069 = vmatprep.subr.bf16.mxu1 %v16514_v58  ;;  %v2260_v61 = vrot.slane %v2258_v46, 4  ;;  %v18114_v44 = vrot.slane %v5398_v8, 5  ;;  %v2273_v27 = vrot.slane %v2271_v12, 4  ;;  %v16528_v59 = vld [vmem:[#allocation7 + $0x120] sm:$0xff]   ;;  %v18119_v17 = vcombine.low %v2246_v32, %v2256_v34  ;;  %v18128_v8 = vld [vmem:[#allocation2 + $0x40] sm:$0xf] }
 0x158   : > { %14784 = vmatpush3.bf16.msra.mxu0 %v16515_v60  ;;  %v5377_v60 = vsel %vm17309_vm11, %v5372_v31, %v18061_v14  ;;  %v18105_v33 = vrot.slane %v5385_v6, 4  ;;  %v18110_v14 = vld [vmem:[#allocation2 + $0x98] sm:$0x1]  ;;  %v5406_v31 = vshll.u32 %v5315_v42, 16  ;;  %v2277_v50 = vshll.u32 %v18092_v63, 16  ;;  %v16524_v46 = vld [vmem:[#allocation7 + $0x118] sm:$0xff]  }
 0x159   : > { %15054 = vmatmul.mubr.bf16.vlgmr.msra.gmra.mrb[0].mxu1 %v16513_v39  ;;  %14785 = vmatprep.subr.bf16.mxu0 %v16520_v16  ;;  %v2263_v39 = vrot.slane %v2261_v13, 5  ;;  %20484 = vst [vmem:[#allocation22_spill] sm:$0xff] %v18110_v14  ;;  %v5405_v54 = vrot.slane %v5403_v0, 4  ;;  %v5416_v6 = vshrl.u32 %v18103_v26, 16  ;;  %v5422_v13 = vshll.u32 %v18110_v14, 16  ;;  %v16532_v34 = vld [vmem:[#allocation7 + $0x128] sm:$0xff]  }
 0x15a   : > { %15070 = vmatpush3.bf16.msra.mxu1 %v16514_v58  ;;  %15057 = vmatprep.mubr.bf16.mxu1 %v16518_v1  ;;  %v18116_v58 = vcombine.low %v5367_v3, %v5377_v60  ;;  %v5408_v1 = vrot.slane %v5406_v31, 5  ;;  %v16527_v3 = vld [vmem:[#allocation2 + $0x48] sm:$0xff]   ;;  %v2282_v2 = vshrl.u32 %v2173_v15, 16  ;;  %v2285_v42 = vshll.u32 %v2173_v15, 16  ;;  %v16533_v60 = vld [vmem:[#allocation2 + $0x54] sm:$0xff]  }
 0x15b   : > { %15071 = vmatprep.subr.bf16.mxu1 %v16516_v62  ;;  %14770 = vmatmul.mubr.bf16.gmra.mrb[4].mxu0 %v16519_v9  ;;  %v2264_v37 = vor.u32 %v2263_v39, %v2260_v61  ;;  %v5418_v61 = vrot.slane %v5416_v6, 4  ;;  %v18139_v39 = vld [vmem:[#allocation2 + $0x44] sm:$0x1]  ;;  %v2291_v12 = vshll.u32 %v18128_v8, 16  ;;  %v18144_v0 = vrot.slane %v2277_v50, 5  ;;  %v16539_v14 = vld [vmem:[#allocation7 + $0x138] sm:$0xff]  }
 0x15c   : > { %14786 = vmatpush3.bf16.msra.mxu0 %v16520_v16  ;;  %14773 = vmatprep.mubr.bf16.mxu0 %v16525_v25  ;;  %v2274_v16 = vor.u32 %v2273_v27, %v18107_v56  ;;  %v18125_v25 = vrot.slane %v5412_v30, 5  ;;  %v5409_v24 = vor.u32 %v5408_v1, %v5405_v54  ;;  %v2284_v31 = vrot.slane %v2282_v2, 4  ;;  %v5318_v27 = vld [vmem:[#allocation2 + $0x9c] sm:$0xf]  ;;  %v16530_v30 = vld [vmem:[#allocation7 + $0x120] sm:$0xff]  }
 0x15d   : > { %14787 = vmatprep.subr.bf16.mxu0 %v16523_v48  ;;  %v18122_v9 = vrot.slane %v2264_v37, 4  ;;  %v2287_v37 = vrot.slane %v2285_v42, 5  ;;  %v18147_v15 = vrot.slane %v2291_v12, 5  ;;  %v2295_v6 = vshrl.u32 %v18128_v8, 16  ;;  %v2176_v2 = vld [vmem:[#allocation2 + $0x48] sm:$0xf] }
 0x15e   : > { %15072 = vmatpush3.bf16.msra.mxu1 %v16516_v62  ;;  %v16531_v62 = vld [vmem:[#allocation7 + $0x128] sm:$0xff]   ;;  %v5410_v54 = vrot.slane %v5409_v24, 4  ;;  %v5419_v1 = vor.u32 %v5418_v61, %v18125_v25  ;;  %v18157_v24 = vld [vmem:[#allocation2 + $0xa4] sm:$0x1]  ;;  %v5427_v32 = vshrl.u32 %v5318_v27, 16 }
 0x15f   : > { %15073 = vmatprep.subr.bf16.mxu1 %v16522_v53  ;;  %v2270_v50 = vsel %vm17309_vm11, %v18122_v9, %v18107_v56  ;;  %v16534_v42 = vld [vmem:[#allocation2 + $0xb4] sm:$0xff]   ;;  %v2297_v12 = vrot.slane %v2295_v6, 4  ;;  %v18166_v6 = vld [vmem:[#allocation2 + $0x4c] sm:$0xf] }
 0x160   : > { %14788 = vmatpush3.bf16.msra.mxu0 %v16523_v48  ;;  %v18142_v48 = vrot.slane %v2274_v16, 4  ;;  %v2301_v16 = vshll.u32 %v18139_v39, 16  ;;  %v5420_v61 = vrot.slane %v5419_v1, 4  ;;  %v5429_v1 = vrot.slane %v5427_v32, 4 }
 0x161   : > { %15058 = vmatmul.mubr.bf16.gmra.mrb[4].mxu1 %v16521_v28  ;;  %14789 = vmatprep.subr.bf16.mxu0 %v16528_v59  ;;  %v16529_v28 = vld [vmem:[#allocation2 + $0xa8] sm:$0xff]   ;;  %v5415_v40 = vsel %vm17309_vm11, %v5410_v54, %v18125_v25  ;;  %v2309_v54 = vshll.u32 %v2176_v2, 16 }
 0x162   : > { %15074 = vmatpush3.bf16.msra.mxu1 %v16522_v53  ;;  %15061 = vmatprep.mubr.bf16.mxu1 %v16526_v5  ;;  %v5424_v53 = vrot.slane %v5422_v13, 5  ;;  %v2288_v5 = vor.u32 %v2287_v37, %v2284_v31  ;;  %v2280_v56 = vsel %vm17309_vm11, %v18142_v48, %v18144_v0  ;;  %v5436_v13 = vshll.u32 %v18150_v20, 16 }
 0x163   : > { %15075 = vmatprep.subr.bf16.mxu1 %v16524_v46  ;;  %14774 = vmatmul.mubr.bf16.gmra.mrb[8].mxu0 %v16527_v3  ;;  %v5430_v3 = vshll.u32 %v5318_v27, 16  ;;  %v5440_v31 = vshrl.u32 %v18150_v20, 16  ;;  %v2303_v37 = vrot.slane %v2301_v16, 5  ;;  %v5321_v20 = vld [vmem:[#allocation2 + $0xa8] sm:$0xf] }
 0x164   : > { %14790 = vmatpush3.bf16.msra.mxu0 %v16528_v59  ;;  %14777 = vmatprep.mubr.bf16.mxu0 %v16533_v60  ;;  %v2289_v9 = vrot.slane %v2288_v5, 4  ;;  %v16535_v59 = vld [vmem:[#allocation2 + $0x60] sm:$0xff]   ;;  %v2298_v60 = vor.u32 %v2297_v12, %v18147_v15  ;;  %v5425_v48 = vsel %vm17309_vm11, %v5420_v61, %v5424_v53  ;;  %v18173_v0 = vrot.slane %v5436_v13, 5 }
 0x165   : > { %14791 = vmatprep.subr.bf16.mxu0 %v16531_v62  ;;  %v5432_v27 = vrot.slane %v5430_v3, 5  ;;  %v5442_v5 = vrot.slane %v5440_v31, 4  ;;  %v5446_v12 = vshll.u32 %v18157_v24, 16  ;;  %v2306_v3 = vshrl.u32 %v2176_v2, 16  ;;  %v16538_v13 = vld [vmem:[#allocation7 + $0x130] sm:$0xff]  }
 0x166   : > { %15076 = vmatpush3.bf16.msra.mxu1 %v16524_v46  ;;  %v18175_v46 = vld [vmem:[#allocation2 + $0x50] sm:$0x1]  ;;  %v2299_v16 = vrot.slane %v2298_v60, 4  ;;  %v2315_v53 = vshll.u32 %v18166_v6, 16  ;;  %v2319_v61 = vshrl.u32 %v18166_v6, 16  ;;  %v18193_v2 = vcombine.low %v2270_v50, %v2280_v56 }
 0x167   : > { %15077 = vmatprep.subr.bf16.mxu1 %v16530_v30  ;;  %v5433_v32 = vor.u32 %v5432_v27, %v5429_v1  ;;  %v5443_v25 = vor.u32 %v5442_v5, %v18173_v0  ;;  %v18195_v60 = vcombine.low %v5415_v40, %v5425_v48  ;;  %v2308_v1 = vrot.slane %v2306_v3, 4 }
 0x168   : > { %14792 = vmatpush3.bf16.msra.mxu0 %v16531_v62  ;;  %v20486_v62 = vsel %vm17309_vm11, %v18112_v11, %v18114_v44  ;;  %v2304_v11 = vsel %vm17309_vm11, %v2299_v16, %v2303_v37  ;;  %v2311_v44 = vrot.slane %v2309_v54, 5  ;;  %v18202_v27 = vrot.slane %v2315_v53, 5  ;;  %v2179_v37 = vld [vmem:[#allocation2 + $0x54] sm:$0xf]  ;;  %v18214_v54 = vld [vmem:[#allocation2 + $0x58] sm:$0xf] }
 0x169   : > { %15062 = vmatmul.mubr.bf16.gmra.mrb[8].mxu1 %v16529_v28  ;;  %14793 = vmatprep.subr.bf16.mxu0 %v16536_v43  ;;  %v20487_v28 = vsel %vm17309_vm11, %v18105_v33, %v18082_v35  ;;  %v18204_v35 = vld [vmem:[#allocation2 + $0xac] sm:$0xf]  ;;  %v5434_v40 = vrot.slane %v5433_v32, 4  ;;  %v2321_v33 = vrot.slane %v2319_v61, 4  ;;  %v2325_v50 = vshll.u32 %v18175_v46, 16 }
 0x16a   : > { %15078 = vmatpush3.bf16.msra.mxu1 %v16530_v30  ;;  %15065 = vmatprep.mubr.bf16.mxu1 %v16534_v42  ;;  %v18191_v31 = vcombine.low %v20487_v28, %v20486_v62  ;;  %v16541_v30 = vld [vmem:[#allocation7 + $0x140] sm:$0xff]   ;;  %v2294_v42 = vsel %vm17309_vm11, %v2289_v9, %v18147_v15  ;;  %v5451_v56 = vshrl.u32 %v5321_v20, 16  ;;  %v5444_v48 = vrot.slane %v5443_v25, 4  ;;  %v16540_v53 = vld [vmem:[#allocation7 + $0x138] sm:$0xff]  }
 0x16b   : > { %15079 = vmatprep.subr.bf16.mxu1 %v16532_v34  ;;  %14778 = vmatmul.mubr.bf16.gmra.mrb[12].mxu0 %v16535_v59  ;;  %v16537_v59 = vld [vmem:[#allocation2 + $0xc0] sm:$0xff]   ;;  %v5448_v15 = vrot.slane %v5446_v12, 5  ;;  %v2312_v9 = vor.u32 %v2311_v44, %v2308_v1  ;;  %v5454_v5 = vshll.u32 %v5321_v20, 16  ;;  %v18208_v16 = vcombine.low %v2294_v42, %v2304_v11  ;;  %v16542_v11 = vld [vmem:[#allocation7 + $0x140] sm:$0xff]  }
 0x16c   : > { %14794 = vmatpush3.bf16.msra.mxu0 %v16536_v43  ;;  %14797 = vmatprep.mubr.bf16.mxu0 %v18035_v36  ;;  %v2322_v3 = vor.u32 %v2321_v33, %v18202_v27  ;;  %v18211_v43 = vld [vmem:[#allocation2 + $0xb0] sm:$0x1]  ;;  %v5453_v36 = vrot.slane %v5451_v56, 4  ;;  %v5460_v32 = vshll.u32 %v18204_v35, 16  ;;  %v2327_v25 = vrot.slane %v2325_v50, 5 }
 0x16d   : > { %14795 = vmatprep.subr.bf16.mxu0 %v16539_v14  ;;  %20488 = vst [vmem:[#allocation19_spill] sm:$0xff] %v18211_v43  ;;  %v2313_v61 = vrot.slane %v2312_v9, 4  ;;  %v5456_v12 = vrot.slane %v5454_v5, 5  ;;  %v5464_v20 = vshrl.u32 %v18204_v35, 16  ;;  %v5439_v62 = vsel %vm17309_vm11, %v5434_v40, %v18173_v0  ;;  %v18223_v56 = vld [vmem:[#allocation2 + $0x5c] sm:$0x1] }
 0x16e   : > { %15080 = vmatpush3.bf16.msra.mxu1 %v16532_v34  ;;  %v16543_v34 = vld [vmem:[#allocation7 + $0x148] sm:$0xff]   ;;  %v2323_v28 = vrot.slane %v2322_v3, 4  ;;  %v2330_v1 = vshrl.u32 %v2179_v37, 16  ;;  %v2333_v42 = vshll.u32 %v2179_v37, 16  ;;  %v5449_v44 = vsel %vm17309_vm11, %v5444_v48, %v5448_v15  ;;  %20489 = vst [vmem:[#allocation24_spill] sm:$0xff] %v18223_v56 }
 0x16f   : > { %15081 = vmatprep.subr.bf16.mxu1 %v16538_v13  ;;  %v5457_v33 = vor.u32 %v5456_v12, %v5453_v36  ;;  %v5470_v50 = vshll.u32 %v18211_v43, 16  ;;  %v5324_v9 = vld [vmem:[#allocation2 + $0xb4] sm:$0xf]  ;;  %v18227_v0 = vrot.slane %v5460_v32, 5  ;;  %v5466_v40 = vrot.slane %v5464_v20, 4  ;;  %v16544_v12 = vld [vmem:[#allocation7 + $0x148] sm:$0xff]  }
 0x170   : > { %14796 = vmatpush3.bf16.msra.mxu0 %v16539_v14  ;;  %v2339_v14 = vshll.u32 %v18214_v54, 16  ;;  %v2335_v5 = vrot.slane %v2333_v42, 5  ;;  %v18229_v37 = vld [vmem:[#allocation2 + $0xb8] sm:$0xf]  ;;  %v2318_v48 = vsel %vm17309_vm11, %v2313_v61, %v18202_v27  ;;  %v2328_v15 = vsel %vm17309_vm11, %v2323_v28, %v2327_v25  ;;  %v16545_v20 = vld [vmem:[#allocation7 + $0x150] sm:$0xff]  }
 0x171   : > { %15066 = vmatmul.mubr.bf16.gmra.mrb[12].mxu1 %v16537_v59  ;;  %14813 = vmatprep.subr.bf16.mxu0 %v16541_v30  ;;  %v2332_v59 = vrot.slane %v2330_v1, 4  ;;  %20490 = vst [vmem:[#allocation25_spill] sm:$0xff] %v18229_v37  ;;  %v2343_v36 = vshrl.u32 %v18214_v54, 16  ;;  %v2349_v32 = vshll.u32 %v18223_v56, 16  ;;  %v18244_v27 = vcombine.low %v5439_v62, %v5449_v44  ;;  %v18248_v25 = vld [vmem:[#allocation2 + $0xbc] sm:$0x1] }
 0x172   : > { %15082 = vmatpush3.bf16.msra.mxu1 %v16538_v13  ;;  %15085 = vmatprep.mubr.bf16.mxu1 %v18080_v19  ;;  %v18237_v13 = vrot.slane %v5457_v33, 4  ;;  %v18239_v19 = vrot.slane %v2339_v14, 5  ;;  %v18246_v61 = vrot.slane %v5470_v50, 5  ;;  %20491 = vst [vmem:[#allocation23_spill] sm:$0xff] %v18248_v25  ;;  %v5478_v28 = vshll.u32 %v5324_v9, 16 }
 0x173   : > { %15083 = vmatprep.subr.bf16.mxu1 %v16540_v53  ;;  %14798 = vmatmul.mubr.bf16.vlgmr.msra.gmra.mrb[0].mxu0 %v18084_v18  ;;  %v2336_v3 = vor.u32 %v2335_v5, %v2332_v59  ;;  %v5475_v18 = vshrl.u32 %v5324_v9, 16  ;;  %v5467_v1 = vor.u32 %v5466_v40, %v18227_v0  ;;  %v2345_v42 = vrot.slane %v2343_v36, 4  ;;  %v2182_v14 = vld [vmem:[#allocation2 + $0x60] sm:$0xf]  ;;  %v18254_v59 = vld [vmem:[#allocation2 + $0x64] sm:$0xf] }
 0x174   : > { %14814 = vmatpush3.bf16.msra.mxu0 %v16541_v30  ;;  %14801 = vmatprep.mubr.bf16.mxu0 %v18119_v17  ;;  %v5484_v30 = vshll.u32 %v18229_v37, 16  ;;  %v18251_v17 = vcombine.low %v2318_v48, %v2328_v15  ;;  %20492 = vst [vmem:[#allocation21_spill] sm:$0xff] %v18254_v59  ;;  %v5480_v44 = vrot.slane %v5478_v28, 5  ;;  %v5488_v5 = vshrl.u32 %v18229_v37, 16  ;;  %v18259_v9 = vld [vmem:[#allocation2 + $0x68] sm:$0x1] }
 0x175   : > { %14815 = vmatprep.subr.bf16.mxu0 %v16543_v34  ;;  %v5477_v33 = vrot.slane %v5475_v18, 4  ;;  %v2337_v62 = vrot.slane %v2336_v3, 4  ;;  %20493 = vst [vmem:[#allocation26_spill] sm:$0xff] %v18259_v9  ;;  %v2346_v40 = vor.u32 %v2345_v42, %v18239_v19  ;;  %v2351_v48 = vrot.slane %v2349_v32, 5  ;;  %v16546_v3 = vld [vmem:[#allocation7 + $0x150] sm:$0xff]   ;;  %v16547_v36 = vld [vmem:[#allocation7 + $0x158] sm:$0xff]  }
 0x176   : > { %15084 = vmatpush3.bf16.msra.mxu1 %v16540_v53  ;;  %v18256_v50 = vrot.slane %v5484_v30, 5  ;;  %v5494_v15 = vshll.u32 %v18248_v25, 16  ;;  %v5490_v28 = vrot.slane %v5488_v5, 4  ;;  %v2354_v30 = vshrl.u32 %v2182_v14, 16 }
 0x177   : > { %15101 = vmatprep.subr.bf16.mxu1 %v16542_v11  ;;  %v5481_v18 = vor.u32 %v5480_v44, %v5477_v33  ;;  %v2357_v37 = vshll.u32 %v2182_v14, 16  ;;  %v18269_v56 = vrot.slane %v5467_v1, 4  ;;  %v2347_v53 = vrot.slane %v2346_v40, 4  ;;  %v5327_v44 = vld [vmem:[#allocation2 + $0xc0] sm:$0xf] }
 0x178   : > { %14816 = vmatpush3.bf16.msra.mxu0 %v16543_v34  ;;  %v414_v34 = vld [vmem:[#allocation2 + $0xc8] sm:$0x1]  ;;  %v2363_v32 = vshll.u32 %v18254_v59, 16  ;;  %v2367_v42 = vshrl.u32 %v18254_v59, 16  ;;  %v5491_v33 = vor.u32 %v5490_v28, %v18256_v50  ;;  %v2356_v14 = vrot.slane %v2354_v30, 4 }
 0x179   : > { %15086 = vmatmul.mubr.bf16.vlgmr.msra.gmra.mrb[0].mxu1 %v18116_v58  ;;  %14817 = vmatprep.subr.bf16.mxu0 %v16545_v20  ;;  %v2342_v58 = vsel %vm17309_vm11, %v2337_v62, %v18239_v19  ;;  %v2373_v40 = vshll.u32 %v18259_v9, 16  ;;  %v18280_v59 = vld [vmem:[#allocation2 + $0xc4] sm:$0xf]  ;;  %v2352_v19 = vsel %vm17309_vm11, %v2347_v53, %v2351_v48  ;;  %v5496_v28 = vrot.slane %v5494_v15, 5 }
 0x17a   : > { %15102 = vmatpush3.bf16.msra.mxu1 %v16542_v11  ;;  %15089 = vmatprep.mubr.bf16.mxu1 %v18191_v31  ;;  %v2359_v11 = vrot.slane %v2357_v37, 5  ;;  %v5482_v31 = vrot.slane %v5481_v18, 4  ;;  %v2365_v1 = vrot.slane %v2363_v32, 5  ;;  %v2369_v5 = vrot.slane %v2367_v42, 4  ;;  %v2587_v37 = vld [vmem:[#allocation2 + $0xc] sm:$0xe] }
 0x17b   : > { %15103 = vmatprep.subr.bf16.mxu1 %v16544_v12  ;;  %14802 = vmatmul.mubr.bf16.gmra.mrb[4].mxu0 %v18193_v2  ;;  %v16549_v2 = vld [vmem:[#allocation7 + $0x160] sm:$0xff]   ;;  %v5492_v62 = vrot.slane %v5491_v33, 4  ;;  %v2375_v25 = vrot.slane %v2373_v40, 5  ;;  %v415_v18 = vsel %vm17264_vm4, 0, %v414_v34  ;;  %v5499_v32 = vshrl.u32 %v5327_v44, 16  ;;  %v16548_v42 = vld [vmem:[#allocation7 + $0x158] sm:$0xff]  }
 0x17c   : > { %14818 = vmatpush3.bf16.msra.mxu0 %v16545_v20  ;;  %14805 = vmatprep.mubr.bf16.mxu0 %v18208_v16  ;;  %v2360_v30 = vor.u32 %v2359_v11, %v2356_v14  ;;  %v2370_v20 = vor.u32 %v2369_v5, %v2365_v1  ;;  %v5473_v9 = vsel %vm17309_vm11, %v18269_v56, %v18246_v61  ;;  %v5502_v53 = vshll.u32 %v5327_v44, 16  ;;  %v18300_v44 = vld [vmem:[#allocation2 + $0x6c] sm:$0xe]  ;;  %v2588_v40 = vld [vmem:[#allocation2 + $0x18] sm:$0xe] }
 0x17d   : > { %14819 = vmatprep.subr.bf16.mxu0 %v16547_v36  ;;  %416 = vst [vmem:[#allocation2 + $0xc8] sm:$0x1] %v415_v18  ;;  %v5508_v48 = vshll.u32 %v18280_v59, 16  ;;  %v13386_v15 = vcombine.low %v2342_v58, %v2352_v19  ;;  %v5487_v34 = vsel %vm17309_vm11, %v5482_v31, %v18256_v50  ;;  %v5512_v14 = vshrl.u32 %v18280_v59, 16  ;;  %v16550_v50 = vld [vmem:[#allocation7 + $0x160] sm:$0xff]  }
 0x17e   : > { %15104 = vmatpush3.bf16.msra.mxu1 %v16544_v12  ;;  %v2361_v43 = vrot.slane %v2360_v30, 4  ;;  %v16551_v12 = vld [vmem:[#allocation7 + $0x168] sm:$0xff]   ;;  %v2371_v33 = vrot.slane %v2370_v20, 4  ;;  %v5497_v56 = vsel %vm17309_vm11, %v5492_v62, %v5496_v28  ;;  %v5501_v11 = vrot.slane %v5499_v32, 4  ;;  %v16553_v62 = vld [vmem:[#allocation7 + $0x170] sm:$0xff]  }
 0x17f   : > { %15105 = vmatprep.subr.bf16.mxu1 %v16546_v3  ;;  %v5504_v31 = vrot.slane %v5502_v53, 5  ;;  %v2624_v5 = vrot.slane %v17968_v21, 5  ;;  %v13571_v21 = vcombine.low %v5487_v34, %v5497_v56  ;;  %v2589_v20 = vld [vmem:[#allocation2 + $0x24] sm:$0xe]  ;;  %v13397_v32 = vrot.slane %v2588_v40, 9  ;;  %v16555_v53 = vld [vmem:[#allocation7 + $0x178] sm:$0xff]  }
 0x180   : > { %14820 = vmatpush3.bf16.msra.mxu0 %v16547_v36  ;;  %v2366_v61 = vsel %vm17309_vm11, %v2361_v43, %v2365_v1  ;;  %v13396_v36 = vrot.slane %v2587_v37, 9  ;;  %v2376_v58 = vsel %vm17309_vm11, %v2371_v33, %v2375_v25  ;;  %v18308_v43 = vrot.slane %v5508_v48, 5  ;;  %v16841_v34 = vld [vmem:[#allocation2 + $0x74] sm:$0x1] }
 0x181   : > { %15090 = vmatmul.mubr.bf16.gmra.mrb[4].mxu1 %v18195_v60  ;;  %14821 = vmatprep.subr.bf16.mxu0 %v16549_v2  ;;  %v2621_v60 = vrot.slane %v17965_v7, 5  ;;  %v5514_v1 = vrot.slane %v5512_v14, 4  ;;  %v20495_v25 = vsel %vm17309_vm11, %v18237_v13, %v18227_v0  ;;  %v13387_v19 = vcombine.low %v2366_v61, %v2376_v58  ;;  %v16552_v0 = vld [vmem:[#allocation7 + $0x168] sm:$0xff]   ;;  %v16554_v14 = vld [vmem:[#allocation7 + $0x170] sm:$0xff]   ;;  %v16557_v40 = vld [vmem:[#allocation7 + $0x180] sm:$0xff]  }
 0x182   : > { %15106 = vmatpush3.bf16.msra.mxu1 %v16546_v3  ;;  %15093 = vmatprep.mubr.bf16.mxu1 %v18244_v27  ;;  %v5765_v27 = vrot.slane %v17974_v41, 5  ;;  %v13570_v7 = vcombine.low %v20495_v25, %v5473_v9  ;;  %v13581_v41 = vrot.slane %v18300_v44, 9  ;;  %v2628_v37 = vrot.slane %v17987_v23, 5 }
 0x183   : > { %15107 = vmatprep.subr.bf16.mxu1 %v16548_v42  ;;  %14806 = vmatmul.mubr.bf16.gmra.mrb[8].mxu0 %v18251_v17  ;;  %v2623_v3 = vrot.slane %v2621_v60, 4  ;;  %v2622_v17 = vsel %vm17763_vm14, %v13396_v36, %v2621_v60  ;;  %v20496_v13 = vrot.slane %v17963_v52, 4  ;;  %v5515_v18 = vor.u32 %v5514_v1, %v18308_v43  ;;  %v5732_v52 = vld [vmem:[#allocation2 + $0x78] sm:$0xe]  ;;  %v2590_v60 = vld [vmem:[#allocation2 + $0x30] sm:$0xe] }
 0x184   : > { %14822 = vmatpush3.bf16.msra.mxu0 %v16549_v2  ;;  %14809 = vmatprep.mubr.bf16.mxu0 %v13386_v15  ;;  %v1001_v28 = vld [vmem:[#allocation2 + $0xc8] sm:$0x1]  ;;  %v5505_v2 = vor.u32 %v5504_v31, %v5501_v11  ;;  %v5767_v15 = vrot.slane %v5765_v27, 4  ;;  %v5768_v23 = vrot.slane %v16841_v34, 5  ;;  %v2630_v33 = vrot.slane %v2628_v37, 4 }
 0x185   : > { %14823 = vmatprep.subr.bf16.mxu0 %v16551_v12  ;;  %v2625_v30 = vsel %vm17763_vm14, %v2623_v3, %v2624_v5  ;;  %v1002_v9 = vsel %vm17259_vm3, %v20496_v13, %v1001_v28  ;;  %v13398_v56 = vrot.slane %v2589_v20, 9  ;;  %v2635_v61 = vrot.slane %v18043_v57, 5  ;;  %v16556_v5 = vld [vmem:[#allocation7 + $0x178] sm:$0xff]   ;;  %v2591_v28 = vld [vmem:[#allocation2 + $0x3c] sm:$0xe] }
 0x186   : > { %15108 = vmatpush3.bf16.msra.mxu1 %v16548_v42  ;;  %v2631_v42 = vrot.slane %v17994_v29, 5  ;;  %1003 = vst [vmem:[#allocation2 + $0xc8] sm:$0x1] %v1002_v9  ;;  %v13404_v48 = vcombine.low %v2622_v17, %v2625_v30  ;;  %v5772_v11 = vrot.slane %v18000_v22, 5  ;;  %v2638_v29 = vrot.slane %v18045_v47, 5 }
 0x187   : > { %15109 = vmatprep.subr.bf16.mxu1 %v16550_v50  ;;  %v18333_v36 = vrot.slane %v5505_v2, 4  ;;  %v2629_v44 = vsel %vm17763_vm14, %v13397_v32, %v2628_v37  ;;  %v5779_v57 = vrot.slane %v18063_v45, 5  ;;  %v18342_v22 = vsel %vm17763_vm14, %v13581_v41, %v5765_v27  ;;  %v18355_v17 = vld [vmem:[#allocation2 + $0x90] sm:$0xe] }
 0x188   : > { %14824 = vmatpush3.bf16.msra.mxu0 %v16551_v12  ;;  %v18331_v12 = vld [vmem:[#allocation2 + $0x84] sm:$0xe]  ;;  %v2632_v58 = vsel %vm17763_vm14, %v2630_v33, %v2631_v42  ;;  %v18346_v47 = vsel %vm17763_vm14, %v5767_v15, %v5768_v23  ;;  %v2637_v31 = vrot.slane %v2635_v61, 4  ;;  %v13582_v1 = vrot.slane %v5732_v52, 9  ;;  %v18370_v32 = vld [vmem:[#allocation7 + $0x180] sm:$0xff]  }
 0x189   : > { %15094 = vmatmul.mubr.bf16.gmra.mrb[8].mxu1 %v13570_v7  ;;  %14825 = vmatprep.subr.bf16.mxu0 %v16553_v62  ;;  %v5775_v3 = vrot.slane %v18010_v10, 5  ;;  %v2636_v25 = vsel %vm17763_vm14, %v13398_v56, %v2635_v61  ;;  %v2642_v7 = vrot.slane %v18078_v4, 5  ;;  %v13405_v27 = vcombine.low %v2629_v44, %v2632_v58  ;;  %v16559_v10 = vld [vmem:[#allocation7 + $0x188] sm:$0xff]   ;;  %v2592_v23 = vld [vmem:[#allocation2 + $0x48] sm:$0xe]  ;;  %v20497_v52 = vld [vmem:[#allocation22_spill] sm:$0xff] }
 0x18a   : > { %15110 = vmatpush3.bf16.msra.mxu1 %v16550_v50  ;;  %15097 = vmatprep.mubr.bf16.mxu1 %v13571_v21  ;;  %v5516_v50 = vrot.slane %v5515_v18, 4  ;;  %v5774_v21 = vrot.slane %v5772_v11, 4  ;;  %v5781_v30 = vrot.slane %v5779_v57, 4  ;;  %v5782_v4 = vrot.slane %v18073_v55, 5  ;;  %v18368_v18 = vld [vmem:[#allocation2 + $0x9c] sm:$0xe] }
 0x18b   : > { %15111 = vmatprep.subr.bf16.mxu1 %v16552_v0  ;;  %14810 = vmatmul.mubr.bf16.gmra.mrb[12].mxu0 %v13387_v19  ;;  %v2639_v19 = vsel %vm17763_vm14, %v2637_v31, %v2638_v29  ;;  %v13399_v41 = vrot.slane %v2590_v60, 9  ;;  %v2645_v37 = vrot.slane %v18092_v63, 5  ;;  %v5511_v20 = vsel %vm17309_vm11, %v18333_v36, %v18308_v43 }
 0x18c   : > { %14826 = vmatpush3.bf16.msra.mxu0 %v16553_v62  ;;  %14829 = vmatprep.mubr.bf16.mxu0 %v13404_v48  ;;  %v13583_v62 = vrot.slane %v18331_v12, 9  ;;  %v13406_v13 = vcombine.low %v2636_v25, %v2639_v19  ;;  %v2644_v9 = vrot.slane %v2642_v7, 4  ;;  %v13584_v55 = vrot.slane %v18355_v17, 9  ;;  %v16563_v25 = vld [vmem:[#allocation7 + $0x198] sm:$0xff]  }
 0x18d   : > { %14827 = vmatprep.subr.bf16.mxu0 %v16555_v53  ;;  %v18357_v2 = vld [vmem:[#allocation2 + $0xc8] sm:$0x1]  ;;  %v13400_v42 = vrot.slane %v2591_v28, 9  ;;  %v2649_v63 = vrot.slane %v18128_v8, 5  ;;  %v2652_v48 = vrot.slane %v18139_v39, 5  ;;  %v13589_v43 = vcombine.low %v18342_v22, %v18346_v47  ;;  %v16561_v8 = vld [vmem:[#allocation7 + $0x190] sm:$0xff]  }
 0x18e   : > { %15112 = vmatpush3.bf16.msra.mxu1 %v16552_v0  ;;  %v5518_v0 = vshll.u32 %v18357_v2, 16  ;;  %v5786_v34 = vrot.slane %v18103_v26, 5  ;;  %v2643_v33 = vsel %vm17763_vm14, %v13399_v41, %v2642_v7  ;;  %v5789_v39 = vrot.slane %v20497_v52, 5  ;;  %v18400_v47 = vld [vmem:[#allocation2 + $0xa8] sm:$0xe] }
 0x18f   : > { %15113 = vmatprep.subr.bf16.mxu1 %v16554_v14  ;;  %v2651_v56 = vrot.slane %v2649_v63, 4  ;;  %v13585_v12 = vrot.slane %v18368_v18, 9  ;;  %v2656_v36 = vrot.slane %v18166_v6, 5  ;;  %v5780_v58 = vsel %vm17763_vm14, %v13583_v62, %v5779_v57  ;;  %v2593_v57 = vld [vmem:[#allocation2 + $0x54] sm:$0xe] }
 0x190   : > { %14828 = vmatpush3.bf16.msra.mxu0 %v16555_v53  ;;  %v5520_v15 = vrot.slane %v5518_v0, 5  ;;  %v18379_v53 = vsel %vm17763_vm14, %v13582_v1, %v5772_v11  ;;  %v2646_v11 = vsel %vm17763_vm14, %v2644_v9, %v2645_v37  ;;  %v2650_v22 = vsel %vm17763_vm14, %v13400_v42, %v2649_v63  ;;  %v20499_v37 = vld [vmem:[#allocation19_spill] sm:$0xff] }
 0x191   : > { %14845 = vmatprep.subr.bf16.mxu0 %v16557_v40  ;;  %v5788_v31 = vrot.slane %v5786_v34, 4  ;;  %v5796_v45 = vrot.slane %v18157_v24, 5  ;;  %v13401_v60 = vrot.slane %v2592_v23, 9  ;;  %v13407_v1 = vcombine.low %v2643_v33, %v2646_v11  ;;  %v16565_v33 = vld [vmem:[#allocation7 + $0x1a0] sm:$0xff]   ;;  %v16573_v24 = vld [vmem:[#allocation2 + $0x18] sm:$0xff]  }
 0x192   : > { %15114 = vmatpush3.bf16.msra.mxu1 %v16554_v14  ;;  %v20498_v14 = vld [vmem:[#allocation20_spill] sm:$0xff]  ;;  %v5521_v29 = vsel %vm17309_vm11, %v5516_v50, %v5520_v15  ;;  %v2653_v50 = vsel %vm17763_vm14, %v2651_v56, %v2652_v48  ;;  %v5800_v7 = vrot.slane %v18204_v35, 5  ;;  %v5783_v19 = vsel %vm17763_vm14, %v5781_v30, %v5782_v4  ;;  %v16560_v4 = vld [vmem:[#allocation7 + $0x188] sm:$0xff]  }
 0x193   : > { %15115 = vmatprep.subr.bf16.mxu1 %v16556_v5  ;;  %14830 = vmatmul.mubr.bf16.vlgmr.msra.gmra.mrb[0].mxu0 %v13405_v27  ;;  %v5793_v61 = vrot.slane %v20498_v14, 5  ;;  %v13572_v44 = vcombine.low %v5511_v20, %v5521_v29  ;;  %v18413_v27 = vld [vmem:[#allocation2 + $0xb4] sm:$0xe]  ;;  %v13408_v62 = vcombine.low %v2650_v22, %v2653_v50  ;;  %v2659_v28 = vrot.slane %v18175_v46, 5  ;;  %v18427_v15 = vld [vmem:[#allocation2 + $0xc0] sm:$0xe] }
 0x194   : > { %14846 = vmatpush3.bf16.msra.mxu0 %v16557_v40  ;;  %14833 = vmatprep.mubr.bf16.mxu0 %v13406_v13  ;;  %v5776_v40 = vsel %vm17763_vm14, %v5774_v21, %v5775_v3  ;;  %v2663_v41 = vrot.slane %v18214_v54, 5  ;;  %v2594_v3 = vld [vmem:[#allocation2 + $0x60] sm:$0xe]  ;;  %v13586_v21 = vrot.slane %v18400_v47, 9  ;;  %v5803_v20 = vrot.slane %v20499_v37, 5  ;;  %v20501_v54 = vld [vmem:[#allocation25_spill] sm:$0xff] }
 0x195   : > { %14847 = vmatprep.subr.bf16.mxu0 %v16559_v10  ;;  %v18406_v6 = vrot.slane %v5793_v61, 4  ;;  %15098 = vmatmul.mubr.bf16.gmra.mrb[12].mxu1 %v13572_v44  ;;  %v13402_v0 = vrot.slane %v2593_v57, 9  ;;  %v20500_v13 = vld [vmem:[#allocation24_spill] sm:$0xff]  ;;  %v13590_v30 = vcombine.low %v18379_v53, %v5776_v40  ;;  %v13591_v63 = vcombine.low %v5780_v58, %v5783_v19  ;;  %v20502_v56 = vld [vmem:[#allocation23_spill] sm:$0xff]  ;;  %v20503_v29 = vld [vmem:[#allocation21_spill] sm:$0xff] }
 0x196   : > { %15116 = vmatpush3.bf16.msra.mxu1 %v16556_v5  ;;  %v2658_v5 = vrot.slane %v2656_v36, 4  ;;  %15117 = vmatprep.mubr.bf16.mxu1 %v13589_v43  ;;  %v2666_v9 = vrot.slane %v20500_v13, 5  ;;  %v2665_v42 = vrot.slane %v2663_v41, 4  ;;  %v13587_v46 = vrot.slane %v18413_v27, 9  ;;  %v20504_v22 = vld [vmem:[#allocation26_spill] sm:$0xff]  ;;  %v16568_v47 = vld [vmem:[#allocation7 + $0x1a8] sm:$0xff]  }
 0x197   : > { %15133 = vmatprep.subr.bf16.mxu1 %v18370_v32  ;;  %v5807_v48 = vrot.slane %v20501_v54, 5  ;;  %v2657_v43 = vsel %vm17763_vm14, %v13401_v60, %v2656_v36  ;;  %v5810_v53 = vrot.slane %v20502_v56, 5  ;;  %v2670_v11 = vrot.slane %v20503_v29, 5  ;;  %v16566_v14 = vld [vmem:[#allocation7 + $0x1a0] sm:$0xff]   ;;  %v3128_v54 = vld [vmem:[#allocation2 + $0x18] sm:$0xf] }
 0x198   : > { %14848 = vmatpush3.bf16.msra.mxu0 %v16559_v10  ;;  %v5802_v10 = vrot.slane %v5800_v7, 4  ;;  %v2660_v23 = vsel %vm17763_vm14, %v2658_v5, %v2659_v28  ;;  %v2664_v44 = vsel %vm17763_vm14, %v13402_v0, %v2663_v41  ;;  %v2667_v58 = vsel %vm17763_vm14, %v2665_v42, %v2666_v9  ;;  %v16562_v5 = vld [vmem:[#allocation7 + $0x190] sm:$0xff]   ;;  %v16576_v41 = vld [vmem:[#allocation7 + $0x1c0] sm:$0xff]   ;;  %v16579_v0 = vld [vmem:[#allocation7 + $0x1c8] sm:$0xff]  }
 0x199   : > { %14849 = vmatprep.subr.bf16.mxu0 %v16561_v8  ;;  %v2673_v50 = vrot.slane %v20504_v22, 5  ;;  %v5809_v57 = vrot.slane %v5807_v48, 4  ;;  %v2672_v36 = vrot.slane %v2670_v11, 4  ;;  %v13588_v60 = vrot.slane %v18427_v15, 9  ;;  %v16581_v13 = vld [vmem:[#allocation2 + $0x30] sm:$0xff]   ;;  %v16572_v42 = vld [vmem:[#allocation7 + $0x1b8] sm:$0xff]  }
 0x19a   : > { %v5814_v40 = vrot.slane %v18280_v59, 5  ;;  %v13409_v27 = vcombine.low %v2657_v43, %v2660_v23  ;;  %v5790_v19 = vsel %vm17763_vm14, %v5788_v31, %v5789_v39  ;;  %v13410_v59 = vcombine.low %v2664_v44, %v2667_v58  ;;  %v16569_v39 = vld [vmem:[#allocation7 + $0x1b0] sm:$0xff]   ;;  %v361_v9 = vld [vmem:[#allocation2 + $0xcc] sm:$0x1]  ;;  %v16578_v43 = vld [vmem:[#allocation7 + $0x1c0] sm:$0xff]  }
 0x19b   : > { %14834 = vmatmul.mubr.bf16.gmra.mrb[4].mxu0 %v13407_v1  ;;  %v5787_v1 = vsel %vm17763_vm14, %v13584_v55, %v5786_v34  ;;  %v5817_v26 = vrot.slane %v18357_v2, 5  ;;  %v5794_v17 = vsel %vm17763_vm14, %v13585_v12, %v5793_v61  ;;  %v16564_v34 = vld [vmem:[#allocation7 + $0x198] sm:$0xff]   ;;  %v2674_v18 = vsel %vm17763_vm14, %v2672_v36, %v2673_v50  ;;  %v18491_v15 = vld [vmem:[#allocation2 + $0x20] sm:$0x1]  ;;  %v6270_v29 = vld [vmem:[#allocation2 + $0x78] sm:$0xf] }
 0x19c   : > { %14850 = vmatpush3.bf16.msra.mxu0 %v16561_v8  ;;  %14837 = vmatprep.mubr.bf16.mxu0 %v13408_v62  ;;  %v13403_v8 = vrot.slane %v2594_v3, 9  ;;  %v16567_v62 = vld [vmem:[#allocation7 + $0x1a8] sm:$0xff]   ;;  %v5816_v28 = vrot.slane %v5814_v40, 4  ;;  %v13592_v55 = vcombine.low %v5787_v1, %v5790_v19  ;;  %v5801_v12 = vsel %vm17763_vm14, %v13586_v21, %v5800_v7  ;;  %v16570_v3 = vld [vmem:[#allocation7 + $0x1b0] sm:$0xff]   ;;  %v16582_v1 = vld [vmem:[#allocation2 + $0x90] sm:$0xff]  }
 0x19d   : > { %14851 = vmatprep.subr.bf16.mxu0 %v16563_v25  ;;  %15118 = vmatmul.mubr.bf16.vlgmr.msra.gmra.mrb[0].mxu1 %v13590_v30  ;;  %v5804_v31 = vsel %vm17763_vm14, %v5802_v10, %v5803_v20  ;;  %v5815_v21 = vsel %vm17763_vm14, %v13588_v60, %v5814_v40  ;;  %v16575_v20 = vld [vmem:[#allocation2 + $0x24] sm:$0xff]   ;;  %v362_v30 = vsel %vm17259_vm3, 0, %v361_v9  ;;  %v3153_v23 = vshrl.u32 %v3128_v54, 16  ;;  %v18496_v44 = vld [vmem:[#allocation2 + $0x7c] sm:$0xf] }
 0x19e   : > { %15134 = vmatpush3.bf16.msra.mxu1 %v18370_v32  ;;  %15121 = vmatprep.mubr.bf16.mxu1 %v13591_v63  ;;  %v5797_v32 = vsel %vm17763_vm14, %v18406_v6, %v5796_v45  ;;  %v2671_v52 = vsel %vm17763_vm14, %v13403_v8, %v2670_v11  ;;  %v16571_v6 = vld [vmem:[#allocation7 + $0x1b8] sm:$0xff]   ;;  %v5808_v45 = vsel %vm17763_vm14, %v13587_v46, %v5807_v48  ;;  %v16584_v63 = vld [vmem:[#allocation7 + $0x1d0] sm:$0xff]   ;;  %v18489_v48 = vld [vmem:[#allocation2 + $0x1c] sm:$0xf]  ;;  %v3172_v11 = vshll.u32 %v18491_v15, 16 }
 0x19f   : > { %15135 = vmatprep.subr.bf16.mxu1 %v16560_v4  ;;  %v13593_v2 = vcombine.low %v5794_v17, %v5797_v32  ;;  %v13411_v61 = vcombine.low %v2671_v52, %v2674_v18  ;;  %v13594_v35 = vcombine.low %v5801_v12, %v5804_v31  ;;  %v5818_v37 = vsel %vm17763_vm14, %v5816_v28, %v5817_v26  ;;  %v16583_v46 = vld [vmem:[#allocation2 + $0x3c] sm:$0xff]   ;;  %v16577_v22 = vld [vmem:[#allocation2 + $0x84] sm:$0xff]  }
 0x1a0   : > { %14852 = vmatpush3.bf16.msra.mxu0 %v16563_v25  ;;  %v5811_v25 = vsel %vm17763_vm14, %v5809_v57, %v5810_v53  ;;  %v13596_v10 = vcombine.low %v5815_v21, %v5818_v37  ;;  %363 = vst [vmem:[#allocation2 + $0xcc] sm:$0x1] %v362_v30  ;;  %v3162_v56 = vshll.u32 %v18489_v48, 16  ;;  %v3166_v53 = vshrl.u32 %v18489_v48, 16  ;;  %v18498_v58 = vld [vmem:[#allocation2 + $0x80] sm:$0x1] }
 0x1a1   : > { %14853 = vmatprep.subr.bf16.mxu0 %v16565_v33  ;;  %v13595_v7 = vcombine.low %v5808_v45, %v5811_v25  ;;  %v6295_v8 = vshrl.u32 %v6270_v29, 16  ;;  %v3155_v50 = vrot.slane %v3153_v23, 4  ;;  %v3131_v40 = vld [vmem:[#allocation2 + $0x24] sm:$0xf]  ;;  %v3174_v19 = vrot.slane %v3172_v11, 5  ;;  %v16580_v26 = vld [vmem:[#allocation7 + $0x1c8] sm:$0xff]  }
 0x1a2   : > { %15136 = vmatpush3.bf16.msra.mxu1 %v16560_v4  ;;  %v16574_v4 = vld [vmem:[#allocation2 + $0x78] sm:$0xff]   ;;  %v3164_v36 = vrot.slane %v3162_v56, 5  ;;  %v3168_v60 = vrot.slane %v3166_v53, 4  ;;  %v6304_v28 = vshll.u32 %v18496_v44, 16  ;;  %v16592_v45 = vld [vmem:[#allocation7 + $0x1e0] sm:$0xff]  }
 0x1a3   : > { %14838 = vmatmul.mubr.bf16.gmra.mrb[8].mxu0 %v13409_v27  ;;  %15137 = vmatprep.subr.bf16.mxu1 %v16562_v5  ;;  %v16589_v27 = vld [vmem:[#allocation2 + $0x48] sm:$0xff]  }
 0x1a4   : > { %14841 = vmatprep.mubr.bf16.mxu0 %v13410_v59  ;;  %14854 = vmatpush3.bf16.msra.mxu0 %v16565_v33  ;;  %v3156_v33 = vshll.u32 %v3128_v54, 16  ;;  %v6298_v59 = vshll.u32 %v6270_v29, 16  ;;  %v3169_v32 = vor.u32 %v3168_v60, %v3164_v36  ;;  %v6306_v18 = vrot.slane %v6304_v28, 5  ;;  %v18513_v9 = vld [vmem:[#allocation2 + $0x88] sm:$0xf]  ;;  %v16585_v54 = vld [vmem:[#allocation2 + $0x9c] sm:$0xff]  }
 0x1a5   : > { %14855 = vmatprep.subr.bf16.mxu0 %v16567_v62  ;;  %15122 = vmatmul.mubr.bf16.gmra.mrb[4].mxu1 %v13592_v55  ;;  %v6308_v55 = vshrl.u32 %v18496_v44, 16  ;;  %v16590_v29 = vld [vmem:[#allocation2 + $0xa8] sm:$0xff]  }
 0x1a6   : > { %15138 = vmatpush3.bf16.msra.mxu1 %v16562_v5  ;;  %15125 = vmatprep.mubr.bf16.mxu1 %v13593_v2  ;;  %v3158_v57 = vrot.slane %v3156_v33, 5  ;;  %v16587_v5 = vld [vmem:[#allocation7 + $0x1d8] sm:$0xff]   ;;  %v6300_v52 = vrot.slane %v6298_v59, 5  ;;  %v3170_v12 = vrot.slane %v3169_v32, 4  ;;  %v3134_v59 = vld [vmem:[#allocation2 + $0x30] sm:$0xf] }
 0x1a7   : > { %15139 = vmatprep.subr.bf16.mxu1 %v16564_v34  ;;  %v18503_v2 = vld [vmem:[#allocation2 + $0x28] sm:$0xf]  ;;  %v6310_v31 = vrot.slane %v6308_v55, 4  ;;  %v18535_v55 = vld [vmem:[#allocation2 + $0x34] sm:$0xf] }
 0x1a8   : > { %14856 = vmatpush3.bf16.msra.mxu0 %v16567_v62  ;;  %v6297_v62 = vrot.slane %v6295_v8, 4  ;;  %v3159_v17 = vor.u32 %v3158_v57, %v3155_v50  ;;  %v3175_v37 = vsel %vm17309_vm11, %v3170_v12, %v3174_v19  ;;  %v6328_v50 = vshll.u32 %v18513_v9, 16  ;;  %v16588_v57 = vld [vmem:[#allocation7 + $0x1d8] sm:$0xff]  }
 0x1a9   : > { %14857 = vmatprep.subr.bf16.mxu0 %v16569_v39 }
 0x1aa   : > { %15140 = vmatpush3.bf16.msra.mxu1 %v16564_v34  ;;  %v6314_v34 = vshll.u32 %v18498_v58, 16  ;;  %v6301_v25 = vor.u32 %v6300_v52, %v6297_v62  ;;  %v18531_v62 = vrot.slane %v6328_v50, 5  ;;  %v18557_v50 = vld [vmem:[#allocation2 + $0x40] sm:$0xf] }
 0x1ab   : > { %14842 = vmatmul.mubr.bf16.gmra.mrb[12].mxu0 %v13411_v61  ;;  %15141 = vmatprep.subr.bf16.mxu1 %v16566_v14  ;;  %v3160_v61 = vrot.slane %v3159_v17, 4  ;;  %v6332_v17 = vshrl.u32 %v18513_v9, 16 }
 0x1ac   : > { %14861 = vmatprep.mubr.bf16.mxu0 %v16573_v24  ;;  %14858 = vmatpush3.bf16.msra.mxu0 %v16569_v39  ;;  %v18505_v39 = vld [vmem:[#allocation2 + $0x2c] sm:$0x1]  ;;  %v3177_v24 = vshrl.u32 %v3131_v40, 16  ;;  %v6302_v30 = vrot.slane %v6301_v25, 4  ;;  %v6276_v25 = vld [vmem:[#allocation2 + $0x90] sm:$0xf] }
 0x1ad   : > { %14859 = vmatprep.subr.bf16.mxu0 %v16571_v6  ;;  %15126 = vmatmul.mubr.bf16.gmra.mrb[8].mxu1 %v13594_v35  ;;  %v3165_v21 = vsel %vm17309_vm11, %v3160_v61, %v3164_v36  ;;  %v3196_v56 = vshll.u32 %v18505_v39, 16  ;;  %v3214_v61 = vshrl.u32 %v18535_v55, 16 }
 0x1ae   : > { %15142 = vmatpush3.bf16.msra.mxu1 %v16566_v14  ;;  %15129 = vmatprep.mubr.bf16.mxu1 %v13595_v7  ;;  %v3180_v14 = vshll.u32 %v3131_v40, 16  ;;  %v3179_v35 = vrot.slane %v3177_v24, 4  ;;  %v3186_v7 = vshll.u32 %v18503_v2, 16  ;;  %v6307_v11 = vsel %vm17309_vm11, %v6302_v30, %v6306_v18 }
 0x1af   : > { %15143 = vmatprep.subr.bf16.mxu1 %v16568_v47  ;;  %v3198_v40 = vrot.slane %v3196_v56, 5  ;;  %v3204_v24 = vshll.u32 %v3134_v59, 16  ;;  %v6346_v56 = vshll.u32 %v6276_v25, 16 }
 0x1b0   : > { %14860 = vmatpush3.bf16.msra.mxu0 %v16571_v6  ;;  %v6316_v6 = vrot.slane %v6314_v34, 5  ;;  %v16600_v34 = vld [vmem:[#allocation7 + $0x1f0] sm:$0xff]  }
 0x1b1   : > { %14877 = vmatprep.subr.bf16.mxu0 %v16576_v41 }
 0x1b2   : > { %15144 = vmatpush3.bf16.msra.mxu1 %v16568_v47  ;;  %v3182_v47 = vrot.slane %v3180_v14, 5  ;;  %v3210_v14 = vshll.u32 %v18535_v55, 16 }
 0x1b3   : > { %14862 = vmatmul.mubr.bf16.vlgmr.msra.gmra.mrb[0].mxu0 %v16575_v20  ;;  %15145 = vmatprep.subr.bf16.mxu1 %v16570_v3  ;;  %v6311_v20 = vor.u32 %v6310_v31, %v6306_v18  ;;  %v18538_v18 = vld [vmem:[#allocation2 + $0x38] sm:$0x1]  ;;  %v6334_v31 = vrot.slane %v6332_v17, 4 }
 0x1b4   : > { %14878 = vmatpush3.bf16.msra.mxu0 %v16576_v41  ;;  %14865 = vmatprep.mubr.bf16.mxu0 %v16581_v13  ;;  %v16586_v41 = vld [vmem:[#allocation7 + $0x1d0] sm:$0xff]  }
 0x1b5   : > { %14879 = vmatprep.subr.bf16.mxu0 %v16579_v0  ;;  %15130 = vmatmul.mubr.bf16.gmra.mrb[12].mxu1 %v13596_v10  ;;  %v6273_v13 = vld [vmem:[#allocation2 + $0x84] sm:$0xf]  ;;  %v18515_v10 = vld [vmem:[#allocation7 + $0x1e8] sm:$0xff]   ;;  %v6312_v23 = vrot.slane %v6311_v20, 4  ;;  %v6335_v30 = vor.u32 %v6334_v31, %v18531_v62 }
 0x1b6   : > { %15146 = vmatpush3.bf16.msra.mxu1 %v16570_v3  ;;  %15149 = vmatprep.mubr.bf16.mxu1 %v16574_v4  ;;  %v16591_v3 = vld [vmem:[#allocation2 + $0x54] sm:$0xff]   ;;  %v3183_v4 = vor.u32 %v3182_v47, %v3179_v35  ;;  %v6319_v53 = vshrl.u32 %v6273_v13, 16  ;;  %v16599_v35 = vld [vmem:[#allocation2 + $0x6c] sm:$0xff]  }
 0x1b7   : > { %15147 = vmatprep.subr.bf16.mxu1 %v16572_v42  ;;  %v6317_v36 = vsel %vm17309_vm11, %v6312_v23, %v6316_v6  ;;  %v16593_v20 = vld [vmem:[#allocation2 + $0xb4] sm:$0xff]  }
 0x1b8   : > { %14880 = vmatpush3.bf16.msra.mxu0 %v16579_v0  ;;  %v3190_v0 = vshrl.u32 %v18503_v2, 16  ;;  %v3184_v8 = vrot.slane %v3183_v4, 4  ;;  %v3216_v4 = vrot.slane %v3214_v61, 4 }
 0x1b9   : > { %14881 = vmatprep.subr.bf16.mxu0 %v16584_v63 }
 0x1ba   : > { %15148 = vmatpush3.bf16.msra.mxu1 %v16572_v42  ;;  %v18517_v42 = vcombine.low %v3165_v21, %v3175_v37  ;;  %v3192_v33 = vrot.slane %v3190_v0, 4  ;;  %v3212_v21 = vrot.slane %v3210_v14, 5  ;;  %v18546_v37 = vld [vmem:[#allocation2 + $0x94] sm:$0xf]  ;;  %v16602_v14 = vld [vmem:[#allocation7 + $0x1f0] sm:$0xff]  }
 0x1bb   : > { %14866 = vmatmul.mubr.bf16.gmra.mrb[4].mxu0 %v16583_v46  ;;  %15165 = vmatprep.subr.bf16.mxu1 %v16578_v43  ;;  %v18519_v46 = vld [vmem:[#allocation2 + $0x8c] sm:$0x1]  ;;  %v16594_v0 = vld [vmem:[#allocation7 + $0x1e0] sm:$0xff]  }
 0x1bc   : > { %14882 = vmatpush3.bf16.msra.mxu0 %v16584_v63  ;;  %14869 = vmatprep.mubr.bf16.mxu0 %v16589_v27  ;;  %v3188_v63 = vrot.slane %v3186_v7, 5  ;;  %v6338_v32 = vshll.u32 %v18519_v46, 16 }
 0x1bd   : > { %14883 = vmatprep.subr.bf16.mxu0 %v16587_v5  ;;  %15150 = vmatmul.mubr.bf16.vlgmr.msra.gmra.mrb[0].mxu1 %v16577_v22  ;;  %v6322_v22 = vshll.u32 %v6273_v13, 16  ;;  %v16603_v13 = vld [vmem:[#allocation7 + $0x1f8] sm:$0xff]  }
 0x1be   : > { %15166 = vmatpush3.bf16.msra.mxu1 %v16578_v43  ;;  %15153 = vmatprep.mubr.bf16.mxu1 %v16582_v1  ;;  %v16597_v43 = vld [vmem:[#allocation2 + $0x60] sm:$0xff]   ;;  %v3193_v60 = vor.u32 %v3192_v33, %v3188_v63  ;;  %v6321_v1 = vrot.slane %v6319_v53, 4  ;;  %v3189_v27 = vsel %vm17309_vm11, %v3184_v8, %v3188_v63  ;;  %v6340_v6 = vrot.slane %v6338_v32, 5  ;;  %v18554_v33 = vld [vmem:[#allocation2 + $0x98] sm:$0x1] }
 0x1bf   : > { %15167 = vmatprep.subr.bf16.mxu1 %v16580_v26  ;;  %v6324_v19 = vrot.slane %v6322_v22, 5  ;;  %v6343_v63 = vshrl.u32 %v6276_v25, 16  ;;  %v6352_v53 = vshll.u32 %v18546_v37, 16 }
 0x1c0   : > { %14884 = vmatpush3.bf16.msra.mxu0 %v16587_v5  ;;  %v18527_v5 = vcombine.low %v6307_v11, %v6317_v36  ;;  %v3194_v28 = vrot.slane %v3193_v60, 4  ;;  %v3217_v11 = vor.u32 %v3216_v4, %v3212_v21  ;;  %v6348_v60 = vrot.slane %v6346_v56, 5  ;;  %v16601_v56 = vld [vmem:[#allocation2 + $0xcc] sm:$0xff]  }
 0x1c1   : > { %14885 = vmatprep.subr.bf16.mxu0 %v16592_v45  ;;  %v6325_v52 = vor.u32 %v6324_v19, %v6321_v1  ;;  %v6345_v22 = vrot.slane %v6343_v63, 4  ;;  %v6356_v1 = vshrl.u32 %v18546_v37, 16 }
 0x1c2   : > { %15168 = vmatpush3.bf16.msra.mxu1 %v16580_v26  ;;  %v3201_v26 = vshrl.u32 %v3134_v59, 16  ;;  %v3199_v12 = vsel %vm17309_vm11, %v3194_v28, %v3198_v40  ;;  %v6354_v40 = vrot.slane %v6352_v53, 5  ;;  %v6362_v59 = vshll.u32 %v18554_v33, 16 }
 0x1c3   : > { %14870 = vmatmul.mubr.bf16.gmra.mrb[8].mxu0 %v16591_v3  ;;  %15169 = vmatprep.subr.bf16.mxu1 %v16586_v41  ;;  %v18544_v47 = vcombine.low %v3189_v27, %v3199_v12  ;;  %v6326_v7 = vrot.slane %v6325_v52, 4  ;;  %v3206_v3 = vrot.slane %v3204_v24, 5  ;;  %v16596_v27 = vld [vmem:[#allocation7 + $0x1e8] sm:$0xff]   ;;  %v6358_v52 = vrot.slane %v6356_v1, 4  ;;  %v18568_v24 = vld [vmem:[#allocation2 + $0x44] sm:$0x1] }
 0x1c4   : > { %14886 = vmatpush3.bf16.msra.mxu0 %v16592_v45  ;;  %14873 = vmatprep.mubr.bf16.mxu0 %v16597_v43  ;;  %v3203_v45 = vrot.slane %v3201_v26, 4  ;;  %v6336_v43 = vrot.slane %v6335_v30, 4  ;;  %v6349_v26 = vor.u32 %v6348_v60, %v6345_v22  ;;  %v6364_v12 = vrot.slane %v6362_v59, 5 }
 0x1c5   : > { %14887 = vmatprep.subr.bf16.mxu0 %v18515_v10  ;;  %15154 = vmatmul.mubr.bf16.gmra.mrb[4].mxu1 %v16585_v54  ;;  %v6331_v54 = vsel %vm17309_vm11, %v6326_v7, %v18531_v62  ;;  %v3218_v62 = vrot.slane %v3217_v11, 4  ;;  %v3234_v7 = vshll.u32 %v18557_v50, 16  ;;  %v3244_v30 = vshll.u32 %v18568_v24, 16 }
 0x1c6   : > { %15170 = vmatpush3.bf16.msra.mxu1 %v16586_v41  ;;  %15157 = vmatprep.mubr.bf16.mxu1 %v16590_v29  ;;  %v3220_v41 = vshll.u32 %v18538_v18, 16  ;;  %v3207_v23 = vor.u32 %v3206_v3, %v3203_v45  ;;  %v3137_v29 = vld [vmem:[#allocation2 + $0x3c] sm:$0xf]  ;;  %v6341_v19 = vsel %vm17309_vm11, %v6336_v43, %v6340_v6  ;;  %v6350_v25 = vrot.slane %v6349_v26, 4  ;;  %v18575_v3 = vld [vmem:[#allocation2 + $0xa4] sm:$0x1] }
 0x1c7   : > { %15171 = vmatprep.subr.bf16.mxu1 %v16588_v57  ;;  %v3225_v28 = vshrl.u32 %v3137_v29, 16  ;;  %v18564_v17 = vcombine.low %v6331_v54, %v6341_v19  ;;  %v3228_v6 = vshll.u32 %v3137_v29, 16  ;;  %v3236_v54 = vrot.slane %v3234_v7, 5  ;;  %v18591_v26 = vld [vmem:[#allocation2 + $0x50] sm:$0x1] }
 0x1c8   : > { %14888 = vmatpush3.bf16.msra.mxu0 %v18515_v10  ;;  %v16598_v10 = vld [vmem:[#allocation2 + $0xc0] sm:$0xff]   ;;  %v3222_v8 = vrot.slane %v3220_v41, 5  ;;  %v3208_v36 = vrot.slane %v3207_v23, 4  ;;  %v16607_v41 = vld [vmem:[#allocation7 + $0x208] sm:$0xff]   ;;  %v6386_v19 = vshll.u32 %v18575_v3, 16  ;;  %v16606_v7 = vld [vmem:[#allocation7 + $0x200] sm:$0xff]  }
 0x1c9   : > { %14889 = vmatprep.subr.bf16.mxu0 %v16600_v34  ;;  %v3227_v31 = vrot.slane %v3225_v28, 4 }
 0x1ca   : > { %15172 = vmatpush3.bf16.msra.mxu1 %v16588_v57  ;;  %v16605_v57 = vld [vmem:[#allocation7 + $0x200] sm:$0xff]   ;;  %v3213_v32 = vsel %vm17309_vm11, %v3208_v36, %v3212_v21  ;;  %v3223_v61 = vsel %vm17309_vm11, %v3218_v62, %v3222_v8  ;;  %v3230_v21 = vrot.slane %v3228_v6, 5  ;;  %v18589_v62 = vld [vmem:[#allocation2 + $0x4c] sm:$0xf] }
 0x1cb   : > { %14874 = vmatmul.mubr.bf16.gmra.mrb[12].mxu0 %v16599_v35  ;;  %15173 = vmatprep.subr.bf16.mxu1 %v16594_v0  ;;  %v13438_v45 = vcombine.low %v3213_v32, %v3223_v61  ;;  %v6359_v35 = vor.u32 %v6358_v52, %v6354_v40  ;;  %v6388_v61 = vrot.slane %v6386_v19, 5 }
 0x1cc   : > { %14890 = vmatpush3.bf16.msra.mxu0 %v16600_v34  ;;  %14893 = vmatprep.mubr.bf16.mxu0 %v18517_v42  ;;  %v6279_v34 = vld [vmem:[#allocation2 + $0x9c] sm:$0xf]  ;;  %v18572_v42 = vld [vmem:[#allocation2 + $0xa0] sm:$0xf]  ;;  %v3231_v53 = vor.u32 %v3230_v21, %v3227_v31 }
 0x1cd   : > { %14891 = vmatprep.subr.bf16.mxu0 %v16603_v13  ;;  %15158 = vmatmul.mubr.bf16.gmra.mrb[8].mxu1 %v16593_v20  ;;  %v3238_v20 = vshrl.u32 %v18557_v50, 16  ;;  %v6367_v4 = vshrl.u32 %v6279_v34, 16  ;;  %v6360_v63 = vrot.slane %v6359_v35, 4  ;;  %v6370_v23 = vshll.u32 %v6279_v34, 16  ;;  %v6282_v35 = vld [vmem:[#allocation2 + $0xa8] sm:$0xf] }
 0x1ce   : > { %15174 = vmatpush3.bf16.msra.mxu1 %v16594_v0  ;;  %15161 = vmatprep.mubr.bf16.mxu1 %v16598_v10  ;;  %v6355_v0 = vsel %vm17309_vm11, %v6350_v25, %v6354_v40  ;;  %v3246_v10 = vrot.slane %v3244_v30, 5  ;;  %v6376_v22 = vshll.u32 %v18572_v42, 16  ;;  %v6380_v36 = vshrl.u32 %v18572_v42, 16 }
 0x1cf   : > { %15175 = vmatprep.subr.bf16.mxu1 %v16596_v27  ;;  %v3240_v29 = vrot.slane %v3238_v20, 4  ;;  %v6369_v43 = vrot.slane %v6367_v4, 4  ;;  %v6365_v11 = vsel %vm17309_vm11, %v6360_v63, %v6364_v12  ;;  %v6372_v8 = vrot.slane %v6370_v23, 5 }
 0x1d0   : > { %14892 = vmatpush3.bf16.msra.mxu0 %v16603_v13  ;;  %v16604_v13 = vld [vmem:[#allocation7 + $0x1f8] sm:$0xff]   ;;  %v18586_v60 = vcombine.low %v6355_v0, %v6365_v11  ;;  %v3232_v40 = vrot.slane %v3231_v53, 4  ;;  %v6378_v28 = vrot.slane %v6376_v22, 5  ;;  %v6382_v32 = vrot.slane %v6380_v36, 4  ;;  %v3143_v11 = vld [vmem:[#allocation2 + $0x54] sm:$0xf] }
 0x1d1   : > { %14909 = vmatprep.subr.bf16.mxu0 %v16605_v57  ;;  %v3241_v1 = vor.u32 %v3240_v29, %v3236_v54  ;;  %v6373_v59 = vor.u32 %v6372_v8, %v6369_v43  ;;  %v3258_v25 = vshll.u32 %v18589_v62, 16  ;;  %v3262_v30 = vshrl.u32 %v18589_v62, 16 }
 0x1d2   : > { %15176 = vmatpush3.bf16.msra.mxu1 %v16596_v27  ;;  %v3140_v27 = vld [vmem:[#allocation2 + $0x48] sm:$0xf]  ;;  %v6383_v6 = vor.u32 %v6382_v32, %v6378_v28  ;;  %v3268_v4 = vshll.u32 %v18591_v26, 16  ;;  %v6391_v43 = vshrl.u32 %v6282_v35, 16  ;;  %v6394_v22 = vshll.u32 %v6282_v35, 16 }
 0x1d3   : > { %14894 = vmatmul.mubr.bf16.vlgmr.msra.gmra.mrb[0].mxu0 %v18544_v47  ;;  %15177 = vmatprep.subr.bf16.mxu1 %v16602_v14  ;;  %v16609_v47 = vld [vmem:[#allocation7 + $0x210] sm:$0xff]   ;;  %v3249_v52 = vshrl.u32 %v3140_v27, 16  ;;  %v3242_v34 = vrot.slane %v3241_v1, 4  ;;  %v3252_v12 = vshll.u32 %v3140_v27, 16  ;;  %v6374_v31 = vrot.slane %v6373_v59, 4  ;;  %v16613_v1 = vld [vmem:[#allocation7 + $0x220] sm:$0xff]  }
 0x1d4   : > { %14910 = vmatpush3.bf16.msra.mxu0 %v16605_v57  ;;  %14897 = vmatprep.mubr.bf16.mxu0 %v13438_v45  ;;  %v3237_v57 = vsel %vm17309_vm11, %v3232_v40, %v3236_v54  ;;  %v6384_v63 = vrot.slane %v6383_v6, 4  ;;  %v16611_v54 = vld [vmem:[#allocation7 + $0x218] sm:$0xff]   ;;  %v3260_v23 = vrot.slane %v3258_v25, 5  ;;  %v3264_v29 = vrot.slane %v3262_v30, 4  ;;  %v18613_v32 = vld [vmem:[#allocation2 + $0x58] sm:$0xf] }
 0x1d5   : > { %14911 = vmatprep.subr.bf16.mxu0 %v16607_v41  ;;  %15162 = vmatmul.mubr.bf16.gmra.mrb[12].mxu1 %v16601_v56  ;;  %v3251_v45 = vrot.slane %v3249_v52, 4  ;;  %v3247_v21 = vsel %vm17309_vm11, %v3242_v34, %v3246_v10  ;;  %v3254_v20 = vrot.slane %v3252_v12, 5  ;;  %v6379_v0 = vsel %vm17309_vm11, %v6374_v31, %v6378_v28  ;;  %v18605_v56 = vld [vmem:[#allocation2 + $0xb0] sm:$0x1]  ;;  %v6285_v12 = vld [vmem:[#allocation2 + $0xb4] sm:$0xf] }
 0x1d6   : > { %15178 = vmatpush3.bf16.msra.mxu1 %v16602_v14  ;;  %15181 = vmatprep.mubr.bf16.mxu1 %v18527_v5  ;;  %v18601_v14 = vld [vmem:[#allocation2 + $0xac] sm:$0xf]  ;;  %v13439_v5 = vcombine.low %v3237_v57, %v3247_v21  ;;  %v3270_v10 = vrot.slane %v3268_v4, 5  ;;  %v6389_v8 = vsel %vm17309_vm11, %v6384_v63, %v6388_v61  ;;  %v3265_v59 = vor.u32 %v3264_v29, %v3260_v23  ;;  %v18616_v61 = vld [vmem:[#allocation2 + $0x5c] sm:$0x1]  ;;  %v16610_v4 = vld [vmem:[#allocation7 + $0x210] sm:$0xff]  }
 0x1d7   : > { %15179 = vmatprep.subr.bf16.mxu1 %v16604_v13  ;;  %v3255_v53 = vor.u32 %v3254_v20, %v3251_v45  ;;  %v6400_v36 = vshll.u32 %v18601_v14, 16  ;;  %v6404_v40 = vshrl.u32 %v18601_v14, 16  ;;  %v18611_v19 = vcombine.low %v6379_v0, %v6389_v8  ;;  %v18621_v25 = vld [vmem:[#allocation2 + $0xb8] sm:$0xf] }
 0x1d8   : > { %14912 = vmatpush3.bf16.msra.mxu0 %v16607_v41  ;;  %v16608_v41 = vld [vmem:[#allocation7 + $0x208] sm:$0xff]   ;;  %v6393_v28 = vrot.slane %v6391_v43, 4  ;;  %v6410_v34 = vshll.u32 %v18605_v56, 16  ;;  %v3273_v6 = vshrl.u32 %v3143_v11, 16  ;;  %v3276_v45 = vshll.u32 %v3143_v11, 16 }
 0x1d9   : > { %14913 = vmatprep.subr.bf16.mxu0 %v16609_v47  ;;  %v3256_v27 = vrot.slane %v3255_v53, 4  ;;  %v6402_v52 = vrot.slane %v6400_v36, 5  ;;  %v6406_v57 = vrot.slane %v6404_v40, 4  ;;  %v3282_v30 = vshll.u32 %v18613_v32, 16  ;;  %v16615_v43 = vld [vmem:[#allocation7 + $0x228] sm:$0xff]  }
 0x1da   : > { %15180 = vmatpush3.bf16.msra.mxu1 %v16604_v13  ;;  %v6396_v13 = vrot.slane %v6394_v22, 5  ;;  %v6412_v20 = vrot.slane %v6410_v34, 5  ;;  %v3278_v0 = vrot.slane %v3276_v45, 5  ;;  %v3286_v63 = vshrl.u32 %v18613_v32, 16 }
 0x1db   : > { %14898 = vmatmul.mubr.bf16.gmra.mrb[4].mxu0 %v13439_v5  ;;  %15197 = vmatprep.subr.bf16.mxu1 %v16606_v7  ;;  %v3261_v31 = vsel %vm17309_vm11, %v3256_v27, %v3260_v23  ;;  %v6407_v21 = vor.u32 %v6406_v57, %v6402_v52  ;;  %v3275_v5 = vrot.slane %v3273_v6, 4  ;;  %v3284_v29 = vrot.slane %v3282_v30, 5  ;;  %v18643_v30 = vld [vmem:[#allocation2 + $0x68] sm:$0x1] }
 0x1dc   : > { %14914 = vmatpush3.bf16.msra.mxu0 %v16609_v47  ;;  %v3266_v47 = vrot.slane %v3265_v59, 4  ;;  %v6397_v35 = vor.u32 %v6396_v13, %v6393_v28  ;;  %v3288_v8 = vrot.slane %v3286_v63, 4  ;;  %v3292_v22 = vshll.u32 %v18616_v61, 16  ;;  %v3146_v59 = vld [vmem:[#allocation2 + $0x60] sm:$0xf]  ;;  %v16612_v28 = vld [vmem:[#allocation7 + $0x218] sm:$0xff]  }
 0x1dd   : > { %14915 = vmatprep.subr.bf16.mxu0 %v16611_v54  ;;  %15182 = vmatmul.mubr.bf16.vlgmr.msra.gmra.mrb[0].mxu1 %v18564_v17  ;;  %v3279_v11 = vor.u32 %v3278_v0, %v3275_v5  ;;  %v6418_v40 = vshll.u32 %v6285_v12, 16  ;;  %v6424_v27 = vshll.u32 %v18621_v25, 16  ;;  %v3300_v0 = vshll.u32 %v3146_v59, 16 }
 0x1de   : > { %15198 = vmatpush3.bf16.msra.mxu1 %v16606_v7  ;;  %15185 = vmatprep.mubr.bf16.mxu1 %v18586_v60  ;;  %v3271_v17 = vsel %vm17309_vm11, %v3266_v47, %v3270_v10  ;;  %v6398_v53 = vrot.slane %v6397_v35, 4  ;;  %v6408_v7 = vrot.slane %v6407_v21, 4  ;;  %v18628_v60 = vld [vmem:[#allocation2 + $0xbc] sm:$0x1]  ;;  %v3289_v34 = vor.u32 %v3288_v8, %v3284_v29  ;;  %v18636_v47 = vld [vmem:[#allocation2 + $0x64] sm:$0xf] }
 0x1df   : > { %15199 = vmatprep.subr.bf16.mxu1 %v16608_v41  ;;  %v13440_v23 = vcombine.low %v3261_v31, %v3271_v17  ;;  %v3280_v57 = vrot.slane %v3279_v11, 4  ;;  %v3294_v31 = vrot.slane %v3292_v22, 5  ;;  %v6420_v6 = vrot.slane %v6418_v40, 5  ;;  %v16617_v35 = vld [vmem:[#allocation7 + $0x230] sm:$0xff]   ;;  %v16619_v8 = vld [vmem:[#allocation7 + $0x238] sm:$0xff]  }
 0x1e0   : > { %14916 = vmatpush3.bf16.msra.mxu0 %v16611_v54  ;;  %v6415_v54 = vshrl.u32 %v6285_v12, 16  ;;  %v6403_v10 = vsel %vm17309_vm11, %v6398_v53, %v6402_v52  ;;  %v6413_v36 = vsel %vm17309_vm11, %v6408_v7, %v6412_v20  ;;  %v6426_v45 = vrot.slane %v6424_v27, 5  ;;  %v16614_v7 = vld [vmem:[#allocation7 + $0x220] sm:$0xff]   ;;  %v18651_v40 = vld [vmem:[#allocation2 + $0xc8] sm:$0x1] }
 0x1e1   : > { %14917 = vmatprep.subr.bf16.mxu0 %v16613_v1  ;;  %14901 = vmatprep.mubr.bf16.mxu0 %v13440_v23  ;;  %v13625_v13 = vcombine.low %v6403_v10, %v6413_v36  ;;  %v6428_v52 = vshrl.u32 %v18621_v25, 16  ;;  %v3285_v12 = vsel %vm17309_vm11, %v3280_v57, %v3284_v29  ;;  %v3290_v21 = vrot.slane %v3289_v34, 4  ;;  %v6288_v23 = vld [vmem:[#allocation2 + $0xc0] sm:$0xf]  ;;  %v18649_v36 = vld [vmem:[#allocation2 + $0xc4] sm:$0xf] }
 0x1e2   : > { %15200 = vmatpush3.bf16.msra.mxu1 %v16608_v41  ;;  %v6417_v41 = vrot.slane %v6415_v54, 4  ;;  %v6434_v20 = vshll.u32 %v18628_v60, 16  ;;  %v3306_v63 = vshll.u32 %v18636_v47, 16  ;;  %v3310_v11 = vshrl.u32 %v18636_v47, 16 }
 0x1e3   : > { %15201 = vmatprep.subr.bf16.mxu1 %v16610_v4  ;;  %v6430_v5 = vrot.slane %v6428_v52, 4  ;;  %v3302_v10 = vrot.slane %v3300_v0, 5  ;;  %v6439_v57 = vshrl.u32 %v6288_v23, 16  ;;  %v16616_v52 = vld [vmem:[#allocation7 + $0x228] sm:$0xff]  }
 0x1e4   : > { %14918 = vmatpush3.bf16.msra.mxu0 %v16613_v1  ;;  %v3297_v1 = vshrl.u32 %v3146_v59, 16  ;;  %v6421_v17 = vor.u32 %v6420_v6, %v6417_v41  ;;  %v6436_v53 = vrot.slane %v6434_v20, 5  ;;  %v3308_v27 = vrot.slane %v3306_v63, 5  ;;  %v3149_v6 = vld [vmem:[#allocation2 + $0x6c] sm:$0xf] }
 0x1e5   : > { %14919 = vmatprep.subr.bf16.mxu0 %v16615_v43  ;;  %15186 = vmatmul.mubr.bf16.gmra.mrb[4].mxu1 %v18611_v19  ;;  %v3295_v19 = vsel %vm17309_vm11, %v3290_v21, %v3294_v31  ;;  %v6431_v54 = vor.u32 %v6430_v5, %v6426_v45  ;;  %v3312_v59 = vrot.slane %v3310_v11, 4  ;;  %v6442_v41 = vshll.u32 %v6288_v23, 16  ;;  %v18662_v63 = vld [vmem:[#allocation2 + $0x74] sm:$0x1] }
 0x1e6   : > { %15202 = vmatpush3.bf16.msra.mxu1 %v16610_v4  ;;  %15189 = vmatprep.mubr.bf16.mxu1 %v13625_v13  ;;  %v3299_v29 = vrot.slane %v3297_v1, 4  ;;  %v13441_v22 = vcombine.low %v3285_v12, %v3295_v19  ;;  %v6422_v4 = vrot.slane %v6421_v17, 4  ;;  %v3316_v13 = vshll.u32 %v18643_v30, 16  ;;  %v18657_v17 = vld [vmem:[#allocation2 + $0x70] sm:$0xf] }
 0x1e7   : > { %15203 = vmatprep.subr.bf16.mxu1 %v16612_v28  ;;  %v6432_v34 = vrot.slane %v6431_v54, 4  ;;  %v3313_v12 = vor.u32 %v3312_v59, %v3308_v27  ;;  %v6441_v20 = vrot.slane %v6439_v57, 4  ;;  %v6448_v1 = vshll.u32 %v18649_v36, 16 }
 0x1e8   : > { %14920 = vmatpush3.bf16.msra.mxu0 %v16615_v43  ;;  %v6427_v43 = vsel %vm17309_vm11, %v6422_v4, %v6426_v45  ;;  %v3303_v31 = vor.u32 %v3302_v10, %v3299_v29  ;;  %v3318_v21 = vrot.slane %v3316_v13, 5  ;;  %v6444_v0 = vrot.slane %v6442_v41, 5  ;;  %v6291_v4 = vld [vmem:[#allocation2 + $0xcc] sm:$0xf] }
 0x1e9   : > { %14921 = vmatprep.subr.bf16.mxu0 %v16617_v35  ;;  %14902 = vmatmul.mubr.bf16.gmra.mrb[8].mxu0 %v13441_v22  ;;  %v6452_v45 = vshrl.u32 %v18649_v36, 16  ;;  %v3314_v19 = vrot.slane %v3313_v12, 4  ;;  %v6450_v29 = vrot.slane %v6448_v1, 5  ;;  %v6458_v11 = vshll.u32 %v18651_v40, 16  ;;  %v417_v22 = vld [vmem:[#allocation2 + $0xd4] sm:$0x1] }
 0x1ea   : > { %15204 = vmatpush3.bf16.msra.mxu1 %v16612_v28  ;;  %v6437_v28 = vsel %vm17309_vm11, %v6432_v34, %v6436_v53  ;;  %v3304_v5 = vrot.slane %v3303_v31, 4  ;;  %v6445_v54 = vor.u32 %v6444_v0, %v6441_v20  ;;  %v3321_v10 = vshrl.u32 %v3149_v6, 16  ;;  %v16618_v34 = vld [vmem:[#allocation7 + $0x230] sm:$0xff]  }
 0x1eb   : > { %15205 = vmatprep.subr.bf16.mxu1 %v16614_v7  ;;  %v13626_v23 = vcombine.low %v6427_v43, %v6437_v28  ;;  %v6454_v53 = vrot.slane %v6452_v45, 4  ;;  %v3319_v59 = vsel %vm17309_vm11, %v3314_v19, %v3318_v21  ;;  %v6460_v13 = vrot.slane %v6458_v11, 5 }
 0x1ec   : > { %14922 = vmatpush3.bf16.msra.mxu0 %v16617_v35  ;;  %v3309_v35 = vsel %vm17309_vm11, %v3304_v5, %v3308_v27  ;;  %v3324_v57 = vshll.u32 %v3149_v6, 16  ;;  %v3330_v43 = vshll.u32 %v18657_v17, 16  ;;  %v6446_v41 = vrot.slane %v6445_v54, 4  ;;  %v18672_v5 = vld [vmem:[#allocation2 + $0xd0] sm:$0xf] }
 0x1ed   : > { %14923 = vmatprep.subr.bf16.mxu0 %v16619_v8  ;;  %15190 = vmatmul.mubr.bf16.gmra.mrb[8].mxu1 %v13626_v23  ;;  %v13442_v31 = vcombine.low %v3309_v35, %v3319_v59  ;;  %v6455_v12 = vor.u32 %v6454_v53, %v6450_v29  ;;  %v3334_v20 = vshrl.u32 %v18657_v17, 16  ;;  %v3340_v28 = vshll.u32 %v18662_v63, 16  ;;  %v16620_v35 = vld [vmem:[#allocation7 + $0x238] sm:$0xff]   ;;  %v3554_v54 = vld [vmem:[#allocation2 + $0x18] sm:$0xe] }
 0x1ee   : > { %15206 = vmatpush3.bf16.msra.mxu1 %v16614_v7  ;;  %v3323_v7 = vrot.slane %v3321_v10, 4  ;;  %v3326_v1 = vrot.slane %v3324_v57, 5  ;;  %v3332_v27 = vrot.slane %v3330_v43, 5  ;;  %v6451_v6 = vsel %vm17309_vm11, %v6446_v41, %v6450_v29 }
 0x1ef   : > { %15207 = vmatprep.subr.bf16.mxu1 %v16616_v52  ;;  %14905 = vmatprep.mubr.bf16.mxu0 %v13442_v31  ;;  %v6456_v21 = vrot.slane %v6455_v12, 4  ;;  %v418_v0 = vsel %vm17264_vm4, 0, %v417_v22  ;;  %v6463_v45 = vshrl.u32 %v6291_v4, 16  ;;  %v3342_v19 = vrot.slane %v3340_v28, 5  ;;  %v6695_v31 = vld [vmem:[#allocation2 + $0x78] sm:$0xe] }
 0x1f0   : > { %14924 = vmatpush3.bf16.msra.mxu0 %v16619_v8  ;;  %v3327_v23 = vor.u32 %v3326_v1, %v3323_v7  ;;  %v3336_v8 = vrot.slane %v3334_v20, 4  ;;  %419 = vst [vmem:[#allocation2 + $0xd4] sm:$0x1] %v418_v0  ;;  %v6466_v11 = vshll.u32 %v6291_v4, 16  ;;  %v6472_v10 = vshll.u32 %v18672_v5, 16 }
 0x1f1   : > { %v6465_v53 = vrot.slane %v6463_v45, 4  ;;  %v6476_v29 = vshrl.u32 %v18672_v5, 16  ;;  %v13452_v4 = vrot.slane %v3554_v54, 9  ;;  %v3588_v7 = vrot.slane %v18489_v48, 5 }
 0x1f2   : > { %15208 = vmatpush3.bf16.msra.mxu1 %v16616_v52  ;;  %v6461_v52 = vsel %vm17309_vm11, %v6456_v21, %v6460_v13  ;;  %v3328_v57 = vrot.slane %v3327_v23, 4  ;;  %v3337_v22 = vor.u32 %v3336_v8, %v3332_v27  ;;  %v6468_v43 = vrot.slane %v6466_v11, 5  ;;  %v6696_v11 = vld [vmem:[#allocation2 + $0x84] sm:$0xe] }
 0x1f3   : > { %15209 = vmatprep.subr.bf16.mxu1 %v16618_v34  ;;  %v13627_v59 = vcombine.low %v6451_v6, %v6461_v52  ;;  %v6474_v41 = vrot.slane %v6472_v10, 5  ;;  %v6478_v12 = vrot.slane %v6476_v29, 4  ;;  %v3591_v28 = vrot.slane %v18491_v15, 5  ;;  %v3555_v6 = vld [vmem:[#allocation2 + $0x24] sm:$0xe] }
 0x1f4   : > { %v3333_v13 = vsel %vm17309_vm11, %v3328_v57, %v3332_v27  ;;  %v3338_v1 = vrot.slane %v3337_v22, 4  ;;  %v6469_v20 = vor.u32 %v6468_v43, %v6465_v53  ;;  %v3589_v0 = vsel %vm17763_vm14, %v13452_v4, %v3588_v7  ;;  %v3556_v10 = vld [vmem:[#allocation2 + $0x30] sm:$0xe] }
 0x1f5   : > { %15193 = vmatprep.mubr.bf16.mxu1 %v13627_v59  ;;  %v6479_v21 = vor.u32 %v6478_v12, %v6474_v41  ;;  %v3590_v45 = vrot.slane %v3588_v7, 4  ;;  %v13637_v23 = vrot.slane %v6695_v31, 9  ;;  %v6729_v8 = vrot.slane %v18496_v44, 5  ;;  %v6697_v31 = vld [vmem:[#allocation2 + $0x90] sm:$0xe] }
 0x1f6   : > { %15210 = vmatpush3.bf16.msra.mxu1 %v16618_v34  ;;  %v3343_v34 = vsel %vm17309_vm11, %v3338_v1, %v3342_v19  ;;  %v6470_v48 = vrot.slane %v6469_v20, 4  ;;  %v6732_v52 = vrot.slane %v18498_v58, 5  ;;  %v13453_v53 = vrot.slane %v3555_v6, 9  ;;  %v3557_v7 = vld [vmem:[#allocation2 + $0x3c] sm:$0xe] }
 0x1f7   : > { %15211 = vmatprep.subr.bf16.mxu1 %v16620_v35  ;;  %v13443_v27 = vcombine.low %v3333_v13, %v3343_v34  ;;  %v18691_v54 = vld [vmem:[#allocation2 + $0xd4] sm:$0x1]  ;;  %v3592_v15 = vsel %vm17763_vm14, %v3590_v45, %v3591_v28  ;;  %v6480_v59 = vrot.slane %v6479_v21, 4  ;;  %v6730_v44 = vsel %vm17763_vm14, %v13637_v23, %v6729_v8  ;;  %v6698_v23 = vld [vmem:[#allocation2 + $0x9c] sm:$0xe] }
 0x1f8   : > { %v6475_v29 = vsel %vm17309_vm11, %v6470_v48, %v6474_v41  ;;  %v6482_v19 = vshll.u32 %v18691_v54, 16  ;;  %v13460_v57 = vcombine.low %v3589_v0, %v3592_v15  ;;  %v6731_v22 = vrot.slane %v6729_v8, 4  ;;  %v3558_v34 = vld [vmem:[#allocation2 + $0x48] sm:$0xe] }
 0x1f9   : > { %14906 = vmatmul.mubr.bf16.gmra.mrb[12].mxu0 %v13443_v27  ;;  %v3598_v43 = vrot.slane %v18505_v39, 5  ;;  %v13638_v12 = vrot.slane %v6696_v11, 9  ;;  %v6736_v4 = vrot.slane %v18513_v9, 5  ;;  %v13454_v41 = vrot.slane %v3556_v10, 9 }
 0x1fa   : > { %15212 = vmatpush3.bf16.msra.mxu1 %v16620_v35  ;;  %v3595_v35 = vrot.slane %v18503_v2, 5  ;;  %v6484_v58 = vrot.slane %v6482_v19, 5  ;;  %14925 = vmatprep.mubr.bf16.mxu0 %v13460_v57  ;;  %v6733_v13 = vsel %vm17763_vm14, %v6731_v22, %v6732_v52  ;;  %v3602_v28 = vrot.slane %v18535_v55, 5 }
 0x1fb   : > { %v13645_v39 = vcombine.low %v6730_v44, %v6733_v13  ;;  %v6738_v6 = vrot.slane %v6736_v4, 4  ;;  %v6739_v21 = vrot.slane %v18519_v46, 5  ;;  %v3605_v55 = vrot.slane %v18538_v18, 5  ;;  %v3559_v44 = vld [vmem:[#allocation2 + $0x54] sm:$0xe] }
 0x1fc   : > { %v3596_v1 = vsel %vm17763_vm14, %v13453_v53, %v3595_v35  ;;  %v3597_v20 = vrot.slane %v3595_v35, 4  ;;  %v6485_v2 = vsel %vm17309_vm11, %v6480_v59, %v6484_v58  ;;  %v3604_v45 = vrot.slane %v3602_v28, 4  ;;  %v6699_v59 = vld [vmem:[#allocation2 + $0xa8] sm:$0xe]  ;;  %v3560_v13 = vld [vmem:[#allocation2 + $0x60] sm:$0xe] }
 0x1fd   : > { %v13628_v0 = vcombine.low %v6475_v29, %v6485_v2  ;;  %v3603_v8 = vsel %vm17763_vm14, %v13454_v41, %v3602_v28  ;;  %v13639_v11 = vrot.slane %v6697_v31, 9  ;;  %v6737_v27 = vsel %vm17763_vm14, %v13638_v12, %v6736_v4 }
 0x1fe   : > { %v3599_v9 = vsel %vm17763_vm14, %v3597_v20, %v3598_v43  ;;  %v6743_v46 = vrot.slane %v18546_v37, 5  ;;  %v6746_v15 = vrot.slane %v18554_v33, 5  ;;  %v13455_v52 = vrot.slane %v3557_v7, 9 }
 0x1ff   : > { %v13461_v48 = vcombine.low %v3596_v1, %v3599_v9  ;;  %15194 = vmatmul.mubr.bf16.gmra.mrb[12].mxu1 %v13628_v0  ;;  %v6740_v53 = vsel %vm17763_vm14, %v6738_v6, %v6739_v21  ;;  %v3606_v10 = vsel %vm17763_vm14, %v3604_v45, %v3605_v55  ;;  %v3609_v29 = vrot.slane %v18557_v50, 5  ;;  %v6700_v9 = vld [vmem:[#allocation2 + $0xb4] sm:$0xe] }
 0x200   : > { %15213 = vmatprep.mubr.bf16.mxu1 %v13645_v39  ;;  %v3612_v18 = vrot.slane %v18568_v24, 5  ;;  %v13462_v19 = vcombine.low %v3603_v8, %v3606_v10  ;;  %v6744_v37 = vsel %vm17763_vm14, %v13639_v11, %v6743_v46  ;;  %v6745_v57 = vrot.slane %v6743_v46, 4  ;;  %v3561_v11 = vld [vmem:[#allocation2 + $0x6c] sm:$0xe] }
 0x201   : > { %14926 = vmatmul.mubr.bf16.vlgmr.msra.gmra.mrb[0].mxu0 %v13461_v48  ;;  %v6750_v33 = vrot.slane %v18572_v42, 5  ;;  %v3610_v22 = vsel %vm17763_vm14, %v13455_v52, %v3609_v29  ;;  %v3611_v35 = vrot.slane %v3609_v29, 4  ;;  %v13640_v43 = vrot.slane %v6698_v23, 9  ;;  %v6702_v10 = vld [vmem:[#allocation2 + $0xcc] sm:$0xe] }
 0x202   : > { %v13456_v31 = vrot.slane %v3558_v34, 9  ;;  %v13646_v58 = vcombine.low %v6737_v27, %v6740_v53  ;;  %14929 = vmatprep.mubr.bf16.mxu0 %v13462_v19  ;;  %v6747_v50 = vsel %vm17763_vm14, %v6745_v57, %v6746_v15  ;;  %v6753_v24 = vrot.slane %v18575_v3, 5  ;;  %v6701_v34 = vld [vmem:[#allocation2 + $0xc0] sm:$0xe]  ;;  %v433_v29 = vld [vmem:[#allocation3 + $0x18] sm:$0x1] }
 0x203   : > { %v3616_v12 = vrot.slane %v18589_v62, 5  ;;  %v13647_v4 = vcombine.low %v6744_v37, %v6747_v50  ;;  %v3613_v42 = vsel %vm17763_vm14, %v3611_v35, %v3612_v18  ;;  %v6752_v41 = vrot.slane %v6750_v33, 4 }
 0x204   : > { %v3619_v7 = vrot.slane %v18591_v26, 5  ;;  %v13463_v1 = vcombine.low %v3610_v22, %v3613_v42  ;;  %v13641_v2 = vrot.slane %v6699_v59, 9  ;;  %v6757_v39 = vrot.slane %v18601_v14, 5 }
 0x205   : > { %v3617_v20 = vsel %vm17763_vm14, %v13456_v31, %v3616_v12  ;;  %v3618_v28 = vrot.slane %v3616_v12, 4  ;;  %v6760_v3 = vrot.slane %v18605_v56, 5  ;;  %v13457_v6 = vrot.slane %v3559_v44, 9 }
 0x206   : > { %v6751_v62 = vsel %vm17763_vm14, %v13640_v43, %v6750_v33  ;;  %v3623_v26 = vrot.slane %v18613_v32, 5  ;;  %v3626_v0 = vrot.slane %v18616_v61, 5  ;;  %v6754_v45 = vsel %vm17763_vm14, %v6752_v41, %v6753_v24 }
 0x207   : > { %15214 = vmatmul.mubr.bf16.vlgmr.msra.gmra.mrb[0].mxu1 %v13646_v58  ;;  %v3620_v21 = vsel %vm17763_vm14, %v3618_v28, %v3619_v7  ;;  %v6759_v23 = vrot.slane %v6757_v39, 4  ;;  %v6764_v56 = vrot.slane %v18621_v25, 5  ;;  %v6758_v48 = vsel %vm17763_vm14, %v13641_v2, %v6757_v39  ;;  %v457_v2 = vld [vmem:[#allocation3 + $0x78] sm:$0x1] }
 0x208   : > { %15217 = vmatprep.mubr.bf16.mxu1 %v13647_v4  ;;  %v13464_v14 = vcombine.low %v3617_v20, %v3620_v21  ;;  %v3625_v8 = vrot.slane %v3623_v26, 4  ;;  %v13458_v55 = vrot.slane %v3560_v13, 9  ;;  %v3624_v61 = vsel %vm17763_vm14, %v13457_v6, %v3623_v26  ;;  %v454_v6 = vld [vmem:[#allocation3 + $0x6c] sm:$0x1]  ;;  %v487_v26 = vld [vmem:[#allocation3 + $0x20] sm:$0x1] }
 0x209   : > { %14930 = vmatmul.mubr.bf16.gmra.mrb[4].mxu0 %v13463_v1  ;;  %v6761_v32 = vsel %vm17763_vm14, %v6759_v23, %v6760_v3  ;;  %v13642_v27 = vrot.slane %v6700_v9, 9  ;;  %v3630_v46 = vrot.slane %v18636_v47, 5  ;;  %v13648_v15 = vcombine.low %v6751_v62, %v6754_v45  ;;  %v430_v3 = vld [vmem:[#allocation3 + $0xc] sm:$0x1]  ;;  %v511_v9 = vld [vmem:[#allocation3 + $0x80] sm:$0x1] }
 0x20a   : > { %14933 = vmatprep.mubr.bf16.mxu0 %v13464_v14  ;;  %v3627_v25 = vsel %vm17763_vm14, %v3625_v8, %v3626_v0  ;;  %v6767_v52 = vrot.slane %v18628_v60, 5  ;;  %v3633_v53 = vrot.slane %v18643_v30, 5  ;;  %v13649_v18 = vcombine.low %v6758_v48, %v6761_v32  ;;  %v484_v14 = vld [vmem:[#allocation3 + $0x14] sm:$0x1]  ;;  %v16621_v48 = vld [vmem:[#allocation9 + $0x40] sm:$0xff]   ;;  %v16622_v8 = vld [vmem:[#allocation9 + $0x48] sm:$0xff]  }
 0x20b   : > { %v6766_v59 = vrot.slane %v6764_v56, 4  ;;  %v3631_v19 = vsel %vm17763_vm14, %v13458_v55, %v3630_v46  ;;  %v3632_v37 = vrot.slane %v3630_v46, 4  ;;  %v13465_v57 = vcombine.low %v3624_v61, %v3627_v25  ;;  %v508_v23 = vld [vmem:[#allocation3 + $0x74] sm:$0x1]  ;;  %15229 = vmatprep.subr.bf16.mxu0 %v16621_v48  ;;  %v439_v55 = vld [vmem:[#allocation3 + $0x30] sm:$0x1] }
 0x20c   : > { %v13643_v33 = vrot.slane %v6701_v34, 9  ;;  %v6771_v47 = vrot.slane %v18649_v36, 5  ;;  %v6774_v44 = vrot.slane %v18651_v40, 5  ;;  %v13459_v60 = vrot.slane %v3561_v11, 9  ;;  %15230 = vmatpush3.bf16.msra.mxu0 %v16621_v48  ;;  %v463_v11 = vld [vmem:[#allocation3 + $0x90] sm:$0x1] }
 0x20d   : > { %v3634_v22 = vsel %vm17763_vm14, %v3632_v37, %v3633_v53  ;;  %v3637_v30 = vrot.slane %v18657_v17, 5  ;;  %v3640_v35 = vrot.slane %v18662_v63, 5  ;;  %v6765_v43 = vsel %vm17763_vm14, %v13642_v27, %v6764_v56  ;;  %15231 = vmatprep.subr.bf16.mxu0 %v16622_v8  ;;  %v436_v27 = vld [vmem:[#allocation3 + $0x24] sm:$0x1]  ;;  %v517_v53 = vld [vmem:[#allocation3 + $0x98] sm:$0x1] }
 0x20e   : > { %v13466_v31 = vcombine.low %v3631_v19, %v3634_v22  ;;  %v6773_v58 = vrot.slane %v6771_v47, 4  ;;  %v6778_v50 = vrot.slane %v18672_v5, 5  ;;  %v6768_v36 = vsel %vm17763_vm14, %v6766_v59, %v6767_v52  ;;  %v460_v46 = vld [vmem:[#allocation3 + $0x84] sm:$0x1]  ;;  %v493_v52 = vld [vmem:[#allocation3 + $0x38] sm:$0x1] }
 0x20f   : > { %15218 = vmatmul.mubr.bf16.gmra.mrb[4].mxu1 %v13648_v15  ;;  %v3639_v40 = vrot.slane %v3637_v30, 4  ;;  %v13644_v24 = vrot.slane %v6702_v10, 9  ;;  %v434_v12 = vsel %vm17259_vm3, 0, %v433_v29  ;;  %v6772_v17 = vsel %vm17763_vm14, %v13643_v33, %v6771_v47  ;;  %v16623_v19 = vld [vmem:[#allocation9 + $0x50] sm:$0xff]   ;;  %v16624_v33 = vld [vmem:[#allocation9 + $0x58] sm:$0xff]  }
 0x210   : > { %15221 = vmatprep.mubr.bf16.mxu1 %v13649_v18  ;;  %v6775_v63 = vsel %vm17763_vm14, %v6773_v58, %v6774_v44  ;;  %v6780_v4 = vrot.slane %v6778_v50, 4  ;;  %v6781_v42 = vrot.slane %v18691_v54, 5  ;;  %435 = vst [vmem:[#allocation3 + $0x18] sm:$0x1] %v434_v12  ;;  %v3638_v5 = vsel %vm17763_vm14, %v13459_v60, %v3637_v30  ;;  %15232 = vmatpush3.bf16.msra.mxu0 %v16622_v8  ;;  %v490_v18 = vld [vmem:[#allocation3 + $0x2c] sm:$0x1] }
 0x211   : > { %14934 = vmatmul.mubr.bf16.gmra.mrb[8].mxu0 %v13465_v57  ;;  %v3641_v41 = vsel %vm17763_vm14, %v3639_v40, %v3640_v35  ;;  %v13650_v7 = vcombine.low %v6765_v43, %v6768_v36  ;;  %v13651_v13 = vcombine.low %v6772_v17, %v6775_v63  ;;  %v6779_v20 = vsel %vm17763_vm14, %v13644_v24, %v6778_v50  ;;  %v514_v37 = vld [vmem:[#allocation3 + $0x8c] sm:$0x1]  ;;  %v445_v47 = vld [vmem:[#allocation3 + $0x48] sm:$0x1]  ;;  %v442_v30 = vld [vmem:[#allocation3 + $0x3c] sm:$0x1] }
 0x212   : > { %14937 = vmatprep.mubr.bf16.mxu0 %v13466_v31  ;;  %v13467_v1 = vcombine.low %v3638_v5, %v3641_v41  ;;  %v6782_v28 = vsel %vm17763_vm14, %v6780_v4, %v6781_v42  ;;  %v458_v39 = vsel %vm17259_vm3, 0, %v457_v2  ;;  %v431_v62 = vsel %vm17259_vm3, 0, %v430_v3  ;;  %15233 = vmatprep.subr.bf16.mxu0 %v16623_v19  ;;  %v469_v44 = vld [vmem:[#allocation3 + $0xa8] sm:$0x1]  ;;  %v466_v35 = vld [vmem:[#allocation3 + $0x9c] sm:$0x1] }
 0x213   : > { %v13652_v54 = vcombine.low %v6779_v20, %v6782_v28  ;;  %459 = vst [vmem:[#allocation3 + $0x78] sm:$0x1] %v458_v39  ;;  %v455_v21 = vsel %vm17259_vm3, 0, %v454_v6  ;;  %432 = vst [vmem:[#allocation3 + $0xc] sm:$0x1] %v431_v62  ;;  %v488_v0 = vsel %vm17264_vm4, 0, %v487_v26 }
 0x214   : > { %456 = vst [vmem:[#allocation3 + $0x6c] sm:$0x1] %v455_v21  ;;  %489 = vst [vmem:[#allocation3 + $0x20] sm:$0x1] %v488_v0  ;;  %v512_v45 = vsel %vm17264_vm4, 0, %v511_v9  ;;  %v485_v56 = vsel %vm17264_vm4, 0, %v484_v14  ;;  %15234 = vmatpush3.bf16.msra.mxu0 %v16623_v19 }
 0x215   : > { %513 = vst [vmem:[#allocation3 + $0x80] sm:$0x1] %v512_v45  ;;  %v509_v34 = vsel %vm17264_vm4, 0, %v508_v23  ;;  %486 = vst [vmem:[#allocation3 + $0x14] sm:$0x1] %v485_v56  ;;  %v440_v32 = vsel %vm17259_vm3, 0, %v439_v55  ;;  %15235 = vmatprep.subr.bf16.mxu0 %v16624_v33 }
 0x216   : > { %510 = vst [vmem:[#allocation3 + $0x74] sm:$0x1] %v509_v34  ;;  %v464_v61 = vsel %vm17259_vm3, 0, %v463_v11  ;;  %441 = vst [vmem:[#allocation3 + $0x30] sm:$0x1] %v440_v32  ;;  %v437_v15 = vsel %vm17259_vm3, 0, %v436_v27 }
 0x217   : > { %15222 = vmatmul.mubr.bf16.gmra.mrb[8].mxu1 %v13650_v7  ;;  %465 = vst [vmem:[#allocation3 + $0x90] sm:$0x1] %v464_v61  ;;  %v461_v25 = vsel %vm17259_vm3, 0, %v460_v46  ;;  %438 = vst [vmem:[#allocation3 + $0x24] sm:$0x1] %v437_v15  ;;  %v494_v10 = vsel %vm17264_vm4, 0, %v493_v52 }
 0x218   : > { %15225 = vmatprep.mubr.bf16.mxu1 %v13651_v13  ;;  %462 = vst [vmem:[#allocation3 + $0x84] sm:$0x1] %v461_v25  ;;  %v518_v29 = vsel %vm17264_vm4, 0, %v517_v53  ;;  %495 = vst [vmem:[#allocation3 + $0x38] sm:$0x1] %v494_v10  ;;  %v491_v59 = vsel %vm17264_vm4, 0, %v490_v18  ;;  %15236 = vmatpush3.bf16.msra.mxu0 %v16624_v33 }
 0x219   : > { %14938 = vmatmul.mubr.bf16.gmra.mrb[12].mxu0 %v13467_v1  ;;  %519 = vst [vmem:[#allocation3 + $0x98] sm:$0x1] %v518_v29  ;;  %492 = vst [vmem:[#allocation3 + $0x2c] sm:$0x1] %v491_v59  ;;  %v515_v57 = vsel %vm17264_vm4, 0, %v514_v37  ;;  %v446_v22 = vsel %vm17259_vm3, 0, %v445_v47 }
 0x21a   : > { %516 = vst [vmem:[#allocation3 + $0x8c] sm:$0x1] %v515_v57  ;;  %v470_v60 = vsel %vm17259_vm3, 0, %v469_v44  ;;  %447 = vst [vmem:[#allocation3 + $0x48] sm:$0x1] %v446_v22  ;;  %v443_v43 = vsel %vm17259_vm3, 0, %v442_v30 }
 0x21b   : > { %471 = vst [vmem:[#allocation3 + $0xa8] sm:$0x1] %v470_v60  ;;  %v467_v31 = vsel %vm17259_vm3, 0, %v466_v35  ;;  %444 = vst [vmem:[#allocation3 + $0x3c] sm:$0x1] %v443_v43  ;;  %v16625_v24 = vld [vmem:[#allocation9 + $0x60] sm:$0xff]  }
 0x21c   : > { %468 = vst [vmem:[#allocation3 + $0x9c] sm:$0x1] %v467_v31  ;;  %v499_v58 = vld [vmem:[#allocation3 + $0x50] sm:$0x1]  ;;  %v496_v12 = vld [vmem:[#allocation3 + $0x44] sm:$0x1]  ;;  %15237 = vmatprep.subr.bf16.mxu0 %v16625_v24 }
 0x21d   : > { %v500_v50 = vsel %vm17264_vm4, 0, %v499_v58  ;;  %v523_v36 = vld [vmem:[#allocation3 + $0xb0] sm:$0x1]  ;;  %v520_v17 = vld [vmem:[#allocation3 + $0xa4] sm:$0x1]  ;;  %v497_v63 = vsel %vm17264_vm4, 0, %v496_v12  ;;  %15238 = vmatpush3.bf16.msra.mxu0 %v16625_v24 }
 0x21e   : > { %501 = vst [vmem:[#allocation3 + $0x50] sm:$0x1] %v500_v50  ;;  %v524_v40 = vsel %vm17264_vm4, 0, %v523_v36  ;;  %v521_v4 = vsel %vm17264_vm4, 0, %v520_v17  ;;  %498 = vst [vmem:[#allocation3 + $0x44] sm:$0x1] %v497_v63 }
 0x21f   : > { %15226 = vmatmul.mubr.bf16.gmra.mrb[12].mxu1 %v13652_v54  ;;  %525 = vst [vmem:[#allocation3 + $0xb0] sm:$0x1] %v524_v40  ;;  %522 = vst [vmem:[#allocation3 + $0xa4] sm:$0x1] %v521_v4  ;;  %v427_v42 = vld [vmem:[#allocation3] sm:$0x1] }
 0x220   : > { %v16626_v5 = vld [vmem:[#allocation9 + $0x68] sm:$0xff]   ;;  %v428_v41 = vsel %vm17259_vm3, 0, %v427_v42  ;;  %v481_v28 = vld [vmem:[#allocation3 + $0x8] sm:$0x1]  ;;  %v448_v2 = vld [vmem:[#allocation3 + $0x54] sm:$0x1] }
 0x221   : > { %v451_v7 = vld [vmem:[#allocation3 + $0x60] sm:$0x1]  ;;  %429 = vst [vmem:[#allocation3] sm:$0x1] %v428_v41  ;;  %15239 = vmatprep.subr.bf16.mxu0 %v16626_v5  ;;  %v482_v54 = vsel %vm17264_vm4, 0, %v481_v28  ;;  %v449_v3 = vsel %vm17259_vm3, 0, %v448_v2 }
 0x222   : > { %v475_v13 = vld [vmem:[#allocation3 + $0xc0] sm:$0x1]  ;;  %v452_v1 = vsel %vm17259_vm3, 0, %v451_v7  ;;  %15240 = vmatpush3.bf16.msra.mxu0 %v16626_v5  ;;  %483 = vst [vmem:[#allocation3 + $0x8] sm:$0x1] %v482_v54  ;;  %v16627_v48 = vld [vmem:[#allocation9 + $0x70] sm:$0xff]  }
 0x223   : > { %v476_v20 = vsel %vm17259_vm3, 0, %v475_v13  ;;  %453 = vst [vmem:[#allocation3 + $0x60] sm:$0x1] %v452_v1  ;;  %v472_v39 = vld [vmem:[#allocation3 + $0xb4] sm:$0x1]  ;;  %15241 = vmatprep.subr.bf16.mxu0 %v16627_v48  ;;  %v16629_v47 = vld [vmem:[#allocation9] sm:$0xff]  }
 0x224   : > { %477 = vst [vmem:[#allocation3 + $0xc0] sm:$0x1] %v476_v20  ;;  %v473_v6 = vsel %vm17259_vm3, 0, %v472_v39  ;;  %450 = vst [vmem:[#allocation3 + $0x54] sm:$0x1] %v449_v3  ;;  %v16628_v29 = vld [vmem:[#allocation9 + $0x78] sm:$0xff]  }
 0x225   : > { %474 = vst [vmem:[#allocation3 + $0xb4] sm:$0x1] %v473_v6  ;;  %v7301_v21 = vld [vmem:[#allocation3 + $0x4] sm:$0xf]  ;;  %v505_v26 = vld [vmem:[#allocation3 + $0x68] sm:$0x1] }
 0x226   : > { %v529_v0 = vld [vmem:[#allocation3 + $0xc8] sm:$0x1]  ;;  %v506_v14 = vsel %vm17264_vm4, 0, %v505_v26  ;;  %v7350_v56 = vshll.u32 %v7301_v21, 16  ;;  %v7354_v34 = vshrl.u32 %v7301_v21, 16  ;;  %15242 = vmatpush3.bf16.msra.mxu0 %v16627_v48 }
 0x227   : > { %v530_v23 = vsel %vm17264_vm4, 0, %v529_v0  ;;  %507 = vst [vmem:[#allocation3 + $0x68] sm:$0x1] %v506_v14  ;;  %v502_v15 = vld [vmem:[#allocation3 + $0x5c] sm:$0x1]  ;;  %15243 = vmatprep.subr.bf16.mxu0 %v16628_v29 }
 0x228   : > { %v7300_v62 = vld [vmem:[#allocation3] sm:$0xf]  ;;  %531 = vst [vmem:[#allocation3 + $0xc8] sm:$0x1] %v530_v23  ;;  %v7352_v32 = vrot.slane %v7350_v56, 5  ;;  %v7356_v61 = vrot.slane %v7354_v34, 4 }
 0x229   : > { %v7341_v9 = vshrl.u32 %v7300_v62, 16  ;;  %v7344_v45 = vshll.u32 %v7300_v62, 16  ;;  %v7332_v11 = vld [vmem:[#allocation3 + $0x8] sm:$0x1]  ;;  %v526_v25 = vld [vmem:[#allocation3 + $0xbc] sm:$0x1] }
 0x22a   : > { %v7360_v46 = vshll.u32 %v7332_v11, 16  ;;  %v7357_v52 = vor.u32 %v7356_v61, %v7352_v32  ;;  %v503_v53 = vsel %vm17264_vm4, 0, %v502_v15  ;;  %v527_v10 = vsel %vm17264_vm4, 0, %v526_v25  ;;  %15244 = vmatpush3.bf16.msra.mxu0 %v16628_v29  ;;  %v18864_v44 = vld [vmem:[%s20357_s2] ss:$0 sm:$0xff] }
 0x22b   : > { %v7343_v8 = vrot.slane %v7341_v9, 4  ;;  %v7346_v55 = vrot.slane %v7344_v45, 5  ;;  %504 = vst [vmem:[#allocation3 + $0x5c] sm:$0x1] %v503_v53  ;;  %528 = vst [vmem:[#allocation3 + $0xbc] sm:$0x1] %v527_v10  ;;  %15261 = vmatprep.subr.bf16.mxu0 %v16629_v47 }
 0x22c   : > { %v7358_v59 = vrot.slane %v7357_v52, 4  ;;  %v7362_v19 = vrot.slane %v7360_v46, 5  ;;  %v4107_v9 = vld [vmem:[#allocation3 + $0x18] sm:$0xf]  ;;  %v4100_v11 = vld [vmem:[#allocation3 + $0xc] sm:$0xf] }
 0x22d   : > { %v7347_v27 = vor.u32 %v7346_v55, %v7343_v8 }
 0x22e   : > { %v7363_v57 = vsel %vm17309_vm11, %v7358_v59, %v7362_v19  ;;  %v4111_v59 = vld [vmem:[#allocation3 + $0x20] sm:$0x1]  ;;  %v7247_v19 = vld [vmem:[#allocation3 + $0x78] sm:$0xf] }
 0x22f   : > { %v7348_v18 = vrot.slane %v7347_v27, 4 }
 0x231   : > { %v7353_v37 = vsel %vm17309_vm11, %v7348_v18, %v7352_v32 }
 0x232   : > { %v13678_v33 = vcombine.low %v7353_v37, %v7363_v57 }
 0x234   : > { %15245 = vmatprep.mubr.bf16.mxu0 %v13678_v33 }
 0x2d4   : > { %v14927_v22 = vpop.f32.mrb[0].mxu0 }
 0x2d5   : > { %v3861_v60 = vadd.f32 %v14927_v22, %v18864_v44  ;;  %v3773_v30 = vpop.f32.mrb[1].mxu0 }
 0x2d6   : > { %v3859_v35 = vadd.f32 %v18864_v44, %v3773_v30  ;;  %v14928_v43 = vpop.f32.mrb[2].mxu0  ;;  %v7240_v30 = vld [vmem:[#allocation3 + $0x6c] sm:$0xf] }
 0x2d7   : > { %v3877_v31 = vmax.f32 %v3861_v60, 0.0  ;;  %v3862_v58 = vadd.f32 %v14928_v43, %v18864_v44  ;;  %v3776_v50 = vpop.f32.mrb[3].mxu0 }
 0x2d8   : > { %v3875_v36 = vmax.f32 %v3859_v35, 0.0  ;;  %v3860_v40 = vadd.f32 %v18864_v44, %v3776_v50 }
 0x2d9   : > { %v14026_v24 = vpack.c.bf16 %v3877_v31, %v3877_v31  ;;  %v3878_v12 = vmax.f32 %v3862_v58, 0.0 }
 0x2da   : > { %v15215_v17 = vpop.f32.mrb[0].mxu1  ;;  %v14024_v63 = vpack.c.bf16 %v3875_v36, %v3875_v36  ;;  %v3876_v4 = vmax.f32 %v3860_v40, 0.0 }
 0x2db   : > { %v3957_v42 = vshrl.u32 %v14026_v24, 16  ;;  %v3960_v5 = vshll.u32 %v14026_v24, 16  ;;  %v7001_v41 = vadd.f32 %v15215_v17, %v18864_v44  ;;  %v6913_v7 = vpop.f32.mrb[1].mxu1  ;;  %v14027_v13 = vpack.c.bf16 %v3878_v12, %v3878_v12  ;;  %v4104_v12 = vld [vmem:[#allocation3 + $0x14] sm:$0x1] }
 0x2dc   : > { %v3940_v1 = vshrl.u32 %v14024_v63, 16  ;;  %v3943_v20 = vshll.u32 %v14024_v63, 16  ;;  %v6999_v28 = vadd.f32 %v18864_v44, %v6913_v7  ;;  %v15216_v54 = vpop.f32.mrb[2].mxu1  ;;  %v14025_v2 = vpack.c.bf16 %v3876_v4, %v3876_v4  ;;  %v18872_v39 = vpop.f32.mrb[4].mxu0 }
 0x2dd   : > { %v3959_v3 = vrot.slane %v3957_v42, 7  ;;  %v7017_v6 = vmax.f32 %v7001_v41, 0.0  ;;  %v3965_v62 = vshrl.u32 %v14027_v13, 16  ;;  %v3968_v21 = vshll.u32 %v14027_v13, 16  ;;  %v6916_v26 = vpop.f32.mrb[3].mxu1  ;;  %v18874_v0 = vpop.f32.mrb[5].mxu0 }
 0x2de   : > { %v18876_v45 = vrot.slane %v3940_v1, 7  ;;  %v7015_v14 = vmax.f32 %v6999_v28, 0.0  ;;  %v7002_v23 = vadd.f32 %v15216_v54, %v18864_v44  ;;  %v3948_v56 = vshrl.u32 %v14025_v2, 16  ;;  %v18879_v34 = vpop.f32.mrb[6].mxu0 }
 0x2df   : > { %v3962_v48 = vor.u32 %v3960_v5, %v3959_v3  ;;  %v3963_v8 = vrot.slane %v3959_v3, 4  ;;  %v14042_v55 = vpack.c.bf16 %v7017_v6, %v7017_v6  ;;  %v3967_v32 = vrot.slane %v3965_v62, 7  ;;  %v18881_v61 = vpop.f32.mrb[7].mxu0 }
 0x2e0   : > { %v3945_v27 = vor.u32 %v3943_v20, %v18876_v45  ;;  %v3946_v46 = vrot.slane %v18876_v45, 4  ;;  %v14040_v15 = vpack.c.bf16 %v7015_v14, %v7015_v14  ;;  %v7018_v25 = vmax.f32 %v7002_v23, 0.0  ;;  %v7251_v14 = vld [vmem:[#allocation3 + $0x80] sm:$0x1] }
 0x2e1   : > { %v4108_v53 = vsel %vm17295_vm10, %v3962_v48, %v4107_v9  ;;  %v7097_v10 = vshrl.u32 %v14042_v55, 16  ;;  %v7100_v29 = vshll.u32 %v14042_v55, 16  ;;  %v3970_v18 = vor.u32 %v3968_v21, %v3967_v32 }
 0x2e2   : > { %4109 = vst [vmem:[#allocation3 + $0x18] sm:$0xf] %v4108_v53  ;;  %v4101_v37 = vsel %vm17295_vm10, %v3945_v27, %v4100_v11  ;;  %v7080_v57 = vshrl.u32 %v14040_v15, 16  ;;  %v7083_v33 = vshll.u32 %v14040_v15, 16  ;;  %v3972_v47 = vrot.slane %v3967_v32, 4  ;;  %v15219_v22 = vpop.f32.mrb[4].mxu1 }
 0x2e3   : > { %v7099_v60 = vrot.slane %v7097_v10, 7  ;;  %4102 = vst [vmem:[#allocation3 + $0xc] sm:$0xf] %v4101_v37  ;;  %v3971_v43 = vsel %vm17286_vm9, %v3963_v8, %v3970_v18  ;;  %v14043_v31 = vpack.c.bf16 %v7018_v25, %v7018_v25  ;;  %v3950_v58 = vrot.slane %v3948_v56, 7  ;;  %v6929_v50 = vpop.f32.mrb[5].mxu1 }
 0x2e4   : > { %v18891_v36 = vrot.slane %v7080_v57, 7  ;;  %4110 = vst [vmem:[#allocation3 + $0x1c] sm:$0xf] %v3971_v43  ;;  %v4112_v40 = vsel %vm17259_vm3, %v3972_v47, %v4111_v59  ;;  %v3951_v24 = vshll.u32 %v14025_v2, 16  ;;  %v7000_v17 = vadd.f32 %v18864_v44, %v6916_v26  ;;  %v15220_v63 = vpop.f32.mrb[6].mxu1  ;;  %v18896_v4 = vpop.f32.mrb[8].mxu0 }
 0x2e5   : > { %v7102_v42 = vor.u32 %v7100_v29, %v7099_v60  ;;  %v7103_v5 = vrot.slane %v7099_v60, 4  ;;  %4113 = vst [vmem:[#allocation3 + $0x20] sm:$0x1] %v4112_v40  ;;  %v7105_v41 = vshrl.u32 %v14043_v31, 16  ;;  %v7108_v7 = vshll.u32 %v14043_v31, 16  ;;  %v18898_v13 = vpop.f32.mrb[7].mxu1 }
 0x2e6   : > { %v18900_v1 = vpop.f32.mrb[9].mxu0  ;;  %v7085_v20 = vor.u32 %v7083_v33, %v18891_v36  ;;  %v7086_v28 = vrot.slane %v18891_v36, 4  ;;  %v3953_v54 = vor.u32 %v3951_v24, %v3950_v58  ;;  %v3955_v2 = vrot.slane %v3950_v58, 4 }
 0x2e7   : > { %v18904_v3 = vpop.f32.mrb[10].mxu0  ;;  %v7248_v6 = vsel %vm17295_vm10, %v7102_v42, %v7247_v19  ;;  %v7107_v62 = vrot.slane %v7105_v41, 7  ;;  %v7016_v21 = vmax.f32 %v7000_v17, 0.0  ;;  %v3865_v26 = vadd.f32 %v18872_v39, %v18864_v44 }
 0x2e8   : > { %v18910_v9 = vpop.f32.mrb[11].mxu0  ;;  %7249 = vst [vmem:[#allocation3 + $0x78] sm:$0xf] %v7248_v6  ;;  %v7241_v45 = vsel %vm17295_vm10, %v7085_v20, %v7240_v30  ;;  %v3954_v23 = vsel %vm17286_vm9, %v3946_v46, %v3953_v54  ;;  %v4105_v56 = vsel %vm17259_vm3, %v3955_v2, %v4104_v12  ;;  %v7005_v48 = vadd.f32 %v15219_v22, %v18864_v44  ;;  %v7244_v22 = vld [vmem:[#allocation3 + $0x74] sm:$0x1] }
 0x2e9   : > { %7242 = vst [vmem:[#allocation3 + $0x6c] sm:$0xf] %v7241_v45  ;;  %v7110_v8 = vor.u32 %v7108_v7, %v7107_v62  ;;  %v7112_v55 = vrot.slane %v7107_v62, 4  ;;  %4103 = vst [vmem:[#allocation3 + $0x10] sm:$0xf] %v3954_v23  ;;  %v14041_v39 = vpack.c.bf16 %v7016_v21, %v7016_v21  ;;  %v3881_v11 = vmax.f32 %v3865_v26, 0.0 }
 0x2ea   : > { %4106 = vst [vmem:[#allocation3 + $0x14] sm:$0x1] %v4105_v56  ;;  %v7021_v32 = vmax.f32 %v7005_v48, 0.0  ;;  %v3863_v27 = vadd.f32 %v18864_v44, %v18874_v0  ;;  %v7003_v15 = vadd.f32 %v18864_v44, %v6929_v50  ;;  %v3866_v46 = vadd.f32 %v18879_v34, %v18864_v44  ;;  %v18924_v25 = vpop.f32.mrb[8].mxu1  ;;  %v4121_v62 = vld [vmem:[#allocation3 + $0x30] sm:$0xf] }
 0x2eb   : > { %v7111_v53 = vsel %vm17286_vm9, %v7103_v5, %v7110_v8  ;;  %v7252_v10 = vsel %vm17259_vm3, %v7112_v55, %v7251_v14  ;;  %v7088_v29 = vshrl.u32 %v14041_v39, 16  ;;  %v7091_v18 = vshll.u32 %v14041_v39, 16  ;;  %v18930_v59 = vpop.f32.mrb[9].mxu1  ;;  %v7261_v21 = vld [vmem:[#allocation3 + $0x90] sm:$0xf] }
 0x2ec   : > { %7250 = vst [vmem:[#allocation3 + $0x7c] sm:$0xf] %v7111_v53  ;;  %7253 = vst [vmem:[#allocation3 + $0x80] sm:$0x1] %v7252_v10  ;;  %v14030_v0 = vpack.c.bf16 %v3881_v11, %v3881_v11  ;;  %v14046_v19 = vpack.c.bf16 %v7021_v32, %v7021_v32  ;;  %v3879_v37 = vmax.f32 %v3863_v27, 0.0  ;;  %v7019_v57 = vmax.f32 %v7003_v15, 0.0 }
 0x2ed   : > { %v18932_v33 = vpop.f32.mrb[10].mxu1  ;;  %v18934_v34 = vpop.f32.mrb[12].mxu0  ;;  %v7090_v47 = vrot.slane %v7088_v29, 7  ;;  %v3882_v60 = vmax.f32 %v3866_v46, 0.0  ;;  %v7006_v30 = vadd.f32 %v15220_v63, %v18864_v44  ;;  %v3864_v43 = vadd.f32 %v18864_v44, %v18881_v61  ;;  %v4114_v8 = vld [vmem:[#allocation3 + $0x24] sm:$0xf] }
 0x2ee   : > { %v18939_v31 = vpop.f32.mrb[11].mxu1  ;;  %v18941_v58 = vpop.f32.mrb[13].mxu0  ;;  %v3991_v50 = vshrl.u32 %v14030_v0, 16  ;;  %v3994_v36 = vshll.u32 %v14030_v0, 16  ;;  %v7131_v40 = vshrl.u32 %v14046_v19, 16  ;;  %v7134_v24 = vshll.u32 %v14046_v19, 16 }
 0x2ef   : > { %v18943_v12 = vpop.f32.mrb[14].mxu0  ;;  %v7093_v17 = vor.u32 %v7091_v18, %v7090_v47  ;;  %v7095_v42 = vrot.slane %v7090_v47, 4  ;;  %v14028_v5 = vpack.c.bf16 %v3879_v37, %v3879_v37  ;;  %v14044_v41 = vpack.c.bf16 %v7019_v57, %v7019_v57  ;;  %v7254_v47 = vld [vmem:[#allocation3 + $0x84] sm:$0xf] }
 0x2f0   : > { %v18945_v7 = vpop.f32.mrb[15].mxu0  ;;  %v3993_v63 = vrot.slane %v3991_v50, 7  ;;  %v18947_v20 = vrot.slane %v7131_v40, 7  ;;  %v14031_v61 = vpack.c.bf16 %v3882_v60, %v3882_v60  ;;  %v7022_v54 = vmax.f32 %v7006_v30, 0.0 }
 0x2f1   : > { %v7094_v2 = vsel %vm17286_vm9, %v7086_v28, %v7093_v17  ;;  %v7245_v6 = vsel %vm17259_vm3, %v7095_v42, %v7244_v22  ;;  %v3974_v26 = vshrl.u32 %v14028_v5, 16  ;;  %v3977_v45 = vshll.u32 %v14028_v5, 16  ;;  %v4125_v42 = vld [vmem:[#allocation3 + $0x38] sm:$0x1] }
 0x2f2   : > { %7243 = vst [vmem:[#allocation3 + $0x70] sm:$0xf] %v7094_v2  ;;  %7246 = vst [vmem:[#allocation3 + $0x74] sm:$0x1] %v7245_v6  ;;  %v3996_v14 = vor.u32 %v3994_v36, %v3993_v63  ;;  %v3997_v23 = vrot.slane %v3993_v63, 4  ;;  %v7136_v56 = vor.u32 %v7134_v24, %v18947_v20  ;;  %v7137_v48 = vrot.slane %v18947_v20, 4 }
 0x2f3   : > { %v18955_v55 = vpop.f32.mrb[12].mxu1  ;;  %v18957_v39 = vrot.slane %v3974_v26, 7  ;;  %v7114_v28 = vshrl.u32 %v14044_v41, 16  ;;  %v7117_v11 = vshll.u32 %v14044_v41, 16  ;;  %v3999_v32 = vshrl.u32 %v14031_v61, 16 }
 0x2f4   : > { %v18959_v27 = vpop.f32.mrb[13].mxu1  ;;  %v4122_v15 = vsel %vm17295_vm10, %v3996_v14, %v4121_v62  ;;  %v7262_v46 = vsel %vm17295_vm10, %v7136_v56, %v7261_v21  ;;  %v4002_v53 = vshll.u32 %v14031_v61, 16  ;;  %v14047_v10 = vpack.c.bf16 %v7022_v54, %v7022_v54  ;;  %v7265_v61 = vld [vmem:[#allocation3 + $0x98] sm:$0x1] }
 0x2f5   : > { %v18965_v29 = vpop.f32.mrb[14].mxu1  ;;  %4123 = vst [vmem:[#allocation3 + $0x30] sm:$0xf] %v4122_v15  ;;  %7263 = vst [vmem:[#allocation3 + $0x90] sm:$0xf] %v7262_v46  ;;  %v3979_v18 = vor.u32 %v3977_v45, %v18957_v39  ;;  %v3980_v0 = vrot.slane %v18957_v39, 4  ;;  %v7004_v50 = vadd.f32 %v18864_v44, %v18898_v13  ;;  %v3869_v54 = vadd.f32 %v18896_v4, %v18864_v44 }
 0x2f6   : > { %v18969_v19 = vrot.slane %v7114_v28, 7  ;;  %v4001_v37 = vrot.slane %v3999_v32, 7  ;;  %v18971_v57 = vpop.f32.mrb[15].mxu1  ;;  %v7139_v22 = vshrl.u32 %v14047_v10, 16  ;;  %v7142_v60 = vshll.u32 %v14047_v10, 16 }
 0x2f7   : > { %v3880_v30 = vmax.f32 %v3864_v43, 0.0  ;;  %v4115_v36 = vsel %vm17295_vm10, %v3979_v18, %v4114_v8  ;;  %v7020_v20 = vmax.f32 %v7004_v50, 0.0  ;;  %v7009_v2 = vadd.f32 %v18924_v25, %v18864_v44  ;;  %v4118_v28 = vld [vmem:[#allocation3 + $0x2c] sm:$0x1] }
 0x2f8   : > { %v7119_v40 = vor.u32 %v7117_v11, %v18969_v19  ;;  %v7120_v24 = vrot.slane %v18969_v19, 4  ;;  %v4004_v17 = vor.u32 %v4002_v53, %v4001_v37  ;;  %4116 = vst [vmem:[#allocation3 + $0x24] sm:$0xf] %v4115_v36  ;;  %v4006_v5 = vrot.slane %v4001_v37, 4 }
 0x2f9   : > { %v7141_v41 = vrot.slane %v7139_v22, 7  ;;  %v14029_v63 = vpack.c.bf16 %v3880_v30, %v3880_v30  ;;  %v14045_v14 = vpack.c.bf16 %v7020_v20, %v7020_v20  ;;  %v3885_v56 = vmax.f32 %v3869_v54, 0.0  ;;  %v7258_v30 = vld [vmem:[#allocation3 + $0x8c] sm:$0x1] }
 0x2fa   : > { %v7255_v43 = vsel %vm17295_vm10, %v7119_v40, %v7254_v47  ;;  %v4005_v13 = vsel %vm17286_vm9, %v3997_v23, %v4004_v17  ;;  %v4126_v6 = vsel %vm17259_vm3, %v4006_v5, %v4125_v42  ;;  %v7025_v23 = vmax.f32 %v7009_v2, 0.0  ;;  %v4135_v5 = vld [vmem:[#allocation3 + $0x48] sm:$0xf] }
 0x2fb   : > { %7256 = vst [vmem:[#allocation3 + $0x84] sm:$0xf] %v7255_v43  ;;  %4124 = vst [vmem:[#allocation3 + $0x34] sm:$0xf] %v4005_v13  ;;  %v7144_v62 = vor.u32 %v7142_v60, %v7141_v41  ;;  %v7146_v21 = vrot.slane %v7141_v41, 4  ;;  %v3982_v26 = vshrl.u32 %v14029_v63, 16  ;;  %v3867_v39 = vadd.f32 %v18864_v44, %v18900_v1 }
 0x2fc   : > { %4127 = vst [vmem:[#allocation3 + $0x38] sm:$0x1] %v4126_v6  ;;  %v3985_v45 = vshll.u32 %v14029_v63, 16  ;;  %v7122_v11 = vshrl.u32 %v14045_v14, 16  ;;  %v7125_v32 = vshll.u32 %v14045_v14, 16  ;;  %v14034_v15 = vpack.c.bf16 %v3885_v56, %v3885_v56 }
 0x2fd   : > { %v7145_v8 = vsel %vm17286_vm9, %v7137_v48, %v7144_v62  ;;  %v7266_v4 = vsel %vm17259_vm3, %v7146_v21, %v7265_v61  ;;  %v3984_v25 = vrot.slane %v3982_v26, 7  ;;  %v14050_v46 = vpack.c.bf16 %v7025_v23, %v7025_v23  ;;  %v7275_v2 = vld [vmem:[#allocation3 + $0xa8] sm:$0xf]  ;;  %v4128_v26 = vld [vmem:[#allocation3 + $0x3c] sm:$0xf] }
 0x2fe   : > { %7264 = vst [vmem:[#allocation3 + $0x94] sm:$0xf] %v7145_v8  ;;  %7267 = vst [vmem:[#allocation3 + $0x98] sm:$0x1] %v7266_v4  ;;  %v3883_v18 = vmax.f32 %v3867_v39, 0.0  ;;  %v7007_v48 = vadd.f32 %v18864_v44, %v18930_v59  ;;  %v7124_v19 = vrot.slane %v7122_v11, 7  ;;  %v7010_v14 = vadd.f32 %v18932_v33, %v18864_v44 }
 0x2ff   : > { %v3987_v53 = vor.u32 %v3985_v45, %v3984_v25  ;;  %v3989_v10 = vrot.slane %v3984_v25, 4  ;;  %v4025_v37 = vshrl.u32 %v14034_v15, 16  ;;  %v4028_v47 = vshll.u32 %v14034_v15, 16 }
 0x300   : > { %v7165_v22 = vshrl.u32 %v14050_v46, 16  ;;  %v7168_v50 = vshll.u32 %v14050_v46, 16  ;;  %v14032_v36 = vpack.c.bf16 %v3883_v18, %v3883_v18  ;;  %v7127_v40 = vor.u32 %v7125_v32, %v7124_v19 }
 0x301   : > { %v3988_v1 = vsel %vm17286_vm9, %v3980_v0, %v3987_v53  ;;  %v4119_v60 = vsel %vm17259_vm3, %v3989_v10, %v4118_v28  ;;  %v7129_v17 = vrot.slane %v7124_v19, 4  ;;  %v19001_v42 = vrot.slane %v4025_v37, 7  ;;  %v7268_v53 = vld [vmem:[#allocation3 + $0x9c] sm:$0xf] }
 0x302   : > { %4117 = vst [vmem:[#allocation3 + $0x28] sm:$0xf] %v3988_v1  ;;  %4120 = vst [vmem:[#allocation3 + $0x2c] sm:$0x1] %v4119_v60  ;;  %v19003_v59 = vrot.slane %v7165_v22, 7  ;;  %v4008_v41 = vshrl.u32 %v14032_v36, 16  ;;  %v3870_v0 = vadd.f32 %v18904_v3, %v18864_v44  ;;  %v7128_v43 = vsel %vm17286_vm9, %v7120_v24, %v7127_v40 }
 0x303   : > { %v4011_v63 = vshll.u32 %v14032_v36, 16  ;;  %v7023_v20 = vmax.f32 %v7007_v48, 0.0  ;;  %v7259_v13 = vsel %vm17259_vm3, %v7129_v17, %v7258_v30  ;;  %v4030_v61 = vor.u32 %v4028_v47, %v19001_v42  ;;  %7257 = vst [vmem:[#allocation3 + $0x88] sm:$0xf] %v7128_v43  ;;  %v4139_v30 = vld [vmem:[#allocation3 + $0x50] sm:$0x1] }
 0x304   : > { %v4031_v54 = vrot.slane %v19001_v42, 4  ;;  %7260 = vst [vmem:[#allocation3 + $0x8c] sm:$0x1] %v7259_v13  ;;  %v7170_v6 = vor.u32 %v7168_v50, %v19003_v59  ;;  %v7171_v62 = vrot.slane %v19003_v59, 4  ;;  %v19015_v21 = vrot.slane %v4008_v41, 7 }
 0x305   : > { %v14048_v3 = vpack.c.bf16 %v7023_v20, %v7023_v20  ;;  %v4136_v24 = vsel %vm17295_vm10, %v4030_v61, %v4135_v5  ;;  %v3886_v45 = vmax.f32 %v3870_v0, 0.0  ;;  %v3868_v56 = vadd.f32 %v18864_v44, %v18910_v9  ;;  %v7279_v0 = vld [vmem:[#allocation3 + $0xb0] sm:$0x1] }
 0x306   : > { %4137 = vst [vmem:[#allocation3 + $0x48] sm:$0xf] %v4136_v24  ;;  %v7276_v23 = vsel %vm17295_vm10, %v7170_v6, %v7275_v2  ;;  %v4013_v8 = vor.u32 %v4011_v63, %v19015_v21  ;;  %v4014_v4 = vrot.slane %v19015_v21, 4  ;;  %v7026_v11 = vmax.f32 %v7010_v14, 0.0 }
 0x307   : > { %v7148_v25 = vshrl.u32 %v14048_v3, 16  ;;  %7277 = vst [vmem:[#allocation3 + $0xa8] sm:$0xf] %v7276_v23  ;;  %v7151_v39 = vshll.u32 %v14048_v3, 16  ;;  %v14035_v28 = vpack.c.bf16 %v3886_v45, %v3886_v45  ;;  %v3884_v32 = vmax.f32 %v3868_v56, 0.0 }
 0x308   : > { %v4129_v33 = vsel %vm17295_vm10, %v4013_v8, %v4128_v26  ;;  %v7008_v9 = vadd.f32 %v18864_v44, %v18939_v31  ;;  %v3873_v46 = vadd.f32 %v18934_v34, %v18864_v44  ;;  %v14051_v48 = vpack.c.bf16 %v7026_v11, %v7026_v11  ;;  %v4132_v26 = vld [vmem:[#allocation3 + $0x44] sm:$0x1] }
 0x309   : > { %v19029_v15 = vrot.slane %v7148_v25, 7  ;;  %4130 = vst [vmem:[#allocation3 + $0x3c] sm:$0xf] %v4129_v33  ;;  %v4033_v10 = vshrl.u32 %v14035_v28, 16  ;;  %v4036_v18 = vshll.u32 %v14035_v28, 16  ;;  %v14033_v19 = vpack.c.bf16 %v3884_v32, %v3884_v32 }
 0x30a   : > { %v7024_v22 = vmax.f32 %v7008_v9, 0.0  ;;  %v3889_v1 = vmax.f32 %v3873_v46, 0.0  ;;  %v7173_v50 = vshrl.u32 %v14051_v48, 16  ;;  %v7176_v36 = vshll.u32 %v14051_v48, 16  ;;  %v7272_v25 = vld [vmem:[#allocation3 + $0xa4] sm:$0x1] }
 0x30b   : > { %v7153_v37 = vor.u32 %v7151_v39, %v19029_v15  ;;  %v7154_v47 = vrot.slane %v19029_v15, 4  ;;  %v4035_v60 = vrot.slane %v4033_v10, 7  ;;  %v4016_v31 = vshrl.u32 %v14033_v19, 16  ;;  %v4149_v33 = vld [vmem:[#allocation3 + $0x60] sm:$0xf] }
 0x30c   : > { %v4019_v40 = vshll.u32 %v14033_v19, 16  ;;  %v14049_v17 = vpack.c.bf16 %v7024_v22, %v7024_v22  ;;  %v14038_v42 = vpack.c.bf16 %v3889_v1, %v3889_v1  ;;  %v7175_v63 = vrot.slane %v7173_v50, 7 }
 0x30d   : > { %v7269_v34 = vsel %vm17295_vm10, %v7153_v37, %v7268_v53  ;;  %v4038_v5 = vor.u32 %v4036_v18, %v4035_v60  ;;  %v4040_v41 = vrot.slane %v4035_v60, 4  ;;  %v4018_v20 = vrot.slane %v4016_v31, 7 }
 0x30e   : > { %7270 = vst [vmem:[#allocation3 + $0x9c] sm:$0xf] %v7269_v34  ;;  %v7156_v43 = vshrl.u32 %v14049_v17, 16  ;;  %v7159_v13 = vshll.u32 %v14049_v17, 16  ;;  %v4059_v61 = vshrl.u32 %v14038_v42, 16  ;;  %v4062_v2 = vshll.u32 %v14038_v42, 16 }
 0x30f   : > { %v4039_v6 = vsel %vm17286_vm9, %v4031_v54, %v4038_v5  ;;  %v4140_v21 = vsel %vm17259_vm3, %v4040_v41, %v4139_v30  ;;  %v7178_v3 = vor.u32 %v7176_v36, %v7175_v63  ;;  %v7180_v24 = vrot.slane %v7175_v63, 4  ;;  %v7289_v42 = vld [vmem:[#allocation3 + $0xc0] sm:$0xf]  ;;  %v4142_v63 = vld [vmem:[#allocation3 + $0x54] sm:$0xf] }
 0x310   : > { %4138 = vst [vmem:[#allocation3 + $0x4c] sm:$0xf] %v4039_v6  ;;  %4141 = vst [vmem:[#allocation3 + $0x50] sm:$0x1] %v4140_v21  ;;  %v4021_v45 = vor.u32 %v4019_v40, %v4018_v20  ;;  %v4023_v14 = vrot.slane %v4018_v20, 4  ;;  %v7158_v56 = vrot.slane %v7156_v43, 7  ;;  %v7013_v39 = vadd.f32 %v18955_v55, %v18864_v44 }
 0x311   : > { %v19043_v23 = vrot.slane %v4059_v61, 7  ;;  %v7179_v8 = vsel %vm17286_vm9, %v7171_v62, %v7178_v3  ;;  %v7280_v54 = vsel %vm17259_vm3, %v7180_v24, %v7279_v0  ;;  %v3871_v28 = vadd.f32 %v18864_v44, %v18941_v58  ;;  %v7282_v21 = vld [vmem:[#allocation3 + $0xb4] sm:$0xf] }
 0x312   : > { %7278 = vst [vmem:[#allocation3 + $0xac] sm:$0xf] %v7179_v8  ;;  %7281 = vst [vmem:[#allocation3 + $0xb0] sm:$0x1] %v7280_v54  ;;  %v4022_v11 = vsel %vm17286_vm9, %v4014_v4, %v4021_v45  ;;  %v4133_v59 = vsel %vm17259_vm3, %v4023_v14, %v4132_v26  ;;  %v7161_v32 = vor.u32 %v7159_v13, %v7158_v56  ;;  %v7163_v62 = vrot.slane %v7158_v56, 4 }
 0x313   : > { %4131 = vst [vmem:[#allocation3 + $0x40] sm:$0xf] %v4022_v11  ;;  %4134 = vst [vmem:[#allocation3 + $0x44] sm:$0x1] %v4133_v59  ;;  %v4064_v15 = vor.u32 %v4062_v2, %v19043_v23  ;;  %v4065_v55 = vrot.slane %v19043_v23, 4  ;;  %v7029_v9 = vmax.f32 %v7013_v39, 0.0  ;;  %v7011_v53 = vadd.f32 %v18864_v44, %v18959_v27 }
 0x314   : > { %v3887_v46 = vmax.f32 %v3871_v28, 0.0  ;;  %v7162_v58 = vsel %vm17286_vm9, %v7154_v47, %v7161_v32  ;;  %v7273_v4 = vsel %vm17259_vm3, %v7163_v62, %v7272_v25  ;;  %v3874_v10 = vadd.f32 %v18943_v12, %v18864_v44  ;;  %v19077_v12 = vld [vmem:[#allocation3 + $0xc] sm:$0xf]  ;;  %v4153_v56 = vld [vmem:[#allocation3 + $0x68] sm:$0x1] }
 0x315   : > { %7271 = vst [vmem:[#allocation3 + $0xa0] sm:$0xf] %v7162_v58  ;;  %7274 = vst [vmem:[#allocation3 + $0xa4] sm:$0x1] %v7273_v4  ;;  %v4150_v18 = vsel %vm17295_vm10, %v4064_v15, %v4149_v33  ;;  %v14054_v48 = vpack.c.bf16 %v7029_v9, %v7029_v9  ;;  %v7014_v37 = vadd.f32 %v18965_v29, %v18864_v44  ;;  %v7027_v47 = vmax.f32 %v7011_v53, 0.0 }
 0x316   : > { %v14036_v19 = vpack.c.bf16 %v3887_v46, %v3887_v46  ;;  %4151 = vst [vmem:[#allocation3 + $0x60] sm:$0xf] %v4150_v18  ;;  %v3890_v22 = vmax.f32 %v3874_v10, 0.0  ;;  %v3872_v1 = vadd.f32 %v18864_v44, %v18945_v7  ;;  %v7012_v27 = vadd.f32 %v18864_v44, %v18971_v57  ;;  %v19092_v59 = vld [vmem:[#allocation3 + $0x10] sm:$0xf] }
 0x317   : > { %v7199_v60 = vshrl.u32 %v14054_v48, 16  ;;  %v7202_v30 = vshll.u32 %v14054_v48, 16  ;;  %v14052_v31 = vpack.c.bf16 %v7027_v47, %v7027_v47  ;;  %v7030_v40 = vmax.f32 %v7014_v37, 0.0  ;;  %v19094_v9 = vld [vmem:[#allocation3 + $0x14] sm:$0x1] }
 0x318   : > { %v4042_v50 = vshrl.u32 %v14036_v19, 16  ;;  %v4045_v36 = vshll.u32 %v14036_v19, 16  ;;  %v14039_v34 = vpack.c.bf16 %v3890_v22, %v3890_v22  ;;  %v3888_v17 = vmax.f32 %v3872_v1, 0.0  ;;  %v7293_v53 = vld [vmem:[#allocation3 + $0xc8] sm:$0x1] }
 0x319   : > { %v19079_v29 = vrot.slane %v7199_v60, 7  ;;  %v7028_v41 = vmax.f32 %v7012_v27, 0.0  ;;  %v7365_v7 = vshrl.u32 %v19077_v12, 16  ;;  %v7182_v44 = vshrl.u32 %v14052_v31, 16  ;;  %v4146_v10 = vld [vmem:[#allocation3 + $0x5c] sm:$0x1] }
 0x31a   : > { %v19081_v5 = vrot.slane %v4042_v50, 7  ;;  %v7185_v57 = vshll.u32 %v14052_v31, 16  ;;  %v4067_v20 = vshrl.u32 %v14039_v34, 16  ;;  %v4070_v0 = vshll.u32 %v14039_v34, 16  ;;  %v7286_v47 = vld [vmem:[#allocation3 + $0xbc] sm:$0x1] }
 0x31b   : > { %v7204_v43 = vor.u32 %v7202_v30, %v19079_v29  ;;  %v7205_v13 = vrot.slane %v19079_v29, 4  ;;  %v7184_v6 = vrot.slane %v7182_v44, 7  ;;  %v14055_v24 = vpack.c.bf16 %v7030_v40, %v7030_v40  ;;  %v19108_v27 = vld [vmem:[#allocation3 + $0x18] sm:$0xf]  ;;  %v19110_v29 = vld [vmem:[#allocation3 + $0x1c] sm:$0xf] }
 0x31c   : > { %v4047_v61 = vor.u32 %v4045_v36, %v19081_v5  ;;  %v4048_v2 = vrot.slane %v19081_v5, 4  ;;  %v4069_v3 = vrot.slane %v4067_v20, 7  ;;  %v14037_v26 = vpack.c.bf16 %v3888_v17, %v3888_v17 }
 0x31d   : > { %v7290_v45 = vsel %vm17295_vm10, %v7204_v43, %v7289_v42  ;;  %v14053_v8 = vpack.c.bf16 %v7028_v41, %v7028_v41  ;;  %v7367_v54 = vrot.slane %v7365_v7, 4  ;;  %v7187_v25 = vor.u32 %v7185_v57, %v7184_v6  ;;  %v19126_v43 = vld [vmem:[#allocation3 + $0x24] sm:$0xf] }
 0x31e   : > { %v4143_v14 = vsel %vm17295_vm10, %v4047_v61, %v4142_v63  ;;  %7291 = vst [vmem:[#allocation3 + $0xc0] sm:$0xf] %v7290_v45  ;;  %v7188_v39 = vrot.slane %v7184_v6, 4  ;;  %v4072_v28 = vor.u32 %v4070_v0, %v4069_v3  ;;  %v4074_v11 = vrot.slane %v4069_v3, 4  ;;  %v19120_v63 = vld [vmem:[#allocation3 + $0x20] sm:$0x1] }
 0x31f   : > { %4144 = vst [vmem:[#allocation3 + $0x54] sm:$0xf] %v4143_v14  ;;  %v7207_v32 = vshrl.u32 %v14055_v24, 16  ;;  %v7210_v62 = vshll.u32 %v14055_v24, 16  ;;  %v4050_v33 = vshrl.u32 %v14037_v26, 16  ;;  %v4053_v15 = vshll.u32 %v14037_v26, 16 }
 0x320   : > { %v7283_v46 = vsel %vm17295_vm10, %v7187_v25, %v7282_v21  ;;  %v4073_v58 = vsel %vm17286_vm9, %v4065_v55, %v4072_v28  ;;  %v4154_v4 = vsel %vm17259_vm3, %v4074_v11, %v4153_v56  ;;  %v7190_v18 = vshrl.u32 %v14053_v8, 16 }
 0x321   : > { %7284 = vst [vmem:[#allocation3 + $0xb4] sm:$0xf] %v7283_v46  ;;  %4152 = vst [vmem:[#allocation3 + $0x64] sm:$0xf] %v4073_v58  ;;  %v7209_v48 = vrot.slane %v7207_v32, 7  ;;  %v4052_v19 = vrot.slane %v4050_v33, 7 }
 0x322   : > { %4155 = vst [vmem:[#allocation3 + $0x68] sm:$0x1] %v4154_v4  ;;  %v7193_v37 = vshll.u32 %v14053_v8, 16  ;;  %v7368_v52 = vshll.u32 %v19077_v12, 16  ;;  %v7192_v22 = vrot.slane %v7190_v18, 7  ;;  %v7374_v23 = vshll.u32 %v19092_v59, 16 }
 0x323   : > { %v7378_v55 = vshrl.u32 %v19092_v59, 16  ;;  %v7384_v1 = vshll.u32 %v19094_v9, 16  ;;  %v7212_v60 = vor.u32 %v7210_v62, %v7209_v48  ;;  %v7214_v30 = vrot.slane %v7209_v48, 4  ;;  %v19135_v8 = vld [vmem:[#allocation3 + $0x2c] sm:$0x1] }
 0x324   : > { %v4055_v50 = vor.u32 %v4053_v15, %v4052_v19  ;;  %v4057_v36 = vrot.slane %v4052_v19, 4  ;;  %v7195_v31 = vor.u32 %v7193_v37, %v7192_v22  ;;  %v7197_v34 = vrot.slane %v7192_v22, 4  ;;  %v19142_v46 = vld [vmem:[#allocation3 + $0x30] sm:$0xf]  ;;  %v19148_v18 = vld [vmem:[#allocation3 + $0x34] sm:$0xf] }
 0x325   : > { %v7370_v40 = vrot.slane %v7368_v52, 5  ;;  %v7376_v17 = vrot.slane %v7374_v23, 5  ;;  %v7213_v42 = vsel %vm17286_vm9, %v7205_v13, %v7212_v60  ;;  %v7294_v5 = vsel %vm17259_vm3, %v7214_v30, %v7293_v53  ;;  %v19128_v13 = vld [vmem:[#allocation3 + $0x28] sm:$0xf]  ;;  %v16630_v37 = vld [vmem:[#allocation9 + $0x8] sm:$0xff]  }
 0x326   : > { %v4056_v41 = vsel %vm17286_vm9, %v4048_v2, %v4055_v50  ;;  %v4147_v7 = vsel %vm17259_vm3, %v4057_v36, %v4146_v10  ;;  %7292 = vst [vmem:[#allocation3 + $0xc4] sm:$0xf] %v7213_v42  ;;  %7295 = vst [vmem:[#allocation3 + $0xc8] sm:$0x1] %v7294_v5  ;;  %v7196_v44 = vsel %vm17286_vm9, %v7188_v39, %v7195_v31  ;;  %v7380_v0 = vrot.slane %v7378_v55, 4 }
 0x327   : > { %4145 = vst [vmem:[#allocation3 + $0x58] sm:$0xf] %v4056_v41  ;;  %4148 = vst [vmem:[#allocation3 + $0x5c] sm:$0x1] %v4147_v7  ;;  %v7287_v57 = vsel %vm17259_vm3, %v7197_v34, %v7286_v47  ;;  %v7371_v20 = vor.u32 %v7370_v40, %v7367_v54  ;;  %v7386_v61 = vrot.slane %v7384_v1, 5  ;;  %v7389_v2 = vshrl.u32 %v19108_v27, 16 }
 0x328   : > { %7285 = vst [vmem:[#allocation3 + $0xb8] sm:$0xf] %v7196_v44  ;;  %7288 = vst [vmem:[#allocation3 + $0xbc] sm:$0x1] %v7287_v57  ;;  %v7392_v6 = vshll.u32 %v19108_v27, 16  ;;  %v7398_v21 = vshll.u32 %v19110_v29, 16  ;;  %v7381_v3 = vor.u32 %v7380_v0, %v7376_v17 }
 0x329   : > { %v7372_v35 = vrot.slane %v7371_v20, 4  ;;  %v7402_v24 = vshrl.u32 %v19110_v29, 16  ;;  %v7408_v26 = vshll.u32 %v19120_v63, 16  ;;  %v7391_v45 = vrot.slane %v7389_v2, 4  ;;  %v19150_v1 = vld [vmem:[#allocation3 + $0x38] sm:$0x1] }
 0x32a   : > { %v7394_v14 = vrot.slane %v7392_v6, 5  ;;  %v7400_v56 = vrot.slane %v7398_v21, 5  ;;  %v7413_v54 = vshrl.u32 %v19126_v43, 16  ;;  %v7382_v39 = vrot.slane %v7381_v3, 4  ;;  %v19157_v34 = vld [vmem:[#allocation3 + $0x3c] sm:$0xf] }
 0x32b   : > { %v7377_v25 = vsel %vm17309_vm11, %v7372_v35, %v7376_v17  ;;  %v7404_v28 = vrot.slane %v7402_v24, 4  ;;  %v7410_v11 = vrot.slane %v7408_v26, 5  ;;  %v7416_v33 = vshll.u32 %v19126_v43, 16  ;;  %v16842_v17 = vld [vmem:[#allocation9] sm:$0xff]   ;;  %v19162_v7 = vld [vmem:[#allocation3 + $0x40] sm:$0xf] }
 0x32c   : > { %v7395_v32 = vor.u32 %v7394_v14, %v7391_v45  ;;  %v7415_v62 = vrot.slane %v7413_v54, 4  ;;  %v7422_v15 = vshll.u32 %v19128_v13, 16  ;;  %v7387_v58 = vsel %vm17309_vm11, %v7382_v39, %v7386_v61  ;;  %v16631_v20 = vld [vmem:[#allocation9 + $0x10] sm:$0xff]  }
 0x32d   : > { %v7405_v4 = vor.u32 %v7404_v28, %v7400_v56  ;;  %v7426_v53 = vshrl.u32 %v19128_v13, 16  ;;  %v7432_v10 = vshll.u32 %v19135_v8, 16  ;;  %v13679_v48 = vcombine.low %v7377_v25, %v7387_v58  ;;  %v19168_v45 = vld [vmem:[#allocation3 + $0x48] sm:$0xf]  ;;  %v19174_v25 = vld [vmem:[#allocation3 + $0x44] sm:$0x1] }
 0x32e   : > { %v7396_v19 = vrot.slane %v7395_v32, 4  ;;  %v7418_v47 = vrot.slane %v7416_v33, 5  ;;  %v7424_v52 = vrot.slane %v7422_v15, 5  ;;  %v7437_v60 = vshrl.u32 %v19142_v46, 16  ;;  %v19176_v28 = vld [vmem:[#allocation3 + $0x4c] sm:$0xf] }
 0x32f   : > { %v7406_v22 = vrot.slane %v7405_v4, 4  ;;  %v7428_v23 = vrot.slane %v7426_v53, 4  ;;  %v7434_v55 = vrot.slane %v7432_v10, 5  ;;  %15246 = vmatmul.mubr.bf16.vlgmr.msra.gmra.mrb[16].mxu0 %v13679_v48  ;;  %v7440_v36 = vshll.u32 %v19142_v46, 16  ;;  %v16632_v33 = vld [vmem:[#allocation9 + $0x18] sm:$0xff]  }
 0x330   : > { %v7401_v30 = vsel %vm17309_vm11, %v7396_v19, %v7400_v56  ;;  %v7419_v50 = vor.u32 %v7418_v47, %v7415_v62  ;;  %v7446_v31 = vshll.u32 %v19148_v18, 16  ;;  %15262 = vmatpush3.bf16.msra.mxu0 %v16842_v17  ;;  %v7439_v5 = vrot.slane %v7437_v60, 4 }
 0x331   : > { %v7411_v40 = vsel %vm17309_vm11, %v7406_v22, %v7410_v11  ;;  %v7429_v42 = vor.u32 %v7428_v23, %v7424_v52  ;;  %v7450_v41 = vshrl.u32 %v19148_v18, 16  ;;  %15263 = vmatprep.subr.bf16.mxu0 %v16630_v37  ;;  %v7442_v0 = vrot.slane %v7440_v36, 5 }
 0x332   : > { %v13680_v44 = vcombine.low %v7401_v30, %v7411_v40  ;;  %v7420_v57 = vrot.slane %v7419_v50, 4  ;;  %v7448_v61 = vrot.slane %v7446_v31, 5  ;;  %v7456_v21 = vshll.u32 %v19150_v1, 16  ;;  %v19189_v30 = vld [vmem:[#allocation3 + $0x58] sm:$0xf] }
 0x333   : > { %v7430_v2 = vrot.slane %v7429_v42, 4  ;;  %v7452_v6 = vrot.slane %v7450_v41, 4  ;;  %v7461_v35 = vshrl.u32 %v19157_v34, 16  ;;  %v7443_v3 = vor.u32 %v7442_v0, %v7439_v5  ;;  %v16633_v31 = vld [vmem:[#allocation9 + $0x20] sm:$0xff]   ;;  %v19191_v40 = vld [vmem:[#allocation3 + $0x50] sm:$0x1] }
 0x334   : > { %15249 = vmatprep.mubr.bf16.mxu0 %v13680_v44  ;;  %v7464_v24 = vshll.u32 %v19157_v34, 16  ;;  %v7470_v26 = vshll.u32 %v19162_v7, 16  ;;  %15264 = vmatpush3.bf16.msra.mxu0 %v16630_v37  ;;  %v7425_v14 = vsel %vm17309_vm11, %v7420_v57, %v7424_v52  ;;  %v7458_v62 = vrot.slane %v7456_v21, 5  ;;  %v19183_v52 = vld [vmem:[#allocation3 + $0x54] sm:$0xf] }
 0x335   : > { %v7435_v56 = vsel %vm17309_vm11, %v7430_v2, %v7434_v55  ;;  %v7453_v54 = vor.u32 %v7452_v6, %v7448_v61  ;;  %v7463_v39 = vrot.slane %v7461_v35, 4  ;;  %15265 = vmatprep.subr.bf16.mxu0 %v16631_v20  ;;  %v7444_v32 = vrot.slane %v7443_v3, 4  ;;  %v19198_v35 = vld [vmem:[#allocation3 + $0x5c] sm:$0x1] }
 0x336   : > { %v13681_v11 = vcombine.low %v7425_v14, %v7435_v56  ;;  %v7466_v15 = vrot.slane %v7464_v24, 5  ;;  %v7472_v4 = vrot.slane %v7470_v26, 5  ;;  %v7474_v53 = vshrl.u32 %v19162_v7, 16  ;;  %v16634_v24 = vld [vmem:[#allocation9 + $0x28] sm:$0xff]  }
 0x337   : > { %v7454_v58 = vrot.slane %v7453_v54, 4  ;;  %v7485_v10 = vshrl.u32 %v19168_v45, 16  ;;  %v7480_v19 = vshll.u32 %v19174_v25, 16  ;;  %v7488_v37 = vshll.u32 %v19168_v45, 16 }
 0x338   : > { %15250 = vmatmul.mubr.bf16.gmra.mrb[20].mxu0 %v13681_v11  ;;  %v7467_v48 = vor.u32 %v7466_v15, %v7463_v39  ;;  %v7494_v47 = vshll.u32 %v19176_v28, 16  ;;  %v7449_v22 = vsel %vm17309_vm11, %v7444_v32, %v7448_v61  ;;  %v7476_v55 = vrot.slane %v7474_v53, 4 }
 0x339   : > { %v7459_v23 = vsel %vm17309_vm11, %v7454_v58, %v7458_v62  ;;  %15266 = vmatpush3.bf16.msra.mxu0 %v16631_v20  ;;  %v7487_v60 = vrot.slane %v7485_v10, 4  ;;  %v7490_v17 = vrot.slane %v7488_v37, 5  ;;  %v7498_v41 = vshrl.u32 %v19176_v28, 16  ;;  %v16635_v37 = vld [vmem:[#allocation9 + $0x30] sm:$0xff]  }
 0x33a   : > { %v13682_v50 = vcombine.low %v7449_v22, %v7459_v23  ;;  %15267 = vmatprep.subr.bf16.mxu0 %v16632_v33  ;;  %v7468_v36 = vrot.slane %v7467_v48, 4  ;;  %v7477_v42 = vor.u32 %v7476_v55, %v7472_v4  ;;  %v7496_v5 = vrot.slane %v7494_v47, 5  ;;  %v7920_v22 = vld [vmem:[#allocation3 + $0xc] sm:$0xe] }
 0x33b   : > { %v7509_v44 = vshrl.u32 %v19183_v52, 16  ;;  %v7482_v57 = vrot.slane %v7480_v19, 5  ;;  %v7491_v20 = vor.u32 %v7490_v17, %v7487_v60  ;;  %v7512_v0 = vshll.u32 %v19183_v52, 16 }
 0x33c   : > { %15253 = vmatprep.mubr.bf16.mxu0 %v13682_v50  ;;  %v7518_v61 = vshll.u32 %v19189_v30, 16  ;;  %v7478_v2 = vrot.slane %v7477_v42, 4  ;;  %v7500_v6 = vrot.slane %v7498_v41, 4  ;;  %v7504_v21 = vshll.u32 %v19191_v40, 16  ;;  %v16636_v42 = vld [vmem:[#allocation9 + $0x38] sm:$0xff]  }
 0x33d   : > { %15268 = vmatpush3.bf16.msra.mxu0 %v16632_v33  ;;  %v7511_v3 = vrot.slane %v7509_v44, 4  ;;  %v7514_v26 = vrot.slane %v7512_v0, 5  ;;  %v7522_v56 = vshrl.u32 %v19189_v30, 16  ;;  %v7473_v54 = vsel %vm17309_vm11, %v7468_v36, %v7472_v4  ;;  %v7921_v36 = vld [vmem:[#allocation3 + $0x18] sm:$0xe] }
 0x33e   : > { %15269 = vmatprep.subr.bf16.mxu0 %v16633_v31  ;;  %v7520_v14 = vrot.slane %v7518_v61, 5  ;;  %v7483_v39 = vsel %vm17309_vm11, %v7478_v2, %v7482_v57  ;;  %v7492_v11 = vrot.slane %v7491_v20, 4  ;;  %v7501_v32 = vor.u32 %v7500_v6, %v7496_v5  ;;  %v19215_v41 = vld [vmem:[#allocation3 + $0x4] sm:$0xf] }
 0x33f   : > { %v13683_v62 = vcombine.low %v7473_v54, %v7483_v39  ;;  %v7515_v33 = vor.u32 %v7514_v26, %v7511_v3  ;;  %v7524_v15 = vrot.slane %v7522_v56, 4  ;;  %v7528_v58 = vshll.u32 %v19198_v35, 16  ;;  %v7922_v6 = vld [vmem:[#allocation3 + $0x24] sm:$0xe] }
 0x340   : > { %v7502_v53 = vrot.slane %v7501_v32, 4  ;;  %v7506_v10 = vrot.slane %v7504_v21, 5  ;;  %v7497_v4 = vsel %vm17309_vm11, %v7492_v11, %v7496_v5  ;;  %v7952_v50 = vrot.slane %v19092_v59, 5  ;;  %v16843_v5 = vld [vmem:[#allocation3] sm:$0xf] }
 0x341   : > { %15270 = vmatpush3.bf16.msra.mxu0 %v16633_v31  ;;  %v7516_v48 = vrot.slane %v7515_v33, 4  ;;  %v7525_v19 = vor.u32 %v7524_v15, %v7520_v14  ;;  %v7530_v60 = vrot.slane %v7528_v58, 5  ;;  %v13694_v44 = vcombine.low %v16843_v5, %v19215_v41  ;;  %v7924_v58 = vld [vmem:[#allocation3 + $0x3c] sm:$0xe] }
 0x342   : > { %15254 = vmatmul.mubr.bf16.gmra.mrb[24].mxu0 %v13683_v62  ;;  %15271 = vmatprep.subr.bf16.mxu0 %v16634_v24  ;;  %v7507_v47 = vsel %vm17309_vm11, %v7502_v53, %v7506_v10  ;;  %v13711_v57 = vrot.slane %v7920_v22, 9  ;;  %v7954_v0 = vrot.slane %v7952_v50, 4  ;;  %v7955_v61 = vrot.slane %v19094_v9, 5  ;;  %v16639_v9 = vld [vmem:[#allocation9 + $0x80] sm:$0xff]   ;;  %v7923_v62 = vld [vmem:[#allocation3 + $0x30] sm:$0xe] }
 0x343   : > { %v13684_v23 = vcombine.low %v7497_v4, %v7507_v47  ;;  %v7526_v55 = vrot.slane %v7525_v19, 4  ;;  %v7521_v31 = vsel %vm17309_vm11, %v7516_v48, %v7520_v14  ;;  %v7959_v2 = vrot.slane %v19110_v29, 5 }
 0x344   : > { %v13712_v21 = vrot.slane %v7921_v36, 9  ;;  %v7966_v3 = vrot.slane %v19128_v13, 5  ;;  %v19227_v26 = vsel %vm17763_vm14, %v7954_v0, %v7955_v61  ;;  %v7962_v56 = vrot.slane %v19120_v63, 5  ;;  %v16643_v0 = vld [vmem:[#allocation9 + $0x90] sm:$0xff]  }
 0x345   : > { %15272 = vmatpush3.bf16.msra.mxu0 %v16634_v24  ;;  %15257 = vmatprep.mubr.bf16.mxu0 %v13684_v23  ;;  %v7531_v17 = vsel %vm17309_vm11, %v7526_v55, %v7530_v60  ;;  %v19223_v24 = vsel %vm17763_vm14, %v13711_v57, %v7952_v50  ;;  %v7961_v14 = vrot.slane %v7959_v2, 4  ;;  %v13713_v39 = vrot.slane %v7922_v6, 9  ;;  %v7926_v60 = vld [vmem:[#allocation3 + $0x54] sm:$0xe] }
 0x346   : > { %15273 = vmatprep.subr.bf16.mxu0 %v16635_v37  ;;  %v13685_v20 = vcombine.low %v7521_v31, %v7531_v17  ;;  %v13719_v54 = vcombine.low %v19223_v24, %v19227_v26  ;;  %v7968_v11 = vrot.slane %v7966_v3, 4  ;;  %v7969_v32 = vrot.slane %v19135_v8, 5  ;;  %v7925_v24 = vld [vmem:[#allocation3 + $0x48] sm:$0xe]  ;;  %v16657_v26 = vld [vmem:[#allocation9 + $0xe0] sm:$0xff]  }
 0x347   : > { %v19235_v33 = vsel %vm17763_vm14, %v13712_v21, %v7959_v2  ;;  %v19239_v15 = vsel %vm17763_vm14, %v7961_v14, %v7962_v56  ;;  %v7973_v63 = vrot.slane %v19148_v18, 5  ;;  %v19246_v10 = vsel %vm17763_vm14, %v13713_v39, %v7966_v3  ;;  %v16645_v2 = vld [vmem:[#allocation9 + $0x98] sm:$0xff]   ;;  %v16647_v21 = vld [vmem:[#allocation9 + $0xa0] sm:$0xff]   ;;  %v7919_v14 = vld [vmem:[#allocation3] sm:$0xe] }
 0x348   : > { %v13720_v53 = vcombine.low %v19235_v33, %v19239_v15  ;;  %v19250_v8 = vsel %vm17763_vm14, %v7968_v11, %v7969_v32  ;;  %v7980_v48 = vrot.slane %v19162_v7, 5  ;;  %v7976_v47 = vrot.slane %v19150_v1, 5  ;;  %v16845_v39 = vld [vmem:[#allocation3 + $0x8] sm:$0x1] }
 0x349   : > { %15274 = vmatpush3.bf16.msra.mxu0 %v16635_v37  ;;  %v13721_v19 = vcombine.low %v19246_v10, %v19250_v8  ;;  %v13714_v37 = vrot.slane %v7923_v62, 9  ;;  %v7975_v4 = vrot.slane %v7973_v63, 4  ;;  %v13715_v22 = vrot.slane %v7924_v58, 9  ;;  %v16652_v62 = vld [vmem:[#allocation9 + $0xb8] sm:$0xff]   ;;  %v16659_v8 = vld [vmem:[#allocation9 + $0xf0] sm:$0xff]  }
 0x34a   : > { %15258 = vmatmul.mubr.bf16.gmra.mrb[28].mxu0 %v13685_v20  ;;  %15275 = vmatprep.subr.bf16.mxu0 %v16636_v42  ;;  %v7982_v23 = vrot.slane %v7980_v48, 4  ;;  %v7983_v55 = vrot.slane %v19174_v25, 5  ;;  %v13695_v50 = vcombine.low %v19077_v12, %v19092_v59  ;;  %v7994_v17 = vrot.slane %v19189_v30, 5  ;;  %v16656_v58 = vld [vmem:[#allocation9 + $0xd8] sm:$0xff]  }
 0x34b   : > { %15277 = vmatprep.mubr.bf16.mxu0 %v13694_v44  ;;  %v19261_v36 = vsel %vm17763_vm14, %v13714_v37, %v7973_v63  ;;  %v19265_v31 = vsel %vm17763_vm14, %v7975_v4, %v7976_v47  ;;  %v13696_v1 = vcombine.low %v19108_v27, %v19110_v29  ;;  %v19274_v12 = vsel %vm17763_vm14, %v13715_v22, %v7980_v48  ;;  %v16654_v63 = vld [vmem:[#allocation9 + $0xc8] sm:$0xff]   ;;  %v16663_v37 = vld [vmem:[#allocation9 + $0x100] sm:$0xff]  }
 0x34c   : > { %v13722_v25 = vcombine.low %v19261_v36, %v19265_v31  ;;  %v19278_v59 = vsel %vm17763_vm14, %v7982_v23, %v7983_v55  ;;  %v13717_v44 = vrot.slane %v7926_v60, 9  ;;  %v7996_v57 = vrot.slane %v7994_v17, 4  ;;  %v16662_v4 = vld [vmem:[#allocation3 + $0x18] sm:$0xff]   ;;  %v16665_v47 = vld [vmem:[#allocation9 + $0x108] sm:$0xff]   ;;  %v19332_v23 = vld [vmem:[#allocation3 + $0x10] sm:$0xf] }
 0x34d   : > { %15276 = vmatpush3.bf16.msra.mxu0 %v16636_v42  ;;  %v16641_v42 = vld [vmem:[#allocation9 + $0x88] sm:$0xff]   ;;  %v13723_v5 = vcombine.low %v19274_v12, %v19278_v59  ;;  %v7997_v20 = vrot.slane %v19198_v35, 5  ;;  %v13697_v35 = vcombine.low %v19126_v43, %v19128_v13  ;;  %v13698_v6 = vcombine.low %v19142_v46, %v19148_v18  ;;  %v16651_v18 = vld [vmem:[#allocation9 + $0xb0] sm:$0xff]  }
 0x34e   : > { %15293 = vmatprep.subr.bf16.mxu0 %v16639_v9  ;;  %v19285_v27 = vsel %vm17763_vm14, %v13717_v44, %v7994_v17  ;;  %v7945_v3 = vrot.slane %v19215_v41, 5  ;;  %v13699_v56 = vcombine.low %v19157_v34, %v19162_v7  ;;  %v13710_v43 = vrot.slane %v7919_v14, 9  ;;  %v16664_v22 = vld [vmem:[#allocation3 + $0x24] sm:$0xff]   ;;  %v8451_v55 = vld [vmem:[#allocation3 + $0xc] sm:$0xf]  ;;  %v16668_v44 = vld [vmem:[#allocation3 + $0x3c] sm:$0xff]  }
 0x34f   : > { %v19289_v29 = vsel %vm17763_vm14, %v7996_v57, %v7997_v20  ;;  %v7948_v11 = vrot.slane %v16845_v39, 5  ;;  %v13700_v46 = vcombine.low %v19168_v45, %v19176_v28  ;;  %v13701_v32 = vcombine.low %v19183_v52, %v19189_v30  ;;  %v16653_v45 = vld [vmem:[#allocation9 + $0xc0] sm:$0xff]   ;;  %v16655_v52 = vld [vmem:[#allocation9 + $0xd0] sm:$0xff]   ;;  %v19347_v14 = vld [vmem:[#allocation3 + $0x20] sm:$0x1] }
 0x350   : > { %v13725_v61 = vcombine.low %v19285_v27, %v19289_v29  ;;  %v7947_v13 = vrot.slane %v7945_v3, 4  ;;  %v7946_v41 = vsel %vm17763_vm14, %v13710_v43, %v7945_v3  ;;  %v7987_v30 = vrot.slane %v19176_v28, 5  ;;  %v16667_v60 = vld [vmem:[#allocation9 + $0x110] sm:$0xff]   ;;  %v8457_v3 = vld [vmem:[#allocation3 + $0x24] sm:$0xf] }
 0x351   : > { %v13716_v33 = vrot.slane %v7925_v24, 9  ;;  %v8489_v36 = vshrl.u32 %v19332_v23, 16  ;;  %v8476_v31 = vshrl.u32 %v8451_v55, 16  ;;  %v8479_v17 = vshll.u32 %v8451_v55, 16  ;;  %v8460_v24 = vld [vmem:[#allocation3 + $0x30] sm:$0xf] }
 0x352   : > { %15278 = vmatmul.mubr.bf16.vlgmr.msra.gmra.mrb[16].mxu0 %v13695_v50  ;;  %v7949_v34 = vsel %vm17763_vm14, %v7947_v13, %v7948_v11  ;;  %v7989_v48 = vrot.slane %v7987_v30, 4  ;;  %v8485_v50 = vshll.u32 %v19332_v23, 16  ;;  %v8463_v55 = vld [vmem:[#allocation3 + $0x3c] sm:$0xf] }
 0x353   : > { %15281 = vmatprep.mubr.bf16.mxu0 %v13696_v1  ;;  %15294 = vmatpush3.bf16.msra.mxu0 %v16639_v9  ;;  %v16649_v9 = vld [vmem:[#allocation9 + $0xa8] sm:$0xff]   ;;  %v13718_v7 = vcombine.low %v7946_v41, %v7949_v34  ;;  %v7988_v15 = vsel %vm17763_vm14, %v13716_v33, %v7987_v30  ;;  %v19336_v1 = vld [vmem:[#allocation3 + $0x1c] sm:$0xf]  ;;  %v8491_v59 = vrot.slane %v8489_v36, 4  ;;  %v8478_v27 = vrot.slane %v8476_v31, 4 }
 0x354   : > { %15295 = vmatprep.subr.bf16.mxu0 %v16641_v42  ;;  %v19338_v12 = vrot.slane %v8485_v50, 5  ;;  %v8509_v57 = vshll.u32 %v19336_v1, 16  ;;  %v8513_v20 = vshrl.u32 %v19336_v1, 16  ;;  %v8481_v29 = vrot.slane %v8479_v17, 5 }
 0x355   : > { %v8524_v41 = vshrl.u32 %v8457_v3, 16  ;;  %v8527_v34 = vshll.u32 %v8457_v3, 16  ;;  %v8551_v50 = vshll.u32 %v8460_v24, 16 }
 0x356   : > { %v8482_v39 = vor.u32 %v8481_v29, %v8478_v27  ;;  %v8575_v27 = vshll.u32 %v8463_v55, 16 }
 0x357   : > { %15296 = vmatpush3.bf16.msra.mxu0 %v16641_v42  ;;  %v16666_v42 = vld [vmem:[#allocation3 + $0x30] sm:$0xff]  }
 0x358   : > { %15297 = vmatprep.subr.bf16.mxu0 %v16643_v0 }
 0x35a   : > { %15282 = vmatmul.mubr.bf16.gmra.mrb[20].mxu0 %v13697_v35 }
 0x35b   : > { %15285 = vmatprep.mubr.bf16.mxu0 %v13698_v6  ;;  %15298 = vmatpush3.bf16.msra.mxu0 %v16643_v0  ;;  %v19342_v0 = vld [vmem:[#allocation3 + $0x28] sm:$0xf]  ;;  %v16671_v6 = vld [vmem:[#allocation9 + $0x120] sm:$0xff]  }
 0x35c   : > { %15299 = vmatprep.subr.bf16.mxu0 %v16645_v2  ;;  %v8533_v43 = vshll.u32 %v19342_v0, 16  ;;  %v8537_v13 = vshrl.u32 %v19342_v0, 16 }
 0x35e   : > { %v19356_v30 = vrot.slane %v8533_v43, 5  ;;  %v19381_v43 = vld [vmem:[#allocation3 + $0x4c] sm:$0xf] }
 0x35f   : > { %15300 = vmatpush3.bf16.msra.mxu0 %v16645_v2 }
 0x360   : > { %15301 = vmatprep.subr.bf16.mxu0 %v16647_v21 }
 0x362   : > { %15286 = vmatmul.mubr.bf16.gmra.mrb[24].mxu0 %v13699_v56  ;;  %v19349_v56 = vrot.slane %v8509_v57, 5  ;;  %v16676_v57 = vld [vmem:[#allocation9 + $0x138] sm:$0xff]  }
 0x363   : > { %15289 = vmatprep.mubr.bf16.mxu0 %v13700_v46  ;;  %15302 = vmatpush3.bf16.msra.mxu0 %v16647_v21  ;;  %v8492_v21 = vor.u32 %v8491_v59, %v19338_v12 }
 0x364   : > { %15303 = vmatprep.subr.bf16.mxu0 %v16649_v9 }
 0x367   : > { %15304 = vmatpush3.bf16.msra.mxu0 %v16649_v9  ;;  %v8515_v9 = vrot.slane %v8513_v20, 4  ;;  %v8572_v20 = vshrl.u32 %v8463_v55, 16 }
 0x368   : > { %15305 = vmatprep.subr.bf16.mxu0 %v16651_v18 }
 0x36a   : > { %15290 = vmatmul.mubr.bf16.gmra.mrb[28].mxu0 %v13701_v32  ;;  %v16673_v32 = vld [vmem:[#allocation9 + $0x128] sm:$0xff]  }
 0x36b   : > { %15306 = vmatpush3.bf16.msra.mxu0 %v16651_v18  ;;  %15309 = vmatprep.mubr.bf16.mxu0 %v13718_v7  ;;  %v16670_v7 = vld [vmem:[#allocation3 + $0x48] sm:$0xff]  }
 0x36c   : > { %15307 = vmatprep.subr.bf16.mxu0 %v16652_v62 }
 0x36f   : > { %15308 = vmatpush3.bf16.msra.mxu0 %v16652_v62  ;;  %v8493_v62 = vrot.slane %v8492_v21, 4 }
 0x370   : > { %15325 = vmatprep.subr.bf16.mxu0 %v16653_v45 }
 0x372   : > { %15310 = vmatmul.mubr.bf16.vlgmr.msra.gmra.mrb[16].mxu0 %v13719_v54  ;;  %v7990_v54 = vrot.slane %v19191_v40, 5  ;;  %v16661_v40 = vld [vmem:[#allocation9 + $0xf8] sm:$0xff]  }
 0x373   : > { %15313 = vmatprep.mubr.bf16.mxu0 %v13720_v53  ;;  %15326 = vmatpush3.bf16.msra.mxu0 %v16653_v45  ;;  %v16658_v53 = vld [vmem:[#allocation9 + $0xe8] sm:$0xff]   ;;  %v8519_v45 = vshll.u32 %v19347_v14, 16 }
 0x374   : > { %15327 = vmatprep.subr.bf16.mxu0 %v16654_v63  ;;  %v7991_v28 = vsel %vm17763_vm14, %v7989_v48, %v7990_v54  ;;  %v8483_v54 = vrot.slane %v8482_v39, 4 }
 0x375   : > { %v13724_v10 = vcombine.low %v7988_v15, %v7991_v28  ;;  %v8526_v28 = vrot.slane %v8524_v41, 4  ;;  %v8529_v15 = vrot.slane %v8527_v34, 5  ;;  %v16677_v34 = vld [vmem:[#allocation9 + $0x140] sm:$0xff]  }
 0x376   : > { %v8488_v17 = vsel %vm17309_vm11, %v8483_v54, %v19338_v12  ;;  %v8553_v12 = vrot.slane %v8551_v50, 5 }
 0x377   : > { %15328 = vmatpush3.bf16.msra.mxu0 %v16654_v63  ;;  %v16672_v63 = vld [vmem:[#allocation3 + $0x54] sm:$0xff]  }
 0x378   : > { %15329 = vmatprep.subr.bf16.mxu0 %v16655_v52 }
 0x37a   : > { %15314 = vmatmul.mubr.bf16.gmra.mrb[20].mxu0 %v13721_v19  ;;  %v16660_v19 = vld [vmem:[#allocation3 + $0xc] sm:$0xff]  }
 0x37b   : > { %15317 = vmatprep.mubr.bf16.mxu0 %v13722_v25  ;;  %15330 = vmatpush3.bf16.msra.mxu0 %v16655_v52  ;;  %v16669_v25 = vld [vmem:[#allocation9 + $0x118] sm:$0xff]   ;;  %v8516_v52 = vor.u32 %v8515_v9, %v19349_v56 }
 0x37c   : > { %15331 = vmatprep.subr.bf16.mxu0 %v16656_v58 }
 0x37f   : > { %15332 = vmatpush3.bf16.msra.mxu0 %v16656_v58  ;;  %v8539_v58 = vrot.slane %v8537_v13, 4 }
 0x380   : > { %15333 = vmatprep.subr.bf16.mxu0 %v16657_v26 }
 0x382   : > { %15318 = vmatmul.mubr.bf16.gmra.mrb[24].mxu0 %v13723_v5  ;;  %v8454_v5 = vld [vmem:[#allocation3 + $0x18] sm:$0xf] }
 0x383   : > { %15321 = vmatprep.mubr.bf16.mxu0 %v13724_v10  ;;  %15334 = vmatpush3.bf16.msra.mxu0 %v16657_v26  ;;  %v8500_v35 = vshrl.u32 %v8454_v5, 16  ;;  %v8503_v2 = vshll.u32 %v8454_v5, 16  ;;  %v19358_v26 = vld [vmem:[#allocation3 + $0x34] sm:$0xf]  ;;  %v16675_v10 = vld [vmem:[#allocation9 + $0x130] sm:$0xff]   ;;  %v16674_v5 = vld [vmem:[#allocation3 + $0x60] sm:$0xff]  }
 0x384   : > { %15335 = vmatprep.subr.bf16.mxu0 %v16658_v53 }
 0x385   : > { %v8502_v46 = vrot.slane %v8500_v35, 4  ;;  %v8505_v18 = vrot.slane %v8503_v2, 5 }
 0x387   : > { %15336 = vmatpush3.bf16.msra.mxu0 %v16658_v53  ;;  %v8506_v33 = vor.u32 %v8505_v18, %v8502_v46  ;;  %v19360_v53 = vld [vmem:[#allocation3 + $0x40] sm:$0xf]  ;;  %v19386_v46 = vld [vmem:[#allocation3 + $0x38] sm:$0x1] }
 0x388   : > { %15337 = vmatprep.subr.bf16.mxu0 %v16659_v8  ;;  %v8581_v36 = vshll.u32 %v19360_v53, 16  ;;  %v8585_v31 = vshrl.u32 %v19360_v53, 16  ;;  %v19388_v18 = vld [vmem:[#allocation3 + $0x58] sm:$0xf] }
 0x38a   : > { %15322 = vmatmul.mubr.bf16.gmra.mrb[28].mxu0 %v13725_v61  ;;  %v19344_v61 = vld [vmem:[#allocation3 + $0x14] sm:$0x1]  ;;  %v19379_v3 = vrot.slane %v8581_v36, 5  ;;  %v8587_v9 = vrot.slane %v8585_v31, 4 }
 0x38b   : > { %15338 = vmatpush3.bf16.msra.mxu0 %v16659_v8  ;;  %15341 = vmatprep.mubr.bf16.mxu0 %v16660_v19  ;;  %v8495_v11 = vshll.u32 %v19344_v61, 16  ;;  %v19364_v19 = vld [vmem:[#allocation3 + $0x2c] sm:$0x1] }
 0x38c   : > { %15339 = vmatprep.subr.bf16.mxu0 %v16661_v40  ;;  %v8543_v59 = vshll.u32 %v19364_v19, 16  ;;  %v8588_v54 = vor.u32 %v8587_v9, %v19379_v3 }
 0x38d   : > { %v8497_v48 = vrot.slane %v8495_v11, 5 }
 0x38e   : > { %v8545_v11 = vrot.slane %v8543_v59, 5 }
 0x38f   : > { %15340 = vmatpush3.bf16.msra.mxu0 %v16661_v40  ;;  %v8498_v8 = vsel %vm17309_vm11, %v8493_v62, %v8497_v48  ;;  %v8521_v40 = vrot.slane %v8519_v45, 5  ;;  %v8466_v62 = vld [vmem:[#allocation3 + $0x48] sm:$0xf]  ;;  %v8469_v48 = vld [vmem:[#allocation3 + $0x54] sm:$0xf] }
 0x390   : > { %15357 = vmatprep.subr.bf16.mxu0 %v16663_v37  ;;  %v8623_v55 = vshll.u32 %v8469_v48, 16 }
 0x392   : > { %15342 = vmatmul.mubr.bf16.vlgmr.msra.gmra.mrb[16].mxu0 %v16662_v4  ;;  %v8540_v4 = vor.u32 %v8539_v58, %v19356_v30  ;;  %v8609_v58 = vshrl.u32 %v19381_v43, 16 }
 0x393   : > { %15345 = vmatprep.mubr.bf16.mxu0 %v16664_v22  ;;  %15358 = vmatpush3.bf16.msra.mxu0 %v16663_v37  ;;  %v8517_v37 = vrot.slane %v8516_v52, 4  ;;  %v8561_v22 = vshrl.u32 %v19358_v26, 16  ;;  %v19393_v52 = vld [vmem:[#allocation3 + $0x44] sm:$0x1] }
 0x394   : > { %15359 = vmatprep.subr.bf16.mxu0 %v16665_v47  ;;  %v8541_v35 = vrot.slane %v8540_v4, 4  ;;  %v8611_v31 = vrot.slane %v8609_v58, 4 }
 0x395   : > { %v8522_v29 = vsel %vm17309_vm11, %v8517_v37, %v8521_v40  ;;  %v8599_v40 = vshll.u32 %v8466_v62, 16  ;;  %v16678_v37 = vld [vmem:[#allocation9 + $0x148] sm:$0xff]  }
 0x396   : > { %v8546_v45 = vsel %vm17309_vm11, %v8541_v35, %v8545_v11 }
 0x397   : > { %15360 = vmatpush3.bf16.msra.mxu0 %v16665_v47  ;;  %v8557_v47 = vshll.u32 %v19358_v26, 16 }
 0x398   : > { %15361 = vmatprep.subr.bf16.mxu0 %v16667_v60 }
 0x399   : > { %v19377_v2 = vrot.slane %v8557_v47, 5  ;;  %v8591_v47 = vshll.u32 %v19393_v52, 16 }
 0x39a   : > { %15346 = vmatmul.mubr.bf16.gmra.mrb[20].mxu0 %v16666_v42  ;;  %v8507_v42 = vrot.slane %v8506_v33, 4  ;;  %v8629_v33 = vshll.u32 %v19388_v18, 16 }
 0x39b   : > { %15349 = vmatprep.mubr.bf16.mxu0 %v16668_v44  ;;  %15362 = vmatpush3.bf16.msra.mxu0 %v16667_v60  ;;  %v8548_v60 = vshrl.u32 %v8460_v24, 16  ;;  %v13750_v44 = vcombine.low %v8488_v17, %v8498_v8  ;;  %v8596_v8 = vshrl.u32 %v8466_v62, 16 }
 0x39c   : > { %15363 = vmatprep.subr.bf16.mxu0 %v16669_v25  ;;  %v8512_v13 = vsel %vm17309_vm11, %v8507_v42, %v19349_v56  ;;  %v8605_v56 = vshll.u32 %v19381_v43, 16  ;;  %v8589_v42 = vrot.slane %v8588_v54, 4 }
 0x39d   : > { %v8550_v21 = vrot.slane %v8548_v60, 4  ;;  %v13751_v41 = vcombine.low %v8512_v13, %v8522_v29  ;;  %v16679_v29 = vld [vmem:[#allocation9 + $0x150] sm:$0xff]  }
 0x39e   : > { %v19405_v36 = vrot.slane %v8605_v56, 5 }
 0x39f   : > { %15364 = vmatpush3.bf16.msra.mxu0 %v16669_v25  ;;  %v8530_v25 = vor.u32 %v8529_v15, %v8526_v28  ;;  %v8554_v24 = vor.u32 %v8553_v12, %v8550_v21  ;;  %v8633_v28 = vshrl.u32 %v19388_v18, 16  ;;  %v8625_v12 = vrot.slane %v8623_v55, 5 }
 0x3a0   : > { %15365 = vmatprep.subr.bf16.mxu0 %v16671_v6  ;;  %v8612_v13 = vor.u32 %v8611_v31, %v19405_v36 }
 0x3a1   : > { %v8531_v39 = vrot.slane %v8530_v25, 4  ;;  %v8555_v17 = vrot.slane %v8554_v24, 4  ;;  %v19409_v25 = vrot.slane %v8629_v33, 5  ;;  %v8635_v59 = vrot.slane %v8633_v28, 4  ;;  %v16680_v24 = vld [vmem:[#allocation9 + $0x158] sm:$0xff]  }
 0x3a2   : > { %15350 = vmatmul.mubr.bf16.gmra.mrb[24].mxu0 %v16670_v7  ;;  %v8574_v7 = vrot.slane %v8572_v20, 4  ;;  %v8601_v20 = vrot.slane %v8599_v40, 5  ;;  %v8613_v28 = vrot.slane %v8612_v13, 4  ;;  %v8914_v13 = vrot.slane %v19344_v61, 5 }
 0x3a3   : > { %15353 = vmatprep.mubr.bf16.mxu0 %v16672_v63  ;;  %15366 = vmatpush3.bf16.msra.mxu0 %v16671_v6  ;;  %v8563_v6 = vrot.slane %v8561_v22, 4  ;;  %v8536_v15 = vsel %vm17309_vm11, %v8531_v39, %v19356_v30  ;;  %v8620_v22 = vshrl.u32 %v8469_v48, 16  ;;  %v19407_v30 = vld [vmem:[#allocation3 + $0x50] sm:$0x1]  ;;  %v19416_v39 = vld [vmem:[#allocation3 + $0x5c] sm:$0x1] }
 0x3a4   : > { %15367 = vmatprep.subr.bf16.mxu0 %v16673_v32  ;;  %v13752_v60 = vcombine.low %v8536_v15, %v8546_v45  ;;  %v8615_v45 = vshll.u32 %v19407_v30, 16 }
 0x3a5   : > { %v8564_v63 = vor.u32 %v8563_v6, %v19377_v2  ;;  %v8593_v6 = vrot.slane %v8591_v47, 5  ;;  %v8622_v21 = vrot.slane %v8620_v22, 4  ;;  %v16681_v22 = vld [vmem:[#allocation9 + $0x160] sm:$0xff]  }
 0x3a7   : > { %15368 = vmatpush3.bf16.msra.mxu0 %v16673_v32  ;;  %v8577_v32 = vrot.slane %v8575_v27, 5  ;;  %v8565_v50 = vrot.slane %v8564_v63, 4  ;;  %v8472_v27 = vld [vmem:[#allocation3 + $0x60] sm:$0xf]  ;;  %v8626_v54 = vor.u32 %v8625_v12, %v8622_v21 }
 0x3a8   : > { %15369 = vmatprep.subr.bf16.mxu0 %v16675_v10  ;;  %v8644_v63 = vshrl.u32 %v8472_v27, 16  ;;  %v8647_v56 = vshll.u32 %v8472_v27, 16 }
 0x3a9   : > { %v8578_v4 = vor.u32 %v8577_v32, %v8574_v7  ;;  %v8594_v7 = vsel %vm17309_vm11, %v8589_v42, %v8593_v6  ;;  %v8636_v32 = vor.u32 %v8635_v59, %v19409_v25  ;;  %v8627_v55 = vrot.slane %v8626_v54, 4  ;;  %v8879_v54 = vld [vmem:[#allocation3 + $0x24] sm:$0xe] }
 0x3aa   : > { %15354 = vmatmul.mubr.bf16.gmra.mrb[28].mxu0 %v16674_v5  ;;  %v19411_v5 = vld [vmem:[#allocation3 + $0x64] sm:$0xf]  ;;  %v8649_v47 = vrot.slane %v8647_v56, 5  ;;  %v8911_v42 = vrot.slane %v19332_v23, 5 }
 0x3ab   : > { %15370 = vmatpush3.bf16.msra.mxu0 %v16675_v10  ;;  %15373 = vmatprep.mubr.bf16.mxu0 %v13750_v44  ;;  %v8567_v10 = vshll.u32 %v19386_v46, 16  ;;  %v8579_v35 = vrot.slane %v8578_v4, 4  ;;  %v8653_v11 = vshll.u32 %v19411_v5, 16  ;;  %v8646_v4 = vrot.slane %v8644_v63, 4 }
 0x3ac   : > { %15371 = vmatprep.subr.bf16.mxu0 %v16676_v57  ;;  %v8632_v27 = vsel %vm17309_vm11, %v8627_v55, %v19409_v25  ;;  %v8913_v21 = vrot.slane %v8911_v42, 4 }
 0x3ad   : > { %v8569_v44 = vrot.slane %v8567_v10, 5  ;;  %v8584_v48 = vsel %vm17309_vm11, %v8579_v35, %v19379_v3  ;;  %v8655_v15 = vrot.slane %v8653_v11, 5 }
 0x3ae   : > { %v13754_v33 = vcombine.low %v8584_v48, %v8594_v7  ;;  %v8925_v7 = vrot.slane %v19342_v0, 5  ;;  %v8932_v48 = vrot.slane %v19358_v26, 5  ;;  %v8921_v0 = vrot.slane %v19347_v14, 5 }
 0x3af   : > { %15372 = vmatpush3.bf16.msra.mxu0 %v16676_v57  ;;  %v8598_v57 = vrot.slane %v8596_v8, 4  ;;  %v8570_v9 = vsel %vm17309_vm11, %v8565_v50, %v8569_v44  ;;  %v8637_v8 = vrot.slane %v8636_v32, 4  ;;  %v8650_v44 = vor.u32 %v8649_v47, %v8646_v4 }
 0x3b0   : > { %15389 = vmatprep.subr.bf16.mxu0 %v16677_v34  ;;  %v8953_v47 = vrot.slane %v19388_v18, 5 }
 0x3b1   : > { %v8602_v62 = vor.u32 %v8601_v20, %v8598_v57  ;;  %v8651_v23 = vrot.slane %v8650_v44, 4  ;;  %v8949_v44 = vrot.slane %v19407_v30, 5 }
 0x3b2   : > { %15374 = vmatmul.mubr.bf16.vlgmr.msra.gmra.mrb[16].mxu0 %v13751_v41  ;;  %v8657_v41 = vshrl.u32 %v19411_v5, 16 }
 0x3b3   : > { %15377 = vmatprep.mubr.bf16.mxu0 %v13752_v60  ;;  %15390 = vmatpush3.bf16.msra.mxu0 %v16677_v34  ;;  %v8560_v34 = vsel %vm17309_vm11, %v8555_v17, %v19377_v2  ;;  %v8639_v2 = vshll.u32 %v19416_v39, 16  ;;  %v8603_v40 = vrot.slane %v8602_v62, 4  ;;  %v19431_v60 = vld [vmem:[#allocation3 + $0x68] sm:$0x1]  ;;  %v8656_v32 = vsel %vm17309_vm11, %v8651_v23, %v8655_v15 }
 0x3b4   : > { %15391 = vmatprep.subr.bf16.mxu0 %v16678_v37  ;;  %v13753_v58 = vcombine.low %v8560_v34, %v8570_v9  ;;  %v8659_v10 = vrot.slane %v8657_v41, 4  ;;  %v8663_v57 = vshll.u32 %v19431_v60, 16  ;;  %v8877_v9 = vld [vmem:[#allocation3 + $0xc] sm:$0xe]  ;;  %v8918_v41 = vrot.slane %v19336_v1, 5 }
 0x3b5   : > { %v8641_v3 = vrot.slane %v8639_v2, 5  ;;  %v8608_v59 = vsel %vm17309_vm11, %v8603_v40, %v19405_v36  ;;  %v16683_v36 = vld [vmem:[#allocation9 + $0x170] sm:$0xff]   ;;  %v13766_v25 = vrot.slane %v8877_v9, 9  ;;  %v8915_v34 = vsel %vm17763_vm14, %v8913_v21, %v8914_v13  ;;  %v8878_v1 = vld [vmem:[#allocation3 + $0x18] sm:$0xe] }
 0x3b6   : > { %v8660_v31 = vor.u32 %v8659_v10, %v8655_v15  ;;  %v8665_v12 = vrot.slane %v8663_v57, 5  ;;  %v8920_v56 = vrot.slane %v8918_v41, 4  ;;  %v8946_v2 = vrot.slane %v19381_v43, 5  ;;  %v8881_v43 = vld [vmem:[#allocation3 + $0x3c] sm:$0xe] }
 0x3b7   : > { %15392 = vmatpush3.bf16.msra.mxu0 %v16678_v37  ;;  %v8617_v37 = vrot.slane %v8615_v45, 5  ;;  %v8642_v17 = vsel %vm17309_vm11, %v8637_v8, %v8641_v3  ;;  %v8912_v61 = vsel %vm17763_vm14, %v13766_v25, %v8911_v42  ;;  %v16684_v45 = vld [vmem:[#allocation9 + $0x178] sm:$0xff]   ;;  %v13767_v15 = vrot.slane %v8878_v1, 9  ;;  %v16686_v3 = vld [vmem:[#allocation9 + $0x188] sm:$0xff]   ;;  %v19488_v23 = vld [vmem:[#allocation3 + $0x68] sm:$0x1] }
 0x3b8   : > { %15393 = vmatprep.subr.bf16.mxu0 %v16679_v29  ;;  %v13756_v35 = vcombine.low %v8632_v27, %v8642_v17  ;;  %v8661_v6 = vrot.slane %v8660_v31, 4  ;;  %v13774_v63 = vcombine.low %v8912_v61, %v8915_v34  ;;  %v8922_v10 = vsel %vm17763_vm14, %v8920_v56, %v8921_v0  ;;  %v8882_v17 = vld [vmem:[#allocation3 + $0x48] sm:$0xe]  ;;  %v8883_v57 = vld [vmem:[#allocation3 + $0x54] sm:$0xe] }
 0x3b9   : > { %v8618_v50 = vsel %vm17309_vm11, %v8613_v28, %v8617_v37  ;;  %v8928_v28 = vrot.slane %v19364_v19, 5  ;;  %v13768_v8 = vrot.slane %v8879_v54, 9  ;;  %v8934_v40 = vrot.slane %v8932_v48, 4  ;;  %v19468_v19 = vld [vmem:[#allocation3 + $0x64] sm:$0xf]  ;;  %v16688_v0 = vld [vmem:[#allocation9 + $0x198] sm:$0xff]  }
 0x3ba   : > { %15378 = vmatmul.mubr.bf16.gmra.mrb[20].mxu0 %v13753_v58  ;;  %v13755_v20 = vcombine.low %v8608_v59, %v8618_v50  ;;  %v8666_v11 = vsel %vm17309_vm11, %v8661_v6, %v8665_v12  ;;  %v8927_v58 = vrot.slane %v8925_v7, 4  ;;  %v8919_v14 = vsel %vm17763_vm14, %v13767_v15, %v8918_v41  ;;  %v10288_v12 = vld [vmem:[#allocation3 + $0x74] sm:$0x1]  ;;  %v10260_v41 = vld [vmem:[#allocation3 + $0x7c] sm:$0xf] }
 0x3bb   : > { %15381 = vmatprep.mubr.bf16.mxu0 %v13754_v33  ;;  %15394 = vmatpush3.bf16.msra.mxu0 %v16679_v29  ;;  %v16682_v29 = vld [vmem:[#allocation9 + $0x168] sm:$0xff]   ;;  %v13757_v62 = vcombine.low %v8656_v32, %v8666_v11  ;;  %v16685_v33 = vld [vmem:[#allocation9 + $0x180] sm:$0xff]   ;;  %v8948_v4 = vrot.slane %v8946_v2, 4  ;;  %v8926_v55 = vsel %vm17763_vm14, %v13768_v8, %v8925_v7  ;;  %v8935_v50 = vrot.slane %v19386_v46, 5 }
 0x3bc   : > { %15395 = vmatprep.subr.bf16.mxu0 %v16680_v24  ;;  %v8929_v26 = vsel %vm17763_vm14, %v8927_v58, %v8928_v28  ;;  %v8942_v31 = vrot.slane %v19393_v52, 5  ;;  %v13770_v27 = vrot.slane %v8881_v43, 9  ;;  %v13771_v52 = vrot.slane %v8882_v17, 9  ;;  %v10873_v25 = vld [vmem:[#allocation3 + $0x60] sm:$0xe] }
 0x3bd   : > { %v13776_v42 = vcombine.low %v8926_v55, %v8929_v26  ;;  %v8936_v18 = vsel %vm17763_vm14, %v8934_v40, %v8935_v50  ;;  %v19485_v30 = vsel %vm17763_vm14, %v8948_v4, %v8949_v44  ;;  %v8955_v6 = vrot.slane %v8953_v47, 4  ;;  %v10289_v61 = vld [vmem:[#allocation3 + $0x80] sm:$0x1]  ;;  %v10262_v58 = vld [vmem:[#allocation3 + $0x88] sm:$0xf] }
 0x3be   : > { %v8960_v21 = vrot.slane %v19411_v5, 5  ;;  %v13772_v11 = vrot.slane %v8883_v57, 9  ;;  %v19496_v32 = vsel %vm17763_vm14, %v13771_v52, %v8946_v2  ;;  %v8963_v1 = vrot.slane %v19431_v60, 5  ;;  %v10290_v2 = vld [vmem:[#allocation3 + $0x8c] sm:$0x1] }
 0x3bf   : > { %15396 = vmatpush3.bf16.msra.mxu0 %v16680_v24  ;;  %v8939_v24 = vrot.slane %v19360_v53, 5  ;;  %v8880_v53 = vld [vmem:[#allocation3 + $0x30] sm:$0xe]  ;;  %v10909_v15 = vrot.slane %v10288_v12, 5  ;;  %v10902_v8 = vrot.slane %v19488_v23, 5  ;;  %v10913_v4 = vrot.slane %v10260_v41, 5 }
 0x3c0   : > { %15397 = vmatprep.subr.bf16.mxu0 %v16681_v22  ;;  %v13769_v59 = vrot.slane %v8880_v53, 9  ;;  %v19503_v56 = vsel %vm17763_vm14, %v13772_v11, %v8953_v47  ;;  %v19513_v54 = vrot.slane %v8960_v21, 4  ;;  %v10876_v53 = vld [vmem:[#allocation3 + $0x84] sm:$0xe]  ;;  %v10264_v40 = vld [vmem:[#allocation3 + $0x94] sm:$0xf] }
 0x3c1   : > { %v8941_v37 = vrot.slane %v8939_v24, 4  ;;  %v8940_v13 = vsel %vm17763_vm14, %v13770_v27, %v8939_v24  ;;  %v10875_v24 = vld [vmem:[#allocation3 + $0x78] sm:$0xe]  ;;  %v10291_v47 = vld [vmem:[#allocation3 + $0x98] sm:$0x1]  ;;  %v10916_v50 = vrot.slane %v10289_v61, 5 }
 0x3c2   : > { %15382 = vmatmul.mubr.bf16.gmra.mrb[24].mxu0 %v13755_v20  ;;  %v19475_v20 = vld [vmem:[#allocation3 + $0x60] sm:$0xf]  ;;  %v8933_v9 = vsel %vm17763_vm14, %v13769_v59, %v8932_v48  ;;  %v10899_v48 = vrot.slane %v19468_v19, 5  ;;  %v13883_v43 = vrot.slane %v10875_v24, 9  ;;  %v10292_v17 = vld [vmem:[#allocation3 + $0xa4] sm:$0x1] }
 0x3c3   : > { %15385 = vmatprep.mubr.bf16.mxu0 %v13756_v35  ;;  %15398 = vmatpush3.bf16.msra.mxu0 %v16681_v22  ;;  %v13775_v22 = vcombine.low %v8919_v14, %v8922_v10  ;;  %v10258_v35 = vld [vmem:[#allocation3 + $0x70] sm:$0xf]  ;;  %v13777_v34 = vcombine.low %v8933_v9, %v8936_v18  ;;  %v10915_v44 = vrot.slane %v10913_v4, 4  ;;  %v13884_v57 = vrot.slane %v10876_v53, 9  ;;  %v16689_v27 = vld [vmem:[#allocation9 + $0x1a0] sm:$0xff]  }
 0x3c4   : > { %15399 = vmatprep.subr.bf16.mxu0 %v16682_v29  ;;  %v10906_v28 = vrot.slane %v10258_v35, 5  ;;  %v10901_v10 = vrot.slane %v10899_v48, 4  ;;  %v10877_v18 = vld [vmem:[#allocation3 + $0x90] sm:$0xe]  ;;  %v10878_v12 = vld [vmem:[#allocation3 + $0x9c] sm:$0xe] }
 0x3c5   : > { %v10268_v9 = vld [vmem:[#allocation3 + $0xac] sm:$0xf]  ;;  %v19544_v11 = vsel %vm17763_vm14, %v10915_v44, %v10916_v50  ;;  %v13885_v61 = vrot.slane %v10877_v18, 9  ;;  %v8884_v53 = vld [vmem:[#allocation3 + $0x60] sm:$0xe] }
 0x3c6   : > { %v10908_v14 = vrot.slane %v10906_v28, 4  ;;  %v19522_v55 = vsel %vm17763_vm14, %v10901_v10, %v10902_v8  ;;  %v10937_v10 = vrot.slane %v10292_v17, 5  ;;  %v10941_v8 = vrot.slane %v10268_v9, 5  ;;  %v16692_v9 = vld [vmem:[#allocation3 + $0x18] sm:$0xff]  }
 0x3c7   : > { %15400 = vmatpush3.bf16.msra.mxu0 %v16682_v29  ;;  %v8943_v29 = vsel %vm17763_vm14, %v8941_v37, %v8942_v31  ;;  %v10920_v31 = vrot.slane %v10262_v58, 5  ;;  %v10294_v58 = vld [vmem:[#allocation3 + $0xbc] sm:$0x1]  ;;  %v9418_v5 = vld [vmem:[#allocation3 + $0x18] sm:$0xf] }
 0x3c8   : > { %15401 = vmatprep.subr.bf16.mxu0 %v16683_v36  ;;  %v13778_v7 = vcombine.low %v8940_v13, %v8943_v29  ;;  %v19532_v59 = vsel %vm17763_vm14, %v10908_v14, %v10909_v15  ;;  %v19540_v13 = vsel %vm17763_vm14, %v13883_v43, %v10913_v4 }
 0x3c9   : > { %v10922_v52 = vrot.slane %v10920_v31, 4  ;;  %v19548_v41 = vsel %vm17763_vm14, %v13884_v57, %v10920_v31  ;;  %v10951_v57 = vrot.slane %v10294_v58, 5 }
 0x3ca   : > { %15386 = vmatmul.mubr.bf16.gmra.mrb[28].mxu0 %v13757_v62  ;;  %v8956_v62 = vrot.slane %v19416_v39, 5 }
 0x3cb   : > { %15402 = vmatpush3.bf16.msra.mxu0 %v16683_v36  ;;  %15405 = vmatprep.mubr.bf16.mxu0 %v13774_v63  ;;  %v16687_v36 = vld [vmem:[#allocation9 + $0x190] sm:$0xff]   ;;  %v13779_v63 = vcombine.low %v19496_v32, %v19485_v30  ;;  %v13773_v30 = vrot.slane %v8884_v53, 9 }
 0x3cc   : > { %15403 = vmatprep.subr.bf16.mxu0 %v16684_v45  ;;  %v19509_v39 = vsel %vm17763_vm14, %v8955_v6, %v8956_v62  ;;  %v10923_v6 = vrot.slane %v10290_v2, 5  ;;  %v13886_v2 = vrot.slane %v10878_v12, 9  ;;  %v16691_v32 = vld [vmem:[#allocation9 + $0x1b0] sm:$0xff]  }
 0x3cd   : > { %v13780_v29 = vcombine.low %v19503_v56, %v19509_v39  ;;  %v10879_v56 = vld [vmem:[#allocation3 + $0xa8] sm:$0xe]  ;;  %v10930_v39 = vrot.slane %v10291_v47, 5  ;;  %v8961_v60 = vsel %vm17763_vm14, %v13773_v30, %v8960_v21  ;;  %v19622_v30 = vld [vmem:[#allocation3 + $0x34] sm:$0xf] }
 0x3ce   : > { %v19554_v62 = vsel %vm17763_vm14, %v10922_v52, %v10923_v6  ;;  %v13887_v14 = vrot.slane %v10879_v56, 9  ;;  %v16699_v21 = vld [vmem:[#allocation9 + $0x1d0] sm:$0xff]  }
 0x3cf   : > { %15404 = vmatpush3.bf16.msra.mxu0 %v16684_v45  ;;  %v10874_v45 = vld [vmem:[#allocation3 + $0x6c] sm:$0xe] }
 0x3d0   : > { %15421 = vmatprep.subr.bf16.mxu0 %v16685_v33  ;;  %v13882_v26 = vrot.slane %v10874_v45, 9 }
 0x3d2   : > { %15406 = vmatmul.mubr.bf16.vlgmr.msra.gmra.mrb[16].mxu0 %v13775_v22  ;;  %v10266_v22 = vld [vmem:[#allocation3 + $0xa0] sm:$0xf] }
 0x3d3   : > { %15409 = vmatprep.mubr.bf16.mxu0 %v13776_v42  ;;  %15422 = vmatpush3.bf16.msra.mxu0 %v16685_v33  ;;  %v13881_v33 = vrot.slane %v10873_v25, 9  ;;  %v10927_v25 = vrot.slane %v10264_v40, 5  ;;  %v10934_v45 = vrot.slane %v10266_v22, 5  ;;  %v10943_v22 = vrot.slane %v10941_v8, 4 }
 0x3d4   : > { %15423 = vmatprep.subr.bf16.mxu0 %v16686_v3 }
 0x3d5   : > { %v19518_v37 = vsel %vm17763_vm14, %v13881_v33, %v10899_v48  ;;  %v10929_v24 = vrot.slane %v10927_v25, 4  ;;  %v16690_v33 = vld [vmem:[#allocation9 + $0x1a8] sm:$0xff]   ;;  %v10936_v15 = vrot.slane %v10934_v45, 4  ;;  %v19568_v40 = vsel %vm17763_vm14, %v13886_v2, %v10934_v45  ;;  %v19610_v45 = vld [vmem:[#allocation3 + $0x1c] sm:$0xf]  ;;  %v16708_v48 = vld [vmem:[#allocation9 + $0x1f8] sm:$0xff]  }
 0x3d6   : > { %v9452_v56 = vshll.u32 %v19610_v45, 16  ;;  %v9456_v58 = vshrl.u32 %v19610_v45, 16  ;;  %v9446_v2 = vshll.u32 %v9418_v5, 16 }
 0x3d7   : > { %15424 = vmatpush3.bf16.msra.mxu0 %v16686_v3  ;;  %v19526_v3 = vsel %vm17763_vm14, %v13882_v26, %v10906_v28  ;;  %v19560_v28 = vsel %vm17763_vm14, %v13885_v61, %v10927_v25  ;;  %v10880_v26 = vld [vmem:[#allocation3 + $0xb4] sm:$0xe]  ;;  %v19577_v47 = vsel %vm17763_vm14, %v10936_v15, %v10937_v10  ;;  %v16694_v25 = vld [vmem:[#allocation3 + $0x24] sm:$0xff]   ;;  %v16698_v15 = vld [vmem:[#allocation3 + $0x3c] sm:$0xff]  }
 0x3d8   : > { %15425 = vmatprep.subr.bf16.mxu0 %v16687_v36  ;;  %v13888_v17 = vrot.slane %v10880_v26, 9  ;;  %v16696_v61 = vld [vmem:[#allocation3 + $0x30] sm:$0xff]   ;;  %v9458_v26 = vrot.slane %v9456_v58, 4 }
 0x3d9   : > { %v16701_v10 = vld [vmem:[#allocation9 + $0x1d8] sm:$0xff]  }
 0x3da   : > { %15410 = vmatmul.mubr.bf16.gmra.mrb[20].mxu0 %v13777_v34  ;;  %v10270_v34 = vld [vmem:[#allocation3 + $0xb8] sm:$0xf] }
 0x3db   : > { %15413 = vmatprep.mubr.bf16.mxu0 %v13778_v7  ;;  %15426 = vmatpush3.bf16.msra.mxu0 %v16687_v36  ;;  %v10293_v36 = vld [vmem:[#allocation3 + $0xb0] sm:$0x1]  ;;  %v10948_v43 = vrot.slane %v10270_v34, 5  ;;  %v16697_v34 = vld [vmem:[#allocation9 + $0x1c8] sm:$0xff]  }
 0x3dc   : > { %15427 = vmatprep.subr.bf16.mxu0 %v16688_v0  ;;  %v10944_v50 = vrot.slane %v10293_v36, 5  ;;  %v16695_v36 = vld [vmem:[#allocation9 + $0x1c0] sm:$0xff]  }
 0x3dd   : > { %v10950_v44 = vrot.slane %v10948_v43, 4  ;;  %v19598_v52 = vsel %vm17763_vm14, %v13888_v17, %v10948_v43  ;;  %v16700_v43 = vld [vmem:[#allocation3 + $0x48] sm:$0xff]   ;;  %v19620_v17 = vld [vmem:[#allocation3 + $0x20] sm:$0x1] }
 0x3de   : > { %v19587_v18 = vsel %vm17763_vm14, %v10943_v22, %v10944_v50  ;;  %20509 = vst [vmem:[#allocation22_spill] sm:$0xff] %v19598_v52  ;;  %v9448_v50 = vrot.slane %v9446_v2, 5  ;;  %v16705_v2 = vld [vmem:[#allocation9 + $0x1e8] sm:$0xff]  }
 0x3df   : > { %15428 = vmatpush3.bf16.msra.mxu0 %v16688_v0  ;;  %v19564_v0 = vsel %vm17763_vm14, %v10929_v24, %v10930_v39  ;;  %20508 = vst [vmem:[#allocation18_spill] sm:$0xff] %v19587_v18  ;;  %v19602_v6 = vsel %vm17763_vm14, %v10950_v44, %v10951_v57  ;;  %v19614_v24 = vld [vmem:[#allocation3 + $0x28] sm:$0xf]  ;;  %v9443_v39 = vshrl.u32 %v9418_v5, 16  ;;  %v19689_v18 = vld [vmem:[#allocation3 + $0x70] sm:$0xf] }
 0x3e0   : > { %15429 = vmatprep.subr.bf16.mxu0 %v16689_v27  ;;  %20510 = vst [vmem:[#allocation20_spill] sm:$0xff] %v19602_v6  ;;  %v9476_v53 = vshll.u32 %v19614_v24, 16 }
 0x3e1   : > { %v9445_v22 = vrot.slane %v9443_v39, 4  ;;  %v16702_v39 = vld [vmem:[#allocation3 + $0x54] sm:$0xff]  }
 0x3e2   : > { %15414 = vmatmul.mubr.bf16.gmra.mrb[24].mxu0 %v13779_v63  ;;  %v19583_v63 = vsel %vm17763_vm14, %v13887_v14, %v10941_v8  ;;  %v19616_v8 = vrot.slane %v9452_v56, 5  ;;  %v9480_v14 = vshrl.u32 %v19614_v24, 16 }
 0x3e3   : > { %15417 = vmatprep.mubr.bf16.mxu0 %v13780_v29  ;;  %15430 = vmatpush3.bf16.msra.mxu0 %v16689_v27  ;;  %20507 = vst [vmem:[#allocation27_spill] sm:$0xff] %v19583_v63  ;;  %v8964_v27 = vsel %vm17763_vm14, %v19513_v54, %v8963_v1  ;;  %v16693_v54 = vld [vmem:[#allocation9 + $0x1b8] sm:$0xff]   ;;  %v19642_v29 = vld [vmem:[#allocation3 + $0x38] sm:$0x1] }
 0x3e4   : > { %15431 = vmatprep.subr.bf16.mxu0 %v16690_v33  ;;  %v13781_v1 = vcombine.low %v8961_v60, %v8964_v27  ;;  %v9459_v27 = vor.u32 %v9458_v26, %v19616_v8  ;;  %v19625_v60 = vrot.slane %v9476_v53, 5  ;;  %v16704_v26 = vld [vmem:[#allocation3 + $0x60] sm:$0xff]   ;;  %v9427_v53 = vld [vmem:[#allocation3 + $0x3c] sm:$0xf] }
 0x3e7   : > { %15432 = vmatpush3.bf16.msra.mxu0 %v16690_v33  ;;  %v9421_v33 = vld [vmem:[#allocation3 + $0x24] sm:$0xf] }
 0x3e8   : > { %15433 = vmatprep.subr.bf16.mxu0 %v16691_v32  ;;  %v9467_v44 = vshrl.u32 %v9421_v33, 16  ;;  %v9470_v57 = vshll.u32 %v9421_v33, 16  ;;  %v9460_v33 = vrot.slane %v9459_v27, 4  ;;  %v19638_v27 = vld [vmem:[#allocation3 + $0x4c] sm:$0xf] }
 0x3ea   : > { %15418 = vmatmul.mubr.bf16.gmra.mrb[28].mxu0 %v13781_v1  ;;  %v9482_v1 = vrot.slane %v9480_v14, 4  ;;  %v9469_v5 = vrot.slane %v9467_v44, 4 }
 0x3eb   : > { %15434 = vmatpush3.bf16.msra.mxu0 %v16691_v32  ;;  %15437 = vmatprep.mubr.bf16.mxu0 %v16692_v9  ;;  %v16703_v32 = vld [vmem:[#allocation9 + $0x1e0] sm:$0xff]   ;;  %v9449_v9 = vor.u32 %v9448_v50, %v9445_v22  ;;  %v19636_v50 = vld [vmem:[#allocation3 + $0x40] sm:$0xf] }
 0x3ec   : > { %15435 = vmatprep.subr.bf16.mxu0 %v16693_v54  ;;  %v9524_v31 = vshll.u32 %v19636_v50, 16 }
 0x3ed   : > { %v9450_v44 = vrot.slane %v9449_v9, 4  ;;  %v9430_v9 = vld [vmem:[#allocation3 + $0x48] sm:$0xf] }
 0x3ee   : > { %v9542_v7 = vshll.u32 %v9430_v9, 16 }
 0x3ef   : > { %15436 = vmatpush3.bf16.msra.mxu0 %v16693_v54  ;;  %v9424_v54 = vld [vmem:[#allocation3 + $0x30] sm:$0xf] }
 0x3f0   : > { %15453 = vmatprep.subr.bf16.mxu0 %v16695_v36  ;;  %v9491_v56 = vshrl.u32 %v9424_v54, 16  ;;  %v9494_v58 = vshll.u32 %v9424_v54, 16 }
 0x3f2   : > { %15438 = vmatmul.mubr.bf16.vlgmr.msra.gmra.mrb[16].mxu0 %v16694_v25  ;;  %v9500_v25 = vshll.u32 %v19622_v30, 16  ;;  %v9493_v54 = vrot.slane %v9491_v56, 4  ;;  %v9496_v12 = vrot.slane %v9494_v58, 5  ;;  %v9548_v56 = vshll.u32 %v19638_v27, 16 }
 0x3f3   : > { %15441 = vmatprep.mubr.bf16.mxu0 %v16696_v61  ;;  %15454 = vmatpush3.bf16.msra.mxu0 %v16695_v36  ;;  %v9462_v36 = vshll.u32 %v19620_v17, 16  ;;  %v19630_v61 = vld [vmem:[#allocation3 + $0x2c] sm:$0x1]  ;;  %v9552_v58 = vshrl.u32 %v19638_v27, 16 }
 0x3f4   : > { %15455 = vmatprep.subr.bf16.mxu0 %v16697_v34  ;;  %v19634_v22 = vrot.slane %v9500_v25, 5  ;;  %v9515_v25 = vshrl.u32 %v9427_v53, 16 }
 0x3f5   : > { %v9464_v14 = vrot.slane %v9462_v36, 5 }
 0x3f6   : > { %v9517_v35 = vrot.slane %v9515_v25, 4  ;;  %v19666_v25 = vld [vmem:[#allocation3 + $0x64] sm:$0xf] }
 0x3f7   : > { %15456 = vmatpush3.bf16.msra.mxu0 %v16697_v34  ;;  %v9504_v34 = vshrl.u32 %v19622_v30, 16  ;;  %v9465_v36 = vsel %vm17309_vm11, %v9460_v33, %v9464_v14  ;;  %v9455_v33 = vsel %vm17309_vm11, %v9450_v44, %v19616_v8  ;;  %v16706_v14 = vld [vmem:[#allocation3 + $0x6c] sm:$0xff]   ;;  %v19657_v44 = vrot.slane %v9548_v56, 5 }
 0x3f8   : > { %15457 = vmatprep.subr.bf16.mxu0 %v16699_v21  ;;  %v13806_v4 = vcombine.low %v9455_v33, %v9465_v36  ;;  %v9436_v33 = vld [vmem:[#allocation3 + $0x60] sm:$0xf] }
 0x3fa   : > { %15442 = vmatmul.mubr.bf16.gmra.mrb[20].mxu0 %v16698_v15  ;;  %v9483_v15 = vor.u32 %v9482_v1, %v19625_v60  ;;  %v16707_v1 = vld [vmem:[#allocation9 + $0x1f0] sm:$0xff]  }
 0x3fb   : > { %15445 = vmatprep.mubr.bf16.mxu0 %v16700_v43  ;;  %15458 = vmatpush3.bf16.msra.mxu0 %v16699_v21  ;;  %v9472_v21 = vrot.slane %v9470_v57, 5  ;;  %v9486_v43 = vshll.u32 %v19630_v61, 16 }
 0x3fc   : > { %15459 = vmatprep.subr.bf16.mxu0 %v16701_v10 }
 0x3fd   : > { %v9473_v57 = vor.u32 %v9472_v21, %v9469_v5  ;;  %v9488_v5 = vrot.slane %v9486_v43, 5 }
 0x3ff   : > { %15460 = vmatpush3.bf16.msra.mxu0 %v16701_v10  ;;  %v9506_v10 = vrot.slane %v9504_v34, 4  ;;  %v9518_v34 = vshll.u32 %v9427_v53, 16  ;;  %v9510_v53 = vshll.u32 %v19642_v29, 16 }
 0x400   : > { %15461 = vmatprep.subr.bf16.mxu0 %v16703_v32 }
 0x401   : > { %v9507_v21 = vor.u32 %v9506_v10, %v19634_v22  ;;  %v9539_v10 = vshrl.u32 %v9430_v9, 16  ;;  %v9520_v42 = vrot.slane %v9518_v34, 5  ;;  %v16709_v34 = vld [vmem:[#allocation9 + $0x200] sm:$0xff]  }
 0x402   : > { %15446 = vmatmul.mubr.bf16.gmra.mrb[24].mxu0 %v16702_v39  ;;  %v9484_v39 = vrot.slane %v9483_v15, 4  ;;  %v9474_v15 = vrot.slane %v9473_v57, 4  ;;  %v19659_v57 = vld [vmem:[#allocation3 + $0x58] sm:$0xf] }
 0x403   : > { %15449 = vmatprep.mubr.bf16.mxu0 %v16704_v26  ;;  %15462 = vmatpush3.bf16.msra.mxu0 %v16703_v32  ;;  %v9528_v32 = vshrl.u32 %v19636_v50, 16  ;;  %v9497_v26 = vor.u32 %v9496_v12, %v9493_v54  ;;  %v9508_v8 = vrot.slane %v9507_v21, 4  ;;  %v9554_v12 = vrot.slane %v9552_v58, 4  ;;  %v9433_v21 = vld [vmem:[#allocation3 + $0x54] sm:$0xf] }
 0x404   : > { %15463 = vmatprep.subr.bf16.mxu0 %v16705_v2  ;;  %v9489_v43 = vsel %vm17309_vm11, %v9484_v39, %v9488_v5  ;;  %v9479_v54 = vsel %vm17309_vm11, %v9474_v15, %v19625_v60  ;;  %v19664_v39 = vld [vmem:[#allocation3 + $0x44] sm:$0x1]  ;;  %v9541_v9 = vrot.slane %v9539_v10, 4  ;;  %v9544_v5 = vrot.slane %v9542_v7, 5 }
 0x405   : > { %v9530_v46 = vrot.slane %v9528_v32, 4  ;;  %v9498_v36 = vrot.slane %v9497_v26, 4  ;;  %v9512_v32 = vrot.slane %v9510_v53, 5  ;;  %v9521_v56 = vor.u32 %v9520_v42, %v9517_v35 }
 0x406   : > { %v9572_v58 = vshll.u32 %v19659_v57, 16  ;;  %v9576_v60 = vshrl.u32 %v19659_v57, 16  ;;  %v9555_v26 = vor.u32 %v9554_v12, %v19657_v44  ;;  %v9596_v53 = vshll.u32 %v19666_v25, 16 }
 0x407   : > { %15464 = vmatpush3.bf16.msra.mxu0 %v16705_v2  ;;  %v19655_v2 = vrot.slane %v9524_v31, 5  ;;  %v13807_v31 = vcombine.low %v9479_v54, %v9489_v43  ;;  %v9513_v15 = vsel %vm17309_vm11, %v9508_v8, %v9512_v32  ;;  %v9600_v7 = vshrl.u32 %v19666_v25, 16  ;;  %v16710_v43 = vld [vmem:[#allocation9 + $0x208] sm:$0xff]  }
 0x408   : > { %15465 = vmatprep.subr.bf16.mxu0 %v16707_v1  ;;  %v9534_v42 = vshll.u32 %v19664_v39, 16  ;;  %v9563_v35 = vshrl.u32 %v9433_v21, 16  ;;  %v9545_v10 = vor.u32 %v9544_v5, %v9541_v9  ;;  %v9587_v54 = vshrl.u32 %v9436_v33, 16 }
 0x409   : > { %v9590_v12 = vshll.u32 %v9436_v33, 16  ;;  %v19683_v6 = vrot.slane %v9572_v58, 5  ;;  %v9522_v52 = vrot.slane %v9521_v56, 4  ;;  %v9556_v51 = vrot.slane %v9555_v26, 4 }
 0x40a   : > { %15450 = vmatmul.mubr.bf16.gmra.mrb[28].mxu0 %v16706_v14  ;;  %v9566_v14 = vshll.u32 %v9433_v21, 16  ;;  %v9602_v21 = vrot.slane %v9600_v7, 4  ;;  %v9536_v9 = vrot.slane %v9534_v42, 5  ;;  %v9565_v5 = vrot.slane %v9563_v35, 4  ;;  %v19694_v7 = vld [vmem:[#allocation3 + $0x68] sm:$0x1] }
 0x40b   : > { %15466 = vmatpush3.bf16.msra.mxu0 %v16707_v1  ;;  %15469 = vmatprep.mubr.bf16.mxu0 %v13806_v4  ;;  %v9531_v1 = vor.u32 %v9530_v46, %v19655_v2  ;;  %v19669_v4 = vld [vmem:[#allocation3 + $0x50] sm:$0x1]  ;;  %v9503_v46 = vsel %vm17309_vm11, %v9498_v36, %v19634_v22  ;;  %v19685_v22 = vld [vmem:[#allocation3 + $0x5c] sm:$0x1]  ;;  %v19687_v36 = vrot.slane %v9596_v53, 5  ;;  %v9546_v58 = vrot.slane %v9545_v10, 4 }
 0x40c   : > { %15467 = vmatprep.subr.bf16.mxu0 %v16708_v48  ;;  %v9558_v8 = vshll.u32 %v19669_v4, 16  ;;  %v13808_v32 = vcombine.low %v9503_v46, %v9513_v15  ;;  %v9568_v33 = vrot.slane %v9566_v14, 5  ;;  %v9439_v15 = vld [vmem:[#allocation3 + $0x6c] sm:$0xf]  ;;  %v9592_v56 = vrot.slane %v9590_v12, 5 }
 0x40d   : > { %v9532_v16 = vrot.slane %v9531_v1, 4  ;;  %v16711_v1 = vld [vmem:[#allocation9 + $0x210] sm:$0xff]   ;;  %v9620_v46 = vshll.u32 %v19689_v18, 16  ;;  %v9527_v42 = vsel %vm17309_vm11, %v9522_v52, %v19655_v2  ;;  %v9603_v14 = vor.u32 %v9602_v21, %v19687_v36 }
 0x40e   : > { %v9569_v10 = vor.u32 %v9568_v33, %v9565_v5  ;;  %v9606_v52 = vshll.u32 %v19694_v7, 16 }
 0x40f   : > { %15468 = vmatpush3.bf16.msra.mxu0 %v16708_v48  ;;  %v9578_v48 = vrot.slane %v9576_v60, 4  ;;  %v9560_v60 = vrot.slane %v9558_v8, 5  ;;  %v9537_v26 = vsel %vm17309_vm11, %v9532_v16, %v9536_v9  ;;  %v9582_v16 = vshll.u32 %v19685_v22, 16 }
 0x410   : > { %15485 = vmatprep.subr.bf16.mxu0 %v16709_v34  ;;  %v9611_v8 = vshrl.u32 %v9439_v15, 16  ;;  %v13809_v12 = vcombine.low %v9527_v42, %v9537_v26  ;;  %v9570_v5 = vrot.slane %v9569_v10, 4  ;;  %v16713_v42 = vld [vmem:[#allocation9 + $0x220] sm:$0xff]  }
 0x411   : > { %v9579_v53 = vor.u32 %v9578_v48, %v19683_v6  ;;  %v9561_v35 = vsel %vm17309_vm11, %v9556_v51, %v9560_v60  ;;  %v16712_v48 = vld [vmem:[#allocation9 + $0x218] sm:$0xff]   ;;  %v9622_v60 = vrot.slane %v9620_v46, 5  ;;  %v9584_v33 = vrot.slane %v9582_v16, 5  ;;  %v16714_v16 = vld [vmem:[#allocation9 + $0x228] sm:$0xff]  }
 0x412   : > { %15470 = vmatmul.mubr.bf16.vlgmr.msra.gmra.mrb[16].mxu0 %v13807_v31  ;;  %v9589_v31 = vrot.slane %v9587_v54, 4  ;;  %v9614_v54 = vshll.u32 %v9439_v15, 16  ;;  %v9613_v15 = vrot.slane %v9611_v8, 4  ;;  %v9878_v46 = vrot.slane %v19610_v45, 5 }
 0x413   : > { %15473 = vmatprep.mubr.bf16.mxu0 %v13808_v32  ;;  %15486 = vmatpush3.bf16.msra.mxu0 %v16709_v34  ;;  %v9624_v34 = vshrl.u32 %v19689_v18, 16  ;;  %v9551_v32 = vsel %vm17309_vm11, %v9546_v58, %v19657_v44  ;;  %v9580_v51 = vrot.slane %v9579_v53, 4  ;;  %v9608_v44 = vrot.slane %v9606_v52, 5  ;;  %v19709_v58 = vld [vmem:[#allocation3 + $0x74] sm:$0x1] }
 0x414   : > { %15487 = vmatprep.subr.bf16.mxu0 %v16710_v43  ;;  %v9593_v9 = vor.u32 %v9592_v56, %v9589_v31  ;;  %v13810_v2 = vcombine.low %v9551_v32, %v9561_v35  ;;  %v9616_v26 = vrot.slane %v9614_v54, 5  ;;  %v9630_v35 = vshll.u32 %v19709_v58, 16 }
 0x415   : > { %v9626_v21 = vrot.slane %v9624_v34, 4  ;;  %v9585_v31 = vsel %vm17309_vm11, %v9580_v51, %v9584_v33  ;;  %v9892_v51 = vrot.slane %v19622_v30, 5  ;;  %v9846_v30 = vld [vmem:[#allocation3 + $0x30] sm:$0xe] }
 0x416   : > { %v9594_v63 = vrot.slane %v9593_v9, 4  ;;  %v9617_v34 = vor.u32 %v9616_v26, %v9613_v15  ;;  %v9632_v32 = vrot.slane %v9630_v35, 5  ;;  %v9881_v9 = vrot.slane %v19620_v17, 5 }
 0x417   : > { %15488 = vmatpush3.bf16.msra.mxu0 %v16710_v43  ;;  %v9604_v43 = vrot.slane %v9603_v14, 4  ;;  %v9627_v56 = vor.u32 %v9626_v21, %v9622_v60  ;;  %v9894_v26 = vrot.slane %v9892_v51, 4 }
 0x418   : > { %15489 = vmatprep.subr.bf16.mxu0 %v16711_v1  ;;  %v9599_v10 = vsel %vm17309_vm11, %v9594_v63, %v19687_v36  ;;  %v9618_v45 = vrot.slane %v9617_v34, 4 }
 0x419   : > { %v9609_v53 = vsel %vm17309_vm11, %v9604_v43, %v9608_v44  ;;  %v9628_v54 = vrot.slane %v9627_v56, 4  ;;  %v9895_v44 = vrot.slane %v19642_v29, 5  ;;  %v9899_v56 = vrot.slane %v19636_v50, 5 }
 0x41a   : > { %15474 = vmatmul.mubr.bf16.gmra.mrb[20].mxu0 %v13809_v12  ;;  %v13812_v8 = vcombine.low %v9599_v10, %v9609_v53  ;;  %v9880_v12 = vrot.slane %v9878_v46, 4  ;;  %v9623_v21 = vsel %vm17309_vm11, %v9618_v45, %v9622_v60  ;;  %v13824_v53 = vrot.slane %v9846_v30, 9  ;;  %v9847_v10 = vld [vmem:[#allocation3 + $0x3c] sm:$0xe] }
 0x41b   : > { %15477 = vmatprep.mubr.bf16.mxu0 %v13810_v2  ;;  %15490 = vmatpush3.bf16.msra.mxu0 %v16711_v1  ;;  %v9575_v1 = vsel %vm17309_vm11, %v9570_v5, %v19683_v6  ;;  %v16715_v6 = vld [vmem:[#allocation9 + $0x230] sm:$0xff]   ;;  %v9633_v52 = vsel %vm17309_vm11, %v9628_v54, %v9632_v32  ;;  %v9885_v2 = vrot.slane %v19614_v24, 5  ;;  %v16716_v5 = vld [vmem:[#allocation9 + $0x238] sm:$0xff]   ;;  %v9845_v24 = vld [vmem:[#allocation3 + $0x24] sm:$0xe]  ;;  %v9902_v50 = vrot.slane %v19664_v39, 5 }
 0x41c   : > { %15491 = vmatprep.subr.bf16.mxu0 %v16712_v48  ;;  %v13811_v14 = vcombine.low %v9575_v1, %v9585_v31  ;;  %v9882_v36 = vsel %vm17763_vm14, %v9880_v12, %v9881_v9  ;;  %v13813_v43 = vcombine.low %v9623_v21, %v9633_v52  ;;  %v13823_v60 = vrot.slane %v9845_v24, 9 }
 0x41d   : > { %v9887_v15 = vrot.slane %v9885_v2, 4  ;;  %v9906_v1 = vrot.slane %v19638_v27, 5  ;;  %v9893_v29 = vsel %vm17763_vm14, %v13824_v53, %v9892_v51  ;;  %v9909_v54 = vrot.slane %v19669_v4, 5  ;;  %v9850_v51 = vld [vmem:[#allocation3 + $0x60] sm:$0xe] }
 0x41e   : > { %v13825_v27 = vrot.slane %v9847_v10, 9  ;;  %v9913_v45 = vrot.slane %v19659_v57, 5  ;;  %v9916_v57 = vrot.slane %v19685_v22, 5  ;;  %v9923_v21 = vrot.slane %v19694_v7, 5  ;;  %v9851_v7 = vld [vmem:[#allocation3 + $0x6c] sm:$0xe] }
 0x41f   : > { %15492 = vmatpush3.bf16.msra.mxu0 %v16712_v48  ;;  %v9844_v48 = vld [vmem:[#allocation3 + $0x18] sm:$0xe]  ;;  %v9930_v30 = vrot.slane %v19709_v58, 5  ;;  %v19780_v53 = vld [vmem:[%s20359_s4] ss:$0 sm:$0xff] }
 0x420   : > { %15493 = vmatprep.subr.bf16.mxu0 %v16713_v42  ;;  %v13822_v63 = vrot.slane %v9844_v48, 9  ;;  %v9900_v9 = vsel %vm17763_vm14, %v13825_v27, %v9899_v56 }
 0x422   : > { %15478 = vmatmul.mubr.bf16.gmra.mrb[24].mxu0 %v13811_v14  ;;  %v9879_v17 = vsel %vm17763_vm14, %v13822_v63, %v9878_v46  ;;  %v9896_v46 = vsel %vm17763_vm14, %v9894_v26, %v9895_v44  ;;  %v9901_v14 = vrot.slane %v9899_v56, 4  ;;  %v9849_v63 = vld [vmem:[#allocation3 + $0x54] sm:$0xe]  ;;  %v13829_v44 = vrot.slane %v9851_v7, 9  ;;  %v16717_v56 = vld [vmem:[%s20360_s5] sm:$0xff]  }
 0x423   : > { %15481 = vmatprep.mubr.bf16.mxu0 %v13812_v8  ;;  %15494 = vmatpush3.bf16.msra.mxu0 %v16713_v42  ;;  %v13830_v33 = vcombine.low %v9879_v17, %v9882_v36  ;;  %v9888_v42 = vrot.slane %v19630_v61, 5  ;;  %v9886_v61 = vsel %vm17763_vm14, %v13823_v60, %v9885_v2  ;;  %v13832_v35 = vcombine.low %v9893_v29, %v9896_v46  ;;  %v9848_v8 = vld [vmem:[#allocation3 + $0x48] sm:$0xe] }
 0x424   : > { %15495 = vmatprep.subr.bf16.mxu0 %v16714_v16  ;;  %v9903_v12 = vsel %vm17763_vm14, %v9901_v14, %v9902_v50  ;;  %v13826_v32 = vrot.slane %v9848_v8, 9  ;;  %v9915_v2 = vrot.slane %v9913_v45, 4  ;;  %v9927_v17 = vrot.slane %v19689_v18, 5  ;;  %15533 = vmatprep.mubr.bf16.mxu1 %v16717_v56 }
 0x425   : > { %v9889_v31 = vsel %vm17763_vm14, %v9887_v15, %v9888_v42  ;;  %v13833_v52 = vcombine.low %v9900_v9, %v9903_v12 }
 0x426   : > { %v13831_v34 = vcombine.low %v9886_v61, %v9889_v31  ;;  %v9907_v39 = vsel %vm17763_vm14, %v13826_v32, %v9906_v1  ;;  %v9929_v42 = vrot.slane %v9927_v17, 4  ;;  %v9928_v60 = vsel %vm17763_vm14, %v13829_v44, %v9927_v17 }
 0x427   : > { %15496 = vmatpush3.bf16.msra.mxu0 %v16714_v16  ;;  %v9908_v16 = vrot.slane %v9906_v1, 4  ;;  %v10309_v44 = vshrl.u32 %v19468_v19, 16 }
 0x428   : > { %15497 = vmatprep.subr.bf16.mxu0 %v16715_v6  ;;  %v9931_v18 = vsel %vm17763_vm14, %v9929_v42, %v9930_v30  ;;  %v10305_v30 = vshll.u32 %v19468_v19, 16 }
 0x429   : > { %v9910_v48 = vsel %vm17763_vm14, %v9908_v16, %v9909_v54  ;;  %v13837_v31 = vcombine.low %v9928_v60, %v9931_v18 }
 0x42a   : > { %15482 = vmatmul.mubr.bf16.gmra.mrb[28].mxu0 %v13813_v43  ;;  %v13834_v4 = vcombine.low %v9907_v39, %v9910_v48  ;;  %v13827_v43 = vrot.slane %v9849_v63, 9 }
 0x42b   : > { %15498 = vmatpush3.bf16.msra.mxu0 %v16715_v6  ;;  %15501 = vmatprep.mubr.bf16.mxu0 %v13830_v33  ;;  %v9920_v6 = vrot.slane %v19666_v25, 5  ;;  %v9917_v25 = vsel %vm17763_vm14, %v9915_v2, %v9916_v57 }
 0x42c   : > { %15499 = vmatprep.subr.bf16.mxu0 %v16716_v5  ;;  %v9914_v15 = vsel %vm17763_vm14, %v13827_v43, %v9913_v45 }
 0x42d   : > { %v9922_v36 = vrot.slane %v9920_v6, 4  ;;  %v13835_v24 = vcombine.low %v9914_v15, %v9917_v25 }
 0x42f   : > { %15500 = vmatpush3.bf16.msra.mxu0 %v16716_v5  ;;  %v13828_v5 = vrot.slane %v9850_v51, 9  ;;  %v9924_v33 = vsel %vm17763_vm14, %v9922_v36, %v9923_v21 }
 0x431   : > { %v9921_v22 = vsel %vm17763_vm14, %v13828_v5, %v9920_v6 }
 0x432   : > { %15502 = vmatmul.mubr.bf16.vlgmr.msra.gmra.mrb[16].mxu0 %v13831_v34  ;;  %v13836_v26 = vcombine.low %v9921_v22, %v9924_v33 }
 0x433   : > { %15505 = vmatprep.mubr.bf16.mxu0 %v13832_v35 }
 0x43a   : > { %15506 = vmatmul.mubr.bf16.gmra.mrb[20].mxu0 %v13833_v52 }
 0x43b   : > { %15509 = vmatprep.mubr.bf16.mxu0 %v13834_v4 }
 0x442   : > { %15510 = vmatmul.mubr.bf16.gmra.mrb[24].mxu0 %v13835_v24 }
 0x443   : > { %15513 = vmatprep.mubr.bf16.mxu0 %v13836_v26 }
 0x44a   : > { %15514 = vmatmul.mubr.bf16.gmra.mrb[28].mxu0 %v13837_v31 }
 0x44b   : > { %15841 = vmatprep.mubr.bf16.mxu0 %v16717_v56  ;;  %v10296_v56 = vshrl.u32 %v19475_v20, 16 }
 0x505   : > { %v15503_v58 = vpop.f32.mrb[16].mxu0 }
 0x506   : > { %v10151_v46 = vadd.f32 %v15503_v58, %v19780_v53  ;;  %v10063_v1 = vpop.f32.mrb[17].mxu0  ;;  %v10299_v58 = vshll.u32 %v19475_v20, 16 }
 0x507   : > { %v10149_v61 = vadd.f32 %v19780_v53, %v10063_v1  ;;  %v15504_v34 = vpop.f32.mrb[18].mxu0 }
 0x508   : > { %v10152_v29 = vadd.f32 %v15504_v34, %v19780_v53  ;;  %v10066_v35 = vpop.f32.mrb[19].mxu0  ;;  %v10167_v10 = vmax.f32 %v10151_v46, 0.0 }
 0x509   : > { %v10150_v14 = vadd.f32 %v19780_v53, %v10066_v35  ;;  %v10165_v50 = vmax.f32 %v10149_v61, 0.0  ;;  %v10311_v35 = vrot.slane %v10309_v44, 4 }
 0x50a   : > { %v10168_v16 = vmax.f32 %v10152_v29, 0.0  ;;  %v10307_v29 = vrot.slane %v10305_v30, 5  ;;  %v19820_v30 = vld [vmem:[#allocation3 + $0x7c] sm:$0xf] }
 0x50b   : > { %v10166_v8 = vmax.f32 %v10150_v14, 0.0  ;;  %v10353_v44 = vshll.u32 %v19820_v30, 16 }
 0x50c   : > { %v10182_v54 = vpack.c.bf16 %v10168_v16, %v10167_v10 }
 0x50d   : > { %v10181_v27 = vpack.c.bf16 %v10166_v8, %v10165_v50  ;;  %v15507_v12 = vpop.f32.mrb[20].mxu0  ;;  %v10298_v50 = vrot.slane %v10296_v56, 4  ;;  %v10301_v8 = vrot.slane %v10299_v58, 5 }
 0x50e   : > { %v10155_v45 = vadd.f32 %v15507_v12, %v19780_v53  ;;  %v10079_v32 = vpop.f32.mrb[21].mxu0 }
 0x50f   : > { %v10153_v48 = vadd.f32 %v19780_v53, %v10079_v32  ;;  %v15508_v6 = vpop.f32.mrb[22].mxu0  ;;  %15517 = vmatprep.subr.bf16.mxu1 %v10181_v27  ;;  %v10312_v32 = vor.u32 %v10311_v35, %v10307_v29  ;;  %v16848_v35 = vld [vmem:[#allocation3 + $0x74] sm:$0x1] }
 0x510   : > { %v10156_v9 = vadd.f32 %v15508_v6, %v19780_v53  ;;  %v10082_v52 = vpop.f32.mrb[23].mxu0  ;;  %15518 = vmatpush3.bf16.msra.mxu1 %v10181_v27  ;;  %v10171_v4 = vmax.f32 %v10155_v45, 0.0 }
 0x511   : > { %v10154_v39 = vadd.f32 %v19780_v53, %v10082_v52  ;;  %15519 = vmatprep.subr.bf16.mxu1 %v10182_v54  ;;  %v10169_v63 = vmax.f32 %v10153_v48, 0.0  ;;  %v10315_v52 = vshll.u32 %v19488_v23, 16  ;;  %v16720_v23 = vld [vmem:[#allocation9 + $0x48] sm:$0xff]  }
 0x512   : > { %v10172_v2 = vmax.f32 %v10156_v9, 0.0  ;;  %v10302_v9 = vor.u32 %v10301_v8, %v10298_v50  ;;  %v19828_v50 = vld [vmem:[#allocation3 + $0x84] sm:$0xf]  ;;  %v16725_v8 = vld [vmem:[#allocation9 + $0x70] sm:$0xff]  }
 0x513   : > { %v10170_v36 = vmax.f32 %v10154_v39, 0.0  ;;  %v10313_v39 = vrot.slane %v10312_v32, 4 }
 0x514   : > { %v10184_v57 = vpack.c.bf16 %v10172_v2, %v10171_v4  ;;  %15520 = vmatpush3.bf16.msra.mxu1 %v10182_v54  ;;  %v16719_v4 = vld [vmem:[#allocation9 + $0x40] sm:$0xff]   ;;  %v10317_v2 = vrot.slane %v10315_v52, 5  ;;  %v19839_v52 = vld [vmem:[#allocation3 + $0x94] sm:$0xf] }
 0x515   : > { %v10183_v51 = vpack.c.bf16 %v10170_v36, %v10169_v63  ;;  %v15511_v21 = vpop.f32.mrb[24].mxu0  ;;  %v16718_v63 = vld [vmem:[%s20360_s5 + $0x8] sm:$0xff]  }
 0x516   : > { %v10159_v43 = vadd.f32 %v15511_v21, %v19780_v53  ;;  %v10095_v25 = vpop.f32.mrb[25].mxu0  ;;  %v10318_v36 = vsel %vm17309_vm11, %v10313_v39, %v10317_v2  ;;  %v16721_v21 = vld [vmem:[#allocation9 + $0x50] sm:$0xff]   ;;  %v10401_v39 = vshll.u32 %v19839_v52, 16 }
 0x517   : > { %v10157_v17 = vadd.f32 %v19780_v53, %v10095_v25  ;;  %v15512_v5 = vpop.f32.mrb[26].mxu0  ;;  %15521 = vmatprep.subr.bf16.mxu1 %v10183_v51  ;;  %v19810_v25 = vld [vmem:[#allocation3 + $0x6c] sm:$0xf] }
 0x518   : > { %v10160_v33 = vadd.f32 %v15512_v5, %v19780_v53  ;;  %v10098_v15 = vpop.f32.mrb[27].mxu0  ;;  %15522 = vmatpush3.bf16.msra.mxu1 %v10183_v51  ;;  %v10175_v22 = vmax.f32 %v10159_v43, 0.0  ;;  %v16722_v43 = vld [vmem:[#allocation9 + $0x58] sm:$0xff]  }
 0x519   : > { %v10158_v24 = vadd.f32 %v19780_v53, %v10098_v15  ;;  %15523 = vmatprep.subr.bf16.mxu1 %v10184_v57  ;;  %v10173_v42 = vmax.f32 %v10157_v17, 0.0  ;;  %v19812_v17 = vld [vmem:[#allocation3 + $0x70] sm:$0xf]  ;;  %v10320_v15 = vshrl.u32 %v19810_v25, 16 }
 0x51a   : > { %v10176_v26 = vmax.f32 %v10160_v33, 0.0  ;;  %v10329_v5 = vshll.u32 %v19812_v17, 16  ;;  %v10333_v33 = vshrl.u32 %v19812_v17, 16 }
 0x51b   : > { %v10174_v7 = vmax.f32 %v10158_v24, 0.0  ;;  %v10323_v24 = vshll.u32 %v19810_v25, 16 }
 0x51c   : > { %v10186_v18 = vpack.c.bf16 %v10176_v26, %v10175_v22  ;;  %15524 = vmatpush3.bf16.msra.mxu1 %v10184_v57  ;;  %v16723_v22 = vld [vmem:[#allocation9 + $0x60] sm:$0xff]  }
 0x51d   : > { %v10185_v60 = vpack.c.bf16 %v10174_v7, %v10173_v42  ;;  %v15515_v31 = vpop.f32.mrb[28].mxu0  ;;  %v19818_v26 = vld [vmem:[#allocation3 + $0x78] sm:$0xf]  ;;  %v10331_v42 = vrot.slane %v10329_v5, 5  ;;  %v10335_v7 = vrot.slane %v10333_v33, 4 }
 0x51e   : > { %v10163_v46 = vadd.f32 %v15515_v31, %v19780_v53  ;;  %v10111_v1 = vpop.f32.mrb[29].mxu0  ;;  %v10325_v31 = vrot.slane %v10323_v24, 5  ;;  %v10344_v56 = vshrl.u32 %v19818_v26, 16  ;;  %v10347_v58 = vshll.u32 %v19818_v26, 16 }
 0x51f   : > { %v10161_v61 = vadd.f32 %v19780_v53, %v10111_v1  ;;  %v15516_v34 = vpop.f32.mrb[30].mxu0  ;;  %15525 = vmatprep.subr.bf16.mxu1 %v10185_v60  ;;  %v10336_v1 = vor.u32 %v10335_v7, %v10331_v42  ;;  %v19849_v7 = vrot.slane %v10401_v39, 5 }
 0x520   : > { %v10164_v14 = vadd.f32 %v15516_v34, %v19780_v53  ;;  %v10114_v10 = vpop.f32.mrb[31].mxu0  ;;  %15526 = vmatpush3.bf16.msra.mxu1 %v10185_v60  ;;  %v10179_v54 = vmax.f32 %v10163_v46, 0.0  ;;  %v10322_v60 = vrot.slane %v10320_v15, 4  ;;  %v16724_v46 = vld [vmem:[#allocation9 + $0x68] sm:$0xff]  }
 0x521   : > { %v10162_v16 = vadd.f32 %v19780_v53, %v10114_v10  ;;  %15527 = vmatprep.subr.bf16.mxu1 %v10186_v18  ;;  %v10177_v12 = vmax.f32 %v10161_v61, 0.0  ;;  %v10303_v53 = vrot.slane %v10302_v9, 4  ;;  %v19826_v61 = vrot.slane %v10353_v44, 5 }
 0x522   : > { %v10180_v27 = vmax.f32 %v10164_v14, 0.0  ;;  %v10339_v14 = vshll.u32 %v16848_v35, 16  ;;  %v10346_v10 = vrot.slane %v10344_v56, 4  ;;  %v10371_v9 = vshll.u32 %v19828_v50, 16 }
 0x523   : > { %v10178_v45 = vmax.f32 %v10162_v16, 0.0  ;;  %v10308_v57 = vsel %vm17309_vm11, %v10303_v53, %v10307_v29  ;;  %v10326_v29 = vor.u32 %v10325_v31, %v10322_v60  ;;  %v10349_v16 = vrot.slane %v10347_v58, 5  ;;  %v16727_v58 = vld [vmem:[#allocation9] sm:$0xff]  }
 0x524   : > { %v10188_v48 = vpack.c.bf16 %v10180_v27, %v10179_v54  ;;  %15528 = vmatpush3.bf16.msra.mxu1 %v10186_v18  ;;  %v13849_v51 = vcombine.low %v10308_v57, %v10318_v36  ;;  %v10357_v18 = vshrl.u32 %v19820_v30, 16  ;;  %v10337_v54 = vrot.slane %v10336_v1, 4  ;;  %v16851_v36 = vld [vmem:[#allocation3 + $0x80] sm:$0x1] }
 0x525   : > { %v10187_v6 = vpack.c.bf16 %v10178_v45, %v10177_v12  ;;  %v19831_v12 = vld [vmem:[#allocation3 + $0x88] sm:$0xf]  ;;  %v10327_v53 = vrot.slane %v10326_v29, 4  ;;  %v10341_v2 = vrot.slane %v10339_v14, 5  ;;  %v10363_v57 = vshll.u32 %v16851_v36, 16 }
 0x526   : > { %v10359_v34 = vrot.slane %v10357_v18, 4  ;;  %v10377_v45 = vshll.u32 %v19831_v12, 16  ;;  %v10381_v32 = vshrl.u32 %v19831_v12, 16  ;;  %v19858_v14 = vld [vmem:[#allocation3 + $0xa0] sm:$0xf] }
 0x527   : > { %15529 = vmatprep.subr.bf16.mxu1 %v10187_v6  ;;  %v10332_v18 = vsel %vm17309_vm11, %v10327_v53, %v10331_v42  ;;  %v10365_v31 = vrot.slane %v10363_v57, 5  ;;  %v10429_v42 = vshrl.u32 %v19858_v14, 16  ;;  %v16855_v36 = vld [vmem:[#allocation3 + $0x98] sm:$0x1] }
 0x528   : > { %15530 = vmatpush3.bf16.msra.mxu1 %v10187_v6  ;;  %v10360_v27 = vor.u32 %v10359_v34, %v19826_v61  ;;  %v10368_v6 = vshrl.u32 %v19828_v50, 16  ;;  %v19847_v33 = vrot.slane %v10377_v45, 5  ;;  %v10383_v15 = vrot.slane %v10381_v32, 4  ;;  %v19853_v34 = vld [vmem:[#allocation3 + $0x9c] sm:$0xf] }
 0x529   : > { %15531 = vmatprep.subr.bf16.mxu1 %v10188_v48  ;;  %v10419_v53 = vshll.u32 %v19853_v34, 16  ;;  %v10411_v57 = vshll.u32 %v16855_v36, 16 }
 0x52a   : > { %v10361_v5 = vrot.slane %v10360_v27, 4  ;;  %v10370_v24 = vrot.slane %v10368_v6, 4  ;;  %v10384_v35 = vor.u32 %v10383_v15, %v19847_v33  ;;  %v19865_v27 = vld [vmem:[#allocation3 + $0xac] sm:$0xf] }
 0x52b   : > { %v10449_v45 = vshll.u32 %v19865_v27, 16  ;;  %v10453_v32 = vshrl.u32 %v19865_v27, 16 }
 0x52c   : > { %15532 = vmatpush3.bf16.msra.mxu1 %v10188_v48  ;;  %v19835_v48 = vld [vmem:[#allocation3 + $0x90] sm:$0xf]  ;;  %v10366_v29 = vsel %vm17309_vm11, %v10361_v5, %v10365_v31  ;;  %v10421_v31 = vrot.slane %v10419_v53, 5 }
 0x52d   : > { %15537 = vmatprep.subr.bf16.mxu1 %v16719_v4 }
 0x52f   : > { %15534 = vmatmul.mubr.bf16.vlgmr.msra.gmra.mrb[16].mxu1 %v16718_v63  ;;  %v10350_v63 = vor.u32 %v10349_v16, %v10346_v10  ;;  %v10425_v10 = vshll.u32 %v19858_v14, 16  ;;  %v19862_v16 = vld [vmem:[#allocation3 + $0xa8] sm:$0xf] }
 0x530   : > { %15538 = vmatpush3.bf16.msra.mxu1 %v16719_v4  ;;  %15553 = vmatprep.mubr.bf16.mxu1 %v13849_v51  ;;  %v10405_v4 = vshrl.u32 %v19839_v52, 16  ;;  %v10392_v51 = vshrl.u32 %v19835_v48, 16 }
 0x531   : > { %15539 = vmatprep.subr.bf16.mxu1 %v16720_v23  ;;  %v10351_v60 = vrot.slane %v10350_v63, 4  ;;  %v19876_v5 = vrot.slane %v10425_v10, 5 }
 0x532   : > { %v10407_v44 = vrot.slane %v10405_v4, 4  ;;  %v10416_v4 = vshrl.u32 %v19853_v34, 16 }
 0x533   : > { %v10356_v6 = vsel %vm17309_vm11, %v10351_v60, %v19826_v61  ;;  %v10431_v61 = vrot.slane %v10429_v42, 4 }
 0x534   : > { %15540 = vmatpush3.bf16.msra.mxu1 %v16720_v23  ;;  %v16726_v23 = vld [vmem:[#allocation9 + $0x78] sm:$0xff]   ;;  %v10418_v60 = vrot.slane %v10416_v4, 4  ;;  %v16857_v4 = vld [vmem:[#allocation3 + $0xa4] sm:$0x1] }
 0x535   : > { %15541 = vmatprep.subr.bf16.mxu1 %v16721_v21  ;;  %v10432_v42 = vor.u32 %v10431_v61, %v19876_v5  ;;  %v10435_v53 = vshll.u32 %v16857_v4, 16 }
 0x538   : > { %15542 = vmatpush3.bf16.msra.mxu1 %v16721_v21  ;;  %v10395_v21 = vshll.u32 %v19835_v48, 16 }
 0x539   : > { %15543 = vmatprep.subr.bf16.mxu1 %v16722_v43 }
 0x53a   : > { %v10397_v1 = vrot.slane %v10395_v21, 5  ;;  %v10443_v21 = vshll.u32 %v19862_v16, 16 }
 0x53c   : > { %15544 = vmatpush3.bf16.msra.mxu1 %v16722_v43  ;;  %v10342_v43 = vsel %vm17309_vm11, %v10337_v54, %v10341_v2  ;;  %v10408_v54 = vor.u32 %v10407_v44, %v19849_v7  ;;  %v16728_v2 = vld [vmem:[#allocation9 + $0x8] sm:$0xff]   ;;  %v10455_v44 = vrot.slane %v10453_v32, 4 }
 0x53d   : > { %15545 = vmatprep.subr.bf16.mxu1 %v16723_v22  ;;  %v13850_v56 = vcombine.low %v10332_v18, %v10342_v43  ;;  %v10385_v43 = vrot.slane %v10384_v35, 4  ;;  %v10413_v35 = vrot.slane %v10411_v57, 5 }
 0x540   : > { %15546 = vmatpush3.bf16.msra.mxu1 %v16723_v22  ;;  %v10373_v22 = vrot.slane %v10371_v9, 5  ;;  %v16854_v9 = vld [vmem:[#allocation3 + $0x8c] sm:$0x1] }
 0x541   : > { %15547 = vmatprep.subr.bf16.mxu1 %v16724_v46  ;;  %v10387_v39 = vshll.u32 %v16854_v9, 16 }
 0x543   : > { %v10389_v18 = vrot.slane %v10387_v39, 5  ;;  %v10422_v39 = vor.u32 %v10421_v31, %v10418_v60  ;;  %v10437_v60 = vrot.slane %v10435_v53, 5 }
 0x544   : > { %15548 = vmatpush3.bf16.msra.mxu1 %v16724_v46  ;;  %v10394_v46 = vrot.slane %v10392_v51, 4  ;;  %v10440_v51 = vshrl.u32 %v19862_v16, 16 }
 0x545   : > { %15549 = vmatprep.subr.bf16.mxu1 %v16725_v8 }
 0x546   : > { %v10398_v63 = vor.u32 %v10397_v1, %v10394_v46  ;;  %v19880_v46 = vld [vmem:[#allocation3 + $0xb4] sm:$0xf]  ;;  %v16729_v1 = vld [vmem:[#allocation9 + $0x10] sm:$0xff]   ;;  %v10442_v10 = vrot.slane %v10440_v51, 4 }
 0x547   : > { %v10467_v36 = vshll.u32 %v19880_v46, 16 }
 0x548   : > { %15550 = vmatpush3.bf16.msra.mxu1 %v16725_v8  ;;  %v10374_v8 = vor.u32 %v10373_v22, %v10370_v24  ;;  %v10409_v24 = vrot.slane %v10408_v54, 4  ;;  %v19878_v22 = vrot.slane %v10449_v45, 5 }
 0x549   : > { %15551 = vmatprep.subr.bf16.mxu1 %v16726_v23 }
 0x54a   : > { %v10375_v15 = vrot.slane %v10374_v8, 4  ;;  %v19885_v8 = vld [vmem:[#allocation3 + $0xb8] sm:$0xf]  ;;  %v10414_v32 = vsel %vm17309_vm11, %v10409_v24, %v10413_v35  ;;  %v10456_v9 = vor.u32 %v10455_v44, %v19878_v22  ;;  %v10469_v35 = vrot.slane %v10467_v36, 5 }
 0x54b   : > { %v10477_v54 = vshrl.u32 %v19885_v8, 16 }
 0x54c   : > { %15552 = vmatpush3.bf16.msra.mxu1 %v16726_v23  ;;  %v13851_v23 = vcombine.low %v10356_v6, %v10366_v29  ;;  %v10399_v29 = vrot.slane %v10398_v63, 4  ;;  %v10445_v6 = vrot.slane %v10443_v21, 5  ;;  %v10380_v45 = vsel %vm17309_vm11, %v10375_v15, %v19847_v33  ;;  %v16730_v33 = vld [vmem:[#allocation9 + $0x18] sm:$0xff]  }
 0x54d   : > { %15569 = vmatprep.subr.bf16.mxu1 %v16727_v58  ;;  %v10464_v63 = vshrl.u32 %v19880_v46, 16  ;;  %v10433_v15 = vrot.slane %v10432_v42, 4  ;;  %v10479_v24 = vrot.slane %v10477_v54, 4  ;;  %v10457_v44 = vrot.slane %v10456_v9, 4 }
 0x54e   : > { %v10404_v51 = vsel %vm17309_vm11, %v10399_v29, %v19849_v7  ;;  %v10446_v21 = vor.u32 %v10445_v6, %v10442_v10 }
 0x54f   : > { %15554 = vmatmul.mubr.bf16.vlgmr.msra.gmra.mrb[20].mxu1 %v13850_v56  ;;  %v10390_v56 = vsel %vm17309_vm11, %v10385_v43, %v10389_v18  ;;  %v13853_v61 = vcombine.low %v10404_v51, %v10414_v32  ;;  %v10423_v18 = vrot.slane %v10422_v39, 4  ;;  %v10466_v31 = vrot.slane %v10464_v63, 4  ;;  %v16732_v39 = vld [vmem:[#allocation9 + $0x28] sm:$0xff]  }
 0x550   : > { %15557 = vmatprep.mubr.bf16.mxu1 %v13851_v23  ;;  %15570 = vmatpush3.bf16.msra.mxu1 %v16727_v58  ;;  %v10473_v58 = vshll.u32 %v19885_v8, 16  ;;  %v13852_v57 = vcombine.low %v10380_v45, %v10390_v56  ;;  %v16858_v23 = vld [vmem:[#allocation3 + $0xb0] sm:$0x1]  ;;  %v16731_v56 = vld [vmem:[#allocation9 + $0x20] sm:$0xff]   ;;  %v10447_v45 = vrot.slane %v10446_v21, 4  ;;  %v10438_v29 = vsel %vm17309_vm11, %v10433_v15, %v10437_v60 }
 0x551   : > { %15571 = vmatprep.subr.bf16.mxu1 %v16728_v2  ;;  %v10459_v43 = vshll.u32 %v16858_v23, 16  ;;  %v10470_v42 = vor.u32 %v10469_v35, %v10466_v31  ;;  %v20511_v21 = vcombine.low %v19475_v20, %v19468_v19  ;;  %v16737_v23 = vld [vmem:[#allocation9 + $0x80] sm:$0xff]   ;;  %v13867_v15 = vcombine.low %v19818_v26, %v19820_v30  ;;  %v16743_v20 = vld [vmem:[#allocation9 + $0x98] sm:$0xff]   ;;  %v16747_v26 = vld [vmem:[#allocation9 + $0xa8] sm:$0xff]  }
 0x552   : > { %v10452_v9 = vsel %vm17309_vm11, %v10447_v45, %v19878_v22  ;;  %v16735_v22 = vld [vmem:[#allocation9 + $0x38] sm:$0xff]   ;;  %v13868_v19 = vcombine.low %v19828_v50, %v19831_v12  ;;  %v13871_v30 = vcombine.low %v19862_v16, %v19865_v27  ;;  %v16749_v50 = vld [vmem:[#allocation9 + $0xb0] sm:$0xff]   ;;  %v13872_v12 = vcombine.low %v19880_v46, %v19885_v8  ;;  %v20522_v35 = vld [vmem:[#allocation22_spill] sm:$0xff] }
 0x553   : > { %v10461_v7 = vrot.slane %v10459_v43, 5  ;;  %v10471_v63 = vrot.slane %v10470_v42, 4  ;;  %v13866_v43 = vcombine.low %v19810_v25, %v19812_v17  ;;  %v16745_v25 = vld [vmem:[#allocation9 + $0xa0] sm:$0xff]   ;;  %v13870_v17 = vcombine.low %v19853_v34, %v19858_v14  ;;  %v16752_v14 = vld [vmem:[#allocation9 + $0xc8] sm:$0xff]   ;;  %v16753_v46 = vld [vmem:[#allocation9 + $0xd0] sm:$0xff]  }
 0x554   : > { %15572 = vmatpush3.bf16.msra.mxu1 %v16728_v2  ;;  %v10475_v2 = vrot.slane %v10473_v58, 5  ;;  %v16859_v58 = vld [vmem:[#allocation3 + $0xbc] sm:$0x1]  ;;  %v20513_v16 = vcombine.low %v19526_v3, %v19532_v59  ;;  %v20514_v27 = vcombine.low %v19540_v13, %v19544_v11  ;;  %v20516_v8 = vcombine.low %v19560_v28, %v19564_v0  ;;  %v16756_v59 = vld [vmem:[#allocation9 + $0xe8] sm:$0xff]   ;;  %v16759_v28 = vld [vmem:[#allocation9 + $0xf8] sm:$0xff]  }
 0x555   : > { %15573 = vmatprep.subr.bf16.mxu1 %v16729_v1  ;;  %v10462_v6 = vsel %vm17309_vm11, %v10457_v44, %v10461_v7  ;;  %v10483_v54 = vshll.u32 %v16859_v58, 16  ;;  %v16751_v34 = vld [vmem:[#allocation9 + $0xc0] sm:$0xff]   ;;  %v20517_v13 = vcombine.low %v19568_v40, %v19577_v47  ;;  %v20518_v11 = vld [vmem:[#allocation27_spill] sm:$0xff]  ;;  %v16758_v31 = vld [vmem:[#allocation3 + $0x6c] sm:$0xff]  }
 0x556   : > { %v10480_v10 = vor.u32 %v10479_v24, %v10475_v2  ;;  %v13855_v4 = vcombine.low %v10452_v9, %v10462_v6  ;;  %v10476_v51 = vsel %vm17309_vm11, %v10471_v63, %v10475_v2  ;;  %v16741_v2 = vld [vmem:[#allocation9 + $0x90] sm:$0xff]   ;;  %v13869_v24 = vcombine.low %v19835_v48, %v19839_v52  ;;  %v16750_v48 = vld [vmem:[#allocation9 + $0xb8] sm:$0xff]   ;;  %v16755_v3 = vld [vmem:[#allocation9 + $0xe0] sm:$0xff]  }
 0x557   : > { %15558 = vmatmul.mubr.bf16.gmra.mrb[24].mxu1 %v13852_v57  ;;  %v10485_v36 = vrot.slane %v10483_v54, 5  ;;  %v16733_v57 = vld [vmem:[#allocation9 + $0x30] sm:$0xff]   ;;  %v20512_v52 = vcombine.low %v19518_v37, %v19522_v55  ;;  %v16754_v37 = vld [vmem:[#allocation9 + $0xd8] sm:$0xff]   ;;  %v20515_v55 = vcombine.low %v19548_v41, %v19554_v62  ;;  %v20519_v44 = vld [vmem:[#allocation18_spill] sm:$0xff] }
 0x558   : > { %15561 = vmatprep.mubr.bf16.mxu1 %v13853_v61  ;;  %15574 = vmatpush3.bf16.msra.mxu1 %v16729_v1  ;;  %v10428_v1 = vsel %vm17309_vm11, %v10423_v18, %v19876_v5  ;;  %v10481_v53 = vrot.slane %v10480_v10, 4  ;;  %v16739_v61 = vld [vmem:[#allocation9 + $0x88] sm:$0xff]   ;;  %v20520_v18 = vcombine.low %v20518_v11, %v20519_v44  ;;  %v16757_v41 = vld [vmem:[#allocation9 + $0xf0] sm:$0xff]   ;;  %v16761_v47 = vld [vmem:[#allocation9 + $0x100] sm:$0xff]  }
 0x559   : > { %15575 = vmatprep.subr.bf16.mxu1 %v16730_v33  ;;  %v13854_v32 = vcombine.low %v10428_v1, %v10438_v29  ;;  %v478_v62 = vld [vmem:[#allocation3 + $0xcc] sm:$0x1]  ;;  %v16760_v45 = vld [vmem:[#allocation3 + $0x78] sm:$0xff]   ;;  %v16763_v7 = vld [vmem:[#allocation9 + $0x108] sm:$0xff]  }
 0x55a   : > { %v10486_v5 = vsel %vm17309_vm11, %v10481_v53, %v10485_v36  ;;  %v479_v60 = vsel %vm17259_vm3, 0, %v478_v62  ;;  %v16762_v29 = vld [vmem:[#allocation3 + $0x84] sm:$0xff]   ;;  %v19957_v10 = vld [vmem:[#allocation3 + $0x70] sm:$0xf]  ;;  %v11403_v6 = vld [vmem:[#allocation3 + $0x6c] sm:$0xf] }
 0x55b   : > { %480 = vst [vmem:[#allocation3 + $0xcc] sm:$0x1] %v479_v60  ;;  %v16765_v1 = vld [vmem:[#allocation9 + $0x110] sm:$0xff]   ;;  %v11437_v42 = vshll.u32 %v19957_v10, 16  ;;  %v11441_v58 = vshrl.u32 %v19957_v10, 16  ;;  %v11428_v54 = vshrl.u32 %v11403_v6, 16 }
 0x55c   : > { %15576 = vmatpush3.bf16.msra.mxu1 %v16730_v33  ;;  %v13856_v33 = vcombine.low %v10476_v51, %v10486_v5  ;;  %v19961_v9 = vld [vmem:[#allocation3 + $0x7c] sm:$0xf]  ;;  %v11406_v36 = vld [vmem:[#allocation3 + $0x78] sm:$0xf]  ;;  %v19983_v11 = vld [vmem:[#allocation3 + $0x94] sm:$0xf] }
 0x55d   : > { %15577 = vmatprep.subr.bf16.mxu1 %v16731_v56  ;;  %v19963_v53 = vrot.slane %v11437_v42, 5  ;;  %v11443_v63 = vrot.slane %v11441_v58, 4  ;;  %v11461_v5 = vshll.u32 %v19961_v9, 16  ;;  %v11465_v51 = vshrl.u32 %v19961_v9, 16  ;;  %v16773_v0 = vld [vmem:[#allocation9 + $0x130] sm:$0xff]  }
 0x55f   : > { %15562 = vmatmul.mubr.bf16.gmra.mrb[28].mxu1 %v13854_v32  ;;  %v11431_v32 = vshll.u32 %v11403_v6, 16 }
 0x560   : > { %15565 = vmatprep.mubr.bf16.mxu1 %v13855_v4  ;;  %15578 = vmatpush3.bf16.msra.mxu1 %v16731_v56  ;;  %v20523_v56 = vld [vmem:[#allocation20_spill] sm:$0xff]  ;;  %v16767_v4 = vld [vmem:[#allocation9 + $0x118] sm:$0xff]  }
 0x561   : > { %15579 = vmatprep.subr.bf16.mxu1 %v16732_v39  ;;  %v20524_v40 = vcombine.low %v20522_v35, %v20523_v56  ;;  %v19989_v35 = vld [vmem:[#allocation3 + $0x8c] sm:$0x1] }
 0x564   : > { %15580 = vmatpush3.bf16.msra.mxu1 %v16732_v39  ;;  %v16764_v39 = vld [vmem:[#allocation3 + $0x90] sm:$0xff]  }
 0x565   : > { %15581 = vmatprep.subr.bf16.mxu1 %v16733_v57 }
 0x567   : > { %15566 = vmatmul.mubr.bf16.gmra.mrb[32].mxu1 %v13856_v33  ;;  %v11430_v33 = vrot.slane %v11428_v54, 4 }
 0x568   : > { %15582 = vmatpush3.bf16.msra.mxu1 %v16733_v57  ;;  %15585 = vmatprep.mubr.bf16.mxu1 %v20511_v21  ;;  %v16766_v57 = vld [vmem:[#allocation3 + $0x9c] sm:$0xff]   ;;  %v19967_v21 = vld [vmem:[#allocation3 + $0x88] sm:$0xf] }
 0x569   : > { %15583 = vmatprep.subr.bf16.mxu1 %v16735_v22 }
 0x56c   : > { %15584 = vmatpush3.bf16.msra.mxu1 %v16735_v22  ;;  %v11433_v22 = vrot.slane %v11431_v32, 5 }
 0x56d   : > { %15601 = vmatprep.subr.bf16.mxu1 %v16737_v23 }
 0x56f   : > { %15586 = vmatmul.mubr.bf16.vlgmr.msra.gmra.mrb[20].mxu1 %v13866_v43  ;;  %v11452_v43 = vshrl.u32 %v11406_v36, 16 }
 0x570   : > { %15589 = vmatprep.mubr.bf16.mxu1 %v13867_v15  ;;  %15602 = vmatpush3.bf16.msra.mxu1 %v16737_v23  ;;  %v19969_v23 = vld [vmem:[#allocation3 + $0x74] sm:$0x1]  ;;  %v16769_v15 = vld [vmem:[#allocation9 + $0x120] sm:$0xff]  }
 0x571   : > { %15603 = vmatprep.subr.bf16.mxu1 %v16739_v61 }
 0x574   : > { %15604 = vmatpush3.bf16.msra.mxu1 %v16739_v61  ;;  %v11455_v61 = vshll.u32 %v11406_v36, 16 }
 0x575   : > { %15605 = vmatprep.subr.bf16.mxu1 %v16741_v2 }
 0x577   : > { %15590 = vmatmul.mubr.bf16.gmra.mrb[24].mxu1 %v13868_v19  ;;  %v11409_v19 = vld [vmem:[#allocation3 + $0x84] sm:$0xf] }
 0x578   : > { %15593 = vmatprep.mubr.bf16.mxu1 %v13869_v24  ;;  %15606 = vmatpush3.bf16.msra.mxu1 %v16741_v2  ;;  %v11444_v2 = vor.u32 %v11443_v63, %v19963_v53  ;;  %v19974_v24 = vrot.slane %v11461_v5, 5  ;;  %v16772_v63 = vld [vmem:[#allocation3 + $0xc0] sm:$0xff]  }
 0x579   : > { %15607 = vmatprep.subr.bf16.mxu1 %v16743_v20 }
 0x57c   : > { %15608 = vmatpush3.bf16.msra.mxu1 %v16743_v20  ;;  %v19972_v20 = vld [vmem:[#allocation3 + $0x80] sm:$0x1] }
 0x57d   : > { %15609 = vmatprep.subr.bf16.mxu1 %v16745_v25 }
 0x57f   : > { %15594 = vmatmul.mubr.bf16.gmra.mrb[28].mxu1 %v13870_v17  ;;  %v11485_v17 = vshll.u32 %v19967_v21, 16 }
 0x580   : > { %15597 = vmatprep.mubr.bf16.mxu1 %v13871_v30  ;;  %15610 = vmatpush3.bf16.msra.mxu1 %v16745_v25  ;;  %v11467_v25 = vrot.slane %v11465_v51, 4  ;;  %v11434_v30 = vor.u32 %v11433_v22, %v11430_v33  ;;  %v16777_v33 = vld [vmem:[#allocation9 + $0x150] sm:$0xff]  }
 0x581   : > { %15611 = vmatprep.subr.bf16.mxu1 %v16747_v26 }
 0x582   : > { %v11435_v44 = vrot.slane %v11434_v30, 4 }
 0x584   : > { %15612 = vmatpush3.bf16.msra.mxu1 %v16747_v26  ;;  %v11489_v26 = vshrl.u32 %v19967_v21, 16  ;;  %v11440_v58 = vsel %vm17309_vm11, %v11435_v44, %v19963_v53 }
 0x585   : > { %15613 = vmatprep.subr.bf16.mxu1 %v16749_v50 }
 0x587   : > { %15598 = vmatmul.mubr.bf16.gmra.mrb[32].mxu1 %v13872_v12  ;;  %v11454_v12 = vrot.slane %v11452_v43, 4 }
 0x588   : > { %15614 = vmatpush3.bf16.msra.mxu1 %v16749_v50  ;;  %15617 = vmatprep.mubr.bf16.mxu1 %v20512_v52  ;;  %v11447_v50 = vshll.u32 %v19969_v23, 16  ;;  %v11476_v52 = vshrl.u32 %v11409_v19, 16 }
 0x589   : > { %15615 = vmatprep.subr.bf16.mxu1 %v16750_v48 }
 0x58c   : > { %15616 = vmatpush3.bf16.msra.mxu1 %v16750_v48  ;;  %v11457_v48 = vrot.slane %v11455_v61, 5 }
 0x58d   : > { %15633 = vmatprep.subr.bf16.mxu1 %v16751_v34 }
 0x58f   : > { %15618 = vmatmul.mubr.bf16.vlgmr.msra.gmra.mrb[20].mxu1 %v20513_v16  ;;  %v16771_v16 = vld [vmem:[#allocation9 + $0x128] sm:$0xff]  }
 0x590   : > { %15621 = vmatprep.mubr.bf16.mxu1 %v20514_v27  ;;  %15634 = vmatpush3.bf16.msra.mxu1 %v16751_v34  ;;  %v11479_v34 = vshll.u32 %v11409_v19, 16  ;;  %v11445_v27 = vrot.slane %v11444_v2, 4 }
 0x591   : > { %15635 = vmatprep.subr.bf16.mxu1 %v16752_v14 }
 0x592   : > { %v11481_v62 = vrot.slane %v11479_v34, 5 }
 0x594   : > { %15636 = vmatpush3.bf16.msra.mxu1 %v16752_v14  ;;  %v16768_v14 = vld [vmem:[#allocation3 + $0xa8] sm:$0xff]  }
 0x595   : > { %15637 = vmatprep.subr.bf16.mxu1 %v16753_v46 }
 0x597   : > { %15622 = vmatmul.mubr.bf16.gmra.mrb[24].mxu1 %v20515_v55  ;;  %v11468_v55 = vor.u32 %v11467_v25, %v19974_v24 }
 0x598   : > { %15625 = vmatprep.mubr.bf16.mxu1 %v20516_v8  ;;  %15638 = vmatpush3.bf16.msra.mxu1 %v16753_v46  ;;  %v11471_v46 = vshll.u32 %v19972_v20, 16  ;;  %v19981_v8 = vrot.slane %v11485_v17, 5 }
 0x599   : > { %15639 = vmatprep.subr.bf16.mxu1 %v16754_v37  ;;  %v11469_v56 = vrot.slane %v11468_v55, 4 }
 0x59c   : > { %15640 = vmatpush3.bf16.msra.mxu1 %v16754_v37  ;;  %v16770_v37 = vld [vmem:[#allocation3 + $0xb4] sm:$0xff]  }
 0x59d   : > { %15641 = vmatprep.subr.bf16.mxu1 %v16755_v3 }
 0x59f   : > { %15626 = vmatmul.mubr.bf16.gmra.mrb[28].mxu1 %v20517_v13  ;;  %v11412_v13 = vld [vmem:[#allocation3 + $0x90] sm:$0xf] }
 0x5a0   : > { %15629 = vmatprep.mubr.bf16.mxu1 %v20520_v18  ;;  %15642 = vmatpush3.bf16.msra.mxu1 %v16755_v3  ;;  %v11491_v3 = vrot.slane %v11489_v26, 4  ;;  %v11458_v18 = vor.u32 %v11457_v48, %v11454_v12  ;;  %v11503_v6 = vshll.u32 %v11412_v13, 16  ;;  %v20008_v26 = vld [vmem:[#allocation3 + $0xac] sm:$0xf]  ;;  %v20013_v48 = vld [vmem:[#allocation3 + $0x98] sm:$0x1] }
 0x5a1   : > { %15643 = vmatprep.subr.bf16.mxu1 %v16756_v59 }
 0x5a2   : > { %v11459_v54 = vrot.slane %v11458_v18, 4  ;;  %v11505_v19 = vrot.slane %v11503_v6, 5 }
 0x5a4   : > { %15644 = vmatpush3.bf16.msra.mxu1 %v16756_v59  ;;  %v11449_v59 = vrot.slane %v11447_v50, 5  ;;  %v11464_v30 = vsel %vm17309_vm11, %v11459_v54, %v19974_v24  ;;  %v11557_v24 = vshll.u32 %v20008_v26, 16 }
 0x5a5   : > { %15645 = vmatprep.subr.bf16.mxu1 %v16757_v41 }
 0x5a6   : > { %v11450_v60 = vsel %vm17309_vm11, %v11445_v27, %v11449_v59  ;;  %v11561_v59 = vshrl.u32 %v20008_v26, 16 }
 0x5a7   : > { %15630 = vmatmul.mubr.bf16.gmra.mrb[32].mxu1 %v20524_v40  ;;  %v11492_v40 = vor.u32 %v11491_v3, %v19981_v8  ;;  %v13921_v36 = vcombine.low %v11440_v58, %v11450_v60  ;;  %v20020_v3 = vld [vmem:[#allocation3 + $0xa4] sm:$0x1]  ;;  %v11519_v60 = vshll.u32 %v20013_v48, 16 }
 0x5a8   : > { %15646 = vmatpush3.bf16.msra.mxu1 %v16757_v41  ;;  %15649 = vmatprep.mubr.bf16.mxu1 %v16758_v31  ;;  %v11478_v41 = vrot.slane %v11476_v52, 4  ;;  %v11473_v31 = vrot.slane %v11471_v46, 5  ;;  %v20015_v52 = vld [vmem:[#allocation3 + $0xb8] sm:$0xf]  ;;  %v11418_v46 = vld [vmem:[#allocation3 + $0xa8] sm:$0xf] }
 0x5a9   : > { %15647 = vmatprep.subr.bf16.mxu1 %v16759_v28  ;;  %v11493_v61 = vrot.slane %v11492_v40, 4  ;;  %v16776_v40 = vld [vmem:[#allocation9 + $0x148] sm:$0xff]   ;;  %v11563_v58 = vrot.slane %v11561_v59, 4  ;;  %v16778_v59 = vld [vmem:[#allocation9 + $0x158] sm:$0xff]  }
 0x5aa   : > { %v11482_v32 = vor.u32 %v11481_v62, %v11478_v41  ;;  %v11474_v43 = vsel %vm17309_vm11, %v11469_v56, %v11473_v31  ;;  %v11581_v41 = vshll.u32 %v20015_v52, 16  ;;  %v11585_v62 = vshrl.u32 %v20015_v52, 16 }
 0x5ab   : > { %v13922_v34 = vcombine.low %v11464_v30, %v11474_v43  ;;  %v11548_v31 = vshrl.u32 %v11418_v46, 16  ;;  %v11551_v56 = vshll.u32 %v11418_v46, 16 }
 0x5ac   : > { %15648 = vmatpush3.bf16.msra.mxu1 %v16759_v28  ;;  %v19985_v28 = vld [vmem:[#allocation3 + $0xa0] sm:$0xf]  ;;  %v11483_v50 = vrot.slane %v11482_v32, 4 }
 0x5ad   : > { %15665 = vmatprep.subr.bf16.mxu1 %v16761_v47  ;;  %v11537_v42 = vshrl.u32 %v19985_v28, 16 }
 0x5af   : > { %15650 = vmatmul.mubr.bf16.vlgmr.msra.gmra.mrb[20].mxu1 %v16760_v45  ;;  %v11513_v45 = vshrl.u32 %v19983_v11, 16  ;;  %v11539_v17 = vrot.slane %v11537_v42, 4  ;;  %v20032_v42 = vrot.slane %v11557_v24, 5 }
 0x5b0   : > { %15653 = vmatprep.mubr.bf16.mxu1 %v16762_v29  ;;  %15666 = vmatpush3.bf16.msra.mxu1 %v16761_v47  ;;  %v11509_v47 = vshll.u32 %v19983_v11, 16  ;;  %v11500_v29 = vshrl.u32 %v11412_v13, 16  ;;  %v11421_v13 = vld [vmem:[#allocation3 + $0xb4] sm:$0xf] }
 0x5b1   : > { %15667 = vmatprep.subr.bf16.mxu1 %v16763_v7  ;;  %v11515_v53 = vrot.slane %v11513_v45, 4  ;;  %v11543_v45 = vshll.u32 %v20020_v3, 16 }
 0x5b2   : > { %v11502_v2 = vrot.slane %v11500_v29, 4  ;;  %v11575_v29 = vshll.u32 %v11421_v13, 16 }
 0x5b3   : > { %v11545_v43 = vrot.slane %v11543_v45, 5 }
 0x5b4   : > { %15668 = vmatpush3.bf16.msra.mxu1 %v16763_v7  ;;  %v11415_v7 = vld [vmem:[#allocation3 + $0x9c] sm:$0xf]  ;;  %v11506_v44 = vor.u32 %v11505_v19, %v11502_v2  ;;  %v11564_v19 = vor.u32 %v11563_v58, %v20032_v42  ;;  %v11862_v58 = vrot.slane %v19957_v10, 5 }
 0x5b5   : > { %15669 = vmatprep.subr.bf16.mxu1 %v16765_v1  ;;  %v11524_v5 = vshrl.u32 %v11415_v7, 16  ;;  %v11527_v51 = vshll.u32 %v11415_v7, 16  ;;  %v11572_v7 = vshrl.u32 %v11421_v13, 16 }
 0x5b6   : > { %v11507_v54 = vrot.slane %v11506_v44, 4 }
 0x5b7   : > { %15654 = vmatmul.mubr.bf16.gmra.mrb[24].mxu1 %v16764_v39  ;;  %v11495_v39 = vshll.u32 %v19989_v35, 16  ;;  %v11529_v27 = vrot.slane %v11527_v51, 5  ;;  %v11424_v51 = vld [vmem:[#allocation3 + $0xc0] sm:$0xf] }
 0x5b8   : > { %15657 = vmatprep.mubr.bf16.mxu1 %v16766_v57  ;;  %15670 = vmatpush3.bf16.msra.mxu1 %v16765_v1  ;;  %v11533_v1 = vshll.u32 %v19985_v28, 16  ;;  %v16774_v57 = vld [vmem:[#allocation9 + $0x138] sm:$0xff]   ;;  %v11596_v46 = vshrl.u32 %v11424_v51, 16 }
 0x5b9   : > { %15671 = vmatprep.subr.bf16.mxu1 %v16767_v4  ;;  %v11497_v12 = vrot.slane %v11495_v39, 5  ;;  %v20036_v39 = vrot.slane %v11581_v41, 5 }
 0x5ba   : > { %v20006_v25 = vrot.slane %v11533_v1, 5 }
 0x5bc   : > { %15672 = vmatpush3.bf16.msra.mxu1 %v16767_v4  ;;  %v532_v4 = vld [vmem:[#allocation3 + $0xd4] sm:$0x1]  ;;  %v11540_v18 = vor.u32 %v11539_v17, %v20006_v25  ;;  %v20043_v17 = vld [vmem:[#allocation3 + $0xbc] sm:$0x1] }
 0x5bd   : > { %15673 = vmatprep.subr.bf16.mxu1 %v16769_v15  ;;  %v533_v22 = vsel %vm17264_vm4, 0, %v532_v4  ;;  %v11587_v4 = vrot.slane %v11585_v62, 4 }
 0x5be   : > { %534 = vst [vmem:[#allocation3 + $0xd4] sm:$0x1] %v533_v22  ;;  %v11541_v32 = vrot.slane %v11540_v18, 4  ;;  %v11565_v18 = vrot.slane %v11564_v19, 4  ;;  %v11869_v19 = vrot.slane %v19961_v9, 5 }
 0x5bf   : > { %15658 = vmatmul.mubr.bf16.gmra.mrb[28].mxu1 %v16768_v14  ;;  %v16775_v14 = vld [vmem:[#allocation9 + $0x140] sm:$0xff]  }
 0x5c0   : > { %15661 = vmatprep.mubr.bf16.mxu1 %v16770_v37  ;;  %15674 = vmatpush3.bf16.msra.mxu1 %v16769_v15  ;;  %v20004_v15 = vrot.slane %v11509_v47, 5  ;;  %v11498_v37 = vsel %vm17309_vm11, %v11493_v61, %v11497_v12  ;;  %v11574_v61 = vrot.slane %v11572_v7, 4  ;;  %v20058_v7 = vld [vmem:[#allocation3 + $0xc8] sm:$0x1]  ;;  %v11829_v9 = vld [vmem:[#allocation3 + $0x78] sm:$0xe] }
 0x5c1   : > { %15675 = vmatprep.subr.bf16.mxu1 %v16771_v16 }
 0x5c2   : > { %v11516_v55 = vor.u32 %v11515_v53, %v20004_v15  ;;  %v11577_v53 = vrot.slane %v11575_v29, 5  ;;  %v11512_v12 = vsel %vm17309_vm11, %v11507_v54, %v20004_v15  ;;  %v11591_v15 = vshll.u32 %v20043_v17, 16 }
 0x5c4   : > { %15676 = vmatpush3.bf16.msra.mxu1 %v16771_v16  ;;  %v11526_v16 = vrot.slane %v11524_v5, 4  ;;  %v11517_v1 = vrot.slane %v11516_v55, 4  ;;  %v11553_v5 = vrot.slane %v11551_v56, 5  ;;  %v11578_v13 = vor.u32 %v11577_v53, %v11574_v61  ;;  %v11828_v61 = vld [vmem:[#allocation3 + $0x6c] sm:$0xe] }
 0x5c5   : > { %15677 = vmatprep.subr.bf16.mxu1 %v16773_v0  ;;  %v11598_v56 = vrot.slane %v11596_v46, 4  ;;  %v11865_v53 = vrot.slane %v19969_v23, 5 }
 0x5c6   : > { %v11530_v47 = vor.u32 %v11529_v27, %v11526_v16  ;;  %v11579_v45 = vrot.slane %v11578_v13, 4 }
 0x5c7   : > { %15662 = vmatmul.mubr.bf16.gmra.mrb[32].mxu1 %v16772_v63  ;;  %v20038_v63 = vld [vmem:[#allocation3 + $0xc4] sm:$0xf] }
 0x5c8   : > { %15678 = vmatpush3.bf16.msra.mxu1 %v16773_v0  ;;  %15681 = vmatprep.mubr.bf16.mxu1 %v13921_v36  ;;  %v11488_v0 = vsel %vm17309_vm11, %v11483_v50, %v19981_v8  ;;  %v20034_v8 = vld [vmem:[#allocation3 + $0xb0] sm:$0x1]  ;;  %v11521_v36 = vrot.slane %v11519_v60, 5  ;;  %v11531_v22 = vrot.slane %v11530_v47, 4  ;;  %v11605_v30 = vshll.u32 %v20038_v63, 16  ;;  %v16779_v47 = vld [vmem:[#allocation9 + $0x160] sm:$0xff]  }
 0x5c9   : > { %15679 = vmatprep.subr.bf16.mxu1 %v16774_v57  ;;  %v13923_v6 = vcombine.low %v11488_v0, %v11498_v37  ;;  %v11609_v50 = vshrl.u32 %v20038_v63, 16  ;;  %v11567_v27 = vshll.u32 %v20034_v8, 16  ;;  %v11599_v37 = vshll.u32 %v11424_v51, 16 }
 0x5ca   : > { %v11522_v2 = vsel %vm17309_vm11, %v11517_v1, %v11521_v36  ;;  %v11536_v24 = vsel %vm17309_vm11, %v11531_v22, %v20006_v25  ;;  %v11607_v41 = vrot.slane %v11605_v30, 5  ;;  %v11593_v25 = vrot.slane %v11591_v15, 5 }
 0x5cb   : > { %v13924_v55 = vcombine.low %v11512_v12, %v11522_v2  ;;  %v11611_v62 = vrot.slane %v11609_v50, 4  ;;  %v11864_v22 = vrot.slane %v11862_v58, 4  ;;  %v11876_v50 = vrot.slane %v19967_v21, 5  ;;  %v11830_v21 = vld [vmem:[#allocation3 + $0x84] sm:$0xe] }
 0x5cc   : > { %15680 = vmatpush3.bf16.msra.mxu1 %v16774_v57  ;;  %v11550_v57 = vrot.slane %v11548_v31, 4  ;;  %v11569_v31 = vrot.slane %v11567_v27, 5  ;;  %v11871_v27 = vrot.slane %v11869_v19, 4  ;;  %v11883_v15 = vrot.slane %v19983_v11, 5  ;;  %v11831_v11 = vld [vmem:[#allocation3 + $0x90] sm:$0xe] }
 0x5cd   : > { %15697 = vmatprep.subr.bf16.mxu1 %v16775_v14  ;;  %v11866_v30 = vsel %vm17763_vm14, %v11864_v22, %v11865_v53  ;;  %v11878_v46 = vrot.slane %v11876_v50, 4  ;;  %v11907_v22 = vrot.slane %v20043_v17, 5  ;;  %v16788_v17 = vld [vmem:[#allocation9 + $0x1a8] sm:$0xff]  }
 0x5ce   : > { %v11554_v16 = vor.u32 %v11553_v5, %v11550_v57  ;;  %v11570_v29 = vsel %vm17309_vm11, %v11565_v18, %v11569_v31  ;;  %v11584_v57 = vsel %vm17309_vm11, %v11579_v45, %v20036_v39  ;;  %v16780_v5 = vld [vmem:[#allocation9 + $0x168] sm:$0xff]   ;;  %v11885_v31 = vrot.slane %v11883_v15, 4 }
 0x5cf   : > { %15682 = vmatmul.mubr.bf16.vlgmr.msra.gmra.mrb[20].mxu1 %v13922_v34  ;;  %v11546_v34 = vsel %vm17309_vm11, %v11541_v32, %v11545_v43  ;;  %v11893_v45 = vrot.slane %v20020_v3, 5 }
 0x5d0   : > { %15685 = vmatprep.mubr.bf16.mxu1 %v13923_v6  ;;  %15698 = vmatpush3.bf16.msra.mxu1 %v16775_v14  ;;  %v11588_v14 = vor.u32 %v11587_v4, %v20036_v39  ;;  %v13925_v44 = vcombine.low %v11536_v24, %v11546_v34  ;;  %v11555_v60 = vrot.slane %v11554_v16, 4  ;;  %v11612_v6 = vor.u32 %v11611_v62, %v11607_v41 }
 0x5d1   : > { %15699 = vmatprep.subr.bf16.mxu1 %v16776_v40  ;;  %v11615_v4 = vshll.u32 %v20058_v7, 16  ;;  %v13937_v39 = vrot.slane %v11828_v61, 9  ;;  %v11879_v24 = vrot.slane %v19989_v35, 5  ;;  %v11911_v61 = vrot.slane %v20038_v63, 5 }
 0x5d2   : > { %v11589_v0 = vrot.slane %v11588_v14, 4  ;;  %v11560_v54 = vsel %vm17309_vm11, %v11555_v60, %v20032_v42  ;;  %v16781_v42 = vld [vmem:[#allocation9 + $0x170] sm:$0xff]   ;;  %v16782_v14 = vld [vmem:[#allocation9 + $0x178] sm:$0xff]   ;;  %v11914_v63 = vrot.slane %v20058_v7, 5 }
 0x5d3   : > { %v13926_v36 = vcombine.low %v11560_v54, %v11570_v29  ;;  %v11617_v43 = vrot.slane %v11615_v4, 5  ;;  %v11863_v23 = vsel %vm17763_vm14, %v13937_v39, %v11862_v58  ;;  %v11880_v18 = vsel %vm17763_vm14, %v11878_v46, %v11879_v24  ;;  %v16786_v4 = vld [vmem:[#allocation9 + $0x198] sm:$0xff]   ;;  %v16792_v24 = vld [vmem:[#allocation3 + $0x84] sm:$0xff]  }
 0x5d4   : > { %15700 = vmatpush3.bf16.msra.mxu1 %v16776_v40  ;;  %v11601_v40 = vrot.slane %v11599_v37, 5  ;;  %v11594_v1 = vsel %vm17309_vm11, %v11589_v0, %v11593_v25  ;;  %v13945_v16 = vcombine.low %v11863_v23, %v11866_v30  ;;  %v11872_v37 = vrot.slane %v19972_v20, 5  ;;  %v16784_v0 = vld [vmem:[#allocation9 + $0x188] sm:$0xff]  }
 0x5d5   : > { %15701 = vmatprep.subr.bf16.mxu1 %v16777_v33  ;;  %v13927_v51 = vcombine.low %v11584_v57, %v11594_v1  ;;  %v13940_v25 = vrot.slane %v11831_v11, 9  ;;  %v11904_v54 = vrot.slane %v20015_v52, 5  ;;  %v11900_v52 = vrot.slane %v20034_v8, 5  ;;  %v12370_v11 = vld [vmem:[#allocation3 + $0x84] sm:$0xf] }
 0x5d6   : > { %v11602_v32 = vor.u32 %v11601_v40, %v11598_v56  ;;  %v11873_v13 = vsel %vm17763_vm14, %v11871_v27, %v11872_v37  ;;  %v11886_v40 = vrot.slane %v20013_v48, 5  ;;  %v11913_v30 = vrot.slane %v11911_v61, 4  ;;  %v16791_v37 = vld [vmem:[#allocation9 + $0x1b8] sm:$0xff]  }
 0x5d7   : > { %15686 = vmatmul.mubr.bf16.gmra.mrb[24].mxu1 %v13924_v55  ;;  %v16783_v55 = vld [vmem:[#allocation9 + $0x180] sm:$0xff]   ;;  %v11884_v48 = vsel %vm17763_vm14, %v13940_v25, %v11883_v15 }
 0x5d8   : > { %15689 = vmatprep.mubr.bf16.mxu1 %v13925_v44  ;;  %15702 = vmatpush3.bf16.msra.mxu1 %v16777_v33  ;;  %v11613_v33 = vrot.slane %v11612_v6, 4  ;;  %v11603_v10 = vrot.slane %v11602_v32, 4  ;;  %v13939_v44 = vrot.slane %v11830_v21, 9  ;;  %v11887_v29 = vsel %vm17763_vm14, %v11885_v31, %v11886_v40  ;;  %v16790_v21 = vld [vmem:[#allocation3 + $0x78] sm:$0xff]   ;;  %v16799_v31 = vld [vmem:[#allocation9 + $0x1d8] sm:$0xff]  }
 0x5d9   : > { %15703 = vmatprep.subr.bf16.mxu1 %v16778_v59  ;;  %v11897_v6 = vrot.slane %v20008_v26, 5  ;;  %v13948_v32 = vcombine.low %v11884_v48, %v11887_v29  ;;  %v11833_v26 = vld [vmem:[#allocation3 + $0xa8] sm:$0xe]  ;;  %v12367_v15 = vld [vmem:[#allocation3 + $0x78] sm:$0xf] }
 0x5da   : > { %v11618_v2 = vsel %vm17309_vm11, %v11613_v33, %v11617_v43  ;;  %v11608_v12 = vsel %vm17309_vm11, %v11603_v10, %v11607_v41  ;;  %v11890_v41 = vrot.slane %v19985_v28, 5  ;;  %v11877_v35 = vsel %vm17763_vm14, %v13939_v44, %v11876_v50  ;;  %v11832_v28 = vld [vmem:[#allocation3 + $0x9c] sm:$0xe]  ;;  %v11835_v50 = vld [vmem:[#allocation3 + $0xc0] sm:$0xe] }
 0x5db   : > { %v13928_v34 = vcombine.low %v11608_v12, %v11618_v2  ;;  %v13947_v60 = vcombine.low %v11877_v35, %v11880_v18  ;;  %v13941_v1 = vrot.slane %v11832_v28, 9  ;;  %v11899_v57 = vrot.slane %v11897_v6, 4  ;;  %v16787_v33 = vld [vmem:[#allocation9 + $0x1a0] sm:$0xff]   ;;  %v16789_v12 = vld [vmem:[#allocation9 + $0x1b0] sm:$0xff]  }
 0x5dc   : > { %15704 = vmatpush3.bf16.msra.mxu1 %v16778_v59  ;;  %v13938_v59 = vrot.slane %v11829_v9, 9  ;;  %v11892_v56 = vrot.slane %v11890_v41, 4  ;;  %v13942_v10 = vrot.slane %v11833_v26, 9  ;;  %v13944_v23 = vrot.slane %v11835_v50, 9  ;;  %v20130_v44 = vld [vmem:[#allocation3 + $0x7c] sm:$0xf] }
 0x5dd   : > { %15705 = vmatprep.subr.bf16.mxu1 %v16779_v47  ;;  %v11891_v3 = vsel %vm17763_vm14, %v13941_v1, %v11890_v41  ;;  %v11901_v43 = vsel %vm17763_vm14, %v11899_v57, %v11900_v52  ;;  %v16797_v18 = vld [vmem:[#allocation9 + $0x1d0] sm:$0xff]   ;;  %v12392_v41 = vshrl.u32 %v12367_v15, 16  ;;  %v12405_v35 = vshrl.u32 %v20130_v44, 16 }
 0x5de   : > { %v11870_v20 = vsel %vm17763_vm14, %v13938_v59, %v11869_v19  ;;  %v11894_v58 = vsel %vm17763_vm14, %v11892_v56, %v11893_v45  ;;  %v11898_v2 = vsel %vm17763_vm14, %v13942_v10, %v11897_v6  ;;  %v11912_v7 = vsel %vm17763_vm14, %v13944_v23, %v11911_v61  ;;  %v16795_v59 = vld [vmem:[#allocation9 + $0x1c8] sm:$0xff]   ;;  %v20134_v56 = vld [vmem:[#allocation3 + $0x88] sm:$0xf]  ;;  %v20136_v45 = vld [vmem:[#allocation3 + $0x94] sm:$0xf] }
 0x5df   : > { %15690 = vmatmul.mubr.bf16.gmra.mrb[28].mxu1 %v13926_v36  ;;  %v13946_v62 = vcombine.low %v11870_v20, %v11873_v13  ;;  %v13949_v36 = vcombine.low %v11891_v3, %v11894_v58  ;;  %v13950_v8 = vcombine.low %v11898_v2, %v11901_v43  ;;  %v16794_v13 = vld [vmem:[#allocation3 + $0x90] sm:$0xff]   ;;  %v12395_v20 = vshll.u32 %v12367_v15, 16  ;;  %v20140_v6 = vld [vmem:[#allocation3 + $0x80] sm:$0x1]  ;;  %v12376_v43 = vld [vmem:[#allocation3 + $0x9c] sm:$0xf] }
 0x5e0   : > { %15693 = vmatprep.mubr.bf16.mxu1 %v13927_v51  ;;  %15706 = vmatpush3.bf16.msra.mxu1 %v16779_v47  ;;  %v16785_v47 = vld [vmem:[#allocation9 + $0x190] sm:$0xff]   ;;  %v11834_v51 = vld [vmem:[#allocation3 + $0xb4] sm:$0xe]  ;;  %v12394_v40 = vrot.slane %v12392_v41, 4  ;;  %v12407_v29 = vrot.slane %v12405_v35, 4  ;;  %v12416_v1 = vshrl.u32 %v12370_v11, 16 }
 0x5e1   : > { %15707 = vmatprep.subr.bf16.mxu1 %v16780_v5  ;;  %v12397_v28 = vrot.slane %v12395_v20, 5  ;;  %v12419_v58 = vshll.u32 %v12370_v11, 16  ;;  %v12429_v48 = vshrl.u32 %v20134_v56, 16  ;;  %v12453_v57 = vshrl.u32 %v20136_v45, 16  ;;  %v16800_v61 = vld [vmem:[#allocation3 + $0xb4] sm:$0xff]   ;;  %v16804_v15 = vld [vmem:[#allocation3 + $0xcc] sm:$0xff]  }
 0x5e2   : > { %v12411_v52 = vshll.u32 %v20140_v6, 16  ;;  %v20152_v50 = vld [vmem:[#allocation3 + $0x8c] sm:$0x1]  ;;  %v20157_v23 = vld [vmem:[#allocation3 + $0x98] sm:$0x1] }
 0x5e3   : > { %v12398_v26 = vor.u32 %v12397_v28, %v12394_v40  ;;  %v12431_v10 = vrot.slane %v12429_v48, 4  ;;  %v12459_v41 = vshll.u32 %v20157_v23, 16  ;;  %v16806_v40 = vld [vmem:[#allocation9 + $0x1f8] sm:$0xff]  }
 0x5e4   : > { %15708 = vmatpush3.bf16.msra.mxu1 %v16780_v5  ;;  %v11906_v5 = vrot.slane %v11904_v54, 4 }
 0x5e5   : > { %15709 = vmatprep.subr.bf16.mxu1 %v16781_v42 }
 0x5e6   : > { %v11908_v53 = vsel %vm17763_vm14, %v11906_v5, %v11907_v22 }
 0x5e7   : > { %15694 = vmatmul.mubr.bf16.gmra.mrb[32].mxu1 %v13928_v34 }
 0x5e8   : > { %15710 = vmatpush3.bf16.msra.mxu1 %v16781_v42  ;;  %15713 = vmatprep.mubr.bf16.mxu1 %v13945_v16  ;;  %v13943_v42 = vrot.slane %v11834_v51, 9  ;;  %v12418_v51 = vrot.slane %v12416_v1, 4 }
 0x5e9   : > { %15711 = vmatprep.subr.bf16.mxu1 %v16782_v14 }
 0x5ea   : > { %v11905_v19 = vsel %vm17763_vm14, %v13943_v42, %v11904_v54  ;;  %v12425_v54 = vshll.u32 %v20134_v56, 16  ;;  %v16803_v42 = vld [vmem:[#allocation9 + $0x1e8] sm:$0xff]  }
 0x5eb   : > { %v13951_v39 = vcombine.low %v11905_v19, %v11908_v53  ;;  %v12455_v19 = vrot.slane %v12453_v57, 4  ;;  %v20179_v57 = vld [vmem:[#allocation3 + $0xb8] sm:$0xf] }
 0x5ec   : > { %15712 = vmatpush3.bf16.msra.mxu1 %v16782_v14  ;;  %v11915_v14 = vsel %vm17763_vm14, %v11913_v30, %v11914_v63  ;;  %v20148_v22 = vrot.slane %v12425_v54, 5  ;;  %v20154_v63 = vld [vmem:[#allocation3 + $0xa0] sm:$0xf] }
 0x5ed   : > { %15729 = vmatprep.subr.bf16.mxu1 %v16783_v55  ;;  %v13952_v46 = vcombine.low %v11912_v7, %v11915_v14  ;;  %v12464_v14 = vshrl.u32 %v12376_v43, 16  ;;  %v16805_v7 = vld [vmem:[#allocation9 + $0x1f0] sm:$0xff]  }
 0x5ef   : > { %15714 = vmatmul.mubr.bf16.vlgmr.msra.gmra.mrb[20].mxu1 %v13946_v62  ;;  %v12401_v62 = vshll.u32 %v20130_v44, 16 }
 0x5f0   : > { %15717 = vmatprep.mubr.bf16.mxu1 %v13947_v60  ;;  %15730 = vmatpush3.bf16.msra.mxu1 %v16783_v55  ;;  %v16793_v55 = vld [vmem:[#allocation9 + $0x1c0] sm:$0xff]   ;;  %v16798_v60 = vld [vmem:[#allocation3 + $0xa8] sm:$0xff]  }
 0x5f1   : > { %15731 = vmatprep.subr.bf16.mxu1 %v16784_v0  ;;  %v20138_v25 = vrot.slane %v12401_v62, 5 }
 0x5f3   : > { %v12408_v5 = vor.u32 %v12407_v29, %v20138_v25 }
 0x5f4   : > { %15732 = vmatpush3.bf16.msra.mxu1 %v16784_v0  ;;  %v16796_v0 = vld [vmem:[#allocation3 + $0x9c] sm:$0xff]  }
 0x5f5   : > { %15733 = vmatprep.subr.bf16.mxu1 %v16785_v47  ;;  %v12409_v30 = vrot.slane %v12408_v5, 4 }
 0x5f7   : > { %15718 = vmatmul.mubr.bf16.gmra.mrb[24].mxu1 %v13948_v32  ;;  %v16801_v32 = vld [vmem:[#allocation9 + $0x1e0] sm:$0xff]  }
 0x5f8   : > { %15721 = vmatprep.mubr.bf16.mxu1 %v13949_v36  ;;  %15734 = vmatpush3.bf16.msra.mxu1 %v16785_v47  ;;  %v12373_v47 = vld [vmem:[#allocation3 + $0x90] sm:$0xf]  ;;  %v12449_v36 = vshll.u32 %v20136_v45, 16 }
 0x5f9   : > { %15735 = vmatprep.subr.bf16.mxu1 %v16786_v4  ;;  %v12440_v3 = vshrl.u32 %v12373_v47, 16 }
 0x5fb   : > { %v12442_v53 = vrot.slane %v12440_v3, 4  ;;  %v12461_v3 = vrot.slane %v12459_v41, 5 }
 0x5fc   : > { %15736 = vmatpush3.bf16.msra.mxu1 %v16786_v4  ;;  %v12443_v4 = vshll.u32 %v12373_v47, 16 }
 0x5fd   : > { %15737 = vmatprep.subr.bf16.mxu1 %v16787_v33 }
 0x5fe   : > { %v12445_v2 = vrot.slane %v12443_v4, 5 }
 0x5ff   : > { %15722 = vmatmul.mubr.bf16.gmra.mrb[28].mxu1 %v13950_v8  ;;  %v20150_v8 = vrot.slane %v12449_v36, 5 }
 0x600   : > { %15725 = vmatprep.mubr.bf16.mxu1 %v13951_v39  ;;  %15738 = vmatpush3.bf16.msra.mxu1 %v16787_v33  ;;  %v12421_v33 = vrot.slane %v12419_v58, 5  ;;  %v12399_v39 = vrot.slane %v12398_v26, 4 }
 0x601   : > { %15739 = vmatprep.subr.bf16.mxu1 %v16788_v17 }
 0x602   : > { %v15535_v34 = vpop.f32.mrb[16].mxu1 }
 0x603   : > { %10252 = vst [vmem:[%s20122_s10 + $0x10] sm:$0xff] %v15535_v34  ;;  %v10235_v16 = vpop.f32.mrb[17].mxu1  ;;  %v12432_v34 = vor.u32 %v12431_v10, %v20148_v22  ;;  %v20189_v10 = vld [vmem:[#allocation3 + $0xc4] sm:$0xf] }
 0x604   : > { %10250 = vst [vmem:[%s20122_s10] sm:$0xff] %v10235_v16  ;;  %v15536_v27 = vpop.f32.mrb[18].mxu1  ;;  %15740 = vmatpush3.bf16.msra.mxu1 %v16788_v17  ;;  %v16802_v17 = vld [vmem:[#allocation3 + $0xc0] sm:$0xff]   ;;  %v12467_v16 = vshll.u32 %v12376_v43, 16  ;;  %v16807_v43 = vld [vmem:[#allocation9 + $0x200] sm:$0xff]  }
 0x605   : > { %10253 = vst [vmem:[%s20122_s10 + $0x18] sm:$0xff] %v15536_v27  ;;  %v10238_v9 = vpop.f32.mrb[19].mxu1  ;;  %15741 = vmatprep.subr.bf16.mxu1 %v16789_v12  ;;  %v20159_v27 = vld [vmem:[#allocation3 + $0xac] sm:$0xf] }
 0x606   : > { %10251 = vst [vmem:[%s20122_s10 + $0x8] sm:$0xff] %v10238_v9  ;;  %v12413_v9 = vrot.slane %v12411_v52, 5  ;;  %v12497_v20 = vshll.u32 %v20159_v27, 16  ;;  %v12501_v62 = vshrl.u32 %v20159_v27, 16  ;;  %v12469_v11 = vrot.slane %v12467_v16, 5 }
 0x607   : > { %15726 = vmatmul.mubr.bf16.gmra.mrb[32].mxu1 %v13952_v46  ;;  %v12446_v46 = vor.u32 %v12445_v2, %v12442_v53  ;;  %v12385_v2 = vld [vmem:[#allocation3 + $0xc0] sm:$0xf] }
 0x608   : > { %15742 = vmatpush3.bf16.msra.mxu1 %v16789_v12  ;;  %15745 = vmatprep.mubr.bf16.mxu1 %v16790_v21  ;;  %v12422_v12 = vor.u32 %v12421_v33, %v12418_v51  ;;  %v12404_v21 = vsel %vm17309_vm11, %v12399_v39, %v20138_v25  ;;  %v20177_v4 = vrot.slane %v12497_v20, 5  ;;  %v12503_v36 = vrot.slane %v12501_v62, 4  ;;  %v20187_v33 = vld [vmem:[#allocation3 + $0xb0] sm:$0x1] }
 0x609   : > { %15743 = vmatprep.subr.bf16.mxu1 %v16791_v37  ;;  %v12447_v28 = vrot.slane %v12446_v46, 4  ;;  %v12521_v39 = vshll.u32 %v20179_v57, 16  ;;  %v12536_v46 = vshrl.u32 %v12385_v2, 16 }
 0x60a   : > { %v12423_v35 = vrot.slane %v12422_v12, 4  ;;  %v12504_v12 = vor.u32 %v12503_v36, %v20177_v4 }
 0x60b   : > { %v20205_v20 = vrot.slane %v12521_v39, 5  ;;  %v16810_v39 = vld [vmem:[#allocation9 + $0x218] sm:$0xff]  }
 0x60c   : > { %15744 = vmatpush3.bf16.msra.mxu1 %v16791_v37  ;;  %v12456_v37 = vor.u32 %v12455_v19, %v20150_v8  ;;  %v12428_v26 = vsel %vm17309_vm11, %v12423_v35, %v20148_v22  ;;  %v12505_v35 = vrot.slane %v12504_v12, 4 }
 0x60d   : > { %15761 = vmatprep.subr.bf16.mxu1 %v16793_v55 }
 0x60e   : > { %v12457_v47 = vrot.slane %v12456_v37, 4 }
 0x60f   : > { %15746 = vmatmul.mubr.bf16.vlgmr.msra.gmra.mrb[20].mxu1 %v16792_v24  ;;  %v12473_v24 = vshll.u32 %v20154_v63, 16 }
 0x610   : > { %15749 = vmatprep.mubr.bf16.mxu1 %v16794_v13  ;;  %15762 = vmatpush3.bf16.msra.mxu1 %v16793_v55  ;;  %v12435_v55 = vshll.u32 %v20152_v50, 16  ;;  %v12379_v13 = vld [vmem:[#allocation3 + $0xa8] sm:$0xf] }
 0x611   : > { %15763 = vmatprep.subr.bf16.mxu1 %v16795_v59  ;;  %v12488_v25 = vshrl.u32 %v12379_v13, 16  ;;  %v12491_v29 = vshll.u32 %v12379_v13, 16  ;;  %v20175_v54 = vrot.slane %v12473_v24, 5  ;;  %v12388_v13 = vld [vmem:[#allocation3 + $0xcc] sm:$0xf] }
 0x612   : > { %v12437_v58 = vrot.slane %v12435_v55, 5  ;;  %v16808_v55 = vld [vmem:[#allocation9 + $0x208] sm:$0xff]  }
 0x613   : > { %v12490_v22 = vrot.slane %v12488_v25, 4  ;;  %v12493_v53 = vrot.slane %v12491_v29, 5 }
 0x614   : > { %15764 = vmatpush3.bf16.msra.mxu1 %v16795_v59  ;;  %v12477_v59 = vshrl.u32 %v20154_v63, 16 }
 0x615   : > { %15765 = vmatprep.subr.bf16.mxu1 %v16797_v18  ;;  %v12494_v24 = vor.u32 %v12493_v53, %v12490_v22 }
 0x616   : > { %v12479_v48 = vrot.slane %v12477_v59, 4  ;;  %v12539_v59 = vshll.u32 %v12385_v2, 16 }
 0x617   : > { %15750 = vmatmul.mubr.bf16.gmra.mrb[24].mxu1 %v16796_v0  ;;  %v12433_v0 = vrot.slane %v12432_v34, 4 }
 0x618   : > { %15753 = vmatprep.mubr.bf16.mxu1 %v16798_v60  ;;  %15766 = vmatpush3.bf16.msra.mxu1 %v16797_v18  ;;  %v12414_v18 = vsel %vm17309_vm11, %v12409_v30, %v12413_v9  ;;  %v20173_v60 = vld [vmem:[#allocation3 + $0xa4] sm:$0x1]  ;;  %v12480_v19 = vor.u32 %v12479_v48, %v20175_v54  ;;  %v12525_v30 = vshrl.u32 %v20179_v57, 16  ;;  %v12507_v9 = vshll.u32 %v20187_v33, 16 }
 0x619   : > { %15767 = vmatprep.subr.bf16.mxu1 %v16799_v31  ;;  %v13977_v1 = vcombine.low %v12404_v21, %v12414_v18  ;;  %v12438_v5 = vsel %vm17309_vm11, %v12433_v0, %v12437_v58  ;;  %v12483_v51 = vshll.u32 %v20173_v60, 16  ;;  %v12495_v58 = vrot.slane %v12494_v24, 4 }
 0x61a   : > { %v13978_v37 = vcombine.low %v12428_v26, %v12438_v5  ;;  %v12481_v18 = vrot.slane %v12480_v19, 4  ;;  %v12527_v62 = vrot.slane %v12525_v30, 4  ;;  %v12509_v48 = vrot.slane %v12507_v9, 5 }
 0x61c   : > { %15768 = vmatpush3.bf16.msra.mxu1 %v16799_v31  ;;  %v12466_v31 = vrot.slane %v12464_v14, 4  ;;  %v12545_v14 = vshll.u32 %v20189_v10, 16  ;;  %v12528_v5 = vor.u32 %v12527_v62, %v20205_v20 }
 0x61d   : > { %15769 = vmatprep.subr.bf16.mxu1 %v16801_v32 }
 0x61e   : > { %v12470_v52 = vor.u32 %v12469_v11, %v12466_v31  ;;  %v20207_v31 = vrot.slane %v12545_v14, 5 }
 0x61f   : > { %15754 = vmatmul.mubr.bf16.gmra.mrb[28].mxu1 %v16800_v61  ;;  %v12452_v61 = vsel %vm17309_vm11, %v12447_v28, %v20150_v8  ;;  %v12549_v8 = vshrl.u32 %v20189_v10, 16  ;;  %v12560_v28 = vshrl.u32 %v12388_v13, 16 }
 0x620   : > { %15757 = vmatprep.mubr.bf16.mxu1 %v16802_v17  ;;  %15770 = vmatpush3.bf16.msra.mxu1 %v16801_v32  ;;  %v12382_v32 = vld [vmem:[#allocation3 + $0xb4] sm:$0xf]  ;;  %v12471_v16 = vrot.slane %v12470_v52, 4  ;;  %v20219_v52 = vld [vmem:[#allocation3 + $0xc8] sm:$0x1] }
 0x621   : > { %15771 = vmatprep.subr.bf16.mxu1 %v16803_v42  ;;  %v12512_v17 = vshrl.u32 %v12382_v32, 16  ;;  %v12515_v34 = vshll.u32 %v12382_v32, 16  ;;  %v12551_v11 = vrot.slane %v12549_v8, 4  ;;  %v12538_v32 = vrot.slane %v12536_v46, 4 }
 0x622   : > { %v12476_v36 = vsel %vm17309_vm11, %v12471_v16, %v20175_v54  ;;  %v12562_v22 = vrot.slane %v12560_v28, 4  ;;  %v12555_v12 = vshll.u32 %v20219_v52, 16  ;;  %v12529_v8 = vrot.slane %v12528_v5, 4  ;;  %v16814_v5 = vld [vmem:[#allocation9 + $0x238] sm:$0xff]  }
 0x623   : > { %v12514_v41 = vrot.slane %v12512_v17, 4  ;;  %v12517_v0 = vrot.slane %v12515_v34, 5  ;;  %v12500_v17 = vsel %vm17309_vm11, %v12495_v58, %v20177_v4  ;;  %v20229_v34 = vld [vmem:[#allocation3 + $0xd4] sm:$0x1]  ;;  %v16811_v4 = vld [vmem:[#allocation9 + $0x220] sm:$0xff]   ;;  %v16813_v58 = vld [vmem:[#allocation9 + $0x230] sm:$0xff]  }
 0x624   : > { %15772 = vmatpush3.bf16.msra.mxu1 %v16803_v42  ;;  %v12462_v42 = vsel %vm17309_vm11, %v12457_v47, %v12461_v3  ;;  %v12563_v47 = vshll.u32 %v12388_v13, 16  ;;  %v12541_v3 = vrot.slane %v12539_v59, 5  ;;  %v12557_v24 = vrot.slane %v12555_v12, 5 }
 0x625   : > { %15773 = vmatprep.subr.bf16.mxu1 %v16805_v7  ;;  %v13979_v21 = vcombine.low %v12452_v61, %v12462_v42  ;;  %v12552_v42 = vor.u32 %v12551_v11, %v20207_v31 }
 0x626   : > { %v12565_v53 = vrot.slane %v12563_v47, 5  ;;  %v12542_v30 = vor.u32 %v12541_v3, %v12538_v32  ;;  %v16812_v47 = vld [vmem:[#allocation9 + $0x228] sm:$0xff]   ;;  %v12833_v32 = vrot.slane %v20134_v56, 5  ;;  %v12836_v56 = vrot.slane %v20152_v50, 5 }
 0x627   : > { %15758 = vmatmul.mubr.bf16.gmra.mrb[32].mxu1 %v16804_v15  ;;  %v20203_v15 = vld [vmem:[#allocation3 + $0xd0] sm:$0xf] }
 0x628   : > { %15774 = vmatpush3.bf16.msra.mxu1 %v16805_v7  ;;  %15777 = vmatprep.mubr.bf16.mxu1 %v13977_v1  ;;  %v12485_v7 = vrot.slane %v12483_v51, 5  ;;  %v12569_v25 = vshll.u32 %v20203_v15, 16  ;;  %v12573_v29 = vshrl.u32 %v20203_v15, 16  ;;  %v16809_v1 = vld [vmem:[#allocation9 + $0x210] sm:$0xff]   ;;  %v12510_v51 = vsel %vm17309_vm11, %v12505_v35, %v12509_v48 }
 0x629   : > { %15775 = vmatprep.subr.bf16.mxu1 %v16806_v40  ;;  %v13981_v14 = vcombine.low %v12500_v17, %v12510_v51  ;;  %v12566_v46 = vor.u32 %v12565_v53, %v12562_v22  ;;  %v12829_v48 = vrot.slane %v20140_v6, 5  ;;  %v12843_v22 = vrot.slane %v20157_v23, 5 }
 0x62a   : > { %v12486_v26 = vsel %vm17309_vm11, %v12481_v18, %v12485_v7  ;;  %v12571_v2 = vrot.slane %v12569_v25, 5  ;;  %v12575_v54 = vrot.slane %v12573_v29, 4  ;;  %v12553_v7 = vrot.slane %v12552_v42, 4  ;;  %v12794_v42 = vld [vmem:[#allocation3 + $0x90] sm:$0xe] }
 0x62b   : > { %v13980_v19 = vcombine.low %v12476_v36, %v12486_v26  ;;  %v12826_v18 = vrot.slane %v20130_v44, 5  ;;  %v12567_v62 = vrot.slane %v12566_v46, 4  ;;  %v12840_v26 = vrot.slane %v20136_v45, 5 }
 0x62c   : > { %15776 = vmatpush3.bf16.msra.mxu1 %v16806_v40  ;;  %v20209_v40 = vld [vmem:[#allocation3 + $0xbc] sm:$0x1]  ;;  %v12558_v13 = vsel %vm17309_vm11, %v12553_v7, %v12557_v24  ;;  %v12854_v17 = vrot.slane %v20159_v27, 5  ;;  %v12857_v7 = vrot.slane %v20187_v33, 5  ;;  %v12861_v46 = vrot.slane %v20179_v57, 5 }
 0x62d   : > { %15793 = vmatprep.subr.bf16.mxu1 %v16807_v43  ;;  %v12531_v61 = vshll.u32 %v20209_v40, 16  ;;  %v12828_v29 = vrot.slane %v12826_v18, 4  ;;  %v12572_v44 = vsel %vm17309_vm11, %v12567_v62, %v12571_v2  ;;  %v12842_v6 = vrot.slane %v12840_v26, 4 }
 0x62e   : > { %v12864_v57 = vrot.slane %v20209_v40, 5  ;;  %v12875_v62 = vrot.slane %v20203_v15, 5  ;;  %v12878_v40 = vrot.slane %v20229_v34, 5 }
 0x62f   : > { %15778 = vmatmul.mubr.bf16.vlgmr.msra.gmra.mrb[20].mxu1 %v13978_v37  ;;  %v12533_v16 = vrot.slane %v12531_v61, 5  ;;  %v12576_v37 = vor.u32 %v12575_v54, %v12571_v2  ;;  %v12830_v36 = vsel %vm17763_vm14, %v12828_v29, %v12829_v48  ;;  %v12793_v61 = vld [vmem:[#allocation3 + $0x84] sm:$0xe]  ;;  %v12847_v2 = vrot.slane %v20154_v63, 5 }
 0x630   : > { %15781 = vmatprep.mubr.bf16.mxu1 %v13979_v21  ;;  %15794 = vmatpush3.bf16.msra.mxu1 %v16807_v43  ;;  %v12518_v43 = vor.u32 %v12517_v0, %v12514_v41  ;;  %v12579_v21 = vshll.u32 %v20229_v34, 16  ;;  %v13994_v45 = vrot.slane %v12793_v61, 9  ;;  %v13995_v54 = vrot.slane %v12794_v42, 9 }
 0x631   : > { %15795 = vmatprep.subr.bf16.mxu1 %v16808_v55  ;;  %v12534_v59 = vsel %vm17309_vm11, %v12529_v8, %v12533_v16  ;;  %v12577_v35 = vrot.slane %v12576_v37, 4  ;;  %v12849_v12 = vrot.slane %v12847_v2, 4  ;;  %v12856_v8 = vrot.slane %v12854_v17, 4  ;;  %v12796_v16 = vld [vmem:[#allocation3 + $0xa8] sm:$0xe] }
 0x632   : > { %v12519_v9 = vrot.slane %v12518_v43, 4  ;;  %v12581_v0 = vrot.slane %v12579_v21, 5  ;;  %v12835_v43 = vrot.slane %v12833_v32, 4  ;;  %v12834_v50 = vsel %vm17763_vm14, %v13994_v45, %v12833_v32  ;;  %v14017_v32 = vld [vmem:[%s20359_s4] ss:$0 sm:$0xff] }
 0x633   : > { %v12841_v23 = vsel %vm17763_vm14, %v13995_v54, %v12840_v26  ;;  %v12850_v63 = vrot.slane %v20173_v60, 5  ;;  %v13997_v37 = vrot.slane %v12796_v16, 9  ;;  %v12858_v21 = vsel %vm17763_vm14, %v12856_v8, %v12857_v7 }
 0x634   : > { %15796 = vmatpush3.bf16.msra.mxu1 %v16808_v55  ;;  %v12543_v55 = vrot.slane %v12542_v30, 4  ;;  %v12524_v41 = vsel %vm17309_vm11, %v12519_v9, %v20205_v20  ;;  %v12582_v20 = vsel %vm17309_vm11, %v12577_v35, %v12581_v0  ;;  %v12837_v53 = vsel %vm17763_vm14, %v12835_v43, %v12836_v56  ;;  %v12799_v35 = vld [vmem:[#allocation3 + $0xcc] sm:$0xe] }
 0x635   : > { %15797 = vmatprep.subr.bf16.mxu1 %v16809_v1  ;;  %v13982_v11 = vcombine.low %v12524_v41, %v12534_v59  ;;  %v12851_v9 = vsel %vm17763_vm14, %v12849_v12, %v12850_v63  ;;  %v12855_v60 = vsel %vm17763_vm14, %v13997_v37, %v12854_v17  ;;  %v12863_v59 = vrot.slane %v12861_v46, 4  ;;  %v12798_v41 = vld [vmem:[#allocation3 + $0xc0] sm:$0xe] }
 0x636   : > { %v12548_v28 = vsel %vm17309_vm11, %v12543_v55, %v20207_v31  ;;  %v13984_v31 = vcombine.low %v12572_v44, %v12582_v20  ;;  %v14005_v33 = vcombine.low %v12855_v60, %v12858_v21  ;;  %v14000_v29 = vrot.slane %v12799_v35, 9 }
 0x637   : > { %15782 = vmatmul.mubr.bf16.gmra.mrb[24].mxu1 %v13980_v19  ;;  %v13983_v25 = vcombine.low %v12548_v28, %v12558_v13  ;;  %v12844_v19 = vsel %vm17763_vm14, %v12842_v6, %v12843_v22  ;;  %v12797_v13 = vld [vmem:[#allocation3 + $0xb4] sm:$0xe]  ;;  %v13999_v28 = vrot.slane %v12798_v41, 9  ;;  %v12877_v44 = vrot.slane %v12875_v62, 4 }
 0x638   : > { %15785 = vmatprep.mubr.bf16.mxu1 %v13981_v14  ;;  %15798 = vmatpush3.bf16.msra.mxu1 %v16809_v1  ;;  %v12792_v1 = vld [vmem:[#allocation3 + $0x78] sm:$0xe]  ;;  %v14003_v30 = vcombine.low %v12841_v23, %v12844_v19  ;;  %v12795_v14 = vld [vmem:[#allocation3 + $0x9c] sm:$0xe]  ;;  %v13998_v0 = vrot.slane %v12797_v13, 9 }
 0x639   : > { %15799 = vmatprep.subr.bf16.mxu1 %v16810_v39  ;;  %v13993_v3 = vrot.slane %v12792_v1, 9  ;;  %v13996_v27 = vrot.slane %v12795_v14, 9  ;;  %v12876_v1 = vsel %vm17763_vm14, %v14000_v29, %v12875_v62 }
 0x63b   : > { %v12827_v38 = vsel %vm17763_vm14, %v13993_v3, %v12826_v18  ;;  %v12848_v55 = vsel %vm17763_vm14, %v13996_v27, %v12847_v2 }
 0x63c   : > { %15800 = vmatpush3.bf16.msra.mxu1 %v16810_v39  ;;  %v14001_v51 = vcombine.low %v12827_v38, %v12830_v36  ;;  %v14002_v39 = vcombine.low %v12834_v50, %v12837_v53  ;;  %v14004_v24 = vcombine.low %v12848_v55, %v12851_v9 }
 0x63d   : > { %15801 = vmatprep.subr.bf16.mxu1 %v16811_v4 }
 0x63f   : > { %15786 = vmatmul.mubr.bf16.gmra.mrb[28].mxu1 %v13982_v11  ;;  %v12865_v11 = vsel %vm17763_vm14, %v12863_v59, %v12864_v57 }
 0x640   : > { %15789 = vmatprep.mubr.bf16.mxu1 %v13983_v25  ;;  %15802 = vmatpush3.bf16.msra.mxu1 %v16811_v4  ;;  %v12868_v4 = vrot.slane %v20189_v10, 5  ;;  %v12871_v10 = vrot.slane %v20219_v52, 5  ;;  %v12862_v25 = vsel %vm17763_vm14, %v13998_v0, %v12861_v46 }
 0x641   : > { %15803 = vmatprep.subr.bf16.mxu1 %v16812_v47  ;;  %v14006_v20 = vcombine.low %v12862_v25, %v12865_v11 }
 0x642   : > { %v12870_v18 = vrot.slane %v12868_v4, 4  ;;  %v12869_v15 = vsel %vm17763_vm14, %v13999_v28, %v12868_v4 }
 0x644   : > { %15804 = vmatpush3.bf16.msra.mxu1 %v16812_v47  ;;  %v12872_v47 = vsel %vm17763_vm14, %v12870_v18, %v12871_v10 }
 0x645   : > { %15805 = vmatprep.subr.bf16.mxu1 %v16813_v58  ;;  %v14007_v52 = vcombine.low %v12869_v15, %v12872_v47 }
 0x647   : > { %15790 = vmatmul.mubr.bf16.gmra.mrb[32].mxu1 %v13984_v31 }
 0x648   : > { %15806 = vmatpush3.bf16.msra.mxu1 %v16813_v58  ;;  %15809 = vmatprep.mubr.bf16.mxu1 %v14001_v51  ;;  %v12879_v58 = vsel %vm17763_vm14, %v12877_v44, %v12878_v40  ;;  %v16860_v40 = vld [vmem:[%s20360_s5 + $0x8] sm:$0xff]  }
 0x649   : > { %15807 = vmatprep.subr.bf16.mxu1 %v16814_v5  ;;  %v14008_v48 = vcombine.low %v12876_v1, %v12879_v58 }
 0x64c   : > { %15808 = vmatpush3.bf16.msra.mxu1 %v16814_v5 }
 0x64f   : > { %15810 = vmatmul.mubr.bf16.vlgmr.msra.gmra.mrb[20].mxu1 %v14002_v39 }
 0x650   : > { %15813 = vmatprep.mubr.bf16.mxu1 %v14003_v30 }
 0x657   : > { %15814 = vmatmul.mubr.bf16.gmra.mrb[24].mxu1 %v14004_v24 }
 0x658   : > { %15817 = vmatprep.mubr.bf16.mxu1 %v14005_v33 }
 0x65f   : > { %15818 = vmatmul.mubr.bf16.gmra.mrb[28].mxu1 %v14006_v20 }
 0x660   : > { %15821 = vmatprep.mubr.bf16.mxu1 %v14007_v52 }
 0x667   : > { %15822 = vmatmul.mubr.bf16.gmra.mrb[32].mxu1 %v14008_v48 }
 0x722   : > { %v15811_v34 = vpop.f32.mrb[20].mxu1 }
 0x723   : > { %v13098_v31 = vadd.f32 %v15811_v34, %v14017_v32  ;;  %v13010_v3 = vpop.f32.mrb[21].mxu1 }
 0x724   : > { %v13096_v36 = vadd.f32 %v14017_v32, %v13010_v3  ;;  %v15812_v26 = vpop.f32.mrb[22].mxu1 }
 0x725   : > { %v13099_v38 = vadd.f32 %v15812_v26, %v14017_v32  ;;  %v13013_v5 = vpop.f32.mrb[23].mxu1  ;;  %v13114_v43 = vmax.f32 %v13098_v31, 0.0 }
 0x726   : > { %v13097_v51 = vadd.f32 %v14017_v32, %v13013_v5  ;;  %v13112_v6 = vmax.f32 %v13096_v36, 0.0 }
 0x727   : > { %v13115_v61 = vmax.f32 %v13099_v38, 0.0 }
 0x728   : > { %v13113_v56 = vmax.f32 %v13097_v51, 0.0 }
 0x729   : > { %v13129_v49 = vpack.c.bf16 %v13115_v61, %v13114_v43 }
 0x72a   : > { %v13128_v42 = vpack.c.bf16 %v13113_v56, %v13112_v6  ;;  %v15815_v22 = vpop.f32.mrb[24].mxu1 }
 0x72b   : > { %v13102_v45 = vadd.f32 %v15815_v22, %v14017_v32  ;;  %v13026_v53 = vpop.f32.mrb[25].mxu1 }
 0x72c   : > { %v13100_v2 = vadd.f32 %v14017_v32, %v13026_v53  ;;  %v15816_v54 = vpop.f32.mrb[26].mxu1  ;;  %15825 = vmatprep.subr.bf16.mxu0 %v13128_v42 }
 0x72d   : > { %v13103_v19 = vadd.f32 %v15816_v54, %v14017_v32  ;;  %v13029_v17 = vpop.f32.mrb[27].mxu1  ;;  %15826 = vmatpush3.bf16.msra.mxu0 %v13128_v42  ;;  %v13118_v39 = vmax.f32 %v13102_v45, 0.0 }
 0x72e   : > { %v13101_v50 = vadd.f32 %v14017_v32, %v13029_v17  ;;  %15827 = vmatprep.subr.bf16.mxu0 %v13129_v49  ;;  %v13116_v30 = vmax.f32 %v13100_v2, 0.0 }
 0x72f   : > { %v13119_v23 = vmax.f32 %v13103_v19, 0.0 }
 0x730   : > { %v13117_v12 = vmax.f32 %v13101_v50, 0.0 }
 0x731   : > { %v13131_v14 = vpack.c.bf16 %v13119_v23, %v13118_v39  ;;  %15828 = vmatpush3.bf16.msra.mxu0 %v13129_v49 }
 0x732   : > { %v13130_v8 = vpack.c.bf16 %v13117_v12, %v13116_v30  ;;  %v15819_v63 = vpop.f32.mrb[28].mxu1 }
 0x733   : > { %v13106_v16 = vadd.f32 %v15819_v63, %v14017_v32  ;;  %v13042_v7 = vpop.f32.mrb[29].mxu1 }
 0x734   : > { %v13104_v27 = vadd.f32 %v14017_v32, %v13042_v7  ;;  %v15820_v9 = vpop.f32.mrb[30].mxu1  ;;  %15829 = vmatprep.subr.bf16.mxu0 %v13130_v8 }
 0x735   : > { %v13107_v46 = vadd.f32 %v15820_v9, %v14017_v32  ;;  %v13045_v37 = vpop.f32.mrb[31].mxu1  ;;  %15830 = vmatpush3.bf16.msra.mxu0 %v13130_v8  ;;  %v13122_v4 = vmax.f32 %v13106_v16, 0.0 }
 0x736   : > { %v13105_v21 = vadd.f32 %v14017_v32, %v13045_v37  ;;  %15831 = vmatprep.subr.bf16.mxu0 %v13131_v14  ;;  %v13120_v24 = vmax.f32 %v13104_v27, 0.0 }
 0x737   : > { %v13123_v55 = vmax.f32 %v13107_v46, 0.0 }
 0x738   : > { %v13121_v60 = vmax.f32 %v13105_v21, 0.0 }
 0x739   : > { %v13133_v33 = vpack.c.bf16 %v13123_v55, %v13122_v4  ;;  %15832 = vmatpush3.bf16.msra.mxu0 %v13131_v14 }
 0x73a   : > { %v13132_v59 = vpack.c.bf16 %v13121_v60, %v13120_v24  ;;  %v15823_v13 = vpop.f32.mrb[32].mxu1 }
 0x73b   : > { %v13110_v18 = vadd.f32 %v15823_v13, %v14017_v32  ;;  %v13058_v57 = vpop.f32.mrb[33].mxu1 }
 0x73c   : > { %v13108_v41 = vadd.f32 %v14017_v32, %v13058_v57  ;;  %v15824_v62 = vpop.f32.mrb[34].mxu1  ;;  %15833 = vmatprep.subr.bf16.mxu0 %v13132_v59 }
 0x73d   : > { %v13111_v10 = vadd.f32 %v15824_v62, %v14017_v32  ;;  %v13061_v35 = vpop.f32.mrb[35].mxu1  ;;  %15834 = vmatpush3.bf16.msra.mxu0 %v13132_v59  ;;  %v13126_v11 = vmax.f32 %v13110_v18, 0.0 }
 0x73e   : > { %v13109_v0 = vadd.f32 %v14017_v32, %v13061_v35  ;;  %15835 = vmatprep.subr.bf16.mxu0 %v13133_v33  ;;  %v13124_v47 = vmax.f32 %v13108_v41, 0.0 }
 0x73f   : > { %v13127_v28 = vmax.f32 %v13111_v10, 0.0 }
 0x740   : > { %v13125_v25 = vmax.f32 %v13109_v0, 0.0 }
 0x741   : > { %v13135_v29 = vpack.c.bf16 %v13127_v28, %v13126_v11  ;;  %15836 = vmatpush3.bf16.msra.mxu0 %v13133_v33 }
 0x742   : > { %v13134_v44 = vpack.c.bf16 %v13125_v25, %v13124_v47 }
 0x744   : > { %15837 = vmatprep.subr.bf16.mxu0 %v13134_v44 }
 0x745   : > { %15838 = vmatpush3.bf16.msra.mxu0 %v13134_v44 }
 0x746   : > { %15839 = vmatprep.subr.bf16.mxu0 %v13135_v29 }
 0x749   : > { %15840 = vmatpush3.bf16.msra.mxu0 %v13135_v29 }
 0x74c   : > { %15842 = vmatmul.mubr.bf16.vlgmr.msra.gmra.mrb[32].mxu0 %v16860_v40 }
 0x81f   : > { %v15843_v20 = vpop.f32.mrb[32].mxu0 }
 0x820   : > { %13187 = vst [vmem:[%s20122_s10 + $0x30] sm:$0xff] %v15843_v20  ;;  %v13170_v15 = vpop.f32.mrb[33].mxu0 }
 0x821   : > { %13185 = vst [vmem:[%s20122_s10 + $0x20] sm:$0xff] %v13170_v15  ;;  %v15844_v52 = vpop.f32.mrb[34].mxu0 }
 0x822   : > { %13188 = vst [vmem:[%s20122_s10 + $0x38] sm:$0xff] %v15844_v52  ;;  %v13173_v1 = vpop.f32.mrb[35].mxu0 }
 0x823   : > { %13186 = vst [vmem:[%s20122_s10 + $0x28] sm:$0xff] %v13173_v1 }
 0x824   : > { %16960 = shalt.err (!%p16957_p1)
}
 0x825   : > { %s16961_s10 = scalar_lea.hbm %s20308_s16, 1024  ;;  %s16965_s7 = scalar_lea.hbm %s20361_s6, 2048 }
 0x826   : > { %p16962_p13 = scmp.ne.s32.totalorder %s20308_s16, %s16961_s10  ;;  %p16966_p4 = scmp.lt.u32.totalorder %s20308_s16, %s20361_s6 }
 0x827   : > { %p16967_p5 = scmp.lt.u32.totalorder %s16965_s7, %s16961_s10  ;;  %p16969_p11 = scmp.lt.u32.totalorder %s16961_s10, %s20308_s16 }
 0x828   : > { %p16963_p6 = pnand %p16962_p13, %p20526_p0 }
 0x829   : > { %p16968_p8 = por %p16967_p5, %p16966_p4 }
 0x82a   : > { %p16964_p10 = pneg %p16963_p6 }
 0x82b   : > { %p16970_p2 = por %p16969_p11, %p16968_p8 }
 0x82d   : > { %p16971_p3 = pnand %p16970_p2, %p16964_p10 }
 0x82f   : > { %16974 = shalt.err (!%p16971_p3)
}
 0x830   : > { %s17026_s19 = smov 128   ;;  %s17027_s20 = smov 8  }
 0x831   : > { %16367 = dma.vmem_to_hbm [thread:$0]  (%p20526_p0), %s20302_s27, 1024, %s20308_s16, %s13190_s17, %s17026_s19, %s17026_s19, %s17027_s20  }
 0x832 PF: > { %s13218_s25 = sand.u32 1, %s17005_s21   ;;  %p20527_p7 = scmp.ne.s32.totalorder %s20405_s28, 0 }
 0x833   : > { %p20528_p9 = scmp.ge.s32.totalorder %s17017_s24, 2  ;;  %s13219_s18 = scalar_lea.sflag [#allocation6], %s13218_s25 }
 0x835   : > { %p16381_p12 = pnand %p20528_p9, %p20527_p7 }
 0x837   : > { %17000 = dma.done.wait (!%p16381_p12), %s13219_s18, 1024  }
 0x838   : > { %17002 = vsyncadd (!%p16381_p12), %s13219_s18, 4294966272  ;;  %p20_p1 = scmp.ge.s32.totalorder %s17179_s8, 4   ;;  %s20529_s21 = smov %s17009_s22 }
 0x839   : > { %s20530_s22 = smov %s17013_s23  ;;  %s20531_s23 = smov %s17195_s11 }
 0x83a   : > { %s20532_s24 = smov %s17179_s8  ;;  %22 = sbr.rel (!%p20_p1) target bundleno = 6 (0x6), region = 125 }
 0x841   :  { %13224 = vsyncpa [#allocation5], 1 }
 0x842   :  { %13226 = vsyncpa [#allocation5 + $0x1], 1 }
 0x843   :  { %13227 = vsyncpa [#allocation8], 1 }
 0x844   :  { %13228 = vsyncpa [#allocation6], 1 }
 0x845   :  { %13230 = vsyncpa [#allocation6 + $0x1], 1 }

</bundles_post_ra>
